<compile_context>
chip_gen: v7x
topology: tpu7x:2x2x1
jax: 0.10.0
libtpu: 0.0.40
codegen_flags: <defaults>
</compile_context>

<pallas_src>
import jax
import jax.numpy as jnp
from jax import lax
from jax.experimental import pallas as pl
from jax.experimental.pallas import tpu as pltpu

VMEM_LIMIT = 32 * 1024 * 1024  # explicit scoped-VMEM budget; safe on v5e/v6e/v7x
PAD = 512                      # all 448-wide dims zero-padded to 4*128 lanes


# ---------------------- Pallas kernel: matmul + bias + ReLU --------------------

def _mm_bias_relu_kernel(x_ref, w_ref, b_ref, o_ref):
    # o = relu(x @ w + b); bf16 MXU operands, f32 accumulate + f32 epilogue.
    acc = jnp.dot(x_ref[...].astype(jnp.bfloat16), w_ref[...],
                  preferred_element_type=jnp.float32)
    o_ref[...] = jnp.maximum(acc + b_ref[...], 0.0)


def matmul_bias_relu(x, w, b, tile_m=512):
    """x:(M,K) f32, w:(K,N) bf16, b:(1,N) f32 -> relu(x@w+b):(M,N) f32 (M-tiled grid)."""
    M, K = x.shape
    N = w.shape[1]
    tm = min(tile_m, M)
    return pl.pallas_call(
        _mm_bias_relu_kernel,
        out_shape=jax.ShapeDtypeStruct((M, N), jnp.float32),
        grid=(pl.cdiv(M, tm),),
        in_specs=[pl.BlockSpec((tm, K), lambda i: (i, 0)),
                  pl.BlockSpec((K, N), lambda i: (0, 0)),   # weight resident across M tiles
                  pl.BlockSpec((1, N), lambda i: (0, 0))],
        out_specs=pl.BlockSpec((tm, N), lambda i: (i, 0)),
        compiler_params=pltpu.CompilerParams(
            dimension_semantics=("parallel",),
            vmem_limit_bytes=VMEM_LIMIT),
    )(x, w, b)


# ---------------- Pallas kernel: fused FC trunk + actor/critic heads -----------

def _fc_heads_kernel(x_ref, w1, b1, w2, b2, wa1, ba1, wa2, ba2, wex, bex, wv, bv,
                     pol_ref, val_ref):
    def mm(a, w_ref):
        return jnp.dot(a.astype(jnp.bfloat16), w_ref[...],
                       preferred_element_type=jnp.float32)

    h = jnp.maximum(mm(x_ref[...], w1) + b1[...], 0.0)        # fc1 + ReLU      (B, 256)
    feat = jnp.maximum(mm(h, w2) + b2[...], 0.0)              # fc2 + ReLU      (B, 512pad)
    a = jnp.maximum(mm(feat, wa1) + ba1[...], 0.0)            # actor hidden    (B, 512pad)
    pol_ref[...] = mm(a, wa2) + ba2[...]                      # policy logits   (B, A)
    ex = jnp.maximum(mm(feat, wex) + bex[...], 0.0) + feat    # extra_layer + x (B, 512pad)
    val_ref[...] = mm(ex, wv) + bv[...]                       # [v_ext, v_int]  (B, 2)


_W_NAMES = ("w1", "b1", "w2", "b2", "wa1", "ba1", "wa2", "ba2", "wex", "bex", "wv", "bv")


def fused_fc_heads(flat, p, tile_b=128):
    """flat:(B, 3136) f32 -> (policy:(B,A), value:(B,2)) in one VMEM-resident kernel."""
    B, K = flat.shape
    A = p["wa2"].shape[1]
    tb = min(tile_b, B)
    in_specs = [pl.BlockSpec((tb, K), lambda i: (i, 0))]
    args = [flat]
    for name in _W_NAMES:
        arr = p[name]
        in_specs.append(pl.BlockSpec(arr.shape, lambda i: (0, 0)))  # whole array in VMEM
        args.append(arr)
    return pl.pallas_call(
        _fc_heads_kernel,
        out_shape=(jax.ShapeDtypeStruct((B, A), jnp.float32),
                   jax.ShapeDtypeStruct((B, 2), jnp.float32)),
        grid=(pl.cdiv(B, tb),),
        in_specs=in_specs,
        out_specs=(pl.BlockSpec((tb, A), lambda i: (i, 0)),
                   pl.BlockSpec((tb, 2), lambda i: (i, 0))),
        compiler_params=pltpu.CompilerParams(
            dimension_semantics=("parallel",),
            vmem_limit_bytes=VMEM_LIMIT),
    )(*args)


# ------------------------------ conv trunk (NHWC) ------------------------------

# TODO(synk): im2col patch extraction has no clean Pallas equivalent (needs
# strided in-kernel gathers); it is a single fused XLA op here, and the conv
# arithmetic itself runs in the Pallas matmul kernel above.
def _extract_patches(x, ksz, stride):
    """x:(B,H,W,C) NHWC -> patches:(B*OH*OW, C*ksz*ksz); feature order (c,kh,kw)
    matches PyTorch's Conv2d weight flattening."""
    p = lax.conv_general_dilated_patches(
        x, filter_shape=(ksz, ksz), window_strides=(stride, stride),
        padding="VALID", dimension_numbers=("NHWC", "HWIO", "NHWC"),
        precision=lax.Precision.HIGHEST)
    B, OH, OW, K = p.shape
    return p.reshape(B * OH * OW, K), OH, OW


def conv2d_relu(x, w_kn, b, ksz, stride):
    """PyTorch Conv2d (no padding) + ReLU, NHWC in / NHWC out. w_kn:(Cin*KH*KW,Cout) bf16."""
    B = x.shape[0]
    patches, OH, OW = _extract_patches(x, ksz, stride)
    y = matmul_bias_relu(patches, w_kn, b)                  # Pallas: (B*OH*OW, Cout)
    return y.reshape(B, OH, OW, w_kn.shape[1])              # NHWC directly, no transpose


# --------------------------------- parameters ----------------------------------

def init_params(key, output_size):
    ks = jax.random.split(key, 10)
    ortho = jax.nn.initializers.orthogonal
    g = 2.0 ** 0.5

    def torch_w(k, out_f, in_f, gain):
        # Same layout/gain as PyTorch init.orthogonal_(weight, gain); biases are zero.
        return ortho(gain)(k, (out_f, in_f), jnp.float32)

    def conv_w(k, cout, cin, ksz, gain):
        w = torch_w(k, cout, cin * ksz * ksz, gain)         # PyTorch (Cout, Cin*KH*KW) flatten
        return w.T.astype(jnp.bfloat16)                     # matmul layout (Cin*KH*KW, Cout)

    def kn_w(w_torch, k_pad=None, n_pad=None):
        w = w_torch.T                                       # (K, N) matmul layout
        kk, nn = w.shape
        w = jnp.pad(w, ((0, (k_pad or kk) - kk), (0, (n_pad or nn) - nn)))
        return w.astype(jnp.bfloat16)

    zeros = lambda n: jnp.zeros((1, n), jnp.float32)

    p = {}
    # Conv trunk.  (conv1 Cout kept at 32: padding it to 128 lanes would trade 4x
    # conv2 patch traffic for denser stores — not worth it at these sizes.)
    p["c1w"], p["c1b"] = conv_w(ks[0], 32, 4, 8, g), zeros(32)
    p["c2w"], p["c2b"] = conv_w(ks[1], 64, 32, 4, g), zeros(64)
    p["c3w"], p["c3b"] = conv_w(ks[2], 64, 64, 3, g), zeros(64)

    # fc1: PyTorch flattens the conv3 output in (C,H,W) order, the NHWC trunk
    # yields (H,W,C); fold that permutation into the fc1 weight once at init.
    w_fc1 = torch_w(ks[3], 256, 7 * 7 * 64, g)              # cols indexed by c*49 + h*7 + w
    k_idx = jnp.arange(7 * 7 * 64)
    hh, ww, cc = k_idx // (7 * 64), (k_idx // 64) % 7, k_idx % 64
    w_fc1 = w_fc1[:, cc * 49 + hh * 7 + ww]                 # cols now in (h, w, c) order
    p["w1"], p["b1"] = w_fc1.T.astype(jnp.bfloat16), zeros(256)

    p["w2"], p["b2"] = kn_w(torch_w(ks[4], 448, 256, g), n_pad=PAD), zeros(PAD)
    p["wa1"], p["ba1"] = kn_w(torch_w(ks[5], 448, 448, 0.01), k_pad=PAD, n_pad=PAD), zeros(PAD)
    p["wa2"], p["ba2"] = kn_w(torch_w(ks[6], output_size, 448, 0.01), k_pad=PAD), zeros(output_size)
    p["wex"], p["bex"] = kn_w(torch_w(ks[7], 448, 448, 0.1), k_pad=PAD, n_pad=PAD), zeros(PAD)
    # critic_ext / critic_int merged into a single (448 -> 2) head.
    wv = jnp.concatenate([torch_w(ks[8], 1, 448, 0.01),
                          torch_w(ks[9], 1, 448, 0.01)], axis=0)
    p["wv"], p["bv"] = kn_w(wv, k_pad=PAD), zeros(2)
    return p


# -------------------------------- forward pass ---------------------------------

@jax.jit
def cnn_actor_critic_forward(params, state):
    """state: (B, 4, 84, 84) f32 (PyTorch NCHW) -> (policy, value_ext, value_int)."""
    x = jnp.transpose(state, (0, 2, 3, 1))                                 # NCHW -> NHWC once
    x = conv2d_relu(x, params["c1w"], params["c1b"], ksz=8, stride=4)      # (B, 20, 20, 32)
    x = conv2d_relu(x, params["c2w"], params["c2b"], ksz=4, stride=2)      # (B,  9,  9, 64)
    x = conv2d_relu(x, params["c3w"], params["c3b"], ksz=3, stride=1)      # (B,  7,  7, 64)
    flat = x.reshape(x.shape[0], -1)                                       # (B, 3136), (H,W,C)
    policy, value = fused_fc_heads(flat, params)                           # one fused kernel
    return policy, value[:, 0:1], value[:, 1:2]


# ------------------------------------- main -------------------------------------

if __name__ == "__main__":
    key = jax.random.PRNGKey(0)
    k_param, k_in = jax.random.split(key)

    OUTPUT_SIZE = 6
    BATCH = 2
    # Input must be (B, 4, 84, 84): the 7*7*64 flatten in the module fixes the
    # spatial resolution of the conv stack.
    state = jax.random.normal(k_in, (BATCH, 4, 84, 84), jnp.float32)

    params = init_params(k_param, OUTPUT_SIZE)

    policy, value_ext, value_int = cnn_actor_critic_forward(params, state)
    jax.block_until_ready((policy, value_ext, value_int))

    assert policy.shape == (BATCH, OUTPUT_SIZE)
    assert value_ext.shape == (BATCH, 1)
    assert value_int.shape == (BATCH, 1)
    print("KERNEL_OK")
</pallas_src>

<mosaic_0001>
module attributes {stable_mosaic.version = 11 : i64} {
  func.func @_mm_bias_relu_kernel(%arg0: i32, %arg1: memref<512x256xf32, #tpu.memory_space<vmem>>, %arg2: memref<256x32xbf16, #tpu.memory_space<vmem>>, %arg3: memref<1x32xf32, #tpu.memory_space<vmem>>, %arg4: memref<512x32xf32, #tpu.memory_space<vmem>>) attributes {dimension_semantics = [#tpu.dimension_semantics<parallel>], iteration_bounds = array<i64: 2>, scalar_prefetch = 0 : i64, scratch_operands = 0 : i64, tpu.core_type = #tpu.core_type<tc>, window_params = [{transform_indices = @transform_0, window_bounds = array<i64: 512, 256>}, {pipeline_mode = #tpu.pipeline_mode<synchronous>, transform_indices = @transform_1, window_bounds = array<i64: 256, 32>}, {pipeline_mode = #tpu.pipeline_mode<synchronous>, transform_indices = @transform_2, window_bounds = array<i64: 1, 32>}, {transform_indices = @transform_3, window_bounds = array<i64: 512, 32>}]} {
    %c0 = arith.constant 0 : index
    %c0_0 = arith.constant 0 : index
    %0 = vector.load %arg1[%c0, %c0_0] : memref<512x256xf32, #tpu.memory_space<vmem>>, vector<512x256xf32>
    %1 = arith.truncf %0 : vector<512x256xf32> to vector<512x256xbf16>
    %c0_1 = arith.constant 0 : index
    %c0_2 = arith.constant 0 : index
    %2 = vector.load %arg2[%c0_1, %c0_2] : memref<256x32xbf16, #tpu.memory_space<vmem>>, vector<256x32xbf16>
    %cst = arith.constant dense<0.000000e+00> : vector<512x32xf32>
    %3 = tpu.matmul %1, %2, %cst {dimension_numbers = #tpu.dot_dimension_numbers<[1], [0], [0], [1], [0, 0, 1, 1], [], []>} : vector<512x256xbf16>, vector<256x32xbf16>, vector<512x32xf32> -> vector<512x32xf32>
    %c0_3 = arith.constant 0 : index
    %c0_4 = arith.constant 0 : index
    %4 = vector.load %arg3[%c0_3, %c0_4] : memref<1x32xf32, #tpu.memory_space<vmem>>, vector<1x32xf32>
    %5 = vector.broadcast %4 : vector<1x32xf32> to vector<512x32xf32>
    %6 = arith.addf %3, %5 : vector<512x32xf32>
    %cst_5 = arith.constant 0.000000e+00 : f32
    %7 = vector.broadcast %cst_5 : f32 to vector<512x32xf32>
    %8 = arith.maximumf %6, %7 : vector<512x32xf32>
    %c0_6 = arith.constant 0 : index
    %c0_7 = arith.constant 0 : index
    %9 = vector.load %arg4[%c0_6, %c0_7] : memref<512x32xf32, #tpu.memory_space<vmem>>, vector<512x32xf32>
    tpu.vector_store %arg4[%c0_6, %c0_7], %8 {strides = array<i32>} : memref<512x32xf32, #tpu.memory_space<vmem>>, vector<512x32xf32>,
    return
  }
  func.func @transform_0(%arg0: i32) -> (i32, i32) {
    %c0_i32 = arith.constant 0 : i32
    %c0_i32_0 = arith.constant 0 : i32
    return %arg0, %c0_i32 : i32, i32
  }
  func.func @transform_1(%arg0: i32) -> (i32, i32) {
    %c0_i32 = arith.constant 0 : i32
    %c0_i32_0 = arith.constant 0 : i32
    %c0_i32_1 = arith.constant 0 : i32
    return %c0_i32, %c0_i32_0 : i32, i32
  }
  func.func @transform_2(%arg0: i32) -> (i32, i32) {
    %c0_i32 = arith.constant 0 : i32
    %c0_i32_0 = arith.constant 0 : i32
    %c0_i32_1 = arith.constant 0 : i32
    return %c0_i32, %c0_i32_0 : i32, i32
  }
  func.func @transform_3(%arg0: i32) -> (i32, i32) {
    %c0_i32 = arith.constant 0 : i32
    %c0_i32_0 = arith.constant 0 : i32
    return %arg0, %c0_i32 : i32, i32
  }
}

module attributes {stable_mosaic.version = 11 : i64} {
  func.func @_mm_bias_relu_kernel(%arg0: i32, %arg1: memref<162x512xf32, #tpu.memory_space<vmem>>, %arg2: memref<512x64xbf16, #tpu.memory_space<vmem>>, %arg3: memref<1x64xf32, #tpu.memory_space<vmem>>, %arg4: memref<162x64xf32, #tpu.memory_space<vmem>>) attributes {dimension_semantics = [#tpu.dimension_semantics<parallel>], iteration_bounds = array<i64: 1>, scalar_prefetch = 0 : i64, scratch_operands = 0 : i64, tpu.core_type = #tpu.core_type<tc>, window_params = [{transform_indices = @transform_0, window_bounds = array<i64: 162, 512>}, {pipeline_mode = #tpu.pipeline_mode<synchronous>, transform_indices = @transform_1, window_bounds = array<i64: 512, 64>}, {pipeline_mode = #tpu.pipeline_mode<synchronous>, transform_indices = @transform_2, window_bounds = array<i64: 1, 64>}, {transform_indices = @transform_3, window_bounds = array<i64: 162, 64>}]} {
    %c0 = arith.constant 0 : index
    %c0_0 = arith.constant 0 : index
    %0 = vector.load %arg1[%c0, %c0_0] : memref<162x512xf32, #tpu.memory_space<vmem>>, vector<162x512xf32>
    %1 = arith.truncf %0 : vector<162x512xf32> to vector<162x512xbf16>
    %c0_1 = arith.constant 0 : index
    %c0_2 = arith.constant 0 : index
    %2 = vector.load %arg2[%c0_1, %c0_2] : memref<512x64xbf16, #tpu.memory_space<vmem>>, vector<512x64xbf16>
    %cst = arith.constant dense<0.000000e+00> : vector<162x64xf32>
    %3 = tpu.matmul %1, %2, %cst {dimension_numbers = #tpu.dot_dimension_numbers<[1], [0], [0], [1], [0, 0, 1, 1], [], []>} : vector<162x512xbf16>, vector<512x64xbf16>, vector<162x64xf32> -> vector<162x64xf32>
    %c0_3 = arith.constant 0 : index
    %c0_4 = arith.constant 0 : index
    %4 = vector.load %arg3[%c0_3, %c0_4] : memref<1x64xf32, #tpu.memory_space<vmem>>, vector<1x64xf32>
    %5 = vector.broadcast %4 : vector<1x64xf32> to vector<162x64xf32>
    %6 = arith.addf %3, %5 : vector<162x64xf32>
    %cst_5 = arith.constant 0.000000e+00 : f32
    %7 = vector.broadcast %cst_5 : f32 to vector<162x64xf32>
    %8 = arith.maximumf %6, %7 : vector<162x64xf32>
    %c0_6 = arith.constant 0 : index
    %c0_7 = arith.constant 0 : index
    %9 = vector.load %arg4[%c0_6, %c0_7] : memref<162x64xf32, #tpu.memory_space<vmem>>, vector<162x64xf32>
    tpu.vector_store %arg4[%c0_6, %c0_7], %8 {strides = array<i32>} : memref<162x64xf32, #tpu.memory_space<vmem>>, vector<162x64xf32>,
    return
  }
  func.func @transform_0(%arg0: i32) -> (i32, i32) {
    %c0_i32 = arith.constant 0 : i32
    %c0_i32_0 = arith.constant 0 : i32
    return %arg0, %c0_i32 : i32, i32
  }
  func.func @transform_1(%arg0: i32) -> (i32, i32) {
    %c0_i32 = arith.constant 0 : i32
    %c0_i32_0 = arith.constant 0 : i32
    %c0_i32_1 = arith.constant 0 : i32
    return %c0_i32, %c0_i32_0 : i32, i32
  }
  func.func @transform_2(%arg0: i32) -> (i32, i32) {
    %c0_i32 = arith.constant 0 : i32
    %c0_i32_0 = arith.constant 0 : i32
    %c0_i32_1 = arith.constant 0 : i32
    return %c0_i32, %c0_i32_0 : i32, i32
  }
  func.func @transform_3(%arg0: i32) -> (i32, i32) {
    %c0_i32 = arith.constant 0 : i32
    %c0_i32_0 = arith.constant 0 : i32
    return %arg0, %c0_i32 : i32, i32
  }
}

module attributes {stable_mosaic.version = 11 : i64} {
  func.func @_mm_bias_relu_kernel(%arg0: i32, %arg1: memref<98x576xf32, #tpu.memory_space<vmem>>, %arg2: memref<576x64xbf16, #tpu.memory_space<vmem>>, %arg3: memref<1x64xf32, #tpu.memory_space<vmem>>, %arg4: memref<98x64xf32, #tpu.memory_space<vmem>>) attributes {dimension_semantics = [#tpu.dimension_semantics<parallel>], iteration_bounds = array<i64: 1>, scalar_prefetch = 0 : i64, scratch_operands = 0 : i64, tpu.core_type = #tpu.core_type<tc>, window_params = [{transform_indices = @transform_0, window_bounds = array<i64: 98, 576>}, {pipeline_mode = #tpu.pipeline_mode<synchronous>, transform_indices = @transform_1, window_bounds = array<i64: 576, 64>}, {pipeline_mode = #tpu.pipeline_mode<synchronous>, transform_indices = @transform_2, window_bounds = array<i64: 1, 64>}, {transform_indices = @transform_3, window_bounds = array<i64: 98, 64>}]} {
    %c0 = arith.constant 0 : index
    %c0_0 = arith.constant 0 : index
    %0 = vector.load %arg1[%c0, %c0_0] : memref<98x576xf32, #tpu.memory_space<vmem>>, vector<98x576xf32>
    %1 = arith.truncf %0 : vector<98x576xf32> to vector<98x576xbf16>
    %c0_1 = arith.constant 0 : index
    %c0_2 = arith.constant 0 : index
    %2 = vector.load %arg2[%c0_1, %c0_2] : memref<576x64xbf16, #tpu.memory_space<vmem>>, vector<576x64xbf16>
    %cst = arith.constant dense<0.000000e+00> : vector<98x64xf32>
    %3 = tpu.matmul %1, %2, %cst {dimension_numbers = #tpu.dot_dimension_numbers<[1], [0], [0], [1], [0, 0, 1, 1], [], []>} : vector<98x576xbf16>, vector<576x64xbf16>, vector<98x64xf32> -> vector<98x64xf32>
    %c0_3 = arith.constant 0 : index
    %c0_4 = arith.constant 0 : index
    %4 = vector.load %arg3[%c0_3, %c0_4] : memref<1x64xf32, #tpu.memory_space<vmem>>, vector<1x64xf32>
    %5 = vector.broadcast %4 : vector<1x64xf32> to vector<98x64xf32>
    %6 = arith.addf %3, %5 : vector<98x64xf32>
    %cst_5 = arith.constant 0.000000e+00 : f32
    %7 = vector.broadcast %cst_5 : f32 to vector<98x64xf32>
    %8 = arith.maximumf %6, %7 : vector<98x64xf32>
    %c0_6 = arith.constant 0 : index
    %c0_7 = arith.constant 0 : index
    %9 = vector.load %arg4[%c0_6, %c0_7] : memref<98x64xf32, #tpu.memory_space<vmem>>, vector<98x64xf32>
    tpu.vector_store %arg4[%c0_6, %c0_7], %8 {strides = array<i32>} : memref<98x64xf32, #tpu.memory_space<vmem>>, vector<98x64xf32>,
    return
  }
  func.func @transform_0(%arg0: i32) -> (i32, i32) {
    %c0_i32 = arith.constant 0 : i32
    %c0_i32_0 = arith.constant 0 : i32
    return %arg0, %c0_i32 : i32, i32
  }
  func.func @transform_1(%arg0: i32) -> (i32, i32) {
    %c0_i32 = arith.constant 0 : i32
    %c0_i32_0 = arith.constant 0 : i32
    %c0_i32_1 = arith.constant 0 : i32
    return %c0_i32, %c0_i32_0 : i32, i32
  }
  func.func @transform_2(%arg0: i32) -> (i32, i32) {
    %c0_i32 = arith.constant 0 : i32
    %c0_i32_0 = arith.constant 0 : i32
    %c0_i32_1 = arith.constant 0 : i32
    return %c0_i32, %c0_i32_0 : i32, i32
  }
  func.func @transform_3(%arg0: i32) -> (i32, i32) {
    %c0_i32 = arith.constant 0 : i32
    %c0_i32_0 = arith.constant 0 : i32
    return %arg0, %c0_i32 : i32, i32
  }
}

module attributes {stable_mosaic.version = 11 : i64} {
  func.func @_fc_heads_kernel(%arg0: i32, %arg1: memref<2x3136xf32, #tpu.memory_space<vmem>>, %arg2: memref<3136x256xbf16, #tpu.memory_space<vmem>>, %arg3: memref<1x256xf32, #tpu.memory_space<vmem>>, %arg4: memref<256x512xbf16, #tpu.memory_space<vmem>>, %arg5: memref<1x512xf32, #tpu.memory_space<vmem>>, %arg6: memref<512x512xbf16, #tpu.memory_space<vmem>>, %arg7: memref<1x512xf32, #tpu.memory_space<vmem>>, %arg8: memref<512x6xbf16, #tpu.memory_space<vmem>>, %arg9: memref<1x6xf32, #tpu.memory_space<vmem>>, %arg10: memref<512x512xbf16, #tpu.memory_space<vmem>>, %arg11: memref<1x512xf32, #tpu.memory_space<vmem>>, %arg12: memref<512x2xbf16, #tpu.memory_space<vmem>>, %arg13: memref<1x2xf32, #tpu.memory_space<vmem>>, %arg14: memref<2x6xf32, #tpu.memory_space<vmem>>, %arg15: memref<2x2xf32, #tpu.memory_space<vmem>>) attributes {dimension_semantics = [#tpu.dimension_semantics<parallel>], iteration_bounds = array<i64: 1>, scalar_prefetch = 0 : i64, scratch_operands = 0 : i64, tpu.core_type = #tpu.core_type<tc>, window_params = [{transform_indices = @transform_0, window_bounds = array<i64: 2, 3136>}, {pipeline_mode = #tpu.pipeline_mode<synchronous>, transform_indices = @transform_1, window_bounds = array<i64: 3136, 256>}, {pipeline_mode = #tpu.pipeline_mode<synchronous>, transform_indices = @transform_2, window_bounds = array<i64: 1, 256>}, {pipeline_mode = #tpu.pipeline_mode<synchronous>, transform_indices = @transform_3, window_bounds = array<i64: 256, 512>}, {pipeline_mode = #tpu.pipeline_mode<synchronous>, transform_indices = @transform_4, window_bounds = array<i64: 1, 512>}, {pipeline_mode = #tpu.pipeline_mode<synchronous>, transform_indices = @transform_5, window_bounds = array<i64: 512, 512>}, {pipeline_mode = #tpu.pipeline_mode<synchronous>, transform_indices = @transform_6, window_bounds = array<i64: 1, 512>}, {pipeline_mode = #tpu.pipeline_mode<synchronous>, transform_indices = @transform_7, window_bounds = array<i64: 512, 6>}, {pipeline_mode = #tpu.pipeline_mode<synchronous>, transform_indices = @transform_8, window_bounds = array<i64: 1, 6>}, {pipeline_mode = #tpu.pipeline_mode<synchronous>, transform_indices = @transform_9, window_bounds = array<i64: 512, 512>}, {pipeline_mode = #tpu.pipeline_mode<synchronous>, transform_indices = @transform_10, window_bounds = array<i64: 1, 512>}, {pipeline_mode = #tpu.pipeline_mode<synchronous>, transform_indices = @transform_11, window_bounds = array<i64: 512, 2>}, {pipeline_mode = #tpu.pipeline_mode<synchronous>, transform_indices = @transform_12, window_bounds = array<i64: 1, 2>}, {transform_indices = @transform_13, window_bounds = array<i64: 2, 6>}, {transform_indices = @transform_14, window_bounds = array<i64: 2, 2>}]} {
    %c0 = arith.constant 0 : index
    %c0_0 = arith.constant 0 : index
    %0 = vector.load %arg1[%c0, %c0_0] : memref<2x3136xf32, #tpu.memory_space<vmem>>, vector<2x3136xf32>
    %1 = arith.truncf %0 : vector<2x3136xf32> to vector<2x3136xbf16>
    %c0_1 = arith.constant 0 : index
    %c0_2 = arith.constant 0 : index
    %2 = vector.load %arg2[%c0_1, %c0_2] : memref<3136x256xbf16, #tpu.memory_space<vmem>>, vector<3136x256xbf16>
    %cst = arith.constant dense<0.000000e+00> : vector<2x256xf32>
    %3 = tpu.matmul %1, %2, %cst {dimension_numbers = #tpu.dot_dimension_numbers<[1], [0], [0], [1], [0, 0, 1, 1], [], []>} : vector<2x3136xbf16>, vector<3136x256xbf16>, vector<2x256xf32> -> vector<2x256xf32>
    %c0_3 = arith.constant 0 : index
    %c0_4 = arith.constant 0 : index
    %4 = vector.load %arg3[%c0_3, %c0_4] : memref<1x256xf32, #tpu.memory_space<vmem>>, vector<1x256xf32>
    %5 = vector.broadcast %4 : vector<1x256xf32> to vector<2x256xf32>
    %6 = arith.addf %3, %5 : vector<2x256xf32>
    %cst_5 = arith.constant 0.000000e+00 : f32
    %7 = vector.broadcast %cst_5 : f32 to vector<2x256xf32>
    %8 = arith.maximumf %6, %7 : vector<2x256xf32>
    %9 = arith.truncf %8 : vector<2x256xf32> to vector<2x256xbf16>
    %c0_6 = arith.constant 0 : index
    %c0_7 = arith.constant 0 : index
    %10 = vector.load %arg4[%c0_6, %c0_7] : memref<256x512xbf16, #tpu.memory_space<vmem>>, vector<256x512xbf16>
    %cst_8 = arith.constant dense<0.000000e+00> : vector<2x512xf32>
    %11 = tpu.matmul %9, %10, %cst_8 {dimension_numbers = #tpu.dot_dimension_numbers<[1], [0], [0], [1], [0, 0, 1, 1], [], []>} : vector<2x256xbf16>, vector<256x512xbf16>, vector<2x512xf32> -> vector<2x512xf32>
    %c0_9 = arith.constant 0 : index
    %c0_10 = arith.constant 0 : index
    %12 = vector.load %arg5[%c0_9, %c0_10] : memref<1x512xf32, #tpu.memory_space<vmem>>, vector<1x512xf32>
    %13 = vector.broadcast %12 : vector<1x512xf32> to vector<2x512xf32>
    %14 = arith.addf %11, %13 : vector<2x512xf32>
    %cst_11 = arith.constant 0.000000e+00 : f32
    %15 = vector.broadcast %cst_11 : f32 to vector<2x512xf32>
    %16 = arith.maximumf %14, %15 : vector<2x512xf32>
    %17 = arith.truncf %16 : vector<2x512xf32> to vector<2x512xbf16>
    %c0_12 = arith.constant 0 : index
    %c0_13 = arith.constant 0 : index
    %18 = vector.load %arg6[%c0_12, %c0_13] : memref<512x512xbf16, #tpu.memory_space<vmem>>, vector<512x512xbf16>
    %cst_14 = arith.constant dense<0.000000e+00> : vector<2x512xf32>
    %19 = tpu.matmul %17, %18, %cst_14 {dimension_numbers = #tpu.dot_dimension_numbers<[1], [0], [0], [1], [0, 0, 1, 1], [], []>} : vector<2x512xbf16>, vector<512x512xbf16>, vector<2x512xf32> -> vector<2x512xf32>
    %c0_15 = arith.constant 0 : index
    %c0_16 = arith.constant 0 : index
    %20 = vector.load %arg7[%c0_15, %c0_16] : memref<1x512xf32, #tpu.memory_space<vmem>>, vector<1x512xf32>
    %21 = vector.broadcast %20 : vector<1x512xf32> to vector<2x512xf32>
    %22 = arith.addf %19, %21 : vector<2x512xf32>
    %cst_17 = arith.constant 0.000000e+00 : f32
    %23 = vector.broadcast %cst_17 : f32 to vector<2x512xf32>
    %24 = arith.maximumf %22, %23 : vector<2x512xf32>
    %25 = arith.truncf %24 : vector<2x512xf32> to vector<2x512xbf16>
    %c0_18 = arith.constant 0 : index
    %c0_19 = arith.constant 0 : index
    %26 = vector.load %arg8[%c0_18, %c0_19] : memref<512x6xbf16, #tpu.memory_space<vmem>>, vector<512x6xbf16>
    %cst_20 = arith.constant dense<0.000000e+00> : vector<2x6xf32>
    %27 = tpu.matmul %25, %26, %cst_20 {dimension_numbers = #tpu.dot_dimension_numbers<[1], [0], [0], [1], [0, 0, 1, 1], [], []>} : vector<2x512xbf16>, vector<512x6xbf16>, vector<2x6xf32> -> vector<2x6xf32>
    %c0_21 = arith.constant 0 : index
    %c0_22 = arith.constant 0 : index
    %28 = vector.load %arg9[%c0_21, %c0_22] : memref<1x6xf32, #tpu.memory_space<vmem>>, vector<1x6xf32>
    %29 = vector.broadcast %28 : vector<1x6xf32> to vector<2x6xf32>
    %30 = arith.addf %27, %29 : vector<2x6xf32>
    %c0_23 = arith.constant 0 : index
    %c0_24 = arith.constant 0 : index
    %31 = vector.load %arg14[%c0_23, %c0_24] : memref<2x6xf32, #tpu.memory_space<vmem>>, vector<2x6xf32>
    tpu.vector_store %arg14[%c0_23, %c0_24], %30 {strides = array<i32>} : memref<2x6xf32, #tpu.memory_space<vmem>>, vector<2x6xf32>,
    %32 = arith.truncf %16 : vector<2x512xf32> to vector<2x512xbf16>
    %c0_25 = arith.constant 0 : index
    %c0_26 = arith.constant 0 : index
    %33 = vector.load %arg10[%c0_25, %c0_26] : memref<512x512xbf16, #tpu.memory_space<vmem>>, vector<512x512xbf16>
    %cst_27 = arith.constant dense<0.000000e+00> : vector<2x512xf32>
    %34 = tpu.matmul %32, %33, %cst_27 {dimension_numbers = #tpu.dot_dimension_numbers<[1], [0], [0], [1], [0, 0, 1, 1], [], []>} : vector<2x512xbf16>, vector<512x512xbf16>, vector<2x512xf32> -> vector<2x512xf32>
    %c0_28 = arith.constant 0 : index
    %c0_29 = arith.constant 0 : index
    %35 = vector.load %arg11[%c0_28, %c0_29] : memref<1x512xf32, #tpu.memory_space<vmem>>, vector<1x512xf32>
    %36 = vector.broadcast %35 : vector<1x512xf32> to vector<2x512xf32>
    %37 = arith.addf %34, %36 : vector<2x512xf32>
    %cst_30 = arith.constant 0.000000e+00 : f32
    %38 = vector.broadcast %cst_30 : f32 to vector<2x512xf32>
    %39 = arith.maximumf %37, %38 : vector<2x512xf32>
    %40 = arith.addf %39, %16 : vector<2x512xf32>
    %41 = arith.truncf %40 : vector<2x512xf32> to vector<2x512xbf16>
    %c0_31 = arith.constant 0 : index
    %c0_32 = arith.constant 0 : index
    %42 = vector.load %arg12[%c0_31, %c0_32] : memref<512x2xbf16, #tpu.memory_space<vmem>>, vector<512x2xbf16>
    %cst_33 = arith.constant dense<0.000000e+00> : vector<2x2xf32>
    %43 = tpu.matmul %41, %42, %cst_33 {dimension_numbers = #tpu.dot_dimension_numbers<[1], [0], [0], [1], [0, 0, 1, 1], [], []>} : vector<2x512xbf16>, vector<512x2xbf16>, vector<2x2xf32> -> vector<2x2xf32>
    %c0_34 = arith.constant 0 : index
    %c0_35 = arith.constant 0 : index
    %44 = vector.load %arg13[%c0_34, %c0_35] : memref<1x2xf32, #tpu.memory_space<vmem>>, vector<1x2xf32>
    %45 = vector.broadcast %44 : vector<1x2xf32> to vector<2x2xf32>
    %46 = arith.addf %43, %45 : vector<2x2xf32>
    %c0_36 = arith.constant 0 : index
    %c0_37 = arith.constant 0 : index
    %47 = vector.load %arg15[%c0_36, %c0_37] : memref<2x2xf32, #tpu.memory_space<vmem>>, vector<2x2xf32>
    tpu.vector_store %arg15[%c0_36, %c0_37], %46 {strides = array<i32>} : memref<2x2xf32, #tpu.memory_space<vmem>>, vector<2x2xf32>,
    return
  }
  func.func @transform_0(%arg0: i32) -> (i32, i32) {
    %c0_i32 = arith.constant 0 : i32
    %c0_i32_0 = arith.constant 0 : i32
    return %arg0, %c0_i32 : i32, i32
  }
  func.func @transform_1(%arg0: i32) -> (i32, i32) {
    %c0_i32 = arith.constant 0 : i32
    %c0_i32_0 = arith.constant 0 : i32
    %c0_i32_1 = arith.constant 0 : i32
    return %c0_i32, %c0_i32_0 : i32, i32
  }
  func.func @transform_2(%arg0: i32) -> (i32, i32) {
    %c0_i32 = arith.constant 0 : i32
    %c0_i32_0 = arith.constant 0 : i32
    %c0_i32_1 = arith.constant 0 : i32
    return %c0_i32, %c0_i32_0 : i32, i32
  }
  func.func @transform_3(%arg0: i32) -> (i32, i32) {
    %c0_i32 = arith.constant 0 : i32
    %c0_i32_0 = arith.constant 0 : i32
    %c0_i32_1 = arith.constant 0 : i32
    return %c0_i32, %c0_i32_0 : i32, i32
  }
  func.func @transform_4(%arg0: i32) -> (i32, i32) {
    %c0_i32 = arith.constant 0 : i32
    %c0_i32_0 = arith.constant 0 : i32
    %c0_i32_1 = arith.constant 0 : i32
    return %c0_i32, %c0_i32_0 : i32, i32
  }
  func.func @transform_5(%arg0: i32) -> (i32, i32) {
    %c0_i32 = arith.constant 0 : i32
    %c0_i32_0 = arith.constant 0 : i32
    %c0_i32_1 = arith.constant 0 : i32
    return %c0_i32, %c0_i32_0 : i32, i32
  }
  func.func @transform_6(%arg0: i32) -> (i32, i32) {
    %c0_i32 = arith.constant 0 : i32
    %c0_i32_0 = arith.constant 0 : i32
    %c0_i32_1 = arith.constant 0 : i32
    return %c0_i32, %c0_i32_0 : i32, i32
  }
  func.func @transform_7(%arg0: i32) -> (i32, i32) {
    %c0_i32 = arith.constant 0 : i32
    %c0_i32_0 = arith.constant 0 : i32
    %c0_i32_1 = arith.constant 0 : i32
    return %c0_i32, %c0_i32_0 : i32, i32
  }
  func.func @transform_8(%arg0: i32) -> (i32, i32) {
    %c0_i32 = arith.constant 0 : i32
    %c0_i32_0 = arith.constant 0 : i32
    %c0_i32_1 = arith.constant 0 : i32
    return %c0_i32, %c0_i32_0 : i32, i32
  }
  func.func @transform_9(%arg0: i32) -> (i32, i32) {
    %c0_i32 = arith.constant 0 : i32
    %c0_i32_0 = arith.constant 0 : i32
    %c0_i32_1 = arith.constant 0 : i32
    return %c0_i32, %c0_i32_0 : i32, i32
  }
  func.func @transform_10(%arg0: i32) -> (i32, i32) {
    %c0_i32 = arith.constant 0 : i32
    %c0_i32_0 = arith.constant 0 : i32
    %c0_i32_1 = arith.constant 0 : i32
    return %c0_i32, %c0_i32_0 : i32, i32
  }
  func.func @transform_11(%arg0: i32) -> (i32, i32) {
    %c0_i32 = arith.constant 0 : i32
    %c0_i32_0 = arith.constant 0 : i32
    %c0_i32_1 = arith.constant 0 : i32
    return %c0_i32, %c0_i32_0 : i32, i32
  }
  func.func @transform_12(%arg0: i32) -> (i32, i32) {
    %c0_i32 = arith.constant 0 : i32
    %c0_i32_0 = arith.constant 0 : i32
    %c0_i32_1 = arith.constant 0 : i32
    return %c0_i32, %c0_i32_0 : i32, i32
  }
  func.func @transform_13(%arg0: i32) -> (i32, i32) {
    %c0_i32 = arith.constant 0 : i32
    %c0_i32_0 = arith.constant 0 : i32
    return %arg0, %c0_i32 : i32, i32
  }
  func.func @transform_14(%arg0: i32) -> (i32, i32) {
    %c0_i32 = arith.constant 0 : i32
    %c0_i32_0 = arith.constant 0 : i32
    return %arg0, %c0_i32 : i32, i32
  }
}

</mosaic_0001>

<bundles_post_ra>
// kernel: cnn_actor_critic_forward.4
= control target key start
LH: loop header
LB: loop body
LE: loop exit
PB: predicated region body
PF: predicated region fallthrough
CT: control target
= control target key end

     0   :  { %s1705_s12 = smov 0   ;;  %s1707_s13 = smov 0   ;;  %s2358_s0 = inlined_call_operand.vmem [shape: f32[800,256], index: 0, kind: input, shape index: {}]   ;;  %s2359_s1 = inlined_call_operand.vmem [shape: bf16[256,32], index: 1, kind: input, shape index: {}]   ;;  %s2360_s2 = inlined_call_operand.vmem [shape: f32[1,32], index: 2, kind: input, shape index: {}]   ;;  %s2361_s3 = inlined_call_operand.vmem [shape: f32[800,32], index: 3, kind: output, shape index: {}]  }
   0x1   :  { %s1709_s14 = smov 0  }
   0x2 LB: > { %s1718_s15 = sadd.s32 4294967295, %s1650_s14   ;;  %s1720_s16 = sadd.s32 1, %s1650_s14   ;;  %s1650_s14 = sphi %s1709_s14, %s2370_s14   ;;  %s1646_s13 = sphi %s1707_s13, %s2369_s13   ;;  %s1642_s12 = sphi %s1705_s12, %s2368_s12  }
   0x3   : > { %s85_s17 = ssub.s32 %s1650_s14, %s1720_s16  ;;  %s88_s18 = sadd.s32 1, %s1646_s13 }
   0x4   : > { %p86_p0 = scmp.eq.s32.totalorder %s85_s17, 0  ;;  %p98_p1 = scmp.ne.s32.totalorder %s1646_s13, %s1642_s12 }
   0x5   : > { %p99_p2 = scmp.eq.s32.totalorder %s1718_s15, 1  ;;  %p1416_p3 = scmp.ge.s32.totalorder %s1650_s14, 1 }
   0x6   : > { %s1728_s19 = scalar_select %p86_p0, %s1646_s13, %s88_s18  }
   0x7   : > { %p1730_p4 = por %p99_p2, %p98_p1  ;;  %p149_p5 = scmp.lt.s32.totalorder %s1650_s14, 3 }
   0x9   : > { %p150_p6 = pnand %p1416_p3, %p149_p5 }
   0xa   : > { %v1580_v0 = vld [vmem:[%s2359_s1] sm:$0xff] (!%p150_p6)   ;;  %v1684_v1 = vmov (!%p150_p6), 0   ;;  %s1740_s23 = sshll.u32 (!%p150_p6), %s1718_s15, 6  ;;  %v1581_v2 = vld [vmem:[%s2359_s1 + $0x8] sm:$0xff] (!%p150_p6)   ;;  %v1582_v3 = vld [vmem:[%s2359_s1 + $0x10] sm:$0xff] (!%p150_p6)   ;;  %s175_s17 = sand.u32 (!%p150_p6), 1, %s1642_s12  }
   0xb   : > { %153 = sbr.rel (%p150_p6) target bundleno = 486 (0x1e6), region = 32  ;;  %528 = vmatprep.subr.bf16.mxu0 (!%p150_p6), %v1684_v1  ;;  %1459 = vmatprep.subr.bf16.mxu1 (!%p150_p6), %v1684_v1  ;;  %p184_p7 = scmp.lt.s32.totalorder (!%p150_p6), %s1740_s23, 99  ;;  %v1583_v4 = vld [vmem:[%s2359_s1 + $0x18] sm:$0xff] (!%p150_p6)   ;;  %v1584_v5 = vld [vmem:[%s2359_s1 + $0x20] sm:$0xff] (!%p150_p6)   ;;  %v1585_v11 = vld [vmem:[%s2359_s1 + $0x28] sm:$0xff] (!%p150_p6)   ;;  %vm881_vm0 = vcmask (!%p150_p6), 261120  }
   0xc   : > { %529 = vmatpush1.bf16.msra.mxu0 (!%p150_p6), %v1580_v0  ;;  %1475 = vmatpush1.bf16.msra.mxu1 (!%p150_p6), %v1580_v0  ;;  %v1586_v13 = vld [vmem:[%s2359_s1 + $0x30] sm:$0xff] (!%p150_p6)   ;;  %v1587_v14 = vld [vmem:[%s2359_s1 + $0x38] sm:$0xff] (!%p150_p6)   ;;  %v1588_v15 = vld [vmem:[%s2359_s1 + $0x40] sm:$0xff] (!%p150_p6)   ;;  %s1417_s22 = sshll.u32 (!%p150_p6), %s175_s17, 9 }
   0xd   : > { %530 = vmatprep.subr.bf16.mxu0 (!%p150_p6), %v1684_v1  ;;  %1460 = vmatprep.subr.bf16.mxu1 (!%p150_p6), %v1684_v1  ;;  %v1589_v16 = vld [vmem:[%s2359_s1 + $0x48] sm:$0xff] (!%p150_p6)   ;;  %v1590_v17 = vld [vmem:[%s2359_s1 + $0x50] sm:$0xff] (!%p150_p6)   ;;  %v1591_v18 = vld [vmem:[%s2359_s1 + $0x58] sm:$0xff] (!%p150_p6)   ;;  %s1962_s12 = scalar_lea.vmem (!%p150_p6), [#allocation2], %s1417_s22  }
   0xe   : > { %v1592_v19 = vld [vmem:[%s2359_s1 + $0x60] sm:$0xff] (!%p150_p6)   ;;  %v1593_v20 = vld [vmem:[%s2359_s1 + $0x68] sm:$0xff] (!%p150_p6)   ;;  %v1594_v21 = vld [vmem:[%s2359_s1 + $0x70] sm:$0xff] (!%p150_p6)  }
   0xf   : > { %v1595_v22 = vld [vmem:[%s2359_s1 + $0x78] sm:$0xff] (!%p150_p6)  }
  0x10   : > { %531 = vmatpush1.bf16.msra.mxu0 (!%p150_p6), %v1581_v2  ;;  %1476 = vmatpush1.bf16.msra.mxu1 (!%p150_p6), %v1581_v2 }
  0x11   : > { %532 = vmatprep.subr.bf16.mxu0 (!%p150_p6), %v1684_v1  ;;  %1461 = vmatprep.subr.bf16.mxu1 (!%p150_p6), %v1684_v1 }
  0x12   : > { %s185_s28 = scalar_select %p184_p7, %s1740_s23, 99 }
  0x13   : > { %s1456_s24 = sshll.u32 (%p1730_p4), %s1718_s15, 9 }
  0x14   : > { %533 = vmatpush1.bf16.msra.mxu0 %v1582_v3  ;;  %1477 = vmatpush1.bf16.msra.mxu1 %v1582_v3  ;;  %s1455_s4 = sshll.u32 %s185_s28, 4  ;;  %s2159_s27 = scalar_lea.vmem (%p1730_p4), %s2361_s3, %s1456_s24  }
  0x15   : > { %534 = vmatprep.subr.bf16.mxu0 %v1684_v1  ;;  %1462 = vmatprep.subr.bf16.mxu1 %v1684_v1  ;;  %s1762_s7 = scalar_lea.vmem %s2358_s0, %s1455_s4 }
  0x16   : > { %v202_v6 = vld [vmem:[%s1762_s7 + $0x8] sm:$0xff]  ;;  %v204_v7 = vld [vmem:[%s1762_s7 + $0x18] sm:$0xff]  ;;  %v201_v23 = vld [vmem:[%s1762_s7] sm:$0xff] }
  0x17   : > { %v266_v8 = vld [vmem:[%s1762_s7 + $0x208] sm:$0xff]  ;;  %v330_v9 = vpack.c.bf16 %v204_v7, %v202_v6  ;;  %v268_v10 = vld [vmem:[%s1762_s7 + $0x218] sm:$0xff]  ;;  %v203_v24 = vld [vmem:[%s1762_s7 + $0x10] sm:$0xff] }
  0x18   : > { %535 = vmatpush1.bf16.msra.mxu0 %v1583_v4  ;;  %1478 = vmatpush1.bf16.msra.mxu1 %v1583_v4  ;;  %v362_v12 = vpack.c.bf16 %v268_v10, %v266_v8  ;;  %v265_v25 = vld [vmem:[%s1762_s7 + $0x200] sm:$0xff]  ;;  %v267_v26 = vld [vmem:[%s1762_s7 + $0x210] sm:$0xff]  ;;  %v206_v27 = vld [vmem:[%s1762_s7 + $0x28] sm:$0xff]  ;;  %v329_v31 = vpack.c.bf16 %v203_v24, %v201_v23 }
  0x19   : > { %536 = vmatprep.subr.bf16.mxu0 %v1684_v1  ;;  %1463 = vmatprep.subr.bf16.mxu1 %v1684_v1  ;;  %v208_v28 = vld [vmem:[%s1762_s7 + $0x38] sm:$0xff]  ;;  %v270_v29 = vld [vmem:[%s1762_s7 + $0x228] sm:$0xff]  ;;  %v361_v32 = vpack.c.bf16 %v267_v26, %v265_v25  ;;  %v205_v35 = vld [vmem:[%s1762_s7 + $0x20] sm:$0xff] }
  0x1a   : > { %560 = vmatprep.mubr.bf16.mxu0 %v330_v9  ;;  %688 = vmatprep.mubr.bf16.mxu1 %v362_v12  ;;  %v272_v30 = vld [vmem:[%s1762_s7 + $0x238] sm:$0xff]  ;;  %v332_v33 = vpack.c.bf16 %v208_v28, %v206_v27  ;;  %v207_v36 = vld [vmem:[%s1762_s7 + $0x30] sm:$0xff]  ;;  %v269_v37 = vld [vmem:[%s1762_s7 + $0x220] sm:$0xff] }
  0x1b   : > { %v364_v34 = vpack.c.bf16 %v272_v30, %v270_v29  ;;  %v271_v38 = vld [vmem:[%s1762_s7 + $0x230] sm:$0xff]  ;;  %v210_v39 = vld [vmem:[%s1762_s7 + $0x48] sm:$0xff]  ;;  %v212_v40 = vld [vmem:[%s1762_s7 + $0x58] sm:$0xff]  ;;  %v331_v43 = vpack.c.bf16 %v207_v36, %v205_v35 }
  0x1c   : > { %537 = vmatpush1.bf16.msra.mxu0 %v1584_v5  ;;  %1479 = vmatpush1.bf16.msra.mxu1 %v1584_v5  ;;  %v274_v41 = vld [vmem:[%s1762_s7 + $0x248] sm:$0xff]  ;;  %v276_v42 = vld [vmem:[%s1762_s7 + $0x258] sm:$0xff]  ;;  %v363_v44 = vpack.c.bf16 %v271_v38, %v269_v37  ;;  %v334_v45 = vpack.c.bf16 %v212_v40, %v210_v39  ;;  %v209_v47 = vld [vmem:[%s1762_s7 + $0x40] sm:$0xff] }
  0x1d   : > { %538 = vmatprep.subr.bf16.mxu0 %v1684_v1  ;;  %1464 = vmatprep.subr.bf16.mxu1 %v1684_v1  ;;  %v366_v46 = vpack.c.bf16 %v276_v42, %v274_v41  ;;  %v211_v48 = vld [vmem:[%s1762_s7 + $0x50] sm:$0xff]  ;;  %v273_v49 = vld [vmem:[%s1762_s7 + $0x240] sm:$0xff]  ;;  %v214_v51 = vld [vmem:[%s1762_s7 + $0x68] sm:$0xff] }
  0x1e   : > { %v275_v50 = vld [vmem:[%s1762_s7 + $0x250] sm:$0xff]  ;;  %v216_v52 = vld [vmem:[%s1762_s7 + $0x78] sm:$0xff]  ;;  %v278_v53 = vld [vmem:[%s1762_s7 + $0x268] sm:$0xff]  ;;  %v333_v55 = vpack.c.bf16 %v211_v48, %v209_v47 }
  0x1f   : > { %v280_v54 = vld [vmem:[%s1762_s7 + $0x278] sm:$0xff]  ;;  %v365_v56 = vpack.c.bf16 %v275_v50, %v273_v49  ;;  %v336_v57 = vpack.c.bf16 %v216_v52, %v214_v51  ;;  %v213_v59 = vld [vmem:[%s1762_s7 + $0x60] sm:$0xff]  ;;  %v215_v60 = vld [vmem:[%s1762_s7 + $0x70] sm:$0xff] }
  0x20   : > { %539 = vmatpush1.bf16.msra.mxu0 %v1585_v11  ;;  %1480 = vmatpush1.bf16.msra.mxu1 %v1585_v11  ;;  %v368_v58 = vpack.c.bf16 %v280_v54, %v278_v53  ;;  %v277_v61 = vld [vmem:[%s1762_s7 + $0x260] sm:$0xff]  ;;  %v279_v62 = vld [vmem:[%s1762_s7 + $0x270] sm:$0xff]  ;;  %v218_v63 = vld [vmem:[%s1762_s7 + $0x88] sm:$0xff]  ;;  %v335_v3 = vpack.c.bf16 %v215_v60, %v213_v59 }
  0x21   : > { %540 = vmatprep.subr.bf16.mxu0 %v1684_v1  ;;  %1465 = vmatprep.subr.bf16.mxu1 %v1684_v1  ;;  %v220_v0 = vld [vmem:[%s1762_s7 + $0x98] sm:$0xff]  ;;  %v367_v4 = vpack.c.bf16 %v279_v62, %v277_v61  ;;  %v217_v7 = vld [vmem:[%s1762_s7 + $0x80] sm:$0xff]  ;;  %v219_v8 = vld [vmem:[%s1762_s7 + $0x90] sm:$0xff] }
  0x22   : > { %v284_v2 = vld [vmem:[%s1762_s7 + $0x298] sm:$0xff]  ;;  %v338_v5 = vpack.c.bf16 %v220_v0, %v218_v63  ;;  %v281_v9 = vld [vmem:[%s1762_s7 + $0x280] sm:$0xff]  ;;  %v283_v10 = vld [vmem:[%s1762_s7 + $0x290] sm:$0xff] }
  0x23   : > { %v222_v11 = vld [vmem:[%s1762_s7 + $0xa8] sm:$0xff]  ;;  %v224_v12 = vld [vmem:[%s1762_s7 + $0xb8] sm:$0xff] }
  0x24   : > { %541 = vmatpush1.bf16.msra.mxu0 %v1586_v13  ;;  %1481 = vmatpush1.bf16.msra.mxu1 %v1586_v13  ;;  %v286_v13 = vld [vmem:[%s1762_s7 + $0x2a8] sm:$0xff]  ;;  %v228_v24 = vld [vmem:[%s1762_s7 + $0xd8] sm:$0xff] }
  0x25   : > { %542 = vmatprep.subr.bf16.mxu0 %v1684_v1  ;;  %1466 = vmatprep.subr.bf16.mxu1 %v1684_v1  ;;  %v226_v23 = vld [vmem:[%s1762_s7 + $0xc8] sm:$0xff]  ;;  %v292_v26 = vld [vmem:[%s1762_s7 + $0x2d8] sm:$0xff] }
  0x26   : > { %v290_v25 = vld [vmem:[%s1762_s7 + $0x2c8] sm:$0xff]  ;;  %v342_v29 = vpack.c.bf16 %v228_v24, %v226_v23  ;;  %v232_v36 = vld [vmem:[%s1762_s7 + $0xf8] sm:$0xff] }
  0x27   : > { %v374_v30 = vpack.c.bf16 %v292_v26, %v290_v25  ;;  %v230_v35 = vld [vmem:[%s1762_s7 + $0xe8] sm:$0xff]  ;;  %v296_v38 = vld [vmem:[%s1762_s7 + $0x2f8] sm:$0xff] }
  0x28   : > { %543 = vmatpush1.bf16.msra.mxu0 %v1587_v14  ;;  %1482 = vmatpush1.bf16.msra.mxu1 %v1587_v14  ;;  %v288_v14 = vld [vmem:[%s1762_s7 + $0x2b8] sm:$0xff]  ;;  %v294_v37 = vld [vmem:[%s1762_s7 + $0x2e8] sm:$0xff]  ;;  %v344_v41 = vpack.c.bf16 %v232_v36, %v230_v35 }
  0x29   : > { %544 = vmatprep.subr.bf16.mxu0 %v1684_v1  ;;  %1467 = vmatprep.subr.bf16.mxu1 %v1684_v1  ;;  %v376_v42 = vpack.c.bf16 %v296_v38, %v294_v37  ;;  %v234_v47 = vld [vmem:[%s1762_s7 + $0x108] sm:$0xff]  ;;  %v236_v48 = vld [vmem:[%s1762_s7 + $0x118] sm:$0xff] }
  0x2a   : > { %v298_v49 = vld [vmem:[%s1762_s7 + $0x308] sm:$0xff]  ;;  %v300_v50 = vld [vmem:[%s1762_s7 + $0x318] sm:$0xff]  ;;  %v346_v53 = vpack.c.bf16 %v236_v48, %v234_v47 }
  0x2b   : > { %v378_v54 = vpack.c.bf16 %v300_v50, %v298_v49  ;;  %v238_v59 = vld [vmem:[%s1762_s7 + $0x128] sm:$0xff]  ;;  %v240_v60 = vld [vmem:[%s1762_s7 + $0x138] sm:$0xff] }
  0x2c   : > { %545 = vmatpush1.bf16.msra.mxu0 %v1588_v15  ;;  %1483 = vmatpush1.bf16.msra.mxu1 %v1588_v15  ;;  %v337_v15 = vpack.c.bf16 %v219_v8, %v217_v7  ;;  %v302_v61 = vld [vmem:[%s1762_s7 + $0x328] sm:$0xff]  ;;  %v304_v62 = vld [vmem:[%s1762_s7 + $0x338] sm:$0xff] }
  0x2d   : > { %546 = vmatprep.subr.bf16.mxu0 %v1684_v1  ;;  %1468 = vmatprep.subr.bf16.mxu1 %v1684_v1  ;;  %v242_v7 = vld [vmem:[%s1762_s7 + $0x148] sm:$0xff]  ;;  %v244_v8 = vld [vmem:[%s1762_s7 + $0x158] sm:$0xff] }
  0x30   : > { %547 = vmatpush1.bf16.msra.mxu0 %v1589_v16  ;;  %1484 = vmatpush1.bf16.msra.mxu1 %v1589_v16  ;;  %v369_v16 = vpack.c.bf16 %v283_v10, %v281_v9  ;;  %v306_v9 = vld [vmem:[%s1762_s7 + $0x348] sm:$0xff]  ;;  %v308_v10 = vld [vmem:[%s1762_s7 + $0x358] sm:$0xff] }
  0x31   : > { %548 = vmatprep.subr.bf16.mxu0 %v1684_v1  ;;  %1469 = vmatprep.subr.bf16.mxu1 %v1684_v1 }
  0x34   : > { %549 = vmatpush1.bf16.msra.mxu0 %v1590_v17  ;;  %1485 = vmatpush1.bf16.msra.mxu1 %v1590_v17  ;;  %v340_v17 = vpack.c.bf16 %v224_v12, %v222_v11 }
  0x35   : > { %550 = vmatprep.subr.bf16.mxu0 %v1684_v1  ;;  %1470 = vmatprep.subr.bf16.mxu1 %v1684_v1 }
  0x38   : > { %551 = vmatpush1.bf16.msra.mxu0 %v1591_v18  ;;  %1486 = vmatpush1.bf16.msra.mxu1 %v1591_v18  ;;  %v372_v18 = vpack.c.bf16 %v288_v14, %v286_v13  ;;  %v350_v13 = vpack.c.bf16 %v244_v8, %v242_v7  ;;  %v382_v14 = vpack.c.bf16 %v308_v10, %v306_v9 }
  0x39   : > { %552 = vmatprep.subr.bf16.mxu0 %v1684_v1  ;;  %1471 = vmatprep.subr.bf16.mxu1 %v1684_v1 }
  0x3c   : > { %553 = vmatpush1.bf16.msra.mxu0 %v1592_v19  ;;  %1487 = vmatpush1.bf16.msra.mxu1 %v1592_v19  ;;  %v221_v19 = vld [vmem:[%s1762_s7 + $0xa0] sm:$0xff] }
  0x3d   : > { %554 = vmatprep.subr.bf16.mxu0 %v1684_v1  ;;  %1472 = vmatprep.subr.bf16.mxu1 %v1684_v1 }
  0x40   : > { %555 = vmatpush1.bf16.msra.mxu0 %v1593_v20  ;;  %1488 = vmatpush1.bf16.msra.mxu1 %v1593_v20  ;;  %v223_v20 = vld [vmem:[%s1762_s7 + $0xb0] sm:$0xff] }
  0x41   : > { %556 = vmatprep.subr.bf16.mxu0 %v1684_v1  ;;  %1473 = vmatprep.subr.bf16.mxu1 %v1684_v1  ;;  %v339_v27 = vpack.c.bf16 %v223_v20, %v221_v19  ;;  %v246_v19 = vld [vmem:[%s1762_s7 + $0x168] sm:$0xff]  ;;  %v248_v20 = vld [vmem:[%s1762_s7 + $0x178] sm:$0xff] }
  0x42   : > { %v352_v25 = vpack.c.bf16 %v248_v20, %v246_v19 }
  0x44   : > { %557 = vmatpush1.bf16.msra.mxu0 %v1594_v21  ;;  %1489 = vmatpush1.bf16.msra.mxu1 %v1594_v21  ;;  %v285_v21 = vld [vmem:[%s1762_s7 + $0x2a0] sm:$0xff] }
  0x45   : > { %558 = vmatprep.subr.bf16.mxu0 %v1684_v1  ;;  %1474 = vmatprep.subr.bf16.mxu1 %v1684_v1  ;;  %v282_v1 = vld [vmem:[%s1762_s7 + $0x288] sm:$0xff] }
  0x46   : > { %v370_v6 = vpack.c.bf16 %v284_v2, %v282_v1  ;;  %v348_v1 = vpack.c.bf16 %v240_v60, %v238_v59  ;;  %v380_v2 = vpack.c.bf16 %v304_v62, %v302_v61 }
  0x48   : > { %559 = vmatpush1.bf16.msra.mxu0 %v1595_v22  ;;  %1490 = vmatpush1.bf16.msra.mxu1 %v1595_v22  ;;  %v287_v22 = vld [vmem:[%s1762_s7 + $0x2b0] sm:$0xff] }
  0x49   : > { %v371_v28 = vpack.c.bf16 %v287_v22, %v285_v21  ;;  %v310_v21 = vld [vmem:[%s1762_s7 + $0x368] sm:$0xff]  ;;  %v312_v22 = vld [vmem:[%s1762_s7 + $0x378] sm:$0xff] }
  0x4a   : > { %v384_v26 = vpack.c.bf16 %v312_v22, %v310_v21 }
  0x4b   : > { %561 = vmatmul.mubr.bf16.vlgmr.msra.gmra.mrb[0].mxu0 %v329_v31  ;;  %689 = vmatmul.mubr.bf16.vlgmr.msra.gmra.mrb[0].mxu1 %v361_v32  ;;  %v225_v31 = vld [vmem:[%s1762_s7 + $0xc0] sm:$0xff]  ;;  %v227_v32 = vld [vmem:[%s1762_s7 + $0xd0] sm:$0xff] }
  0x4c   : > { %568 = vmatprep.mubr.bf16.mxu0 %v332_v33  ;;  %696 = vmatprep.mubr.bf16.mxu1 %v364_v34  ;;  %v289_v33 = vld [vmem:[%s1762_s7 + $0x2c0] sm:$0xff]  ;;  %v291_v34 = vld [vmem:[%s1762_s7 + $0x2d0] sm:$0xff]  ;;  %v341_v39 = vpack.c.bf16 %v227_v32, %v225_v31  ;;  %v250_v31 = vld [vmem:[%s1762_s7 + $0x188] sm:$0xff] }
  0x4d   : > { %v373_v40 = vpack.c.bf16 %v291_v34, %v289_v33  ;;  %v252_v32 = vld [vmem:[%s1762_s7 + $0x198] sm:$0xff]  ;;  %v314_v33 = vld [vmem:[%s1762_s7 + $0x388] sm:$0xff] }
  0x4e   : > { %v316_v34 = vld [vmem:[%s1762_s7 + $0x398] sm:$0xff]  ;;  %v354_v37 = vpack.c.bf16 %v252_v32, %v250_v31 }
  0x4f   : > { %v386_v38 = vpack.c.bf16 %v316_v34, %v314_v33 }
  0x53   : > { %569 = vmatmul.mubr.bf16.gmra.mrb[4].mxu0 %v331_v43  ;;  %697 = vmatmul.mubr.bf16.gmra.mrb[4].mxu1 %v363_v44  ;;  %v229_v43 = vld [vmem:[%s1762_s7 + $0xe0] sm:$0xff]  ;;  %v231_v44 = vld [vmem:[%s1762_s7 + $0xf0] sm:$0xff] }
  0x54   : > { %576 = vmatprep.mubr.bf16.mxu0 %v334_v45  ;;  %704 = vmatprep.mubr.bf16.mxu1 %v366_v46  ;;  %v293_v45 = vld [vmem:[%s1762_s7 + $0x2e0] sm:$0xff]  ;;  %v295_v46 = vld [vmem:[%s1762_s7 + $0x2f0] sm:$0xff]  ;;  %v343_v51 = vpack.c.bf16 %v231_v44, %v229_v43  ;;  %v254_v43 = vld [vmem:[%s1762_s7 + $0x1a8] sm:$0xff] }
  0x55   : > { %v375_v52 = vpack.c.bf16 %v295_v46, %v293_v45  ;;  %v256_v44 = vld [vmem:[%s1762_s7 + $0x1b8] sm:$0xff]  ;;  %v318_v45 = vld [vmem:[%s1762_s7 + $0x3a8] sm:$0xff] }
  0x56   : > { %v320_v46 = vld [vmem:[%s1762_s7 + $0x3b8] sm:$0xff]  ;;  %v356_v49 = vpack.c.bf16 %v256_v44, %v254_v43 }
  0x57   : > { %v388_v50 = vpack.c.bf16 %v320_v46, %v318_v45 }
  0x5b   : > { %577 = vmatmul.mubr.bf16.gmra.mrb[8].mxu0 %v333_v55  ;;  %705 = vmatmul.mubr.bf16.gmra.mrb[8].mxu1 %v365_v56  ;;  %v233_v55 = vld [vmem:[%s1762_s7 + $0x100] sm:$0xff]  ;;  %v235_v56 = vld [vmem:[%s1762_s7 + $0x110] sm:$0xff] }
  0x5c   : > { %584 = vmatprep.mubr.bf16.mxu0 %v336_v57  ;;  %712 = vmatprep.mubr.bf16.mxu1 %v368_v58  ;;  %v297_v57 = vld [vmem:[%s1762_s7 + $0x300] sm:$0xff]  ;;  %v299_v58 = vld [vmem:[%s1762_s7 + $0x310] sm:$0xff]  ;;  %v345_v63 = vpack.c.bf16 %v235_v56, %v233_v55  ;;  %v258_v55 = vld [vmem:[%s1762_s7 + $0x1c8] sm:$0xff] }
  0x5d   : > { %v377_v0 = vpack.c.bf16 %v299_v58, %v297_v57  ;;  %v260_v56 = vld [vmem:[%s1762_s7 + $0x1d8] sm:$0xff]  ;;  %v322_v57 = vld [vmem:[%s1762_s7 + $0x3c8] sm:$0xff] }
  0x5e   : > { %v324_v58 = vld [vmem:[%s1762_s7 + $0x3d8] sm:$0xff]  ;;  %v358_v61 = vpack.c.bf16 %v260_v56, %v258_v55 }
  0x5f   : > { %v390_v62 = vpack.c.bf16 %v324_v58, %v322_v57 }
  0x63   : > { %585 = vmatmul.mubr.bf16.gmra.mrb[12].mxu0 %v335_v3  ;;  %713 = vmatmul.mubr.bf16.gmra.mrb[12].mxu1 %v367_v4  ;;  %v237_v3 = vld [vmem:[%s1762_s7 + $0x120] sm:$0xff]  ;;  %v239_v4 = vld [vmem:[%s1762_s7 + $0x130] sm:$0xff] }
  0x64   : > { %592 = vmatprep.mubr.bf16.mxu0 %v338_v5  ;;  %720 = vmatprep.mubr.bf16.mxu1 %v370_v6  ;;  %v301_v5 = vld [vmem:[%s1762_s7 + $0x320] sm:$0xff]  ;;  %v303_v6 = vld [vmem:[%s1762_s7 + $0x330] sm:$0xff]  ;;  %v347_v11 = vpack.c.bf16 %v239_v4, %v237_v3  ;;  %v262_v3 = vld [vmem:[%s1762_s7 + $0x1e8] sm:$0xff] }
  0x65   : > { %v379_v12 = vpack.c.bf16 %v303_v6, %v301_v5  ;;  %v264_v4 = vld [vmem:[%s1762_s7 + $0x1f8] sm:$0xff]  ;;  %v326_v5 = vld [vmem:[%s1762_s7 + $0x3e8] sm:$0xff] }
  0x66   : > { %v328_v6 = vld [vmem:[%s1762_s7 + $0x3f8] sm:$0xff]  ;;  %v360_v9 = vpack.c.bf16 %v264_v4, %v262_v3 }
  0x67   : > { %v392_v10 = vpack.c.bf16 %v328_v6, %v326_v5 }
  0x6b   : > { %593 = vmatmul.mubr.bf16.gmra.mrb[16].mxu0 %v337_v15  ;;  %721 = vmatmul.mubr.bf16.gmra.mrb[16].mxu1 %v369_v16  ;;  %v241_v15 = vld [vmem:[%s1762_s7 + $0x140] sm:$0xff]  ;;  %v243_v16 = vld [vmem:[%s1762_s7 + $0x150] sm:$0xff] }
  0x6c   : > { %600 = vmatprep.mubr.bf16.mxu0 %v340_v17  ;;  %728 = vmatprep.mubr.bf16.mxu1 %v372_v18  ;;  %v305_v17 = vld [vmem:[%s1762_s7 + $0x340] sm:$0xff]  ;;  %v307_v18 = vld [vmem:[%s1762_s7 + $0x350] sm:$0xff]  ;;  %v349_v23 = vpack.c.bf16 %v243_v16, %v241_v15 }
  0x6d   : > { %v381_v24 = vpack.c.bf16 %v307_v18, %v305_v17  ;;  %v1956_v17 = vld [vmem:[%s2360_s2] ss:$0 sm:$0xff] }
  0x73   : > { %601 = vmatmul.mubr.bf16.gmra.mrb[20].mxu0 %v339_v27  ;;  %729 = vmatmul.mubr.bf16.gmra.mrb[20].mxu1 %v371_v28  ;;  %v245_v27 = vld [vmem:[%s1762_s7 + $0x160] sm:$0xff]  ;;  %v247_v28 = vld [vmem:[%s1762_s7 + $0x170] sm:$0xff] }
  0x74   : > { %608 = vmatprep.mubr.bf16.mxu0 %v342_v29  ;;  %736 = vmatprep.mubr.bf16.mxu1 %v374_v30  ;;  %v309_v29 = vld [vmem:[%s1762_s7 + $0x360] sm:$0xff]  ;;  %v311_v30 = vld [vmem:[%s1762_s7 + $0x370] sm:$0xff]  ;;  %v351_v35 = vpack.c.bf16 %v247_v28, %v245_v27 }
  0x75   : > { %v383_v36 = vpack.c.bf16 %v311_v30, %v309_v29 }
  0x7b   : > { %609 = vmatmul.mubr.bf16.gmra.mrb[24].mxu0 %v341_v39  ;;  %737 = vmatmul.mubr.bf16.gmra.mrb[24].mxu1 %v373_v40  ;;  %v249_v39 = vld [vmem:[%s1762_s7 + $0x180] sm:$0xff]  ;;  %v251_v40 = vld [vmem:[%s1762_s7 + $0x190] sm:$0xff] }
  0x7c   : > { %616 = vmatprep.mubr.bf16.mxu0 %v344_v41  ;;  %744 = vmatprep.mubr.bf16.mxu1 %v376_v42  ;;  %v313_v41 = vld [vmem:[%s1762_s7 + $0x380] sm:$0xff]  ;;  %v315_v42 = vld [vmem:[%s1762_s7 + $0x390] sm:$0xff]  ;;  %v353_v47 = vpack.c.bf16 %v251_v40, %v249_v39 }
  0x7d   : > { %v385_v48 = vpack.c.bf16 %v315_v42, %v313_v41 }
  0x83   : > { %617 = vmatmul.mubr.bf16.gmra.mrb[28].mxu0 %v343_v51  ;;  %745 = vmatmul.mubr.bf16.gmra.mrb[28].mxu1 %v375_v52  ;;  %v253_v51 = vld [vmem:[%s1762_s7 + $0x1a0] sm:$0xff]  ;;  %v255_v52 = vld [vmem:[%s1762_s7 + $0x1b0] sm:$0xff] }
  0x84   : > { %624 = vmatprep.mubr.bf16.mxu0 %v346_v53  ;;  %752 = vmatprep.mubr.bf16.mxu1 %v378_v54  ;;  %v317_v53 = vld [vmem:[%s1762_s7 + $0x3a0] sm:$0xff]  ;;  %v319_v54 = vld [vmem:[%s1762_s7 + $0x3b0] sm:$0xff]  ;;  %v355_v59 = vpack.c.bf16 %v255_v52, %v253_v51 }
  0x85   : > { %v387_v60 = vpack.c.bf16 %v319_v54, %v317_v53 }
  0x8b   : > { %625 = vmatmul.mubr.bf16.gmra.mrb[32].mxu0 %v345_v63  ;;  %753 = vmatmul.mubr.bf16.gmra.mrb[32].mxu1 %v377_v0  ;;  %v257_v63 = vld [vmem:[%s1762_s7 + $0x1c0] sm:$0xff]  ;;  %v259_v0 = vld [vmem:[%s1762_s7 + $0x1d0] sm:$0xff] }
  0x8c   : > { %632 = vmatprep.mubr.bf16.mxu0 %v348_v1  ;;  %760 = vmatprep.mubr.bf16.mxu1 %v380_v2  ;;  %v321_v1 = vld [vmem:[%s1762_s7 + $0x3c0] sm:$0xff]  ;;  %v323_v2 = vld [vmem:[%s1762_s7 + $0x3d0] sm:$0xff]  ;;  %v357_v7 = vpack.c.bf16 %v259_v0, %v257_v63 }
  0x8d   : > { %v389_v8 = vpack.c.bf16 %v323_v2, %v321_v1 }
  0x93   : > { %633 = vmatmul.mubr.bf16.gmra.mrb[36].mxu0 %v347_v11  ;;  %761 = vmatmul.mubr.bf16.gmra.mrb[36].mxu1 %v379_v12  ;;  %v261_v11 = vld [vmem:[%s1762_s7 + $0x1e0] sm:$0xff]  ;;  %v263_v12 = vld [vmem:[%s1762_s7 + $0x1f0] sm:$0xff] }
  0x94   : > { %640 = vmatprep.mubr.bf16.mxu0 %v350_v13  ;;  %768 = vmatprep.mubr.bf16.mxu1 %v382_v14  ;;  %v325_v13 = vld [vmem:[%s1762_s7 + $0x3e0] sm:$0xff]  ;;  %v327_v14 = vld [vmem:[%s1762_s7 + $0x3f0] sm:$0xff]  ;;  %v359_v15 = vpack.c.bf16 %v263_v12, %v261_v11  ;;  %s954_s7 = ssub.s32 (%p1730_p4), 100, %s1740_s23 }
  0x95   : > { %v391_v16 = vpack.c.bf16 %v327_v14, %v325_v13  ;;  %p955_p8 = scmp.lt.s32.totalorder (%p1730_p4), %s954_s7, 64 }
  0x9b   : > { %641 = vmatmul.mubr.bf16.gmra.mrb[40].mxu0 %v349_v23  ;;  %769 = vmatmul.mubr.bf16.gmra.mrb[40].mxu1 %v381_v24 }
  0x9c   : > { %648 = vmatprep.mubr.bf16.mxu0 %v352_v25  ;;  %776 = vmatprep.mubr.bf16.mxu1 %v384_v26 }
  0xa3   : > { %649 = vmatmul.mubr.bf16.gmra.mrb[44].mxu0 %v351_v35  ;;  %777 = vmatmul.mubr.bf16.gmra.mrb[44].mxu1 %v383_v36 }
  0xa4   : > { %656 = vmatprep.mubr.bf16.mxu0 %v354_v37  ;;  %784 = vmatprep.mubr.bf16.mxu1 %v386_v38 }
  0xab   : > { %657 = vmatmul.mubr.bf16.gmra.mrb[48].mxu0 %v353_v47  ;;  %785 = vmatmul.mubr.bf16.gmra.mrb[48].mxu1 %v385_v48 }
  0xac   : > { %664 = vmatprep.mubr.bf16.mxu0 %v356_v49  ;;  %792 = vmatprep.mubr.bf16.mxu1 %v388_v50 }
  0xb3   : > { %665 = vmatmul.mubr.bf16.gmra.mrb[52].mxu0 %v355_v59  ;;  %793 = vmatmul.mubr.bf16.gmra.mrb[52].mxu1 %v387_v60 }
  0xb4   : > { %672 = vmatprep.mubr.bf16.mxu0 %v358_v61  ;;  %800 = vmatprep.mubr.bf16.mxu1 %v390_v62 }
  0xbb   : > { %673 = vmatmul.mubr.bf16.gmra.mrb[56].mxu0 %v357_v7  ;;  %801 = vmatmul.mubr.bf16.gmra.mrb[56].mxu1 %v389_v8 }
  0xbc   : > { %680 = vmatprep.mubr.bf16.mxu0 %v360_v9  ;;  %808 = vmatprep.mubr.bf16.mxu1 %v392_v10 }
  0xc3   : > { %681 = vmatmul.mubr.bf16.gmra.mrb[60].mxu0 %v359_v15  ;;  %809 = vmatmul.mubr.bf16.gmra.mrb[60].mxu1 %v391_v16 }
 0x11e   : > { %v562_v18 = vpop.f32.mrb[0].mxu0  ;;  %v690_v19 = vpop.f32.mrb[0].mxu1 }
 0x11f   : > { %v563_v20 = vadd.f32 %v1956_v17, %v562_v18  ;;  %v691_v21 = vadd.f32 %v1956_v17, %v690_v19  ;;  %v564_v22 = vpop.f32.mrb[1].mxu0  ;;  %v692_v23 = vpop.f32.mrb[1].mxu1 }
 0x120   : > { %v565_v24 = vpop.f32.mrb[2].mxu0  ;;  %v693_v25 = vpop.f32.mrb[2].mxu1 }
 0x121   : > { %v817_v26 = vmax.f32 %v563_v20, 0.0  ;;  %v849_v27 = vmax.f32 %v691_v21, 0.0  ;;  %v566_v28 = vadd.f32 %v1956_v17, %v565_v24  ;;  %v694_v29 = vadd.f32 %v1956_v17, %v693_v25  ;;  %v567_v30 = vpop.f32.mrb[3].mxu0  ;;  %v695_v31 = vpop.f32.mrb[3].mxu1 }
 0x123   : > { %882 = vst.msk [vmem:[%s1962_s12] sm:$0xff] %vm881_vm0, %v817_v26  ;;  %914 = vst.msk [vmem:[%s1962_s12 + $0x100] sm:$0xff] %vm881_vm0, %v849_v27  ;;  %v818_v32 = vmax.f32 %v566_v28, 0.0  ;;  %v850_v33 = vmax.f32 %v694_v29, 0.0 }
 0x125   : > { %883 = vst.msk [vmem:[%s1962_s12 + $0x8] sm:$0xff] %vm881_vm0, %v818_v32  ;;  %915 = vst.msk [vmem:[%s1962_s12 + $0x108] sm:$0xff] %vm881_vm0, %v850_v33 }
 0x126   : > { %v570_v34 = vpop.f32.mrb[4].mxu0  ;;  %v698_v35 = vpop.f32.mrb[4].mxu1 }
 0x127   : > { %v571_v36 = vadd.f32 %v1956_v17, %v570_v34  ;;  %v699_v37 = vadd.f32 %v1956_v17, %v698_v35  ;;  %v572_v38 = vpop.f32.mrb[5].mxu0  ;;  %v700_v39 = vpop.f32.mrb[5].mxu1 }
 0x128   : > { %v573_v40 = vpop.f32.mrb[6].mxu0  ;;  %v701_v41 = vpop.f32.mrb[6].mxu1 }
 0x129   : > { %v819_v42 = vmax.f32 %v571_v36, 0.0  ;;  %v851_v43 = vmax.f32 %v699_v37, 0.0  ;;  %v574_v44 = vadd.f32 %v1956_v17, %v573_v40  ;;  %v702_v45 = vadd.f32 %v1956_v17, %v701_v41  ;;  %v575_v46 = vpop.f32.mrb[7].mxu0  ;;  %v703_v47 = vpop.f32.mrb[7].mxu1 }
 0x12b   : > { %884 = vst.msk [vmem:[%s1962_s12 + $0x10] sm:$0xff] %vm881_vm0, %v819_v42  ;;  %916 = vst.msk [vmem:[%s1962_s12 + $0x110] sm:$0xff] %vm881_vm0, %v851_v43  ;;  %v820_v48 = vmax.f32 %v574_v44, 0.0  ;;  %v852_v49 = vmax.f32 %v702_v45, 0.0 }
 0x12d   : > { %885 = vst.msk [vmem:[%s1962_s12 + $0x18] sm:$0xff] %vm881_vm0, %v820_v48  ;;  %917 = vst.msk [vmem:[%s1962_s12 + $0x118] sm:$0xff] %vm881_vm0, %v852_v49 }
 0x12e   : > { %v578_v50 = vpop.f32.mrb[8].mxu0  ;;  %v706_v51 = vpop.f32.mrb[8].mxu1 }
 0x12f   : > { %v579_v52 = vadd.f32 %v1956_v17, %v578_v50  ;;  %v707_v53 = vadd.f32 %v1956_v17, %v706_v51  ;;  %v580_v54 = vpop.f32.mrb[9].mxu0  ;;  %v708_v55 = vpop.f32.mrb[9].mxu1 }
 0x130   : > { %v581_v56 = vpop.f32.mrb[10].mxu0  ;;  %v709_v57 = vpop.f32.mrb[10].mxu1 }
 0x131   : > { %v821_v58 = vmax.f32 %v579_v52, 0.0  ;;  %v853_v59 = vmax.f32 %v707_v53, 0.0  ;;  %v582_v60 = vadd.f32 %v1956_v17, %v581_v56  ;;  %v710_v61 = vadd.f32 %v1956_v17, %v709_v57  ;;  %v583_v62 = vpop.f32.mrb[11].mxu0  ;;  %v711_v63 = vpop.f32.mrb[11].mxu1 }
 0x133   : > { %886 = vst.msk [vmem:[%s1962_s12 + $0x20] sm:$0xff] %vm881_vm0, %v821_v58  ;;  %918 = vst.msk [vmem:[%s1962_s12 + $0x120] sm:$0xff] %vm881_vm0, %v853_v59  ;;  %v822_v0 = vmax.f32 %v582_v60, 0.0  ;;  %v854_v1 = vmax.f32 %v710_v61, 0.0 }
 0x135   : > { %887 = vst.msk [vmem:[%s1962_s12 + $0x28] sm:$0xff] %vm881_vm0, %v822_v0  ;;  %919 = vst.msk [vmem:[%s1962_s12 + $0x128] sm:$0xff] %vm881_vm0, %v854_v1 }
 0x136   : > { %v586_v2 = vpop.f32.mrb[12].mxu0  ;;  %v714_v3 = vpop.f32.mrb[12].mxu1 }
 0x137   : > { %v587_v4 = vadd.f32 %v1956_v17, %v586_v2  ;;  %v715_v5 = vadd.f32 %v1956_v17, %v714_v3  ;;  %v588_v6 = vpop.f32.mrb[13].mxu0  ;;  %v716_v7 = vpop.f32.mrb[13].mxu1 }
 0x138   : > { %v589_v8 = vpop.f32.mrb[14].mxu0  ;;  %v717_v9 = vpop.f32.mrb[14].mxu1 }
 0x139   : > { %v823_v10 = vmax.f32 %v587_v4, 0.0  ;;  %v855_v11 = vmax.f32 %v715_v5, 0.0  ;;  %v590_v12 = vadd.f32 %v1956_v17, %v589_v8  ;;  %v718_v13 = vadd.f32 %v1956_v17, %v717_v9  ;;  %v591_v14 = vpop.f32.mrb[15].mxu0  ;;  %v719_v15 = vpop.f32.mrb[15].mxu1 }
 0x13b   : > { %888 = vst.msk [vmem:[%s1962_s12 + $0x30] sm:$0xff] %vm881_vm0, %v823_v10  ;;  %920 = vst.msk [vmem:[%s1962_s12 + $0x130] sm:$0xff] %vm881_vm0, %v855_v11  ;;  %v824_v16 = vmax.f32 %v590_v12, 0.0  ;;  %v856_v18 = vmax.f32 %v718_v13, 0.0 }
 0x13d   : > { %889 = vst.msk [vmem:[%s1962_s12 + $0x38] sm:$0xff] %vm881_vm0, %v824_v16  ;;  %921 = vst.msk [vmem:[%s1962_s12 + $0x138] sm:$0xff] %vm881_vm0, %v856_v18 }
 0x13e   : > { %v594_v19 = vpop.f32.mrb[16].mxu0  ;;  %v722_v20 = vpop.f32.mrb[16].mxu1 }
 0x13f   : > { %v595_v21 = vadd.f32 %v1956_v17, %v594_v19  ;;  %v723_v22 = vadd.f32 %v1956_v17, %v722_v20  ;;  %v596_v23 = vpop.f32.mrb[17].mxu0  ;;  %v724_v24 = vpop.f32.mrb[17].mxu1 }
 0x140   : > { %v597_v25 = vpop.f32.mrb[18].mxu0  ;;  %v725_v26 = vpop.f32.mrb[18].mxu1 }
 0x141   : > { %v825_v27 = vmax.f32 %v595_v21, 0.0  ;;  %v857_v28 = vmax.f32 %v723_v22, 0.0  ;;  %v598_v29 = vadd.f32 %v1956_v17, %v597_v25  ;;  %v726_v30 = vadd.f32 %v1956_v17, %v725_v26  ;;  %v599_v31 = vpop.f32.mrb[19].mxu0  ;;  %v727_v32 = vpop.f32.mrb[19].mxu1 }
 0x143   : > { %890 = vst.msk [vmem:[%s1962_s12 + $0x40] sm:$0xff] %vm881_vm0, %v825_v27  ;;  %922 = vst.msk [vmem:[%s1962_s12 + $0x140] sm:$0xff] %vm881_vm0, %v857_v28  ;;  %v826_v33 = vmax.f32 %v598_v29, 0.0  ;;  %v858_v34 = vmax.f32 %v726_v30, 0.0 }
 0x145   : > { %891 = vst.msk [vmem:[%s1962_s12 + $0x48] sm:$0xff] %vm881_vm0, %v826_v33  ;;  %923 = vst.msk [vmem:[%s1962_s12 + $0x148] sm:$0xff] %vm881_vm0, %v858_v34 }
 0x146   : > { %v602_v35 = vpop.f32.mrb[20].mxu0  ;;  %v730_v36 = vpop.f32.mrb[20].mxu1 }
 0x147   : > { %v603_v37 = vadd.f32 %v1956_v17, %v602_v35  ;;  %v731_v38 = vadd.f32 %v1956_v17, %v730_v36  ;;  %v604_v39 = vpop.f32.mrb[21].mxu0  ;;  %v732_v40 = vpop.f32.mrb[21].mxu1 }
 0x148   : > { %v605_v41 = vpop.f32.mrb[22].mxu0  ;;  %v733_v42 = vpop.f32.mrb[22].mxu1 }
 0x149   : > { %v827_v43 = vmax.f32 %v603_v37, 0.0  ;;  %v859_v44 = vmax.f32 %v731_v38, 0.0  ;;  %v606_v45 = vadd.f32 %v1956_v17, %v605_v41  ;;  %v734_v46 = vadd.f32 %v1956_v17, %v733_v42  ;;  %v607_v47 = vpop.f32.mrb[23].mxu0  ;;  %v735_v48 = vpop.f32.mrb[23].mxu1 }
 0x14b   : > { %892 = vst.msk [vmem:[%s1962_s12 + $0x50] sm:$0xff] %vm881_vm0, %v827_v43  ;;  %924 = vst.msk [vmem:[%s1962_s12 + $0x150] sm:$0xff] %vm881_vm0, %v859_v44  ;;  %v828_v49 = vmax.f32 %v606_v45, 0.0  ;;  %v860_v50 = vmax.f32 %v734_v46, 0.0 }
 0x14d   : > { %893 = vst.msk [vmem:[%s1962_s12 + $0x58] sm:$0xff] %vm881_vm0, %v828_v49  ;;  %925 = vst.msk [vmem:[%s1962_s12 + $0x158] sm:$0xff] %vm881_vm0, %v860_v50 }
 0x14e   : > { %v610_v51 = vpop.f32.mrb[24].mxu0  ;;  %v738_v52 = vpop.f32.mrb[24].mxu1 }
 0x14f   : > { %v611_v53 = vadd.f32 %v1956_v17, %v610_v51  ;;  %v739_v54 = vadd.f32 %v1956_v17, %v738_v52  ;;  %v612_v55 = vpop.f32.mrb[25].mxu0  ;;  %v740_v56 = vpop.f32.mrb[25].mxu1 }
 0x150   : > { %v613_v57 = vpop.f32.mrb[26].mxu0  ;;  %v741_v58 = vpop.f32.mrb[26].mxu1 }
 0x151   : > { %v829_v59 = vmax.f32 %v611_v53, 0.0  ;;  %v861_v60 = vmax.f32 %v739_v54, 0.0  ;;  %v614_v61 = vadd.f32 %v1956_v17, %v613_v57  ;;  %v742_v62 = vadd.f32 %v1956_v17, %v741_v58  ;;  %v615_v63 = vpop.f32.mrb[27].mxu0  ;;  %v743_v0 = vpop.f32.mrb[27].mxu1 }
 0x153   : > { %894 = vst.msk [vmem:[%s1962_s12 + $0x60] sm:$0xff] %vm881_vm0, %v829_v59  ;;  %926 = vst.msk [vmem:[%s1962_s12 + $0x160] sm:$0xff] %vm881_vm0, %v861_v60  ;;  %v830_v1 = vmax.f32 %v614_v61, 0.0  ;;  %v862_v2 = vmax.f32 %v742_v62, 0.0 }
 0x155   : > { %895 = vst.msk [vmem:[%s1962_s12 + $0x68] sm:$0xff] %vm881_vm0, %v830_v1  ;;  %927 = vst.msk [vmem:[%s1962_s12 + $0x168] sm:$0xff] %vm881_vm0, %v862_v2 }
 0x156   : > { %v618_v3 = vpop.f32.mrb[28].mxu0  ;;  %v746_v4 = vpop.f32.mrb[28].mxu1 }
 0x157   : > { %v619_v5 = vadd.f32 %v1956_v17, %v618_v3  ;;  %v747_v6 = vadd.f32 %v1956_v17, %v746_v4  ;;  %v620_v7 = vpop.f32.mrb[29].mxu0  ;;  %v748_v8 = vpop.f32.mrb[29].mxu1 }
 0x158   : > { %v621_v9 = vpop.f32.mrb[30].mxu0  ;;  %v749_v10 = vpop.f32.mrb[30].mxu1 }
 0x159   : > { %v831_v11 = vmax.f32 %v619_v5, 0.0  ;;  %v863_v12 = vmax.f32 %v747_v6, 0.0  ;;  %v622_v13 = vadd.f32 %v1956_v17, %v621_v9  ;;  %v750_v14 = vadd.f32 %v1956_v17, %v749_v10  ;;  %v623_v15 = vpop.f32.mrb[31].mxu0  ;;  %v751_v16 = vpop.f32.mrb[31].mxu1 }
 0x15b   : > { %896 = vst.msk [vmem:[%s1962_s12 + $0x70] sm:$0xff] %vm881_vm0, %v831_v11  ;;  %928 = vst.msk [vmem:[%s1962_s12 + $0x170] sm:$0xff] %vm881_vm0, %v863_v12  ;;  %v832_v18 = vmax.f32 %v622_v13, 0.0  ;;  %v864_v19 = vmax.f32 %v750_v14, 0.0 }
 0x15d   : > { %897 = vst.msk [vmem:[%s1962_s12 + $0x78] sm:$0xff] %vm881_vm0, %v832_v18  ;;  %929 = vst.msk [vmem:[%s1962_s12 + $0x178] sm:$0xff] %vm881_vm0, %v864_v19 }
 0x15e   : > { %v626_v20 = vpop.f32.mrb[32].mxu0  ;;  %v754_v21 = vpop.f32.mrb[32].mxu1 }
 0x15f   : > { %v627_v22 = vadd.f32 %v1956_v17, %v626_v20  ;;  %v755_v23 = vadd.f32 %v1956_v17, %v754_v21  ;;  %v628_v24 = vpop.f32.mrb[33].mxu0  ;;  %v756_v25 = vpop.f32.mrb[33].mxu1 }
 0x160   : > { %v629_v26 = vpop.f32.mrb[34].mxu0  ;;  %v757_v27 = vpop.f32.mrb[34].mxu1 }
 0x161   : > { %v833_v28 = vmax.f32 %v627_v22, 0.0  ;;  %v865_v29 = vmax.f32 %v755_v23, 0.0  ;;  %v630_v30 = vadd.f32 %v1956_v17, %v629_v26  ;;  %v758_v31 = vadd.f32 %v1956_v17, %v757_v27  ;;  %v631_v32 = vpop.f32.mrb[35].mxu0  ;;  %v759_v33 = vpop.f32.mrb[35].mxu1 }
 0x163   : > { %898 = vst.msk [vmem:[%s1962_s12 + $0x80] sm:$0xff] %vm881_vm0, %v833_v28  ;;  %930 = vst.msk [vmem:[%s1962_s12 + $0x180] sm:$0xff] %vm881_vm0, %v865_v29  ;;  %v834_v34 = vmax.f32 %v630_v30, 0.0  ;;  %v866_v35 = vmax.f32 %v758_v31, 0.0 }
 0x165   : > { %899 = vst.msk [vmem:[%s1962_s12 + $0x88] sm:$0xff] %vm881_vm0, %v834_v34  ;;  %931 = vst.msk [vmem:[%s1962_s12 + $0x188] sm:$0xff] %vm881_vm0, %v866_v35 }
 0x166   : > { %v634_v36 = vpop.f32.mrb[36].mxu0  ;;  %v762_v37 = vpop.f32.mrb[36].mxu1 }
 0x167   : > { %v635_v38 = vadd.f32 %v1956_v17, %v634_v36  ;;  %v763_v39 = vadd.f32 %v1956_v17, %v762_v37  ;;  %v636_v40 = vpop.f32.mrb[37].mxu0  ;;  %v764_v41 = vpop.f32.mrb[37].mxu1 }
 0x168   : > { %v637_v42 = vpop.f32.mrb[38].mxu0  ;;  %v765_v43 = vpop.f32.mrb[38].mxu1 }
 0x169   : > { %v835_v44 = vmax.f32 %v635_v38, 0.0  ;;  %v867_v45 = vmax.f32 %v763_v39, 0.0  ;;  %v638_v46 = vadd.f32 %v1956_v17, %v637_v42  ;;  %v766_v47 = vadd.f32 %v1956_v17, %v765_v43  ;;  %v639_v48 = vpop.f32.mrb[39].mxu0  ;;  %v767_v49 = vpop.f32.mrb[39].mxu1 }
 0x16b   : > { %900 = vst.msk [vmem:[%s1962_s12 + $0x90] sm:$0xff] %vm881_vm0, %v835_v44  ;;  %932 = vst.msk [vmem:[%s1962_s12 + $0x190] sm:$0xff] %vm881_vm0, %v867_v45  ;;  %v836_v50 = vmax.f32 %v638_v46, 0.0  ;;  %v868_v51 = vmax.f32 %v766_v47, 0.0 }
 0x16d   : > { %901 = vst.msk [vmem:[%s1962_s12 + $0x98] sm:$0xff] %vm881_vm0, %v836_v50  ;;  %933 = vst.msk [vmem:[%s1962_s12 + $0x198] sm:$0xff] %vm881_vm0, %v868_v51 }
 0x16e   : > { %v642_v52 = vpop.f32.mrb[40].mxu0  ;;  %v770_v53 = vpop.f32.mrb[40].mxu1 }
 0x16f   : > { %v643_v54 = vadd.f32 %v1956_v17, %v642_v52  ;;  %v771_v55 = vadd.f32 %v1956_v17, %v770_v53  ;;  %v644_v56 = vpop.f32.mrb[41].mxu0  ;;  %v772_v57 = vpop.f32.mrb[41].mxu1 }
 0x170   : > { %v645_v58 = vpop.f32.mrb[42].mxu0  ;;  %v773_v59 = vpop.f32.mrb[42].mxu1 }
 0x171   : > { %v837_v60 = vmax.f32 %v643_v54, 0.0  ;;  %v869_v61 = vmax.f32 %v771_v55, 0.0  ;;  %v646_v62 = vadd.f32 %v1956_v17, %v645_v58  ;;  %v774_v63 = vadd.f32 %v1956_v17, %v773_v59  ;;  %v647_v0 = vpop.f32.mrb[43].mxu0  ;;  %v775_v1 = vpop.f32.mrb[43].mxu1 }
 0x173   : > { %902 = vst.msk [vmem:[%s1962_s12 + $0xa0] sm:$0xff] %vm881_vm0, %v837_v60  ;;  %934 = vst.msk [vmem:[%s1962_s12 + $0x1a0] sm:$0xff] %vm881_vm0, %v869_v61  ;;  %v838_v2 = vmax.f32 %v646_v62, 0.0  ;;  %v870_v3 = vmax.f32 %v774_v63, 0.0 }
 0x175   : > { %903 = vst.msk [vmem:[%s1962_s12 + $0xa8] sm:$0xff] %vm881_vm0, %v838_v2  ;;  %935 = vst.msk [vmem:[%s1962_s12 + $0x1a8] sm:$0xff] %vm881_vm0, %v870_v3 }
 0x176   : > { %v650_v4 = vpop.f32.mrb[44].mxu0  ;;  %v778_v5 = vpop.f32.mrb[44].mxu1 }
 0x177   : > { %v651_v6 = vadd.f32 %v1956_v17, %v650_v4  ;;  %v779_v7 = vadd.f32 %v1956_v17, %v778_v5  ;;  %v652_v8 = vpop.f32.mrb[45].mxu0  ;;  %v780_v9 = vpop.f32.mrb[45].mxu1 }
 0x178   : > { %v653_v10 = vpop.f32.mrb[46].mxu0  ;;  %v781_v11 = vpop.f32.mrb[46].mxu1 }
 0x179   : > { %v839_v12 = vmax.f32 %v651_v6, 0.0  ;;  %v871_v13 = vmax.f32 %v779_v7, 0.0  ;;  %v654_v14 = vadd.f32 %v1956_v17, %v653_v10  ;;  %v782_v15 = vadd.f32 %v1956_v17, %v781_v11  ;;  %v655_v16 = vpop.f32.mrb[47].mxu0  ;;  %v783_v18 = vpop.f32.mrb[47].mxu1 }
 0x17b   : > { %904 = vst.msk [vmem:[%s1962_s12 + $0xb0] sm:$0xff] %vm881_vm0, %v839_v12  ;;  %936 = vst.msk [vmem:[%s1962_s12 + $0x1b0] sm:$0xff] %vm881_vm0, %v871_v13  ;;  %v840_v19 = vmax.f32 %v654_v14, 0.0  ;;  %v872_v20 = vmax.f32 %v782_v15, 0.0 }
 0x17d   : > { %905 = vst.msk [vmem:[%s1962_s12 + $0xb8] sm:$0xff] %vm881_vm0, %v840_v19  ;;  %937 = vst.msk [vmem:[%s1962_s12 + $0x1b8] sm:$0xff] %vm881_vm0, %v872_v20 }
 0x17e   : > { %v658_v21 = vpop.f32.mrb[48].mxu0  ;;  %v786_v22 = vpop.f32.mrb[48].mxu1 }
 0x17f   : > { %v659_v23 = vadd.f32 %v1956_v17, %v658_v21  ;;  %v787_v24 = vadd.f32 %v1956_v17, %v786_v22  ;;  %v660_v25 = vpop.f32.mrb[49].mxu0  ;;  %v788_v26 = vpop.f32.mrb[49].mxu1 }
 0x180   : > { %v661_v27 = vpop.f32.mrb[50].mxu0  ;;  %v789_v28 = vpop.f32.mrb[50].mxu1 }
 0x181   : > { %v841_v29 = vmax.f32 %v659_v23, 0.0  ;;  %v873_v30 = vmax.f32 %v787_v24, 0.0  ;;  %v662_v31 = vadd.f32 %v1956_v17, %v661_v27  ;;  %v790_v32 = vadd.f32 %v1956_v17, %v789_v28  ;;  %v663_v33 = vpop.f32.mrb[51].mxu0  ;;  %v791_v34 = vpop.f32.mrb[51].mxu1 }
 0x183   : > { %906 = vst.msk [vmem:[%s1962_s12 + $0xc0] sm:$0xff] %vm881_vm0, %v841_v29  ;;  %938 = vst.msk [vmem:[%s1962_s12 + $0x1c0] sm:$0xff] %vm881_vm0, %v873_v30  ;;  %v842_v35 = vmax.f32 %v662_v31, 0.0  ;;  %v874_v36 = vmax.f32 %v790_v32, 0.0 }
 0x185   : > { %907 = vst.msk [vmem:[%s1962_s12 + $0xc8] sm:$0xff] %vm881_vm0, %v842_v35  ;;  %939 = vst.msk [vmem:[%s1962_s12 + $0x1c8] sm:$0xff] %vm881_vm0, %v874_v36 }
 0x186   : > { %v666_v37 = vpop.f32.mrb[52].mxu0  ;;  %v794_v38 = vpop.f32.mrb[52].mxu1 }
 0x187   : > { %v667_v39 = vadd.f32 %v1956_v17, %v666_v37  ;;  %v795_v40 = vadd.f32 %v1956_v17, %v794_v38  ;;  %v668_v41 = vpop.f32.mrb[53].mxu0  ;;  %v796_v42 = vpop.f32.mrb[53].mxu1 }
 0x188   : > { %v669_v43 = vpop.f32.mrb[54].mxu0  ;;  %v797_v44 = vpop.f32.mrb[54].mxu1 }
 0x189   : > { %v843_v45 = vmax.f32 %v667_v39, 0.0  ;;  %v875_v46 = vmax.f32 %v795_v40, 0.0  ;;  %v670_v47 = vadd.f32 %v1956_v17, %v669_v43  ;;  %v798_v48 = vadd.f32 %v1956_v17, %v797_v44  ;;  %v671_v49 = vpop.f32.mrb[55].mxu0  ;;  %v799_v50 = vpop.f32.mrb[55].mxu1 }
 0x18b   : > { %908 = vst.msk [vmem:[%s1962_s12 + $0xd0] sm:$0xff] %vm881_vm0, %v843_v45  ;;  %940 = vst.msk [vmem:[%s1962_s12 + $0x1d0] sm:$0xff] %vm881_vm0, %v875_v46  ;;  %v844_v51 = vmax.f32 %v670_v47, 0.0  ;;  %v876_v52 = vmax.f32 %v798_v48, 0.0 }
 0x18d   : > { %909 = vst.msk [vmem:[%s1962_s12 + $0xd8] sm:$0xff] %vm881_vm0, %v844_v51  ;;  %941 = vst.msk [vmem:[%s1962_s12 + $0x1d8] sm:$0xff] %vm881_vm0, %v876_v52 }
 0x18e   : > { %v674_v53 = vpop.f32.mrb[56].mxu0  ;;  %v802_v54 = vpop.f32.mrb[56].mxu1 }
 0x18f   : > { %v675_v55 = vadd.f32 %v1956_v17, %v674_v53  ;;  %v803_v56 = vadd.f32 %v1956_v17, %v802_v54  ;;  %v676_v57 = vpop.f32.mrb[57].mxu0  ;;  %v804_v58 = vpop.f32.mrb[57].mxu1 }
 0x190   : > { %v677_v59 = vpop.f32.mrb[58].mxu0  ;;  %v805_v60 = vpop.f32.mrb[58].mxu1 }
 0x191   : > { %v845_v61 = vmax.f32 %v675_v55, 0.0  ;;  %v877_v62 = vmax.f32 %v803_v56, 0.0  ;;  %v678_v63 = vadd.f32 %v1956_v17, %v677_v59  ;;  %v806_v0 = vadd.f32 %v1956_v17, %v805_v60  ;;  %v679_v1 = vpop.f32.mrb[59].mxu0  ;;  %v807_v2 = vpop.f32.mrb[59].mxu1 }
 0x193   : > { %910 = vst.msk [vmem:[%s1962_s12 + $0xe0] sm:$0xff] %vm881_vm0, %v845_v61  ;;  %942 = vst.msk [vmem:[%s1962_s12 + $0x1e0] sm:$0xff] %vm881_vm0, %v877_v62  ;;  %v846_v3 = vmax.f32 %v678_v63, 0.0  ;;  %v878_v4 = vmax.f32 %v806_v0, 0.0 }
 0x195   : > { %911 = vst.msk [vmem:[%s1962_s12 + $0xe8] sm:$0xff] %vm881_vm0, %v846_v3  ;;  %943 = vst.msk [vmem:[%s1962_s12 + $0x1e8] sm:$0xff] %vm881_vm0, %v878_v4 }
 0x196   : > { %v682_v5 = vpop.f32.mrb[60].mxu0  ;;  %v810_v6 = vpop.f32.mrb[60].mxu1 }
 0x197   : > { %v683_v7 = vadd.f32 %v1956_v17, %v682_v5  ;;  %v811_v8 = vadd.f32 %v1956_v17, %v810_v6  ;;  %v684_v9 = vpop.f32.mrb[61].mxu0  ;;  %v812_v10 = vpop.f32.mrb[61].mxu1  ;;  %952 = sbr.rel (!%p1730_p4) target bundleno = 486 (0x1e6), region = 36 }
 0x198   : > { %v685_v11 = vpop.f32.mrb[62].mxu0  ;;  %v813_v12 = vpop.f32.mrb[62].mxu1 }
 0x199   : > { %v847_v13 = vmax.f32 %v683_v7, 0.0  ;;  %v879_v14 = vmax.f32 %v811_v8, 0.0  ;;  %v686_v15 = vadd.f32 %v1956_v17, %v685_v11  ;;  %v814_v16 = vadd.f32 %v1956_v17, %v813_v12  ;;  %v687_v18 = vpop.f32.mrb[63].mxu0  ;;  %v815_v19 = vpop.f32.mrb[63].mxu1 }
 0x19b   : > { %912 = vst.msk [vmem:[%s1962_s12 + $0xf0] sm:$0xff] %vm881_vm0, %v847_v13  ;;  %944 = vst.msk [vmem:[%s1962_s12 + $0x1f0] sm:$0xff] %vm881_vm0, %v879_v14  ;;  %v848_v20 = vmax.f32 %v686_v15, 0.0  ;;  %v880_v21 = vmax.f32 %v814_v16, 0.0 }
 0x19d   : > { %913 = vst.msk [vmem:[%s1962_s12 + $0xf8] sm:$0xff] %vm881_vm0, %v848_v20  ;;  %945 = vst.msk [vmem:[%s1962_s12 + $0x1f8] sm:$0xff] %vm881_vm0, %v880_v21 }
 0x19e   : > { %s2372_s7 = smov (!%p955_p8, %s954_s7), 64 }
 0x19f   : > { %s1440_s28 = sshll.u32 %s2372_s7, 7 }
 0x1a0   : > { %p1443_p9 = scmp.eq.s32.totalorder %s1440_s28, 0 }
 0x1a1   : > { %s2165_s29 = sshrl.u32 (!%p1443_p9), %s2372_s7, 6 }
 0x1a2   : > { %963 = sbr.rel (%p1443_p9) target bundleno = 486 (0x1e6), region = 40  ;;  %p1444_p10 = scmp.le.s32.totalorder (!%p1443_p9), %s2165_s29, 0 }
 0x1a9   : > { %1369 = sbr.rel (%p1444_p10) target bundleno = 465 (0x1d1), region = 116  ;;  %s2363_s15 = smov (!%p1444_p10), %s2159_s27 }
 0x1aa   : > { %s2364_s20 = smov (!%p1444_p10), %s1962_s12  ;;  %s2174_s23 = smov (!%p1444_p10), 0  }
 0x1ab   : > { %s2176_s30 = smov (!%p1444_p10), 0  }
 0x1b0 LB: >> { %v1151_v17 = vld [vmem:[%s1658_s20] sm:$0xff]  ;;  %v1153_v22 = vld [vmem:[%s1658_s20 + $0x8] sm:$0xff]  ;;  %v1155_v23 = vld [vmem:[%s1658_s20 + $0x10] sm:$0xff]  ;;  %s1279_s4 = sadd.s32 1, %s1662_s23  ;;  %s1145_s30 = sadd.s32 1, %s1666_s30   ;;  %s1666_s30 = sphi %s2176_s30, %s1145_s30   ;;  %s1662_s23 = sphi %s2174_s23, %s2367_s23   ;;  %s1658_s20 = sphi %s2364_s20, %s2366_s20   ;;  %s1654_s15 = sphi %s2363_s15, %s2365_s15  }
 0x1b1   : >> { %1152 = vst [vmem:[%s1654_s15] sm:$0xff] %v1151_v17  ;;  %1154 = vst [vmem:[%s1654_s15 + $0x8] sm:$0xff] %v1153_v22  ;;  %v1157_v24 = vld [vmem:[%s1658_s20 + $0x18] sm:$0xff]  ;;  %v1159_v25 = vld [vmem:[%s1658_s20 + $0x20] sm:$0xff]  ;;  %p1280_p11 = scmp.ge.s32.totalorder %s1279_s4, %s2165_s29  ;;  %p1144_p12 = scmp.ge.s32.totalorder %s1145_s30, %s2165_s29 }
 0x1b2   : >> { %1156 = vst [vmem:[%s1654_s15 + $0x10] sm:$0xff] %v1155_v23  ;;  %v1161_v26 = vld [vmem:[%s1658_s20 + $0x28] sm:$0xff]  ;;  %1158 = vst [vmem:[%s1654_s15 + $0x18] sm:$0xff] %v1157_v24  ;;  %v1163_v27 = vld [vmem:[%s1658_s20 + $0x30] sm:$0xff] }
 0x1b3   : >> { %1160 = vst [vmem:[%s1654_s15 + $0x20] sm:$0xff] %v1159_v25  ;;  %1162 = vst [vmem:[%s1654_s15 + $0x28] sm:$0xff] %v1161_v26  ;;  %v1165_v28 = vld [vmem:[%s1658_s20 + $0x38] sm:$0xff]  ;;  %v1167_v29 = vld [vmem:[%s1658_s20 + $0x40] sm:$0xff]  ;;  %s2374_s4 = smov (%p1280_p11, %s1279_s4), 0 }
 0x1b4   : >> { %1164 = vst [vmem:[%s1654_s15 + $0x30] sm:$0xff] %v1163_v27  ;;  %1166 = vst [vmem:[%s1654_s15 + $0x38] sm:$0xff] %v1165_v28  ;;  %v1169_v30 = vld [vmem:[%s1658_s20 + $0x48] sm:$0xff]  ;;  %v1171_v31 = vld [vmem:[%s1658_s20 + $0x50] sm:$0xff]  ;;  %s1445_s5 = sshll.u32 %s2374_s4, 9  ;;  %s2367_s23 = smov %s2374_s4 }
 0x1b5   : >> { %1168 = vst [vmem:[%s1654_s15 + $0x40] sm:$0xff] %v1167_v29  ;;  %v1173_v32 = vld [vmem:[%s1658_s20 + $0x58] sm:$0xff]  ;;  %1170 = vst [vmem:[%s1654_s15 + $0x48] sm:$0xff] %v1169_v30  ;;  %v1175_v33 = vld [vmem:[%s1658_s20 + $0x60] sm:$0xff]  ;;  %s2232_s6 = scalar_lea.vmem %s1962_s12, %s1445_s5 [#allocation2]   ;;  %s2235_s8 = scalar_lea.vmem %s2159_s27, %s1445_s5  }
 0x1b6   : >> { %1172 = vst [vmem:[%s1654_s15 + $0x50] sm:$0xff] %v1171_v31  ;;  %1174 = vst [vmem:[%s1654_s15 + $0x58] sm:$0xff] %v1173_v32  ;;  %v1177_v34 = vld [vmem:[%s1658_s20 + $0x68] sm:$0xff]  ;;  %v1179_v35 = vld [vmem:[%s1658_s20 + $0x70] sm:$0xff] }
 0x1b7   : >> { %1176 = vst [vmem:[%s1654_s15 + $0x60] sm:$0xff] %v1175_v33  ;;  %1178 = vst [vmem:[%s1654_s15 + $0x68] sm:$0xff] %v1177_v34  ;;  %v1181_v36 = vld [vmem:[%s1658_s20 + $0x78] sm:$0xff]  ;;  %v1183_v37 = vld [vmem:[%s1658_s20 + $0x80] sm:$0xff] }
 0x1b8   : >> { %1180 = vst [vmem:[%s1654_s15 + $0x70] sm:$0xff] %v1179_v35  ;;  %v1185_v38 = vld [vmem:[%s1658_s20 + $0x88] sm:$0xff]  ;;  %1182 = vst [vmem:[%s1654_s15 + $0x78] sm:$0xff] %v1181_v36  ;;  %v1187_v39 = vld [vmem:[%s1658_s20 + $0x90] sm:$0xff] }
 0x1b9   : >> { %1184 = vst [vmem:[%s1654_s15 + $0x80] sm:$0xff] %v1183_v37  ;;  %1186 = vst [vmem:[%s1654_s15 + $0x88] sm:$0xff] %v1185_v38  ;;  %v1189_v40 = vld [vmem:[%s1658_s20 + $0x98] sm:$0xff]  ;;  %v1191_v41 = vld [vmem:[%s1658_s20 + $0xa0] sm:$0xff] }
 0x1ba   : >> { %1188 = vst [vmem:[%s1654_s15 + $0x90] sm:$0xff] %v1187_v39  ;;  %1190 = vst [vmem:[%s1654_s15 + $0x98] sm:$0xff] %v1189_v40  ;;  %v1193_v42 = vld [vmem:[%s1658_s20 + $0xa8] sm:$0xff]  ;;  %v1195_v43 = vld [vmem:[%s1658_s20 + $0xb0] sm:$0xff] }
 0x1bb   : >> { %1192 = vst [vmem:[%s1654_s15 + $0xa0] sm:$0xff] %v1191_v41  ;;  %v1197_v44 = vld [vmem:[%s1658_s20 + $0xb8] sm:$0xff]  ;;  %1194 = vst [vmem:[%s1654_s15 + $0xa8] sm:$0xff] %v1193_v42  ;;  %v1199_v45 = vld [vmem:[%s1658_s20 + $0xc0] sm:$0xff] }
 0x1bc   : >> { %1196 = vst [vmem:[%s1654_s15 + $0xb0] sm:$0xff] %v1195_v43  ;;  %1198 = vst [vmem:[%s1654_s15 + $0xb8] sm:$0xff] %v1197_v44  ;;  %v1201_v46 = vld [vmem:[%s1658_s20 + $0xc8] sm:$0xff]  ;;  %v1203_v47 = vld [vmem:[%s1658_s20 + $0xd0] sm:$0xff] }
 0x1bd   : >> { %1200 = vst [vmem:[%s1654_s15 + $0xc0] sm:$0xff] %v1199_v45  ;;  %1202 = vst [vmem:[%s1654_s15 + $0xc8] sm:$0xff] %v1201_v46  ;;  %v1205_v48 = vld [vmem:[%s1658_s20 + $0xd8] sm:$0xff]  ;;  %v1207_v49 = vld [vmem:[%s1658_s20 + $0xe0] sm:$0xff] }
 0x1be   : >> { %1204 = vst [vmem:[%s1654_s15 + $0xd0] sm:$0xff] %v1203_v47  ;;  %v1209_v50 = vld [vmem:[%s1658_s20 + $0xe8] sm:$0xff]  ;;  %1206 = vst [vmem:[%s1654_s15 + $0xd8] sm:$0xff] %v1205_v48  ;;  %v1211_v51 = vld [vmem:[%s1658_s20 + $0xf0] sm:$0xff] }
 0x1bf   : >> { %1208 = vst [vmem:[%s1654_s15 + $0xe0] sm:$0xff] %v1207_v49  ;;  %1210 = vst [vmem:[%s1654_s15 + $0xe8] sm:$0xff] %v1209_v50  ;;  %v1213_v52 = vld [vmem:[%s1658_s20 + $0xf8] sm:$0xff]  ;;  %v1215_v53 = vld [vmem:[%s1658_s20 + $0x100] sm:$0xff] }
 0x1c0   : >> { %1212 = vst [vmem:[%s1654_s15 + $0xf0] sm:$0xff] %v1211_v51  ;;  %1214 = vst [vmem:[%s1654_s15 + $0xf8] sm:$0xff] %v1213_v52  ;;  %v1217_v54 = vld [vmem:[%s1658_s20 + $0x108] sm:$0xff]  ;;  %v1219_v55 = vld [vmem:[%s1658_s20 + $0x110] sm:$0xff] }
 0x1c1   : >> { %1216 = vst [vmem:[%s1654_s15 + $0x100] sm:$0xff] %v1215_v53  ;;  %v1221_v56 = vld [vmem:[%s1658_s20 + $0x118] sm:$0xff]  ;;  %1218 = vst [vmem:[%s1654_s15 + $0x108] sm:$0xff] %v1217_v54  ;;  %v1223_v57 = vld [vmem:[%s1658_s20 + $0x120] sm:$0xff] }
 0x1c2   : >> { %1220 = vst [vmem:[%s1654_s15 + $0x110] sm:$0xff] %v1219_v55  ;;  %1222 = vst [vmem:[%s1654_s15 + $0x118] sm:$0xff] %v1221_v56  ;;  %v1225_v58 = vld [vmem:[%s1658_s20 + $0x128] sm:$0xff]  ;;  %v1227_v59 = vld [vmem:[%s1658_s20 + $0x130] sm:$0xff] }
 0x1c3   : >> { %1224 = vst [vmem:[%s1654_s15 + $0x120] sm:$0xff] %v1223_v57  ;;  %1226 = vst [vmem:[%s1654_s15 + $0x128] sm:$0xff] %v1225_v58  ;;  %v1229_v60 = vld [vmem:[%s1658_s20 + $0x138] sm:$0xff]  ;;  %v1231_v61 = vld [vmem:[%s1658_s20 + $0x140] sm:$0xff] }
 0x1c4   : >> { %1228 = vst [vmem:[%s1654_s15 + $0x130] sm:$0xff] %v1227_v59  ;;  %v1233_v62 = vld [vmem:[%s1658_s20 + $0x148] sm:$0xff]  ;;  %1230 = vst [vmem:[%s1654_s15 + $0x138] sm:$0xff] %v1229_v60  ;;  %v1235_v63 = vld [vmem:[%s1658_s20 + $0x150] sm:$0xff] }
 0x1c5   : >> { %1232 = vst [vmem:[%s1654_s15 + $0x140] sm:$0xff] %v1231_v61  ;;  %1234 = vst [vmem:[%s1654_s15 + $0x148] sm:$0xff] %v1233_v62  ;;  %v1237_v0 = vld [vmem:[%s1658_s20 + $0x158] sm:$0xff]  ;;  %v1239_v1 = vld [vmem:[%s1658_s20 + $0x160] sm:$0xff] }
 0x1c6   : >> { %1236 = vst [vmem:[%s1654_s15 + $0x150] sm:$0xff] %v1235_v63  ;;  %1238 = vst [vmem:[%s1654_s15 + $0x158] sm:$0xff] %v1237_v0  ;;  %v1241_v2 = vld [vmem:[%s1658_s20 + $0x168] sm:$0xff]  ;;  %v1243_v3 = vld [vmem:[%s1658_s20 + $0x170] sm:$0xff] }
 0x1c7   : >> { %1240 = vst [vmem:[%s1654_s15 + $0x160] sm:$0xff] %v1239_v1  ;;  %v1245_v4 = vld [vmem:[%s1658_s20 + $0x178] sm:$0xff]  ;;  %1242 = vst [vmem:[%s1654_s15 + $0x168] sm:$0xff] %v1241_v2  ;;  %v1247_v5 = vld [vmem:[%s1658_s20 + $0x180] sm:$0xff] }
 0x1c8   : >> { %1244 = vst [vmem:[%s1654_s15 + $0x170] sm:$0xff] %v1243_v3  ;;  %1246 = vst [vmem:[%s1654_s15 + $0x178] sm:$0xff] %v1245_v4  ;;  %v1249_v6 = vld [vmem:[%s1658_s20 + $0x188] sm:$0xff]  ;;  %v1251_v7 = vld [vmem:[%s1658_s20 + $0x190] sm:$0xff] }
 0x1c9   : >> { %1248 = vst [vmem:[%s1654_s15 + $0x180] sm:$0xff] %v1247_v5  ;;  %1250 = vst [vmem:[%s1654_s15 + $0x188] sm:$0xff] %v1249_v6  ;;  %v1253_v8 = vld [vmem:[%s1658_s20 + $0x198] sm:$0xff]  ;;  %v1255_v9 = vld [vmem:[%s1658_s20 + $0x1a0] sm:$0xff] }
 0x1ca   : >> { %1252 = vst [vmem:[%s1654_s15 + $0x190] sm:$0xff] %v1251_v7  ;;  %v1257_v10 = vld [vmem:[%s1658_s20 + $0x1a8] sm:$0xff]  ;;  %1254 = vst [vmem:[%s1654_s15 + $0x198] sm:$0xff] %v1253_v8  ;;  %v1259_v11 = vld [vmem:[%s1658_s20 + $0x1b0] sm:$0xff]  ;;  %1147 = sbr.rel (!%p1144_p12) target bundleno = 432 (0x1b0), region = 122 }
 0x1cb   : >> { %1256 = vst [vmem:[%s1654_s15 + $0x1a0] sm:$0xff] %v1255_v9  ;;  %1258 = vst [vmem:[%s1654_s15 + $0x1a8] sm:$0xff] %v1257_v10  ;;  %v1261_v12 = vld [vmem:[%s1658_s20 + $0x1b8] sm:$0xff]  ;;  %v1263_v13 = vld [vmem:[%s1658_s20 + $0x1c0] sm:$0xff] }
 0x1cc   : >> { %1260 = vst [vmem:[%s1654_s15 + $0x1b0] sm:$0xff] %v1259_v11  ;;  %1262 = vst [vmem:[%s1654_s15 + $0x1b8] sm:$0xff] %v1261_v12  ;;  %v1265_v14 = vld [vmem:[%s1658_s20 + $0x1c8] sm:$0xff]  ;;  %v1267_v15 = vld [vmem:[%s1658_s20 + $0x1d0] sm:$0xff] }
 0x1cd   : >> { %1264 = vst [vmem:[%s1654_s15 + $0x1c0] sm:$0xff] %v1263_v13  ;;  %v1269_v16 = vld [vmem:[%s1658_s20 + $0x1d8] sm:$0xff]  ;;  %1266 = vst [vmem:[%s1654_s15 + $0x1c8] sm:$0xff] %v1265_v14  ;;  %v1271_v18 = vld [vmem:[%s1658_s20 + $0x1e0] sm:$0xff] }
 0x1ce   : >> { %1268 = vst [vmem:[%s1654_s15 + $0x1d0] sm:$0xff] %v1267_v15  ;;  %1270 = vst [vmem:[%s1654_s15 + $0x1d8] sm:$0xff] %v1269_v16  ;;  %v1273_v19 = vld [vmem:[%s1658_s20 + $0x1e8] sm:$0xff]  ;;  %v1275_v20 = vld [vmem:[%s1658_s20 + $0x1f0] sm:$0xff] }
 0x1cf   : >> { %1272 = vst [vmem:[%s1654_s15 + $0x1e0] sm:$0xff] %v1271_v18  ;;  %1274 = vst [vmem:[%s1654_s15 + $0x1e8] sm:$0xff] %v1273_v19  ;;  %v1277_v21 = vld [vmem:[%s1658_s20 + $0x1f8] sm:$0xff]  ;;  %s2366_s20 = smov %s2232_s6 }
 0x1d0   : >> { %1276 = vst [vmem:[%s1654_s15 + $0x1f0] sm:$0xff] %v1275_v20  ;;  %1278 = vst [vmem:[%s1654_s15 + $0x1f8] sm:$0xff] %v1277_v21  ;;  %s2365_s15 = smov %s2235_s8 }
 0x1d1 PF: > { %s2340_s9 = sand.u32 63, %s2372_s7   ;;  %s1457_s10 = sshll.u32 %s2165_s29, 9 }
 0x1d2   : > { %s1290_s11 = scalar_lea.vmem %s1962_s12, %s1457_s10 [#allocation2]   ;;  %s1292_s14 = scalar_lea.vmem %s2159_s27, %s1457_s10  }
 0x1d3   : > { %p1450_p13 = scmp.le.s32.totalorder %s2340_s9, 0 }
 0x1d4   : > { %s1668_s17 = smov (!%p1450_p13), %s1292_s14   ;;  %s1672_s18 = smov (!%p1450_p13), %s1290_s11  }
 0x1d5   : > { %1383 = sbr.rel (%p1450_p13) target bundleno = 486 (0x1e6), region = 127  ;;  %s1676_s21 = smov (!%p1450_p13), 0  }
 0x1d6   : > { %s1680_s22 = smov (!%p1450_p13), 0  }
 0x1dc LB: >> { %v1302_v17 = vld [vmem:[%s1674_s18] sm:$0xff]  ;;  %s1304_s7 = sadd.s32 1, %s1678_s21  ;;  %s1296_s22 = sadd.s32 1, %s1682_s22   ;;  %s1682_s22 = sphi %s1680_s22, %s1296_s22   ;;  %s1678_s21 = sphi %s1676_s21, %s1677_s21   ;;  %s1674_s18 = sphi %s1672_s18, %s1309_s18   ;;  %s1670_s17 = sphi %s1668_s17, %s1310_s17  }
 0x1dd   : >> { %1303 = vst [vmem:[%s1670_s17] sm:$0xff] %v1302_v17  ;;  %p1305_p0 = scmp.ge.s32.totalorder %s1304_s7, %s2340_s9  ;;  %p1295_p1 = scmp.ge.s32.totalorder %s1296_s22, %s2340_s9 }
 0x1df   : >> { %s2376_s7 = smov (%p1305_p0, %s1304_s7), 0  ;;  %1298 = sbr.rel (!%p1295_p1) target bundleno = 476 (0x1dc), region = 133 }
 0x1e0   : >> { %s1451_s12 = sshll.u32 %s2376_s7, 3  ;;  %s1677_s21 = smov %s2376_s7  }
 0x1e1   : >> { %s1309_s18 = scalar_lea.vmem %s1290_s11, %s1451_s12 [#allocation2]   ;;  %s1310_s17 = scalar_lea.vmem %s1292_s14, %s1451_s12  }
 0x1e6 PF: > { %p10_p2 = scmp.ge.s32.totalorder %s1720_s16, 4   ;;  %s2368_s12 = smov %s1646_s13 }
 0x1e7   : > { %s2369_s13 = smov %s1728_s19  ;;  %s2370_s14 = smov %s1720_s16 }
 0x1e8   :  { %12 = sbr.rel (!%p10_p2) target bundleno = 2 (0x2), region = 144 }

// kernel: cnn_actor_critic_forward.5
= control target key start
LH: loop header
LB: loop body
LE: loop exit
PB: predicated region body
PF: predicated region fallthrough
CT: control target
= control target key end

     0   :  { %vm667_vm0 = vcmask 523264   ;;  %vm688_vm1 = vcmask 517120   ;;  %s1400_s1 = inlined_call_operand.vmem [shape: bf16[512,64], index: 1, kind: input, shape index: {}]   ;;  %s1401_s0 = inlined_call_operand.vmem [shape: f32[162,512], index: 0, kind: input, shape index: {}]   ;;  %s1402_s2 = inlined_call_operand.vmem [shape: f32[1,64], index: 2, kind: input, shape index: {}]   ;;  %s1403_s3 = inlined_call_operand.vmem [shape: f32[162,64], index: 3, kind: output, shape index: {}]  }
   0x1   :  { %v891_v0 = vld [vmem:[%s1400_s1 + $0x40] sm:$0xff]   ;;  %v895_v4 = vld [vmem:[%s1400_s1 + $0x48] sm:$0xff]   ;;  %v899_v8 = vld [vmem:[%s1400_s1 + $0x50] sm:$0xff]  }
   0x2   :  { %v892_v1 = vld [vmem:[%s1400_s1 + $0xc0] sm:$0xff]   ;;  %727 = vmatprep.subr.bf16.mxu0 %v891_v0  ;;  %v896_v5 = vld [vmem:[%s1400_s1 + $0xc8] sm:$0xff]   ;;  %v900_v9 = vld [vmem:[%s1400_s1 + $0xd0] sm:$0xff]  }
   0x3   :  { %v893_v2 = vld [vmem:[%s1400_s1] sm:$0xff]   ;;  %809 = vmatprep.subr.bf16.mxu1 %v892_v1  ;;  %v897_v6 = vld [vmem:[%s1400_s1 + $0x8] sm:$0xff]   ;;  %v901_v10 = vld [vmem:[%s1400_s1 + $0x10] sm:$0xff]  }
   0x4   :  { %v894_v3 = vld [vmem:[%s1400_s1 + $0x80] sm:$0xff]   ;;  %728 = vmatpush3.bf16.msra.mxu0 %v893_v2  ;;  %v898_v7 = vld [vmem:[%s1400_s1 + $0x88] sm:$0xff]   ;;  %v902_v11 = vld [vmem:[%s1400_s1 + $0x90] sm:$0xff]  }
   0x5   :  { %810 = vmatpush3.bf16.msra.mxu1 %v894_v3  ;;  %729 = vmatprep.subr.bf16.mxu0 %v895_v4  ;;  %v903_v12 = vld [vmem:[%s1400_s1 + $0x58] sm:$0xff]   ;;  %v907_v16 = vld [vmem:[%s1400_s1 + $0x60] sm:$0xff]   ;;  %v911_v20 = vld [vmem:[%s1400_s1 + $0x68] sm:$0xff]  }
   0x6   :  { %811 = vmatprep.subr.bf16.mxu1 %v896_v5  ;;  %v904_v13 = vld [vmem:[%s1400_s1 + $0xd8] sm:$0xff]   ;;  %v908_v17 = vld [vmem:[%s1400_s1 + $0xe0] sm:$0xff]   ;;  %v912_v21 = vld [vmem:[%s1400_s1 + $0xe8] sm:$0xff]  }
   0x7   :  { %v905_v14 = vld [vmem:[%s1400_s1 + $0x18] sm:$0xff]   ;;  %v909_v18 = vld [vmem:[%s1400_s1 + $0x20] sm:$0xff]   ;;  %v913_v22 = vld [vmem:[%s1400_s1 + $0x28] sm:$0xff]  }
   0x8   :  { %730 = vmatpush3.bf16.msra.mxu0 %v897_v6  ;;  %v906_v15 = vld [vmem:[%s1400_s1 + $0x98] sm:$0xff]   ;;  %v910_v19 = vld [vmem:[%s1400_s1 + $0xa0] sm:$0xff]   ;;  %v914_v23 = vld [vmem:[%s1400_s1 + $0xa8] sm:$0xff]  }
   0x9   :  { %812 = vmatpush3.bf16.msra.mxu1 %v898_v7  ;;  %731 = vmatprep.subr.bf16.mxu0 %v899_v8  ;;  %v915_v24 = vld [vmem:[%s1400_s1 + $0x70] sm:$0xff]   ;;  %v919_v28 = vld [vmem:[%s1400_s1 + $0x78] sm:$0xff]   ;;  %v16_v32 = vld [vmem:[%s1401_s0 + $0x8] sm:$0xff] }
   0xa   :  { %813 = vmatprep.subr.bf16.mxu1 %v900_v9  ;;  %v916_v25 = vld [vmem:[%s1400_s1 + $0xf0] sm:$0xff]   ;;  %v920_v29 = vld [vmem:[%s1400_s1 + $0xf8] sm:$0xff]   ;;  %v20_v33 = vld [vmem:[%s1401_s0 + $0x28] sm:$0xff] }
   0xb   :  { %v917_v26 = vld [vmem:[%s1400_s1 + $0x30] sm:$0xff]   ;;  %v921_v30 = vld [vmem:[%s1400_s1 + $0x38] sm:$0xff]   ;;  %v100_v35 = vpack.c.bf16 %v20_v33, %v16_v32  ;;  %v15_v37 = vld [vmem:[%s1401_s0] sm:$0xff] }
   0xc   :  { %732 = vmatpush3.bf16.msra.mxu0 %v901_v10  ;;  %v918_v27 = vld [vmem:[%s1400_s1 + $0xb0] sm:$0xff]   ;;  %v922_v31 = vld [vmem:[%s1400_s1 + $0xb8] sm:$0xff]   ;;  %v19_v38 = vld [vmem:[%s1401_s0 + $0x20] sm:$0xff] }
   0xd   :  { %814 = vmatpush3.bf16.msra.mxu1 %v902_v11  ;;  %733 = vmatprep.subr.bf16.mxu0 %v903_v12  ;;  %v18_v34 = vld [vmem:[%s1401_s0 + $0x18] sm:$0xff]  ;;  %v99_v40 = vpack.c.bf16 %v19_v38, %v15_v37  ;;  %v17_v41 = vld [vmem:[%s1401_s0 + $0x10] sm:$0xff]  ;;  %v24_v43 = vld [vmem:[%s1401_s0 + $0x48] sm:$0xff] }
   0xe   :  { %815 = vmatprep.subr.bf16.mxu1 %v904_v13  ;;  %v22_v36 = vld [vmem:[%s1401_s0 + $0x38] sm:$0xff]  ;;  %v21_v42 = vld [vmem:[%s1401_s0 + $0x30] sm:$0xff]  ;;  %438 = vmatprep.mubr.bf16.mxu0 %v100_v35  ;;  %v28_v45 = vld [vmem:[%s1401_s0 + $0x68] sm:$0xff] }
   0xf   :  { %v102_v39 = vpack.c.bf16 %v22_v36, %v18_v34  ;;  %v101_v44 = vpack.c.bf16 %v21_v42, %v17_v41  ;;  %v26_v46 = vld [vmem:[%s1401_s0 + $0x58] sm:$0xff]  ;;  %v104_v48 = vpack.c.bf16 %v28_v45, %v24_v43  ;;  %v23_v50 = vld [vmem:[%s1401_s0 + $0x40] sm:$0xff]  ;;  %v25_v52 = vld [vmem:[%s1401_s0 + $0x50] sm:$0xff] }
  0x10   :  { %734 = vmatpush3.bf16.msra.mxu0 %v905_v14  ;;  %v30_v47 = vld [vmem:[%s1401_s0 + $0x78] sm:$0xff]  ;;  %v27_v51 = vld [vmem:[%s1401_s0 + $0x60] sm:$0xff]  ;;  %v29_v53 = vld [vmem:[%s1401_s0 + $0x70] sm:$0xff] }
  0x11   :  { %816 = vmatpush3.bf16.msra.mxu1 %v906_v15  ;;  %735 = vmatprep.subr.bf16.mxu0 %v907_v16  ;;  %v106_v49 = vpack.c.bf16 %v30_v47, %v26_v46  ;;  %v32_v54 = vld [vmem:[%s1401_s0 + $0x88] sm:$0xff]  ;;  %v34_v56 = vld [vmem:[%s1401_s0 + $0x98] sm:$0xff]  ;;  %v103_v58 = vpack.c.bf16 %v27_v51, %v23_v50  ;;  %v105_v59 = vpack.c.bf16 %v29_v53, %v25_v52  ;;  %v31_v62 = vld [vmem:[%s1401_s0 + $0x80] sm:$0xff] }
  0x12   :  { %817 = vmatprep.subr.bf16.mxu1 %v908_v17  ;;  %558 = vmatprep.mubr.bf16.mxu1 %v102_v39  ;;  %v36_v55 = vld [vmem:[%s1401_s0 + $0xa8] sm:$0xff]  ;;  %v38_v57 = vld [vmem:[%s1401_s0 + $0xb8] sm:$0xff]  ;;  %v35_v63 = vld [vmem:[%s1401_s0 + $0xa0] sm:$0xff] }
  0x13   :  { %v108_v60 = vpack.c.bf16 %v36_v55, %v32_v54  ;;  %v110_v61 = vpack.c.bf16 %v38_v57, %v34_v56  ;;  %v33_v0 = vld [vmem:[%s1401_s0 + $0x90] sm:$0xff]  ;;  %v40_v2 = vld [vmem:[%s1401_s0 + $0xc8] sm:$0xff]  ;;  %v42_v4 = vld [vmem:[%s1401_s0 + $0xd8] sm:$0xff]  ;;  %v107_v6 = vpack.c.bf16 %v35_v63, %v31_v62 }
  0x14   :  { %736 = vmatpush3.bf16.msra.mxu0 %v909_v18  ;;  %v37_v1 = vld [vmem:[%s1401_s0 + $0xb0] sm:$0xff]  ;;  %v44_v3 = vld [vmem:[%s1401_s0 + $0xe8] sm:$0xff]  ;;  %v46_v5 = vld [vmem:[%s1401_s0 + $0xf8] sm:$0xff] }
  0x15   :  { %818 = vmatpush3.bf16.msra.mxu1 %v910_v19  ;;  %737 = vmatprep.subr.bf16.mxu0 %v911_v20  ;;  %v109_v7 = vpack.c.bf16 %v37_v1, %v33_v0  ;;  %v112_v8 = vpack.c.bf16 %v44_v3, %v40_v2  ;;  %v114_v9 = vpack.c.bf16 %v46_v5, %v42_v4  ;;  %v39_v10 = vld [vmem:[%s1401_s0 + $0xc0] sm:$0xff]  ;;  %v41_v12 = vld [vmem:[%s1401_s0 + $0xd0] sm:$0xff]  ;;  %v48_v14 = vld [vmem:[%s1401_s0 + $0x108] sm:$0xff] }
  0x16   :  { %819 = vmatprep.subr.bf16.mxu1 %v912_v21  ;;  %v43_v11 = vld [vmem:[%s1401_s0 + $0xe0] sm:$0xff]  ;;  %v45_v13 = vld [vmem:[%s1401_s0 + $0xf0] sm:$0xff]  ;;  %v52_v15 = vld [vmem:[%s1401_s0 + $0x128] sm:$0xff] }
  0x17   :  { %v50_v16 = vld [vmem:[%s1401_s0 + $0x118] sm:$0xff]  ;;  %v111_v18 = vpack.c.bf16 %v43_v11, %v39_v10  ;;  %v113_v19 = vpack.c.bf16 %v45_v13, %v41_v12  ;;  %v116_v20 = vpack.c.bf16 %v52_v15, %v48_v14  ;;  %v55_v34 = vld [vmem:[%s1401_s0 + $0x140] sm:$0xff]  ;;  %v57_v36 = vld [vmem:[%s1401_s0 + $0x150] sm:$0xff] }
  0x18   :  { %738 = vmatpush3.bf16.msra.mxu0 %v913_v22  ;;  %v54_v17 = vld [vmem:[%s1401_s0 + $0x138] sm:$0xff]  ;;  %v47_v22 = vld [vmem:[%s1401_s0 + $0x100] sm:$0xff]  ;;  %v61_v37 = vld [vmem:[%s1401_s0 + $0x170] sm:$0xff] }
  0x19   :  { %820 = vmatpush3.bf16.msra.mxu1 %v914_v23  ;;  %739 = vmatprep.subr.bf16.mxu0 %v915_v24  ;;  %v118_v21 = vpack.c.bf16 %v54_v17, %v50_v16  ;;  %v51_v23 = vld [vmem:[%s1401_s0 + $0x120] sm:$0xff]  ;;  %v49_v24 = vld [vmem:[%s1401_s0 + $0x110] sm:$0xff]  ;;  %v64_v38 = vld [vmem:[%s1401_s0 + $0x188] sm:$0xff]  ;;  %v121_v43 = vpack.c.bf16 %v61_v37, %v57_v36 }
  0x1a   :  { %821 = vmatprep.subr.bf16.mxu1 %v916_v25  ;;  %v53_v25 = vld [vmem:[%s1401_s0 + $0x130] sm:$0xff]  ;;  %v59_v35 = vld [vmem:[%s1401_s0 + $0x160] sm:$0xff]  ;;  %v68_v39 = vld [vmem:[%s1401_s0 + $0x1a8] sm:$0xff] }
  0x1b   :  { %v70_v41 = vld [vmem:[%s1401_s0 + $0x1b8] sm:$0xff]  ;;  %v119_v42 = vpack.c.bf16 %v59_v35, %v55_v34  ;;  %v63_v46 = vld [vmem:[%s1401_s0 + $0x180] sm:$0xff]  ;;  %v72_v50 = vld [vmem:[%s1401_s0 + $0x1c8] sm:$0xff] }
  0x1c   :  { %740 = vmatpush3.bf16.msra.mxu0 %v917_v26  ;;  %v56_v26 = vld [vmem:[%s1401_s0 + $0x148] sm:$0xff]  ;;  %v67_v47 = vld [vmem:[%s1401_s0 + $0x1a0] sm:$0xff]  ;;  %v74_v52 = vld [vmem:[%s1401_s0 + $0x1d8] sm:$0xff] }
  0x1d   :  { %822 = vmatpush3.bf16.msra.mxu1 %v918_v27  ;;  %741 = vmatprep.subr.bf16.mxu0 %v919_v28  ;;  %v60_v27 = vld [vmem:[%s1401_s0 + $0x168] sm:$0xff]  ;;  %v58_v28 = vld [vmem:[%s1401_s0 + $0x158] sm:$0xff]  ;;  %v123_v54 = vpack.c.bf16 %v67_v47, %v63_v46  ;;  %v1294_v34 = vld [vmem:[%s1402_s2] ss:$0 sm:$0xff] }
  0x1e   :  { %823 = vmatprep.subr.bf16.mxu1 %v920_v29  ;;  %v62_v29 = vld [vmem:[%s1401_s0 + $0x178] sm:$0xff]  ;;  %v120_v32 = vpack.c.bf16 %v60_v27, %v56_v26  ;;  %v76_v51 = vld [vmem:[%s1401_s0 + $0x1e8] sm:$0xff] }
  0x1f   :  { %v122_v33 = vpack.c.bf16 %v62_v29, %v58_v28  ;;  %v78_v53 = vld [vmem:[%s1401_s0 + $0x1f8] sm:$0xff]  ;;  %v128_v56 = vpack.c.bf16 %v76_v51, %v72_v50  ;;  %v80_v62 = vld [vmem:[%s1401_s0 + $0x208] sm:$0xff]  ;;  %v95_v28 = vld [vmem:[%s1401_s0 + $0x280] sm:$0x3] }
  0x20   :  { %742 = vmatpush3.bf16.msra.mxu0 %v921_v30  ;;  %v115_v30 = vpack.c.bf16 %v51_v23, %v47_v22  ;;  %v130_v57 = vpack.c.bf16 %v78_v53, %v74_v52  ;;  %v84_v63 = vld [vmem:[%s1401_s0 + $0x228] sm:$0xff]  ;;  %v82_v0 = vld [vmem:[%s1401_s0 + $0x218] sm:$0xff]  ;;  %v97_v29 = vld [vmem:[%s1401_s0 + $0x290] sm:$0x3] }
  0x21   :  { %824 = vmatpush3.bf16.msra.mxu1 %v922_v31  ;;  %v117_v31 = vpack.c.bf16 %v53_v25, %v49_v24  ;;  %v86_v1 = vld [vmem:[%s1401_s0 + $0x238] sm:$0xff]  ;;  %v132_v4 = vpack.c.bf16 %v84_v63, %v80_v62  ;;  %v88_v10 = vld [vmem:[%s1401_s0 + $0x248] sm:$0xff] }
  0x22   :  { %v134_v5 = vpack.c.bf16 %v86_v1, %v82_v0  ;;  %v92_v11 = vld [vmem:[%s1401_s0 + $0x268] sm:$0xff]  ;;  %v90_v12 = vld [vmem:[%s1401_s0 + $0x258] sm:$0xff] }
  0x23   :  { %439 = vmatmul.mubr.bf16.vlgmr.msra.gmra.mrb[0].mxu0 %v99_v40  ;;  %v66_v40 = vld [vmem:[%s1401_s0 + $0x198] sm:$0xff]  ;;  %v136_v16 = vpack.c.bf16 %v92_v11, %v88_v10  ;;  %v96_v22 = vld [vmem:[%s1401_s0 + $0x288] sm:$0x3] }
  0x24   :  { %559 = vmatmul.mubr.bf16.vlgmr.msra.gmra.mrb[0].mxu1 %v101_v44  ;;  %446 = vmatprep.mubr.bf16.mxu0 %v104_v48  ;;  %v124_v44 = vpack.c.bf16 %v68_v39, %v64_v38  ;;  %v126_v45 = vpack.c.bf16 %v70_v41, %v66_v40  ;;  %v65_v48 = vld [vmem:[%s1401_s0 + $0x190] sm:$0xff]  ;;  %v94_v13 = vld [vmem:[%s1401_s0 + $0x278] sm:$0xff]  ;;  %v140_v26 = vpack.c.bf16 %v96_v22, %v96_v22 }
  0x25   :  { %566 = vmatprep.mubr.bf16.mxu1 %v106_v49  ;;  %v69_v49 = vld [vmem:[%s1401_s0 + $0x1b0] sm:$0xff]  ;;  %v138_v17 = vpack.c.bf16 %v94_v13, %v90_v12  ;;  %v98_v23 = vld [vmem:[%s1401_s0 + $0x298] sm:$0x3] }
  0x26   :  { %v125_v55 = vpack.c.bf16 %v69_v49, %v65_v48  ;;  %v142_v27 = vpack.c.bf16 %v98_v23, %v98_v23 }
  0x2b   :  { %447 = vmatmul.mubr.bf16.gmra.mrb[4].mxu0 %v103_v58  ;;  %v71_v58 = vld [vmem:[%s1401_s0 + $0x1c0] sm:$0xff] }
  0x2c   :  { %567 = vmatmul.mubr.bf16.gmra.mrb[4].mxu1 %v105_v59  ;;  %454 = vmatprep.mubr.bf16.mxu0 %v108_v60  ;;  %v75_v59 = vld [vmem:[%s1401_s0 + $0x1e0] sm:$0xff]  ;;  %v73_v60 = vld [vmem:[%s1401_s0 + $0x1d0] sm:$0xff] }
  0x2d   :  { %574 = vmatprep.mubr.bf16.mxu1 %v110_v61  ;;  %v77_v61 = vld [vmem:[%s1401_s0 + $0x1f0] sm:$0xff]  ;;  %v127_v2 = vpack.c.bf16 %v75_v59, %v71_v58 }
  0x2e   :  { %v129_v3 = vpack.c.bf16 %v77_v61, %v73_v60 }
  0x33   :  { %455 = vmatmul.mubr.bf16.gmra.mrb[8].mxu0 %v107_v6  ;;  %v79_v6 = vld [vmem:[%s1401_s0 + $0x200] sm:$0xff] }
  0x34   :  { %575 = vmatmul.mubr.bf16.gmra.mrb[8].mxu1 %v109_v7  ;;  %462 = vmatprep.mubr.bf16.mxu0 %v112_v8  ;;  %v83_v7 = vld [vmem:[%s1401_s0 + $0x220] sm:$0xff]  ;;  %v81_v8 = vld [vmem:[%s1401_s0 + $0x210] sm:$0xff] }
  0x35   :  { %582 = vmatprep.mubr.bf16.mxu1 %v114_v9  ;;  %v85_v9 = vld [vmem:[%s1401_s0 + $0x230] sm:$0xff]  ;;  %v131_v14 = vpack.c.bf16 %v83_v7, %v79_v6 }
  0x36   :  { %v133_v15 = vpack.c.bf16 %v85_v9, %v81_v8 }
  0x3b   :  { %463 = vmatmul.mubr.bf16.gmra.mrb[12].mxu0 %v111_v18  ;;  %v87_v18 = vld [vmem:[%s1401_s0 + $0x240] sm:$0xff] }
  0x3c   :  { %583 = vmatmul.mubr.bf16.gmra.mrb[12].mxu1 %v113_v19  ;;  %470 = vmatprep.mubr.bf16.mxu0 %v116_v20  ;;  %v91_v19 = vld [vmem:[%s1401_s0 + $0x260] sm:$0xff]  ;;  %v89_v20 = vld [vmem:[%s1401_s0 + $0x250] sm:$0xff] }
  0x3d   :  { %590 = vmatprep.mubr.bf16.mxu1 %v118_v21  ;;  %v93_v21 = vld [vmem:[%s1401_s0 + $0x270] sm:$0xff]  ;;  %v135_v24 = vpack.c.bf16 %v91_v19, %v87_v18 }
  0x3e   :  { %v137_v25 = vpack.c.bf16 %v93_v21, %v89_v20 }
  0x43   :  { %471 = vmatmul.mubr.bf16.gmra.mrb[16].mxu0 %v115_v30  ;;  %v139_v30 = vpack.c.bf16 %v95_v28, %v95_v28 }
  0x44   :  { %591 = vmatmul.mubr.bf16.gmra.mrb[16].mxu1 %v117_v31  ;;  %478 = vmatprep.mubr.bf16.mxu0 %v120_v32  ;;  %v141_v31 = vpack.c.bf16 %v97_v29, %v97_v29 }
  0x45   :  { %598 = vmatprep.mubr.bf16.mxu1 %v122_v33 }
  0x4b   :  { %479 = vmatmul.mubr.bf16.gmra.mrb[20].mxu0 %v119_v42 }
  0x4c   :  { %599 = vmatmul.mubr.bf16.gmra.mrb[20].mxu1 %v121_v43  ;;  %486 = vmatprep.mubr.bf16.mxu0 %v124_v44 }
  0x4d   :  { %606 = vmatprep.mubr.bf16.mxu1 %v126_v45 }
  0x53   :  { %487 = vmatmul.mubr.bf16.gmra.mrb[24].mxu0 %v123_v54 }
  0x54   :  { %607 = vmatmul.mubr.bf16.gmra.mrb[24].mxu1 %v125_v55  ;;  %494 = vmatprep.mubr.bf16.mxu0 %v128_v56 }
  0x55   :  { %614 = vmatprep.mubr.bf16.mxu1 %v130_v57 }
  0x5b   :  { %495 = vmatmul.mubr.bf16.gmra.mrb[28].mxu0 %v127_v2 }
  0x5c   :  { %615 = vmatmul.mubr.bf16.gmra.mrb[28].mxu1 %v129_v3  ;;  %502 = vmatprep.mubr.bf16.mxu0 %v132_v4 }
  0x5d   :  { %622 = vmatprep.mubr.bf16.mxu1 %v134_v5 }
  0x63   :  { %503 = vmatmul.mubr.bf16.gmra.mrb[32].mxu0 %v131_v14 }
  0x64   :  { %623 = vmatmul.mubr.bf16.gmra.mrb[32].mxu1 %v133_v15  ;;  %510 = vmatprep.mubr.bf16.mxu0 %v136_v16 }
  0x65   :  { %630 = vmatprep.mubr.bf16.mxu1 %v138_v17 }
  0x6b   :  { %511 = vmatmul.mubr.bf16.gmra.mrb[36].mxu0 %v135_v24 }
  0x6c   :  { %631 = vmatmul.mubr.bf16.gmra.mrb[36].mxu1 %v137_v25  ;;  %518 = vmatprep.mubr.bf16.mxu0 %v140_v26 }
  0x6d   :  { %638 = vmatprep.mubr.bf16.mxu1 %v142_v27 }
  0x73   :  { %519 = vmatmul.mubr.bf16.gmra.mrb[40].mxu0 %v139_v30 }
  0x74   :  { %639 = vmatmul.mubr.bf16.gmra.mrb[40].mxu1 %v141_v31 }
  0xf6   :  { %v743_v32 = vpop.f32.mrb[0].mxu0 }
  0xf7   :  { %v825_v33 = vpop.f32.mrb[0].mxu1  ;;  %v744_v35 = vpop.f32.mrb[1].mxu0 }
  0xf8   :  { %v745_v36 = vadd.f32 %v744_v35, %v743_v32  ;;  %v826_v37 = vpop.f32.mrb[1].mxu1  ;;  %v746_v38 = vpop.f32.mrb[2].mxu0 }
  0xf9   :  { %v827_v39 = vadd.f32 %v826_v37, %v825_v33  ;;  %v828_v40 = vpop.f32.mrb[2].mxu1  ;;  %v747_v41 = vpop.f32.mrb[3].mxu0 }
  0xfa   :  { %v441_v42 = vadd.f32 %v745_v36, %v1294_v34  ;;  %v748_v43 = vadd.f32 %v747_v41, %v746_v38  ;;  %v829_v44 = vpop.f32.mrb[3].mxu1 }
  0xfb   :  { %v830_v45 = vadd.f32 %v829_v44, %v828_v40 }
  0xfc   :  { %v561_v46 = vadd.f32 %v827_v39, %v441_v42  ;;  %v444_v47 = vadd.f32 %v748_v43, %v1294_v34 }
  0xfe   :  { %v646_v48 = vmax.f32 %v561_v46, 0.0  ;;  %v564_v49 = vadd.f32 %v830_v45, %v444_v47  ;;  %v749_v50 = vpop.f32.mrb[4].mxu0 }
  0xff   :  { %v831_v51 = vpop.f32.mrb[4].mxu1  ;;  %v750_v52 = vpop.f32.mrb[5].mxu0 }
 0x100   :  { %668 = vst.msk [vmem:[%s1403_s3] sm:$0xff] %vm667_vm0, %v646_v48  ;;  %v647_v53 = vmax.f32 %v564_v49, 0.0  ;;  %v751_v54 = vadd.f32 %v750_v52, %v749_v50  ;;  %v832_v55 = vpop.f32.mrb[5].mxu1  ;;  %v752_v56 = vpop.f32.mrb[6].mxu0 }
 0x101   :  { %v833_v57 = vadd.f32 %v832_v55, %v831_v51  ;;  %v834_v58 = vpop.f32.mrb[6].mxu1  ;;  %v753_v59 = vpop.f32.mrb[7].mxu0 }
 0x102   :  { %669 = vst.msk [vmem:[%s1403_s3 + $0x8] sm:$0xff] %vm667_vm0, %v647_v53  ;;  %v449_v60 = vadd.f32 %v751_v54, %v1294_v34  ;;  %v754_v61 = vadd.f32 %v753_v59, %v752_v56  ;;  %v835_v62 = vpop.f32.mrb[7].mxu1 }
 0x103   :  { %v836_v63 = vadd.f32 %v835_v62, %v834_v58 }
 0x104   :  { %v569_v0 = vadd.f32 %v833_v57, %v449_v60  ;;  %v452_v1 = vadd.f32 %v754_v61, %v1294_v34 }
 0x106   :  { %v648_v2 = vmax.f32 %v569_v0, 0.0  ;;  %v572_v3 = vadd.f32 %v836_v63, %v452_v1  ;;  %v755_v4 = vpop.f32.mrb[8].mxu0 }
 0x107   :  { %v837_v5 = vpop.f32.mrb[8].mxu1  ;;  %v756_v6 = vpop.f32.mrb[9].mxu0 }
 0x108   :  { %670 = vst.msk [vmem:[%s1403_s3 + $0x10] sm:$0xff] %vm667_vm0, %v648_v2  ;;  %v649_v7 = vmax.f32 %v572_v3, 0.0  ;;  %v757_v8 = vadd.f32 %v756_v6, %v755_v4  ;;  %v838_v9 = vpop.f32.mrb[9].mxu1  ;;  %v758_v10 = vpop.f32.mrb[10].mxu0 }
 0x109   :  { %v839_v11 = vadd.f32 %v838_v9, %v837_v5  ;;  %v840_v12 = vpop.f32.mrb[10].mxu1  ;;  %v759_v13 = vpop.f32.mrb[11].mxu0 }
 0x10a   :  { %671 = vst.msk [vmem:[%s1403_s3 + $0x18] sm:$0xff] %vm667_vm0, %v649_v7  ;;  %v457_v14 = vadd.f32 %v757_v8, %v1294_v34  ;;  %v760_v15 = vadd.f32 %v759_v13, %v758_v10  ;;  %v841_v16 = vpop.f32.mrb[11].mxu1 }
 0x10b   :  { %v842_v17 = vadd.f32 %v841_v16, %v840_v12 }
 0x10c   :  { %v577_v18 = vadd.f32 %v839_v11, %v457_v14  ;;  %v460_v19 = vadd.f32 %v760_v15, %v1294_v34 }
 0x10e   :  { %v650_v20 = vmax.f32 %v577_v18, 0.0  ;;  %v580_v21 = vadd.f32 %v842_v17, %v460_v19  ;;  %v761_v22 = vpop.f32.mrb[12].mxu0 }
 0x10f   :  { %v843_v23 = vpop.f32.mrb[12].mxu1  ;;  %v762_v24 = vpop.f32.mrb[13].mxu0 }
 0x110   :  { %672 = vst.msk [vmem:[%s1403_s3 + $0x20] sm:$0xff] %vm667_vm0, %v650_v20  ;;  %v651_v25 = vmax.f32 %v580_v21, 0.0  ;;  %v763_v26 = vadd.f32 %v762_v24, %v761_v22  ;;  %v844_v27 = vpop.f32.mrb[13].mxu1  ;;  %v764_v28 = vpop.f32.mrb[14].mxu0 }
 0x111   :  { %v845_v29 = vadd.f32 %v844_v27, %v843_v23  ;;  %v846_v30 = vpop.f32.mrb[14].mxu1  ;;  %v765_v31 = vpop.f32.mrb[15].mxu0 }
 0x112   :  { %673 = vst.msk [vmem:[%s1403_s3 + $0x28] sm:$0xff] %vm667_vm0, %v651_v25  ;;  %v465_v32 = vadd.f32 %v763_v26, %v1294_v34  ;;  %v766_v33 = vadd.f32 %v765_v31, %v764_v28  ;;  %v847_v35 = vpop.f32.mrb[15].mxu1 }
 0x113   :  { %v848_v36 = vadd.f32 %v847_v35, %v846_v30 }
 0x114   :  { %v585_v37 = vadd.f32 %v845_v29, %v465_v32  ;;  %v468_v38 = vadd.f32 %v766_v33, %v1294_v34 }
 0x116   :  { %v652_v39 = vmax.f32 %v585_v37, 0.0  ;;  %v588_v40 = vadd.f32 %v848_v36, %v468_v38  ;;  %v767_v41 = vpop.f32.mrb[16].mxu0 }
 0x117   :  { %v849_v42 = vpop.f32.mrb[16].mxu1  ;;  %v768_v43 = vpop.f32.mrb[17].mxu0 }
 0x118   :  { %674 = vst.msk [vmem:[%s1403_s3 + $0x30] sm:$0xff] %vm667_vm0, %v652_v39  ;;  %v653_v44 = vmax.f32 %v588_v40, 0.0  ;;  %v769_v45 = vadd.f32 %v768_v43, %v767_v41  ;;  %v850_v46 = vpop.f32.mrb[17].mxu1  ;;  %v770_v47 = vpop.f32.mrb[18].mxu0 }
 0x119   :  { %v851_v48 = vadd.f32 %v850_v46, %v849_v42  ;;  %v852_v49 = vpop.f32.mrb[18].mxu1  ;;  %v771_v50 = vpop.f32.mrb[19].mxu0 }
 0x11a   :  { %675 = vst.msk [vmem:[%s1403_s3 + $0x38] sm:$0xff] %vm667_vm0, %v653_v44  ;;  %v473_v51 = vadd.f32 %v769_v45, %v1294_v34  ;;  %v772_v52 = vadd.f32 %v771_v50, %v770_v47  ;;  %v853_v53 = vpop.f32.mrb[19].mxu1 }
 0x11b   :  { %v854_v54 = vadd.f32 %v853_v53, %v852_v49 }
 0x11c   :  { %v593_v55 = vadd.f32 %v851_v48, %v473_v51  ;;  %v476_v56 = vadd.f32 %v772_v52, %v1294_v34 }
 0x11e   :  { %v654_v57 = vmax.f32 %v593_v55, 0.0  ;;  %v596_v58 = vadd.f32 %v854_v54, %v476_v56  ;;  %v773_v59 = vpop.f32.mrb[20].mxu0 }
 0x11f   :  { %v855_v60 = vpop.f32.mrb[20].mxu1  ;;  %v774_v61 = vpop.f32.mrb[21].mxu0 }
 0x120   :  { %676 = vst.msk [vmem:[%s1403_s3 + $0x40] sm:$0xff] %vm667_vm0, %v654_v57  ;;  %v655_v62 = vmax.f32 %v596_v58, 0.0  ;;  %v775_v63 = vadd.f32 %v774_v61, %v773_v59  ;;  %v856_v0 = vpop.f32.mrb[21].mxu1  ;;  %v776_v1 = vpop.f32.mrb[22].mxu0 }
 0x121   :  { %v857_v2 = vadd.f32 %v856_v0, %v855_v60  ;;  %v858_v3 = vpop.f32.mrb[22].mxu1  ;;  %v777_v4 = vpop.f32.mrb[23].mxu0 }
 0x122   :  { %677 = vst.msk [vmem:[%s1403_s3 + $0x48] sm:$0xff] %vm667_vm0, %v655_v62  ;;  %v481_v5 = vadd.f32 %v775_v63, %v1294_v34  ;;  %v778_v6 = vadd.f32 %v777_v4, %v776_v1  ;;  %v859_v7 = vpop.f32.mrb[23].mxu1 }
 0x123   :  { %v860_v8 = vadd.f32 %v859_v7, %v858_v3 }
 0x124   :  { %v601_v9 = vadd.f32 %v857_v2, %v481_v5  ;;  %v484_v10 = vadd.f32 %v778_v6, %v1294_v34 }
 0x126   :  { %v656_v11 = vmax.f32 %v601_v9, 0.0  ;;  %v604_v12 = vadd.f32 %v860_v8, %v484_v10  ;;  %v779_v13 = vpop.f32.mrb[24].mxu0 }
 0x127   :  { %v861_v14 = vpop.f32.mrb[24].mxu1  ;;  %v780_v15 = vpop.f32.mrb[25].mxu0 }
 0x128   :  { %678 = vst.msk [vmem:[%s1403_s3 + $0x50] sm:$0xff] %vm667_vm0, %v656_v11  ;;  %v657_v16 = vmax.f32 %v604_v12, 0.0  ;;  %v781_v17 = vadd.f32 %v780_v15, %v779_v13  ;;  %v862_v18 = vpop.f32.mrb[25].mxu1  ;;  %v782_v19 = vpop.f32.mrb[26].mxu0 }
 0x129   :  { %v863_v20 = vadd.f32 %v862_v18, %v861_v14  ;;  %v864_v21 = vpop.f32.mrb[26].mxu1  ;;  %v783_v22 = vpop.f32.mrb[27].mxu0 }
 0x12a   :  { %679 = vst.msk [vmem:[%s1403_s3 + $0x58] sm:$0xff] %vm667_vm0, %v657_v16  ;;  %v489_v23 = vadd.f32 %v781_v17, %v1294_v34  ;;  %v784_v24 = vadd.f32 %v783_v22, %v782_v19  ;;  %v865_v25 = vpop.f32.mrb[27].mxu1 }
 0x12b   :  { %v866_v26 = vadd.f32 %v865_v25, %v864_v21 }
 0x12c   :  { %v609_v27 = vadd.f32 %v863_v20, %v489_v23  ;;  %v492_v28 = vadd.f32 %v784_v24, %v1294_v34 }
 0x12e   :  { %v658_v29 = vmax.f32 %v609_v27, 0.0  ;;  %v612_v30 = vadd.f32 %v866_v26, %v492_v28  ;;  %v785_v31 = vpop.f32.mrb[28].mxu0 }
 0x12f   :  { %v867_v32 = vpop.f32.mrb[28].mxu1  ;;  %v786_v33 = vpop.f32.mrb[29].mxu0 }
 0x130   :  { %680 = vst.msk [vmem:[%s1403_s3 + $0x60] sm:$0xff] %vm667_vm0, %v658_v29  ;;  %v659_v35 = vmax.f32 %v612_v30, 0.0  ;;  %v787_v36 = vadd.f32 %v786_v33, %v785_v31  ;;  %v868_v37 = vpop.f32.mrb[29].mxu1  ;;  %v788_v38 = vpop.f32.mrb[30].mxu0 }
 0x131   :  { %v869_v39 = vadd.f32 %v868_v37, %v867_v32  ;;  %v870_v40 = vpop.f32.mrb[30].mxu1  ;;  %v789_v41 = vpop.f32.mrb[31].mxu0 }
 0x132   :  { %681 = vst.msk [vmem:[%s1403_s3 + $0x68] sm:$0xff] %vm667_vm0, %v659_v35  ;;  %v497_v42 = vadd.f32 %v787_v36, %v1294_v34  ;;  %v790_v43 = vadd.f32 %v789_v41, %v788_v38  ;;  %v871_v44 = vpop.f32.mrb[31].mxu1 }
 0x133   :  { %v872_v45 = vadd.f32 %v871_v44, %v870_v40 }
 0x134   :  { %v617_v46 = vadd.f32 %v869_v39, %v497_v42  ;;  %v500_v47 = vadd.f32 %v790_v43, %v1294_v34 }
 0x136   :  { %v660_v48 = vmax.f32 %v617_v46, 0.0  ;;  %v620_v49 = vadd.f32 %v872_v45, %v500_v47  ;;  %v791_v50 = vpop.f32.mrb[32].mxu0 }
 0x137   :  { %v873_v51 = vpop.f32.mrb[32].mxu1  ;;  %v792_v52 = vpop.f32.mrb[33].mxu0 }
 0x138   :  { %682 = vst.msk [vmem:[%s1403_s3 + $0x70] sm:$0xff] %vm667_vm0, %v660_v48  ;;  %v661_v53 = vmax.f32 %v620_v49, 0.0  ;;  %v793_v54 = vadd.f32 %v792_v52, %v791_v50  ;;  %v874_v55 = vpop.f32.mrb[33].mxu1  ;;  %v794_v56 = vpop.f32.mrb[34].mxu0 }
 0x139   :  { %v875_v57 = vadd.f32 %v874_v55, %v873_v51  ;;  %v876_v58 = vpop.f32.mrb[34].mxu1  ;;  %v795_v59 = vpop.f32.mrb[35].mxu0 }
 0x13a   :  { %683 = vst.msk [vmem:[%s1403_s3 + $0x78] sm:$0xff] %vm667_vm0, %v661_v53  ;;  %v505_v60 = vadd.f32 %v793_v54, %v1294_v34  ;;  %v796_v61 = vadd.f32 %v795_v59, %v794_v56  ;;  %v877_v62 = vpop.f32.mrb[35].mxu1 }
 0x13b   :  { %v878_v63 = vadd.f32 %v877_v62, %v876_v58 }
 0x13c   :  { %v625_v0 = vadd.f32 %v875_v57, %v505_v60  ;;  %v508_v1 = vadd.f32 %v796_v61, %v1294_v34 }
 0x13e   :  { %v662_v2 = vmax.f32 %v625_v0, 0.0  ;;  %v628_v3 = vadd.f32 %v878_v63, %v508_v1  ;;  %v797_v4 = vpop.f32.mrb[36].mxu0 }
 0x13f   :  { %v879_v5 = vpop.f32.mrb[36].mxu1  ;;  %v798_v6 = vpop.f32.mrb[37].mxu0 }
 0x140   :  { %684 = vst.msk [vmem:[%s1403_s3 + $0x80] sm:$0xff] %vm667_vm0, %v662_v2  ;;  %v663_v7 = vmax.f32 %v628_v3, 0.0  ;;  %v799_v8 = vadd.f32 %v798_v6, %v797_v4  ;;  %v880_v9 = vpop.f32.mrb[37].mxu1  ;;  %v800_v10 = vpop.f32.mrb[38].mxu0 }
 0x141   :  { %v881_v11 = vadd.f32 %v880_v9, %v879_v5  ;;  %v882_v12 = vpop.f32.mrb[38].mxu1  ;;  %v801_v13 = vpop.f32.mrb[39].mxu0 }
 0x142   :  { %685 = vst.msk [vmem:[%s1403_s3 + $0x88] sm:$0xff] %vm667_vm0, %v663_v7  ;;  %v513_v14 = vadd.f32 %v799_v8, %v1294_v34  ;;  %v802_v15 = vadd.f32 %v801_v13, %v800_v10  ;;  %v883_v16 = vpop.f32.mrb[39].mxu1 }
 0x143   :  { %v884_v17 = vadd.f32 %v883_v16, %v882_v12 }
 0x144   :  { %v633_v18 = vadd.f32 %v881_v11, %v513_v14  ;;  %v516_v19 = vadd.f32 %v802_v15, %v1294_v34 }
 0x146   :  { %v664_v20 = vmax.f32 %v633_v18, 0.0  ;;  %v636_v21 = vadd.f32 %v884_v17, %v516_v19  ;;  %v803_v22 = vpop.f32.mrb[40].mxu0 }
 0x147   :  { %v885_v23 = vpop.f32.mrb[40].mxu1  ;;  %v804_v24 = vpop.f32.mrb[41].mxu0 }
 0x148   :  { %686 = vst.msk [vmem:[%s1403_s3 + $0x90] sm:$0xff] %vm667_vm0, %v664_v20  ;;  %v665_v25 = vmax.f32 %v636_v21, 0.0  ;;  %v805_v26 = vadd.f32 %v804_v24, %v803_v22  ;;  %v886_v27 = vpop.f32.mrb[41].mxu1  ;;  %v806_v28 = vpop.f32.mrb[42].mxu0 }
 0x149   :  { %v887_v29 = vadd.f32 %v886_v27, %v885_v23  ;;  %v888_v30 = vpop.f32.mrb[42].mxu1  ;;  %v807_v31 = vpop.f32.mrb[43].mxu0 }
 0x14a   :  { %687 = vst.msk [vmem:[%s1403_s3 + $0x98] sm:$0xff] %vm667_vm0, %v665_v25  ;;  %v521_v32 = vadd.f32 %v805_v26, %v1294_v34  ;;  %v889_v33 = vpop.f32.mrb[43].mxu1 }
 0x14c   :  { %v641_v35 = vadd.f32 %v887_v29, %v521_v32 }
 0x14e   :  { %v666_v36 = vmax.f32 %v641_v35, 0.0 }
 0x150   :  { %689 = vst.msk [vmem:[%s1403_s3 + $0xa0] sm:$0x3] %vm688_vm1, %v666_v36 }

// kernel: cnn_actor_critic_forward.6
= control target key start
LH: loop header
LB: loop body
LE: loop exit
PB: predicated region body
PF: predicated region fallthrough
CT: control target
= control target key end

     0   :  { %v980_v39 = vmov 0.0   ;;  %vm981_vm0 = vmmov 0   ;;  %vm410_vm1 = vcmask 523264   ;;  %vm721_vm2 = vcmask 517120   ;;  %s1427_s1 = inlined_call_operand.vmem [shape: bf16[576,64], index: 1, kind: input, shape index: {}]   ;;  %s1428_s0 = inlined_call_operand.vmem [shape: f32[98,576], index: 0, kind: input, shape index: {}]   ;;  %s1429_s2 = inlined_call_operand.vmem [shape: f32[1,64], index: 2, kind: input, shape index: {}]   ;;  %s1430_s3 = inlined_call_operand.vmem [shape: f32[98,64], index: 3, kind: output, shape index: {}]  }
   0x1   :  { %v944_v0 = vld [vmem:[%s1427_s1 + $0x40] sm:$0xff]   ;;  %v948_v4 = vld [vmem:[%s1427_s1 + $0x48] sm:$0xff]   ;;  %v952_v8 = vld [vmem:[%s1427_s1 + $0x50] sm:$0xff]  }
   0x2   :  { %v945_v1 = vld [vmem:[%s1427_s1 + $0xc0] sm:$0xff]   ;;  %771 = vmatprep.subr.bf16.mxu0 %v944_v0  ;;  %v949_v5 = vld [vmem:[%s1427_s1 + $0xc8] sm:$0xff]   ;;  %v953_v9 = vld [vmem:[%s1427_s1 + $0xd0] sm:$0xff]  }
   0x3   :  { %v946_v2 = vld [vmem:[%s1427_s1] sm:$0xff]   ;;  %829 = vmatprep.subr.bf16.mxu1 %v945_v1  ;;  %v950_v6 = vld [vmem:[%s1427_s1 + $0x8] sm:$0xff]   ;;  %v954_v10 = vld [vmem:[%s1427_s1 + $0x10] sm:$0xff]  }
   0x4   :  { %v947_v3 = vld [vmem:[%s1427_s1 + $0x80] sm:$0xff]   ;;  %772 = vmatpush3.bf16.msra.mxu0 %v946_v2  ;;  %v951_v7 = vld [vmem:[%s1427_s1 + $0x88] sm:$0xff]   ;;  %v955_v11 = vld [vmem:[%s1427_s1 + $0x90] sm:$0xff]  }
   0x5   :  { %830 = vmatpush3.bf16.msra.mxu1 %v947_v3  ;;  %773 = vmatprep.subr.bf16.mxu0 %v948_v4  ;;  %v956_v12 = vld [vmem:[%s1427_s1 + $0x58] sm:$0xff]   ;;  %v960_v16 = vld [vmem:[%s1427_s1 + $0x60] sm:$0xff]   ;;  %v964_v20 = vld [vmem:[%s1427_s1 + $0x68] sm:$0xff]  }
   0x6   :  { %831 = vmatprep.subr.bf16.mxu1 %v949_v5  ;;  %v957_v13 = vld [vmem:[%s1427_s1 + $0xd8] sm:$0xff]   ;;  %v961_v17 = vld [vmem:[%s1427_s1 + $0xe0] sm:$0xff]   ;;  %v965_v21 = vld [vmem:[%s1427_s1 + $0xe8] sm:$0xff]  }
   0x7   :  { %v958_v14 = vld [vmem:[%s1427_s1 + $0x18] sm:$0xff]   ;;  %v962_v18 = vld [vmem:[%s1427_s1 + $0x20] sm:$0xff]   ;;  %v966_v22 = vld [vmem:[%s1427_s1 + $0x28] sm:$0xff]  }
   0x8   :  { %774 = vmatpush3.bf16.msra.mxu0 %v950_v6  ;;  %v959_v15 = vld [vmem:[%s1427_s1 + $0x98] sm:$0xff]   ;;  %v963_v19 = vld [vmem:[%s1427_s1 + $0xa0] sm:$0xff]   ;;  %v967_v23 = vld [vmem:[%s1427_s1 + $0xa8] sm:$0xff]  }
   0x9   :  { %832 = vmatpush3.bf16.msra.mxu1 %v951_v7  ;;  %775 = vmatprep.subr.bf16.mxu0 %v952_v8  ;;  %v968_v24 = vld [vmem:[%s1427_s1 + $0x70] sm:$0xff]   ;;  %v972_v28 = vld [vmem:[%s1427_s1 + $0x78] sm:$0xff]   ;;  %v16_v32 = vld [vmem:[%s1428_s0 + $0x8] sm:$0xff] }
   0xa   :  { %833 = vmatprep.subr.bf16.mxu1 %v953_v9  ;;  %v969_v25 = vld [vmem:[%s1427_s1 + $0xf0] sm:$0xff]   ;;  %v973_v29 = vld [vmem:[%s1427_s1 + $0xf8] sm:$0xff]   ;;  %v23_v36 = vld [vmem:[%s1428_s0 + $0x40] sm:$0xff] }
   0xb   :  { %v970_v26 = vld [vmem:[%s1427_s1 + $0x30] sm:$0xff]   ;;  %v974_v30 = vld [vmem:[%s1427_s1 + $0x38] sm:$0xff]   ;;  %v15_v37 = vld [vmem:[%s1428_s0] sm:$0xff] }
   0xc   :  { %776 = vmatpush3.bf16.msra.mxu0 %v954_v10  ;;  %v971_v27 = vld [vmem:[%s1427_s1 + $0xb0] sm:$0xff]   ;;  %v975_v31 = vld [vmem:[%s1427_s1 + $0xb8] sm:$0xff]   ;;  %v20_v38 = vld [vmem:[%s1428_s0 + $0x28] sm:$0xff] }
   0xd   :  { %834 = vmatpush3.bf16.msra.mxu1 %v955_v11  ;;  %777 = vmatprep.subr.bf16.mxu0 %v956_v12  ;;  %v21_v33 = vld [vmem:[%s1428_s0 + $0x30] sm:$0xff]  ;;  %v18_v34 = vld [vmem:[%s1428_s0 + $0x18] sm:$0xff]  ;;  %v80_v41 = vpack.c.bf16 %v20_v38, %v15_v37  ;;  %v976_v45 = vld [vmem:[%s1427_s1 + $0x100] sm:$0xff]  }
   0xe   :  { %835 = vmatprep.subr.bf16.mxu1 %v957_v13  ;;  %v81_v35 = vpack.c.bf16 %v21_v33, %v16_v32  ;;  %v83_v40 = vpack.c.bf16 %v23_v36, %v18_v34  ;;  %v17_v42 = vld [vmem:[%s1428_s0 + $0x10] sm:$0xff]  ;;  %v22_v43 = vld [vmem:[%s1428_s0 + $0x38] sm:$0xff]  ;;  %v31_v47 = vld [vmem:[%s1428_s0 + $0x80] sm:$0xff] }
   0xf   :  { %v82_v44 = vpack.c.bf16 %v22_v43, %v17_v42  ;;  %v26_v46 = vld [vmem:[%s1428_s0 + $0x58] sm:$0xff]  ;;  %v28_v48 = vld [vmem:[%s1428_s0 + $0x68] sm:$0xff]  ;;  %v33_v49 = vld [vmem:[%s1428_s0 + $0x90] sm:$0xff] }
  0x10   :  { %778 = vmatpush3.bf16.msra.mxu0 %v958_v14  ;;  %464 = vmatprep.mubr.bf16.mxu0 %v81_v35  ;;  %v86_v50 = vpack.c.bf16 %v31_v47, %v26_v46  ;;  %v88_v51 = vpack.c.bf16 %v33_v49, %v28_v48  ;;  %v25_v52 = vld [vmem:[%s1428_s0 + $0x50] sm:$0xff]  ;;  %v30_v53 = vld [vmem:[%s1428_s0 + $0x78] sm:$0xff]  ;;  %v27_v54 = vld [vmem:[%s1428_s0 + $0x60] sm:$0xff] }
  0x11   :  { %836 = vmatpush3.bf16.msra.mxu1 %v959_v15  ;;  %779 = vmatprep.subr.bf16.mxu0 %v960_v16  ;;  %v32_v55 = vld [vmem:[%s1428_s0 + $0x88] sm:$0xff]  ;;  %v41_v57 = vld [vmem:[%s1428_s0 + $0xd0] sm:$0xff]  ;;  %v38_v58 = vld [vmem:[%s1428_s0 + $0xb8] sm:$0xff]  ;;  %v85_v60 = vpack.c.bf16 %v30_v53, %v25_v52 }
  0x12   :  { %837 = vmatprep.subr.bf16.mxu1 %v961_v17  ;;  %552 = vmatprep.mubr.bf16.mxu1 %v83_v40  ;;  %v36_v56 = vld [vmem:[%s1428_s0 + $0xa8] sm:$0xff]  ;;  %v43_v59 = vld [vmem:[%s1428_s0 + $0xe0] sm:$0xff]  ;;  %v87_v62 = vpack.c.bf16 %v32_v55, %v27_v54  ;;  %v37_v3 = vld [vmem:[%s1428_s0 + $0xb0] sm:$0xff] }
  0x13   :  { %v977_v61 = vld [vmem:[%s1427_s1 + $0x108] sm:$0xff]   ;;  %v91_v63 = vpack.c.bf16 %v41_v57, %v36_v56  ;;  %v93_v0 = vpack.c.bf16 %v43_v59, %v38_v58  ;;  %v35_v1 = vld [vmem:[%s1428_s0 + $0xa0] sm:$0xff]  ;;  %v978_v4 = vld [vmem:[%s1427_s1 + $0x110] sm:$0xff]  }
  0x14   :  { %780 = vmatpush3.bf16.msra.mxu0 %v962_v18  ;;  %v40_v2 = vld [vmem:[%s1428_s0 + $0xc8] sm:$0xff]  ;;  %v42_v5 = vld [vmem:[%s1428_s0 + $0xd8] sm:$0xff]  ;;  %v51_v7 = vld [vmem:[%s1428_s0 + $0x120] sm:$0xff] }
  0x15   :  { %838 = vmatpush3.bf16.msra.mxu1 %v963_v19  ;;  %781 = vmatprep.subr.bf16.mxu0 %v964_v20  ;;  %v46_v6 = vld [vmem:[%s1428_s0 + $0xf8] sm:$0xff]  ;;  %v48_v8 = vld [vmem:[%s1428_s0 + $0x108] sm:$0xff]  ;;  %v53_v9 = vld [vmem:[%s1428_s0 + $0x130] sm:$0xff]  ;;  %v90_v10 = vpack.c.bf16 %v40_v2, %v35_v1  ;;  %v92_v11 = vpack.c.bf16 %v42_v5, %v37_v3 }
  0x16   :  { %839 = vmatprep.subr.bf16.mxu1 %v965_v21  ;;  %v96_v12 = vpack.c.bf16 %v51_v7, %v46_v6  ;;  %v98_v13 = vpack.c.bf16 %v53_v9, %v48_v8  ;;  %v979_v14 = vld [vmem:[%s1427_s1 + $0x118] sm:$0xff]   ;;  %v45_v15 = vld [vmem:[%s1428_s0 + $0xf0] sm:$0xff]  ;;  %v47_v17 = vld [vmem:[%s1428_s0 + $0x100] sm:$0xff] }
  0x17   :  { %v50_v16 = vld [vmem:[%s1428_s0 + $0x118] sm:$0xff]  ;;  %v52_v18 = vld [vmem:[%s1428_s0 + $0x128] sm:$0xff]  ;;  %v61_v20 = vld [vmem:[%s1428_s0 + $0x170] sm:$0xff] }
  0x18   :  { %782 = vmatpush3.bf16.msra.mxu0 %v966_v22  ;;  %v56_v19 = vld [vmem:[%s1428_s0 + $0x148] sm:$0xff]  ;;  %v58_v21 = vld [vmem:[%s1428_s0 + $0x158] sm:$0xff]  ;;  %v63_v22 = vld [vmem:[%s1428_s0 + $0x180] sm:$0xff] }
  0x19   :  { %840 = vmatpush3.bf16.msra.mxu1 %v967_v23  ;;  %783 = vmatprep.subr.bf16.mxu0 %v968_v24  ;;  %v95_v23 = vpack.c.bf16 %v50_v16, %v45_v15  ;;  %v97_v24 = vpack.c.bf16 %v52_v18, %v47_v17  ;;  %v71_v32 = vld [vmem:[%s1428_s0 + $0x1c0] sm:$0xff]  ;;  %v68_v33 = vld [vmem:[%s1428_s0 + $0x1a8] sm:$0xff]  ;;  %v73_v34 = vld [vmem:[%s1428_s0 + $0x1d0] sm:$0xff] }
  0x1a   :  { %841 = vmatprep.subr.bf16.mxu1 %v969_v25  ;;  %v101_v25 = vpack.c.bf16 %v61_v20, %v56_v19  ;;  %v108_v38 = vpack.c.bf16 %v73_v34, %v68_v33  ;;  %v65_v40 = vld [vmem:[%s1428_s0 + $0x190] sm:$0xff]  ;;  %v67_v42 = vld [vmem:[%s1428_s0 + $0x1a0] sm:$0xff]  ;;  %v72_v43 = vld [vmem:[%s1428_s0 + $0x1c8] sm:$0xff] }
  0x1b   :  { %v107_v47 = vpack.c.bf16 %v72_v43, %v67_v42  ;;  %v19_v54 = vld [vmem:[%s1428_s0 + $0x20] sm:$0xff]  ;;  %v24_v55 = vld [vmem:[%s1428_s0 + $0x48] sm:$0xff]  ;;  %v49_v7 = vld [vmem:[%s1428_s0 + $0x110] sm:$0xff] }
  0x1c   :  { %784 = vmatpush3.bf16.msra.mxu0 %v970_v26  ;;  %v103_v26 = vpack.c.bf16 %v63_v22, %v58_v21  ;;  %v59_v56 = vld [vmem:[%s1428_s0 + $0x160] sm:$0xff]  ;;  %v64_v57 = vld [vmem:[%s1428_s0 + $0x188] sm:$0xff]  ;;  %v84_v58 = vpack.c.bf16 %v24_v55, %v19_v54  ;;  %v54_v8 = vld [vmem:[%s1428_s0 + $0x138] sm:$0xff] }
  0x1d   :  { %842 = vmatpush3.bf16.msra.mxu1 %v971_v27  ;;  %785 = vmatprep.subr.bf16.mxu0 %v972_v28  ;;  %v55_v27 = vld [vmem:[%s1428_s0 + $0x140] sm:$0xff]  ;;  %v60_v28 = vld [vmem:[%s1428_s0 + $0x168] sm:$0xff]  ;;  %v104_v59 = vpack.c.bf16 %v64_v57, %v59_v56  ;;  %v99_v9 = vpack.c.bf16 %v54_v8, %v49_v7 }
  0x1e   :  { %843 = vmatprep.subr.bf16.mxu1 %v973_v29  ;;  %v57_v29 = vld [vmem:[%s1428_s0 + $0x150] sm:$0xff]  ;;  %v100_v35 = vpack.c.bf16 %v60_v28, %v55_v27  ;;  %v39_v2 = vld [vmem:[%s1428_s0 + $0xc0] sm:$0xff]  ;;  %v44_v3 = vld [vmem:[%s1428_s0 + $0xe8] sm:$0xff] }
  0x1f   :  { %v94_v5 = vpack.c.bf16 %v44_v3, %v39_v2 }
  0x20   :  { %786 = vmatpush3.bf16.msra.mxu0 %v974_v30  ;;  %v62_v30 = vld [vmem:[%s1428_s0 + $0x178] sm:$0xff] }
  0x21   :  { %844 = vmatpush3.bf16.msra.mxu1 %v975_v31  ;;  %898 = vmatprep.subr.bf16.mxu0 %v980_v39  ;;  %v66_v31 = vld [vmem:[%s1428_s0 + $0x198] sm:$0xff]  ;;  %v102_v36 = vpack.c.bf16 %v62_v30, %v57_v29 }
  0x22   :  { %934 = vmatprep.subr.bf16.mxu1 %v980_v39  ;;  %v106_v37 = vpack.c.bf16 %v71_v32, %v66_v31 }
  0x23   :  { %465 = vmatmul.mubr.bf16.vlgmr.msra.gmra.mrb[0].mxu0 %v80_v41  ;;  %v70_v41 = vld [vmem:[%s1428_s0 + $0x1b8] sm:$0xff] }
  0x24   :  { %553 = vmatmul.mubr.bf16.vlgmr.msra.gmra.mrb[0].mxu1 %v82_v44  ;;  %899 = vmatpush3.bf16.msra.mxu0 %v976_v45  ;;  %v76_v44 = vld [vmem:[%s1428_s0 + $0x1e8] sm:$0x3]  ;;  %v105_v46 = vpack.c.bf16 %v70_v41, %v65_v40 }
  0x25   :  { %938 = vmatpush3.bf16.msra.mxu1 %v976_v45  ;;  %900 = vmatprep.subr.bf16.mxu0 %v980_v39  ;;  %v78_v45 = vld [vmem:[%s1428_s0 + $0x1f8] sm:$0x3]  ;;  %v111_v48 = vpack.c.bf16 %v76_v44, %v76_v44 }
  0x26   :  { %472 = vmatprep.mubr.bf16.mxu0 %v86_v50  ;;  %560 = vmatprep.mubr.bf16.mxu1 %v88_v51  ;;  %v113_v49 = vpack.c.bf16 %v78_v45, %v78_v45  ;;  %v75_v50 = vld [vmem:[%s1428_s0 + $0x1e0] sm:$0x3]  ;;  %v77_v51 = vld [vmem:[%s1428_s0 + $0x1f0] sm:$0x3] }
  0x27   :  { %935 = vmatprep.subr.bf16.mxu1 %v980_v39  ;;  %v110_v52 = vpack.c.bf16 %v75_v50, %v75_v50  ;;  %v112_v53 = vpack.c.bf16 %v77_v51, %v77_v51 }
  0x28   :  { %901 = vmatpush3.bf16.msra.mxu0 %v977_v61 }
  0x29   :  { %939 = vmatpush3.bf16.msra.mxu1 %v977_v61  ;;  %902 = vmatprep.subr.bf16.mxu0 %v980_v39  ;;  %v34_v61 = vld [vmem:[%s1428_s0 + $0x98] sm:$0xff] }
  0x2a   :  { %936 = vmatprep.subr.bf16.mxu1 %v980_v39 }
  0x2b   :  { %473 = vmatmul.mubr.bf16.gmra.mrb[4].mxu0 %v85_v60  ;;  %v29_v60 = vld [vmem:[%s1428_s0 + $0x70] sm:$0xff] }
  0x2c   :  { %561 = vmatmul.mubr.bf16.gmra.mrb[4].mxu1 %v87_v62  ;;  %480 = vmatprep.mubr.bf16.mxu0 %v91_v63  ;;  %v69_v62 = vld [vmem:[%s1428_s0 + $0x1b0] sm:$0xff]  ;;  %v74_v63 = vld [vmem:[%s1428_s0 + $0x1d8] sm:$0xff] }
  0x2d   :  { %568 = vmatprep.mubr.bf16.mxu1 %v93_v0  ;;  %903 = vmatpush3.bf16.msra.mxu0 %v978_v4  ;;  %v89_v0 = vpack.c.bf16 %v34_v61, %v29_v60  ;;  %v109_v1 = vpack.c.bf16 %v74_v63, %v69_v62 }
  0x2e   :  { %940 = vmatpush3.bf16.msra.mxu1 %v978_v4  ;;  %904 = vmatprep.subr.bf16.mxu0 %v980_v39  ;;  %v79_v4 = vld [vmem:[%s1428_s0 + $0x200] sm:$0x3] }
  0x2f   :  { %937 = vmatprep.subr.bf16.mxu1 %v980_v39  ;;  %v114_v6 = vpack.c.bf16 %v79_v4, %v79_v4 }
  0x31   :  { %905 = vmatpush3.bf16.msra.mxu0 %v979_v14 }
  0x32   :  { %941 = vmatpush3.bf16.msra.mxu1 %v979_v14 }
  0x33   :  { %481 = vmatmul.mubr.bf16.gmra.mrb[8].mxu0 %v90_v10 }
  0x34   :  { %569 = vmatmul.mubr.bf16.gmra.mrb[8].mxu1 %v92_v11  ;;  %488 = vmatprep.mubr.bf16.mxu0 %v96_v12  ;;  %v1337_v11 = vld [vmem:[%s1429_s2] ss:$0 sm:$0xff] }
  0x35   :  { %576 = vmatprep.mubr.bf16.mxu1 %v98_v13 }
  0x3b   :  { %489 = vmatmul.mubr.bf16.gmra.mrb[12].mxu0 %v95_v23 }
  0x3c   :  { %577 = vmatmul.mubr.bf16.gmra.mrb[12].mxu1 %v97_v24  ;;  %496 = vmatprep.mubr.bf16.mxu0 %v101_v25 }
  0x3d   :  { %584 = vmatprep.mubr.bf16.mxu1 %v103_v26 }
  0x43   :  { %497 = vmatmul.mubr.bf16.gmra.mrb[16].mxu0 %v100_v35 }
  0x44   :  { %585 = vmatmul.mubr.bf16.gmra.mrb[16].mxu1 %v102_v36  ;;  %504 = vmatprep.mubr.bf16.mxu0 %v106_v37 }
  0x45   :  { %592 = vmatprep.mubr.bf16.mxu1 %v108_v38 }
  0x4b   :  { %505 = vmatmul.mubr.bf16.gmra.mrb[20].mxu0 %v105_v46 }
  0x4c   :  { %593 = vmatmul.mubr.bf16.gmra.mrb[20].mxu1 %v107_v47  ;;  %512 = vmatprep.mubr.bf16.mxu0 %v111_v48 }
  0x4d   :  { %600 = vmatprep.mubr.bf16.mxu1 %v113_v49 }
  0x53   :  { %513 = vmatmul.mubr.bf16.gmra.mrb[24].mxu0 %v110_v52 }
  0x54   :  { %601 = vmatmul.mubr.bf16.gmra.mrb[24].mxu1 %v112_v53  ;;  %906 = vmatprep.mubr.msk.bf16.mxu0 %vm981_vm0, %v980_v39 }
  0x55   :  { %922 = vmatprep.mubr.msk.bf16.mxu1 %vm981_vm0, %v980_v39 }
  0x5b   :  { %907 = vmatmul.mubr.msk.bf16.vlgmr.msra.gmra.mrb[28].mxu0 %vm410_vm1, %v84_v58 }
  0x5c   :  { %923 = vmatmul.mubr.msk.bf16.vlgmr.msra.gmra.mrb[28].mxu1 %vm410_vm1, %v104_v59  ;;  %910 = vmatprep.mubr.msk.bf16.mxu0 %vm981_vm0, %v980_v39 }
  0x5d   :  { %926 = vmatprep.mubr.msk.bf16.mxu1 %vm981_vm0, %v980_v39 }
  0x63   :  { %911 = vmatmul.mubr.msk.bf16.gmra.mrb[32].mxu0 %vm410_vm1, %v89_v0 }
  0x64   :  { %927 = vmatmul.mubr.msk.bf16.gmra.mrb[32].mxu1 %vm410_vm1, %v109_v1  ;;  %914 = vmatprep.mubr.msk.bf16.mxu0 %vm981_vm0, %v980_v39 }
  0x65   :  { %930 = vmatprep.mubr.msk.bf16.mxu1 %vm981_vm0, %v980_v39 }
  0x6b   :  { %915 = vmatmul.mubr.msk.bf16.gmra.mrb[36].mxu0 %vm410_vm1, %v94_v5 }
  0x6c   :  { %931 = vmatmul.mubr.msk.bf16.gmra.mrb[36].mxu1 %vm410_vm1, %v114_v6  ;;  %918 = vmatprep.mubr.msk.bf16.mxu0 %vm981_vm0, %v980_v39 }
  0x73   :  { %919 = vmatmul.mubr.msk.bf16.gmra.mrb[40].mxu0 %vm410_vm1, %v99_v9 }
  0xf6   :  { %v787_v10 = vpop.f32.mrb[0].mxu0 }
  0xf7   :  { %v788_v12 = vpop.f32.mrb[1].mxu0  ;;  %v845_v13 = vpop.f32.mrb[0].mxu1 }
  0xf8   :  { %v789_v39 = vadd.f32 %v788_v12, %v787_v10  ;;  %v790_v14 = vpop.f32.mrb[2].mxu0  ;;  %v846_v15 = vpop.f32.mrb[1].mxu1 }
  0xf9   :  { %v791_v16 = vpop.f32.mrb[3].mxu0  ;;  %v847_v17 = vadd.f32 %v846_v15, %v845_v13  ;;  %v848_v18 = vpop.f32.mrb[2].mxu1 }
  0xfa   :  { %v467_v19 = vadd.f32 %v789_v39, %v1337_v11  ;;  %v792_v20 = vadd.f32 %v791_v16, %v790_v14  ;;  %v849_v21 = vpop.f32.mrb[3].mxu1 }
  0xfb   :  { %v850_v22 = vadd.f32 %v849_v21, %v848_v18 }
  0xfc   :  { %v470_v23 = vadd.f32 %v792_v20, %v1337_v11  ;;  %v1341_v24 = vadd.f32 %v847_v17, %v467_v19 }
  0xfe   :  { %v793_v25 = vpop.f32.mrb[4].mxu0  ;;  %v1343_v26 = vadd.f32 %v850_v22, %v470_v23 }
  0xff   :  { %v794_v27 = vpop.f32.mrb[5].mxu0  ;;  %v851_v28 = vpop.f32.mrb[4].mxu1 }
 0x100   :  { %v795_v29 = vadd.f32 %v794_v27, %v793_v25  ;;  %v796_v30 = vpop.f32.mrb[6].mxu0  ;;  %v852_v31 = vpop.f32.mrb[5].mxu1 }
 0x101   :  { %v797_v32 = vpop.f32.mrb[7].mxu0  ;;  %v853_v33 = vadd.f32 %v852_v31, %v851_v28  ;;  %v854_v34 = vpop.f32.mrb[6].mxu1 }
 0x102   :  { %v475_v35 = vadd.f32 %v795_v29, %v1337_v11  ;;  %v798_v36 = vadd.f32 %v797_v32, %v796_v30  ;;  %v855_v37 = vpop.f32.mrb[7].mxu1 }
 0x103   :  { %v856_v38 = vadd.f32 %v855_v37, %v854_v34 }
 0x104   :  { %v478_v40 = vadd.f32 %v798_v36, %v1337_v11  ;;  %v1347_v41 = vadd.f32 %v853_v33, %v475_v35 }
 0x106   :  { %v799_v42 = vpop.f32.mrb[8].mxu0  ;;  %v1349_v43 = vadd.f32 %v856_v38, %v478_v40 }
 0x107   :  { %v800_v44 = vpop.f32.mrb[9].mxu0  ;;  %v857_v45 = vpop.f32.mrb[8].mxu1 }
 0x108   :  { %v801_v46 = vadd.f32 %v800_v44, %v799_v42  ;;  %v802_v47 = vpop.f32.mrb[10].mxu0  ;;  %v858_v48 = vpop.f32.mrb[9].mxu1 }
 0x109   :  { %v803_v49 = vpop.f32.mrb[11].mxu0  ;;  %v859_v50 = vadd.f32 %v858_v48, %v857_v45  ;;  %v860_v51 = vpop.f32.mrb[10].mxu1 }
 0x10a   :  { %v483_v52 = vadd.f32 %v801_v46, %v1337_v11  ;;  %v804_v53 = vadd.f32 %v803_v49, %v802_v47  ;;  %v861_v54 = vpop.f32.mrb[11].mxu1 }
 0x10b   :  { %v862_v55 = vadd.f32 %v861_v54, %v860_v51 }
 0x10c   :  { %v486_v56 = vadd.f32 %v804_v53, %v1337_v11  ;;  %v1353_v57 = vadd.f32 %v859_v50, %v483_v52 }
 0x10e   :  { %v805_v58 = vpop.f32.mrb[12].mxu0  ;;  %v1355_v59 = vadd.f32 %v862_v55, %v486_v56 }
 0x10f   :  { %v806_v60 = vpop.f32.mrb[13].mxu0  ;;  %v863_v61 = vpop.f32.mrb[12].mxu1 }
 0x110   :  { %v807_v62 = vadd.f32 %v806_v60, %v805_v58  ;;  %v808_v63 = vpop.f32.mrb[14].mxu0  ;;  %v864_v0 = vpop.f32.mrb[13].mxu1 }
 0x111   :  { %v809_v1 = vpop.f32.mrb[15].mxu0  ;;  %v865_v2 = vadd.f32 %v864_v0, %v863_v61  ;;  %v866_v3 = vpop.f32.mrb[14].mxu1 }
 0x112   :  { %v491_v4 = vadd.f32 %v807_v62, %v1337_v11  ;;  %v810_v5 = vadd.f32 %v809_v1, %v808_v63  ;;  %v867_v6 = vpop.f32.mrb[15].mxu1 }
 0x113   :  { %v868_v7 = vadd.f32 %v867_v6, %v866_v3 }
 0x114   :  { %v494_v8 = vadd.f32 %v810_v5, %v1337_v11  ;;  %v1359_v9 = vadd.f32 %v865_v2, %v491_v4 }
 0x116   :  { %v811_v10 = vpop.f32.mrb[16].mxu0  ;;  %v1361_v12 = vadd.f32 %v868_v7, %v494_v8 }
 0x117   :  { %v812_v13 = vpop.f32.mrb[17].mxu0  ;;  %v869_v39 = vpop.f32.mrb[16].mxu1 }
 0x118   :  { %v813_v14 = vadd.f32 %v812_v13, %v811_v10  ;;  %v814_v15 = vpop.f32.mrb[18].mxu0  ;;  %v870_v16 = vpop.f32.mrb[17].mxu1 }
 0x119   :  { %v815_v17 = vpop.f32.mrb[19].mxu0  ;;  %v871_v18 = vadd.f32 %v870_v16, %v869_v39  ;;  %v872_v19 = vpop.f32.mrb[18].mxu1 }
 0x11a   :  { %v499_v20 = vadd.f32 %v813_v14, %v1337_v11  ;;  %v816_v21 = vadd.f32 %v815_v17, %v814_v15  ;;  %v873_v22 = vpop.f32.mrb[19].mxu1 }
 0x11b   :  { %v874_v23 = vadd.f32 %v873_v22, %v872_v19 }
 0x11c   :  { %v502_v25 = vadd.f32 %v816_v21, %v1337_v11  ;;  %v587_v27 = vadd.f32 %v871_v18, %v499_v20 }
 0x11e   :  { %v817_v28 = vpop.f32.mrb[20].mxu0  ;;  %v590_v29 = vadd.f32 %v874_v23, %v502_v25 }
 0x11f   :  { %v818_v30 = vpop.f32.mrb[21].mxu0  ;;  %v875_v31 = vpop.f32.mrb[20].mxu1 }
 0x120   :  { %v819_v32 = vadd.f32 %v818_v30, %v817_v28  ;;  %v820_v33 = vpop.f32.mrb[22].mxu0  ;;  %v876_v34 = vpop.f32.mrb[21].mxu1 }
 0x121   :  { %v821_v35 = vpop.f32.mrb[23].mxu0  ;;  %v877_v36 = vadd.f32 %v876_v34, %v875_v31  ;;  %v878_v37 = vpop.f32.mrb[22].mxu1 }
 0x122   :  { %v507_v38 = vadd.f32 %v819_v32, %v1337_v11  ;;  %v822_v40 = vadd.f32 %v821_v35, %v820_v33  ;;  %v879_v42 = vpop.f32.mrb[23].mxu1 }
 0x123   :  { %v880_v44 = vadd.f32 %v879_v42, %v878_v37 }
 0x124   :  { %v510_v45 = vadd.f32 %v822_v40, %v1337_v11  ;;  %v595_v46 = vadd.f32 %v877_v36, %v507_v38 }
 0x126   :  { %v823_v47 = vpop.f32.mrb[24].mxu0  ;;  %v598_v48 = vadd.f32 %v880_v44, %v510_v45 }
 0x127   :  { %v824_v49 = vpop.f32.mrb[25].mxu0  ;;  %v881_v50 = vpop.f32.mrb[24].mxu1 }
 0x128   :  { %v825_v51 = vadd.f32 %v824_v49, %v823_v47  ;;  %v826_v52 = vpop.f32.mrb[26].mxu0  ;;  %v882_v53 = vpop.f32.mrb[25].mxu1 }
 0x129   :  { %v827_v54 = vpop.f32.mrb[27].mxu0  ;;  %v883_v55 = vadd.f32 %v882_v53, %v881_v50  ;;  %v884_v56 = vpop.f32.mrb[26].mxu1 }
 0x12a   :  { %v515_v58 = vadd.f32 %v825_v51, %v1337_v11  ;;  %v885_v60 = vpop.f32.mrb[27].mxu1 }
 0x12c   :  { %v603_v61 = vadd.f32 %v883_v55, %v515_v58 }
 0x12e   :  { %v642_v62 = vpop.f32.mrb[28].mxu0 }
 0x12f   :  { %v643_v63 = vadd.f32 %v642_v62, %v1341_v24  ;;  %v674_v0 = vpop.f32.mrb[28].mxu1  ;;  %v908_v1 = vpop.f32.mrb[29].mxu0 }
 0x130   :  { %v675_v2 = vadd.f32 %v674_v0, %v587_v27  ;;  %v924_v3 = vpop.f32.mrb[29].mxu1  ;;  %v645_v4 = vpop.f32.mrb[30].mxu0 }
 0x131   :  { %v696_v5 = vmax.f32 %v643_v63, 0.0  ;;  %v646_v6 = vadd.f32 %v645_v4, %v1343_v26  ;;  %v677_v7 = vpop.f32.mrb[30].mxu1  ;;  %v909_v8 = vpop.f32.mrb[31].mxu0 }
 0x132   :  { %v704_v10 = vmax.f32 %v675_v2, 0.0  ;;  %v678_v13 = vadd.f32 %v677_v7, %v590_v29  ;;  %v925_v39 = vpop.f32.mrb[31].mxu1 }
 0x133   :  { %709 = vst.msk [vmem:[%s1430_s3] sm:$0xff] %vm410_vm1, %v696_v5  ;;  %v697_v11 = vmax.f32 %v646_v6, 0.0 }
 0x134   :  { %717 = vst.msk [vmem:[%s1430_s3 + $0x40] sm:$0xff] %vm410_vm1, %v704_v10  ;;  %v705_v24 = vmax.f32 %v678_v13, 0.0 }
 0x135   :  { %710 = vst.msk [vmem:[%s1430_s3 + $0x8] sm:$0xff] %vm410_vm1, %v697_v11 }
 0x136   :  { %718 = vst.msk [vmem:[%s1430_s3 + $0x48] sm:$0xff] %vm410_vm1, %v705_v24  ;;  %v650_v26 = vpop.f32.mrb[32].mxu0 }
 0x137   :  { %v651_v14 = vadd.f32 %v650_v26, %v1347_v41  ;;  %v682_v15 = vpop.f32.mrb[32].mxu1  ;;  %v912_v16 = vpop.f32.mrb[33].mxu0 }
 0x138   :  { %v683_v17 = vadd.f32 %v682_v15, %v595_v46  ;;  %v928_v18 = vpop.f32.mrb[33].mxu1  ;;  %v653_v19 = vpop.f32.mrb[34].mxu0 }
 0x139   :  { %v698_v20 = vmax.f32 %v651_v14, 0.0  ;;  %v654_v21 = vadd.f32 %v653_v19, %v1349_v43  ;;  %v685_v22 = vpop.f32.mrb[34].mxu1  ;;  %v913_v23 = vpop.f32.mrb[35].mxu0 }
 0x13a   :  { %v706_v25 = vmax.f32 %v683_v17, 0.0  ;;  %v686_v27 = vadd.f32 %v685_v22, %v598_v48  ;;  %v929_v28 = vpop.f32.mrb[35].mxu1 }
 0x13b   :  { %711 = vst.msk [vmem:[%s1430_s3 + $0x10] sm:$0xff] %vm410_vm1, %v698_v20  ;;  %v699_v29 = vmax.f32 %v654_v21, 0.0 }
 0x13c   :  { %719 = vst.msk [vmem:[%s1430_s3 + $0x50] sm:$0xff] %vm410_vm1, %v706_v25  ;;  %v707_v41 = vmax.f32 %v686_v27, 0.0 }
 0x13d   :  { %712 = vst.msk [vmem:[%s1430_s3 + $0x18] sm:$0xff] %vm410_vm1, %v699_v29 }
 0x13e   :  { %720 = vst.msk [vmem:[%s1430_s3 + $0x58] sm:$0xff] %vm410_vm1, %v707_v41  ;;  %v658_v43 = vpop.f32.mrb[36].mxu0 }
 0x13f   :  { %v659_v30 = vadd.f32 %v658_v43, %v1353_v57  ;;  %v690_v31 = vpop.f32.mrb[36].mxu1  ;;  %v916_v32 = vpop.f32.mrb[37].mxu0 }
 0x140   :  { %v691_v33 = vadd.f32 %v690_v31, %v603_v61  ;;  %v661_v34 = vpop.f32.mrb[38].mxu0  ;;  %v932_v35 = vpop.f32.mrb[37].mxu1 }
 0x141   :  { %v700_v36 = vmax.f32 %v659_v30, 0.0  ;;  %v662_v37 = vadd.f32 %v661_v34, %v1355_v59  ;;  %v917_v38 = vpop.f32.mrb[39].mxu0  ;;  %v693_v40 = vpop.f32.mrb[38].mxu1 }
 0x142   :  { %v708_v42 = vmax.f32 %v691_v33, 0.0  ;;  %v933_v44 = vpop.f32.mrb[39].mxu1 }
 0x143   :  { %713 = vst.msk [vmem:[%s1430_s3 + $0x20] sm:$0xff] %vm410_vm1, %v700_v36  ;;  %v701_v45 = vmax.f32 %v662_v37, 0.0 }
 0x144   :  { %722 = vst.msk [vmem:[%s1430_s3 + $0x60] sm:$0x3] %vm721_vm2, %v708_v42 }
 0x145   :  { %714 = vst.msk [vmem:[%s1430_s3 + $0x28] sm:$0xff] %vm410_vm1, %v701_v45 }
 0x146   :  { %v666_v57 = vpop.f32.mrb[40].mxu0 }
 0x147   :  { %v667_v59 = vadd.f32 %v666_v57, %v1359_v9  ;;  %v920_v46 = vpop.f32.mrb[41].mxu0 }
 0x148   :  { %v669_v47 = vpop.f32.mrb[42].mxu0 }
 0x149   :  { %v702_v48 = vmax.f32 %v667_v59, 0.0  ;;  %v670_v49 = vadd.f32 %v669_v47, %v1361_v12  ;;  %v921_v50 = vpop.f32.mrb[43].mxu0 }
 0x14b   :  { %715 = vst.msk [vmem:[%s1430_s3 + $0x30] sm:$0xff] %vm410_vm1, %v702_v48  ;;  %v703_v51 = vmax.f32 %v670_v49, 0.0 }
 0x14d   :  { %716 = vst.msk [vmem:[%s1430_s3 + $0x38] sm:$0xff] %vm410_vm1, %v703_v51 }

// kernel: cnn_actor_critic_forward.7
= control target key start
LH: loop header
LB: loop body
LE: loop exit
PB: predicated region body
PF: predicated region fallthrough
CT: control target
= control target key end

     0   :  { %v8365_v7 = vmov 1983009808   ;;  %v66_v9 = vlaneseq  ;;  %s11016_s0 = inlined_call_operand.vmem [shape: f32[2,3136], index: 0, kind: input, shape index: {}]   ;;  %s11017_s1 = inlined_call_operand.vmem [shape: bf16[3136,256], index: 1, kind: input, shape index: {}]   ;;  %s11018_s2 = inlined_call_operand.vmem [shape: f32[1,256], index: 2, kind: input, shape index: {}]   ;;  %s11019_s3 = inlined_call_operand.vmem [shape: bf16[256,512], index: 3, kind: input, shape index: {}]   ;;  %s11020_s4 = inlined_call_operand.vmem [shape: f32[1,512], index: 4, kind: input, shape index: {}]   ;;  %s11021_s5 = inlined_call_operand.vmem [shape: bf16[512,512], index: 5, kind: input, shape index: {}]   ;;  %s11022_s6 = inlined_call_operand.vmem [shape: f32[1,512], index: 6, kind: input, shape index: {}]   ;;  %s11023_s7 = inlined_call_operand.vmem [shape: bf16[512,6], index: 7, kind: input, shape index: {}]   ;;  %s11024_s8 = inlined_call_operand.vmem [shape: f32[1,6], index: 8, kind: input, shape index: {}]   ;;  %s11025_s9 = inlined_call_operand.vmem [shape: bf16[512,512], index: 9, kind: input, shape index: {}]   ;;  %s11026_s10 = inlined_call_operand.vmem [shape: f32[1,512], index: 10, kind: input, shape index: {}]   ;;  %s11027_s11 = inlined_call_operand.vmem [shape: bf16[512,2], index: 11, kind: input, shape index: {}]   ;;  %s11028_s12 = inlined_call_operand.vmem [shape: f32[1,2], index: 12, kind: input, shape index: {}]   ;;  %s11029_s13 = inlined_call_operand.hbm [shape: f32[2,6], index: 13, kind: output, shape index: {0}]   ;;  %s11030_s14 = inlined_call_operand.vmem [shape: f32[2,2], index: 14, kind: output, shape index: {1}]  }
   0x1   :  { %v7203_v0 = vld [vmem:[%s11017_s1 + $0x4] ss:$8 sps:$4 sm:$0xff]   ;;  %v7205_v1 = vld [vmem:[%s11017_s1] ss:$8 sps:$4 sm:$0xff]   ;;  %v7206_v2 = vld [vmem:[%s11017_s1 + $0x14] ss:$8 sps:$4 sm:$0xff]   ;;  %v64_v8 = vunpack.c.l.s4 %v8365_v7 }
   0x2   :  { %2589 = vmatprep.subr.bf16.mxu0 %v7203_v0  ;;  %v7208_v3 = vld [vmem:[%s11017_s1 + $0x10] ss:$8 sps:$4 sm:$0xff]   ;;  %v7209_v4 = vld [vmem:[%s11017_s1 + $0x24] ss:$8 sps:$4 sm:$0xff]   ;;  %v7211_v5 = vld [vmem:[%s11017_s1 + $0x20] ss:$8 sps:$4 sm:$0xff]  }
   0x3   :  { %2590 = vmatpush1.bf16.msra.mxu0 %v7205_v1  ;;  %v7212_v6 = vld [vmem:[%s11017_s1 + $0x34] ss:$8 sps:$4 sm:$0xff]   ;;  %v7214_v10 = vld [vmem:[%s11017_s1 + $0x30] ss:$8 sps:$4 sm:$0xff]   ;;  %v7215_v11 = vld [vmem:[%s11017_s1 + $0x44] ss:$8 sps:$4 sm:$0xff]   ;;  %v65_v12 = vunpack.c.0.s8 %v64_v8 }
   0x4   :  { %2591 = vmatprep.subr.bf16.mxu0 %v7206_v2  ;;  %v8470_v13 = vshrl.u32 %v66_v9, 7  ;;  %v7217_v14 = vld [vmem:[%s11017_s1 + $0x40] ss:$8 sps:$4 sm:$0xff]   ;;  %v7218_v15 = vld [vmem:[%s11017_s1 + $0x54] ss:$8 sps:$4 sm:$0xff]  }
   0x5   :  { %v7220_v17 = vld [vmem:[%s11017_s1 + $0x50] ss:$8 sps:$4 sm:$0xff]   ;;  %v7221_v18 = vld [vmem:[%s11017_s1 + $0x64] ss:$8 sps:$4 sm:$0xff]   ;;  %v7223_v21 = vld [vmem:[%s11017_s1 + $0x60] ss:$8 sps:$4 sm:$0xff]  }
   0x6   :  { %v8479_v16 = vsub.s32 %v65_v12, %v8470_v13  ;;  %v48_v19 = vld [vmem:[%s11016_s0] sm:$0xff]  ;;  %v7224_v22 = vld [vmem:[%s11017_s1 + $0x74] ss:$8 sps:$4 sm:$0xff]   ;;  %v7226_v25 = vld [vmem:[%s11017_s1 + $0x70] ss:$8 sps:$4 sm:$0xff]  }
   0x7   :  { %2592 = vmatpush1.bf16.msra.mxu0 %v7208_v3  ;;  %v7227_v26 = vld [vmem:[%s11017_s1 + $0x84] ss:$8 sps:$4 sm:$0xff]   ;;  %v7229_v27 = vld [vmem:[%s11017_s1 + $0x80] ss:$8 sps:$4 sm:$0xff]   ;;  %v7230_v28 = vld [vmem:[%s11017_s1 + $0x94] ss:$8 sps:$4 sm:$0xff]   ;;  %v62_v38 = vcombine.high %v48_v19, %v48_v19 }
   0x8   :  { %2593 = vmatprep.subr.bf16.mxu0 %v7209_v4  ;;  %v69_v20 = vrot.slane %v48_v19, %v8479_v16  ;;  %v7232_v29 = vld [vmem:[%s11017_s1 + $0x90] ss:$8 sps:$4 sm:$0xff]   ;;  %v7233_v30 = vld [vmem:[%s11017_s1 + $0xa4] ss:$8 sps:$4 sm:$0xff]   ;;  %v7235_v31 = vld [vmem:[%s11017_s1 + $0xa0] ss:$8 sps:$4 sm:$0xff]  }
   0x9   :  { %v7236_v32 = vld [vmem:[%s11017_s1 + $0xb4] ss:$8 sps:$4 sm:$0xff]   ;;  %v7238_v33 = vld [vmem:[%s11017_s1 + $0xb0] ss:$8 sps:$4 sm:$0xff]   ;;  %v7239_v34 = vld [vmem:[%s11017_s1 + $0xc4] ss:$8 sps:$4 sm:$0xff]   ;;  %v8543_v41 = vrot.slane %v62_v38, %v8479_v16 }
   0xa   :  { %v77_v23 = vcombine.high %v69_v20, %v69_v20  ;;  %v7241_v35 = vld [vmem:[%s11017_s1 + $0xc0] ss:$8 sps:$4 sm:$0xff]   ;;  %v7242_v36 = vld [vmem:[%s11017_s1 + $0xd4] ss:$8 sps:$4 sm:$0xff]   ;;  %v7244_v37 = vld [vmem:[%s11017_s1 + $0xd0] ss:$8 sps:$4 sm:$0xff]   ;;  %v196_v46 = vpack.c.bf16 %v69_v20, %v69_v20 }
   0xb   :  { %2594 = vmatpush1.bf16.msra.mxu0 %v7211_v5  ;;  %v7245_v39 = vld [vmem:[%s11017_s1 + $0xe4] ss:$8 sps:$4 sm:$0xff]   ;;  %v7247_v40 = vld [vmem:[%s11017_s1 + $0xe0] ss:$8 sps:$4 sm:$0xff]   ;;  %v7248_v42 = vld [vmem:[%s11017_s1 + $0xf4] ss:$8 sps:$4 sm:$0xff]   ;;  %v78_v44 = vcombine.high %v8543_v41, %v8543_v41 }
   0xc   :  { %2595 = vmatprep.subr.bf16.mxu0 %v7212_v6  ;;  %v197_v24 = vpack.c.bf16 %v77_v23, %v77_v23  ;;  %v7250_v43 = vld [vmem:[%s11017_s1 + $0xf0] ss:$8 sps:$4 sm:$0xff]   ;;  %v7254_v45 = vld [vmem:[%s11017_s1 + $0x104] ss:$8 sps:$4 sm:$0xff]   ;;  %v7252_v47 = vld [vmem:[%s11017_s1 + $0x100] ss:$8 sps:$4 sm:$0xff]  }
   0xd   :  { %v199_v48 = vpack.c.bf16 %v78_v44, %v78_v44  ;;  %v7257_v49 = vld [vmem:[%s11017_s1 + $0x114] ss:$8 sps:$4 sm:$0xff]   ;;  %v7255_v50 = vld [vmem:[%s11017_s1 + $0x110] ss:$8 sps:$4 sm:$0xff]   ;;  %v7260_v51 = vld [vmem:[%s11017_s1 + $0x124] ss:$8 sps:$4 sm:$0xff]  }
   0xe   :  { %2621 = vmatprep.mubr.bf16.mxu0 %v197_v24  ;;  %v7258_v52 = vld [vmem:[%s11017_s1 + $0x120] ss:$8 sps:$4 sm:$0xff]   ;;  %v7263_v53 = vld [vmem:[%s11017_s1 + $0x134] ss:$8 sps:$4 sm:$0xff]   ;;  %v7261_v54 = vld [vmem:[%s11017_s1 + $0x130] ss:$8 sps:$4 sm:$0xff]  }
   0xf   :  { %2596 = vmatpush1.bf16.msra.mxu0 %v7214_v10  ;;  %v7266_v55 = vld [vmem:[%s11017_s1 + $0x144] ss:$8 sps:$4 sm:$0xff]   ;;  %v7264_v56 = vld [vmem:[%s11017_s1 + $0x140] ss:$8 sps:$4 sm:$0xff]   ;;  %v7269_v57 = vld [vmem:[%s11017_s1 + $0x154] ss:$8 sps:$4 sm:$0xff]  }
  0x10   :  { %2597 = vmatprep.subr.bf16.mxu0 %v7215_v11  ;;  %v7267_v58 = vld [vmem:[%s11017_s1 + $0x150] ss:$8 sps:$4 sm:$0xff]   ;;  %v7272_v59 = vld [vmem:[%s11017_s1 + $0x164] ss:$8 sps:$4 sm:$0xff]   ;;  %v7270_v60 = vld [vmem:[%s11017_s1 + $0x160] ss:$8 sps:$4 sm:$0xff]  }
  0x11   :  { %v7275_v61 = vld [vmem:[%s11017_s1 + $0x174] ss:$8 sps:$4 sm:$0xff]   ;;  %v7273_v62 = vld [vmem:[%s11017_s1 + $0x170] ss:$8 sps:$4 sm:$0xff]   ;;  %v7278_v63 = vld [vmem:[%s11017_s1 + $0x184] ss:$8 sps:$4 sm:$0xff]  }
  0x12   :  { %v7276_v0 = vld [vmem:[%s11017_s1 + $0x180] ss:$8 sps:$4 sm:$0xff]   ;;  %v7281_v1 = vld [vmem:[%s11017_s1 + $0x194] ss:$8 sps:$4 sm:$0xff]   ;;  %v7279_v2 = vld [vmem:[%s11017_s1 + $0x190] ss:$8 sps:$4 sm:$0xff]  }
  0x13   :  { %2598 = vmatpush1.bf16.msra.mxu0 %v7217_v14  ;;  %v7284_v3 = vld [vmem:[%s11017_s1 + $0x1a4] ss:$8 sps:$4 sm:$0xff]   ;;  %v7282_v4 = vld [vmem:[%s11017_s1 + $0x1a0] ss:$8 sps:$4 sm:$0xff]   ;;  %v7287_v5 = vld [vmem:[%s11017_s1 + $0x1b4] ss:$8 sps:$4 sm:$0xff]  }
  0x14   :  { %2599 = vmatprep.subr.bf16.mxu0 %v7218_v15  ;;  %v7285_v6 = vld [vmem:[%s11017_s1 + $0x1b0] ss:$8 sps:$4 sm:$0xff]   ;;  %v7290_v7 = vld [vmem:[%s11017_s1 + $0x1c4] ss:$8 sps:$4 sm:$0xff]   ;;  %v7288_v8 = vld [vmem:[%s11017_s1 + $0x1c0] ss:$8 sps:$4 sm:$0xff]  }
  0x15   :  { %v7293_v9 = vld [vmem:[%s11017_s1 + $0x1d4] ss:$8 sps:$4 sm:$0xff]   ;;  %v7291_v10 = vld [vmem:[%s11017_s1 + $0x1d0] ss:$8 sps:$4 sm:$0xff]   ;;  %v7296_v11 = vld [vmem:[%s11017_s1 + $0x1e4] ss:$8 sps:$4 sm:$0xff]  }
  0x16   :  { %v8643_v12 = vld [vmem:[%s11016_s0 + $0x8] sm:$0xff]  ;;  %v7299_v15 = vld [vmem:[%s11017_s1 + $0x1f4] ss:$8 sps:$4 sm:$0xff]  }
  0x17   :  { %2600 = vmatpush1.bf16.msra.mxu0 %v7220_v17  ;;  %v7294_v14 = vld [vmem:[%s11017_s1 + $0x1e0] ss:$8 sps:$4 sm:$0xff]   ;;  %v8653_v17 = vrot.slane %v8643_v12, %v8479_v16  ;;  %v7302_v19 = vld [vmem:[%s11017_s1 + $0x204] ss:$8 sps:$4 sm:$0xff]   ;;  %v7305_v23 = vld [vmem:[%s11017_s1 + $0x214] ss:$8 sps:$4 sm:$0xff]  }
  0x18   :  { %2601 = vmatprep.subr.bf16.mxu0 %v7221_v18  ;;  %v7297_v18 = vld [vmem:[%s11017_s1 + $0x1f0] ss:$8 sps:$4 sm:$0xff]   ;;  %v7326_v38 = vld [vmem:[%s11017_s1 + $0x284] ss:$8 sps:$4 sm:$0xff]   ;;  %v7335_v44 = vld [vmem:[%s11017_s1 + $0x2b4] ss:$8 sps:$4 sm:$0xff]  }
  0x19   :  { %v94_v20 = vcombine.high %v8653_v17, %v8653_v17 }
  0x1b   :  { %2602 = vmatpush1.bf16.msra.mxu0 %v7223_v21  ;;  %v198_v21 = vpack.c.bf16 %v8543_v41, %v8543_v41  ;;  %v201_v24 = vpack.c.bf16 %v94_v20, %v94_v20  ;;  %v7327_v41 = vld [vmem:[%s11017_s1 + $0x290] ss:$8 sps:$4 sm:$0xff]  }
  0x1c   :  { %2603 = vmatprep.subr.bf16.mxu0 %v7224_v22  ;;  %v7300_v22 = vld [vmem:[%s11017_s1 + $0x200] ss:$8 sps:$4 sm:$0xff]   ;;  %v7381_v20 = vld [vmem:[%s11017_s1 + $0x3b0] ss:$8 sps:$4 sm:$0xff]  }
  0x1f   :  { %2604 = vmatpush1.bf16.msra.mxu0 %v7226_v25  ;;  %v7303_v25 = vld [vmem:[%s11017_s1 + $0x210] ss:$8 sps:$4 sm:$0xff]  }
  0x20   :  { %2605 = vmatprep.subr.bf16.mxu0 %v7227_v26  ;;  %v7308_v26 = vld [vmem:[%s11017_s1 + $0x224] ss:$8 sps:$4 sm:$0xff]  }
  0x23   :  { %2606 = vmatpush1.bf16.msra.mxu0 %v7229_v27  ;;  %v7306_v27 = vld [vmem:[%s11017_s1 + $0x220] ss:$8 sps:$4 sm:$0xff]  }
  0x24   :  { %2607 = vmatprep.subr.bf16.mxu0 %v7230_v28  ;;  %v7311_v28 = vld [vmem:[%s11017_s1 + $0x234] ss:$8 sps:$4 sm:$0xff]  }
  0x27   :  { %2608 = vmatpush1.bf16.msra.mxu0 %v7232_v29  ;;  %v7309_v29 = vld [vmem:[%s11017_s1 + $0x230] ss:$8 sps:$4 sm:$0xff]  }
  0x28   :  { %2609 = vmatprep.subr.bf16.mxu0 %v7233_v30  ;;  %v7314_v30 = vld [vmem:[%s11017_s1 + $0x244] ss:$8 sps:$4 sm:$0xff]  }
  0x2b   :  { %2610 = vmatpush1.bf16.msra.mxu0 %v7235_v31  ;;  %v7312_v31 = vld [vmem:[%s11017_s1 + $0x240] ss:$8 sps:$4 sm:$0xff]  }
  0x2c   :  { %2611 = vmatprep.subr.bf16.mxu0 %v7236_v32  ;;  %v7317_v32 = vld [vmem:[%s11017_s1 + $0x254] ss:$8 sps:$4 sm:$0xff]  }
  0x2f   :  { %2612 = vmatpush1.bf16.msra.mxu0 %v7238_v33  ;;  %v7315_v33 = vld [vmem:[%s11017_s1 + $0x250] ss:$8 sps:$4 sm:$0xff]  }
  0x30   :  { %2613 = vmatprep.subr.bf16.mxu0 %v7239_v34  ;;  %v7320_v34 = vld [vmem:[%s11017_s1 + $0x264] ss:$8 sps:$4 sm:$0xff]  }
  0x33   :  { %2614 = vmatpush1.bf16.msra.mxu0 %v7241_v35  ;;  %v7318_v35 = vld [vmem:[%s11017_s1 + $0x260] ss:$8 sps:$4 sm:$0xff]  }
  0x34   :  { %2615 = vmatprep.subr.bf16.mxu0 %v7242_v36  ;;  %v7323_v36 = vld [vmem:[%s11017_s1 + $0x274] ss:$8 sps:$4 sm:$0xff]  }
  0x37   :  { %2616 = vmatpush1.bf16.msra.mxu0 %v7244_v37  ;;  %v7321_v37 = vld [vmem:[%s11017_s1 + $0x270] ss:$8 sps:$4 sm:$0xff]  }
  0x38   :  { %2617 = vmatprep.subr.bf16.mxu0 %v7245_v39  ;;  %v7324_v39 = vld [vmem:[%s11017_s1 + $0x280] ss:$8 sps:$4 sm:$0xff]  }
  0x3b   :  { %2618 = vmatpush1.bf16.msra.mxu0 %v7247_v40  ;;  %v7329_v40 = vld [vmem:[%s11017_s1 + $0x294] ss:$8 sps:$4 sm:$0xff]  }
  0x3c   :  { %2619 = vmatprep.subr.bf16.mxu0 %v7248_v42  ;;  %v7332_v42 = vld [vmem:[%s11017_s1 + $0x2a4] ss:$8 sps:$4 sm:$0xff]  }
  0x3f   :  { %2620 = vmatpush1.bf16.msra.mxu0 %v7250_v43  ;;  %v7330_v43 = vld [vmem:[%s11017_s1 + $0x2a0] ss:$8 sps:$4 sm:$0xff]  }
  0x40   :  { %2630 = vmatprep.subr.bf16.mxu0 %v7254_v45  ;;  %v7333_v45 = vld [vmem:[%s11017_s1 + $0x2b0] ss:$8 sps:$4 sm:$0xff]  }
  0x42   :  { %2622 = vmatmul.mubr.bf16.vlgmr.msra.gmra.mrb[0].mxu0 %v196_v46  ;;  %v7338_v46 = vld [vmem:[%s11017_s1 + $0x2c4] ss:$8 sps:$4 sm:$0xff]  }
  0x43   :  { %2631 = vmatpush1.bf16.msra.mxu0 %v7252_v47  ;;  %2662 = vmatprep.mubr.bf16.mxu0 %v199_v48  ;;  %v7336_v47 = vld [vmem:[%s11017_s1 + $0x2c0] ss:$8 sps:$4 sm:$0xff]   ;;  %v7341_v48 = vld [vmem:[%s11017_s1 + $0x2d4] ss:$8 sps:$4 sm:$0xff]  }
  0x44   :  { %2632 = vmatprep.subr.bf16.mxu0 %v7257_v49  ;;  %v7339_v49 = vld [vmem:[%s11017_s1 + $0x2d0] ss:$8 sps:$4 sm:$0xff]  }
  0x47   :  { %2633 = vmatpush1.bf16.msra.mxu0 %v7255_v50  ;;  %v7344_v50 = vld [vmem:[%s11017_s1 + $0x2e4] ss:$8 sps:$4 sm:$0xff]  }
  0x48   :  { %2634 = vmatprep.subr.bf16.mxu0 %v7260_v51  ;;  %v79_v51 = vcombine.high %v8643_v12, %v8643_v12  ;;  %v7372_v12 = vld [vmem:[%s11017_s1 + $0x380] ss:$8 sps:$4 sm:$0xff]  }
  0x4b   :  { %2635 = vmatpush1.bf16.msra.mxu0 %v7258_v52  ;;  %v7342_v52 = vld [vmem:[%s11017_s1 + $0x2e0] ss:$8 sps:$4 sm:$0xff]  }
  0x4c   :  { %2636 = vmatprep.subr.bf16.mxu0 %v7263_v53  ;;  %v7347_v53 = vld [vmem:[%s11017_s1 + $0x2f4] ss:$8 sps:$4 sm:$0xff]  }
  0x4f   :  { %2637 = vmatpush1.bf16.msra.mxu0 %v7261_v54  ;;  %v8758_v54 = vrot.slane %v79_v51, %v8479_v16  ;;  %v7421_v51 = vld [vmem:[%s11017_s1 + $0x480] ss:$8 sps:$4 sm:$0xff]  }
  0x50   :  { %2638 = vmatprep.subr.bf16.mxu0 %v7266_v55  ;;  %v7345_v55 = vld [vmem:[%s11017_s1 + $0x2f0] ss:$8 sps:$4 sm:$0xff]  }
  0x53   :  { %2639 = vmatpush1.bf16.msra.mxu0 %v7264_v56  ;;  %v7350_v56 = vld [vmem:[%s11017_s1 + $0x304] ss:$8 sps:$4 sm:$0xff]  }
  0x54   :  { %2640 = vmatprep.subr.bf16.mxu0 %v7269_v57  ;;  %v95_v57 = vcombine.high %v8758_v54, %v8758_v54 }
  0x57   :  { %2641 = vmatpush1.bf16.msra.mxu0 %v7267_v58  ;;  %v200_v58 = vpack.c.bf16 %v8653_v17, %v8653_v17  ;;  %v7380_v17 = vld [vmem:[%s11017_s1 + $0x3a4] ss:$8 sps:$4 sm:$0xff]  }
  0x58   :  { %2642 = vmatprep.subr.bf16.mxu0 %v7272_v59  ;;  %v7348_v59 = vld [vmem:[%s11017_s1 + $0x300] ss:$8 sps:$4 sm:$0xff]  }
  0x5b   :  { %2643 = vmatpush1.bf16.msra.mxu0 %v7270_v60  ;;  %v7353_v60 = vld [vmem:[%s11017_s1 + $0x314] ss:$8 sps:$4 sm:$0xff]  }
  0x5c   :  { %2644 = vmatprep.subr.bf16.mxu0 %v7275_v61  ;;  %v203_v61 = vpack.c.bf16 %v95_v57, %v95_v57  ;;  %v7430_v57 = vld [vmem:[%s11017_s1 + $0x4b0] ss:$8 sps:$4 sm:$0xff]  }
  0x5f   :  { %2645 = vmatpush1.bf16.msra.mxu0 %v7273_v62  ;;  %v7351_v62 = vld [vmem:[%s11017_s1 + $0x310] ss:$8 sps:$4 sm:$0xff]  }
  0x60   :  { %2646 = vmatprep.subr.bf16.mxu0 %v7278_v63  ;;  %v7356_v63 = vld [vmem:[%s11017_s1 + $0x324] ss:$8 sps:$4 sm:$0xff]  }
  0x63   :  { %2647 = vmatpush1.bf16.msra.mxu0 %v7276_v0  ;;  %v7354_v0 = vld [vmem:[%s11017_s1 + $0x320] ss:$8 sps:$4 sm:$0xff]  }
  0x64   :  { %2648 = vmatprep.subr.bf16.mxu0 %v7281_v1  ;;  %v7359_v1 = vld [vmem:[%s11017_s1 + $0x334] ss:$8 sps:$4 sm:$0xff]  }
  0x67   :  { %2649 = vmatpush1.bf16.msra.mxu0 %v7279_v2  ;;  %v7357_v2 = vld [vmem:[%s11017_s1 + $0x330] ss:$8 sps:$4 sm:$0xff]  }
  0x68   :  { %2650 = vmatprep.subr.bf16.mxu0 %v7284_v3  ;;  %v7362_v3 = vld [vmem:[%s11017_s1 + $0x344] ss:$8 sps:$4 sm:$0xff]  }
  0x6b   :  { %2651 = vmatpush1.bf16.msra.mxu0 %v7282_v4  ;;  %v7360_v4 = vld [vmem:[%s11017_s1 + $0x340] ss:$8 sps:$4 sm:$0xff]  }
  0x6c   :  { %2652 = vmatprep.subr.bf16.mxu0 %v7287_v5  ;;  %v7365_v5 = vld [vmem:[%s11017_s1 + $0x354] ss:$8 sps:$4 sm:$0xff]  }
  0x6f   :  { %2653 = vmatpush1.bf16.msra.mxu0 %v7285_v6  ;;  %v7363_v6 = vld [vmem:[%s11017_s1 + $0x350] ss:$8 sps:$4 sm:$0xff]  }
  0x70   :  { %2654 = vmatprep.subr.bf16.mxu0 %v7290_v7  ;;  %v7368_v7 = vld [vmem:[%s11017_s1 + $0x364] ss:$8 sps:$4 sm:$0xff]  }
  0x73   :  { %2655 = vmatpush1.bf16.msra.mxu0 %v7288_v8  ;;  %v7366_v8 = vld [vmem:[%s11017_s1 + $0x360] ss:$8 sps:$4 sm:$0xff]  }
  0x74   :  { %2656 = vmatprep.subr.bf16.mxu0 %v7293_v9  ;;  %v7371_v9 = vld [vmem:[%s11017_s1 + $0x374] ss:$8 sps:$4 sm:$0xff]  }
  0x77   :  { %2657 = vmatpush1.bf16.msra.mxu0 %v7291_v10  ;;  %v7369_v10 = vld [vmem:[%s11017_s1 + $0x370] ss:$8 sps:$4 sm:$0xff]  }
  0x78   :  { %2658 = vmatprep.subr.bf16.mxu0 %v7296_v11  ;;  %v7374_v11 = vld [vmem:[%s11017_s1 + $0x384] ss:$8 sps:$4 sm:$0xff]  }
  0x7b   :  { %2659 = vmatpush1.bf16.msra.mxu0 %v7294_v14  ;;  %v7377_v14 = vld [vmem:[%s11017_s1 + $0x394] ss:$8 sps:$4 sm:$0xff]  }
  0x7c   :  { %2660 = vmatprep.subr.bf16.mxu0 %v7299_v15  ;;  %v7375_v15 = vld [vmem:[%s11017_s1 + $0x390] ss:$8 sps:$4 sm:$0xff]  }
  0x7f   :  { %2661 = vmatpush1.bf16.msra.mxu0 %v7297_v18  ;;  %v7378_v18 = vld [vmem:[%s11017_s1 + $0x3a0] ss:$8 sps:$4 sm:$0xff]  }
  0x80   :  { %2671 = vmatprep.subr.bf16.mxu0 %v7302_v19  ;;  %v7383_v19 = vld [vmem:[%s11017_s1 + $0x3b4] ss:$8 sps:$4 sm:$0xff]  }
  0x82   :  { %2663 = vmatmul.mubr.bf16.vlgmr.msra.gmra.mrb[0].mxu0 %v198_v21  ;;  %v7386_v21 = vld [vmem:[%s11017_s1 + $0x3c4] ss:$8 sps:$4 sm:$0xff]  }
  0x83   :  { %2672 = vmatpush1.bf16.msra.mxu0 %v7300_v22  ;;  %2703 = vmatprep.mubr.bf16.mxu0 %v201_v24  ;;  %v7384_v22 = vld [vmem:[%s11017_s1 + $0x3c0] ss:$8 sps:$4 sm:$0xff]   ;;  %v7387_v24 = vld [vmem:[%s11017_s1 + $0x3d0] ss:$8 sps:$4 sm:$0xff]  }
  0x84   :  { %2673 = vmatprep.subr.bf16.mxu0 %v7305_v23  ;;  %v7389_v23 = vld [vmem:[%s11017_s1 + $0x3d4] ss:$8 sps:$4 sm:$0xff]  }
  0x87   :  { %2674 = vmatpush1.bf16.msra.mxu0 %v7303_v25  ;;  %v7392_v25 = vld [vmem:[%s11017_s1 + $0x3e4] ss:$8 sps:$4 sm:$0xff]  }
  0x88   :  { %2675 = vmatprep.subr.bf16.mxu0 %v7308_v26  ;;  %v8857_v26 = vld [vmem:[%s11016_s0 + $0x10] sm:$0xff] }
  0x8b   :  { %2676 = vmatpush1.bf16.msra.mxu0 %v7306_v27  ;;  %v7390_v27 = vld [vmem:[%s11017_s1 + $0x3e0] ss:$8 sps:$4 sm:$0xff]  }
  0x8c   :  { %2677 = vmatprep.subr.bf16.mxu0 %v7311_v28  ;;  %v7395_v28 = vld [vmem:[%s11017_s1 + $0x3f4] ss:$8 sps:$4 sm:$0xff]  }
  0x8f   :  { %2678 = vmatpush1.bf16.msra.mxu0 %v7309_v29  ;;  %v8867_v29 = vrot.slane %v8857_v26, %v8479_v16 }
  0x90   :  { %2679 = vmatprep.subr.bf16.mxu0 %v7314_v30  ;;  %v7393_v30 = vld [vmem:[%s11017_s1 + $0x3f0] ss:$8 sps:$4 sm:$0xff]  }
  0x93   :  { %2680 = vmatpush1.bf16.msra.mxu0 %v7312_v31  ;;  %v7399_v31 = vld [vmem:[%s11017_s1 + $0x404] ss:$8 sps:$4 sm:$0xff]  }
  0x94   :  { %2681 = vmatprep.subr.bf16.mxu0 %v7317_v32  ;;  %v111_v32 = vcombine.high %v8867_v29, %v8867_v29 }
  0x97   :  { %2682 = vmatpush1.bf16.msra.mxu0 %v7315_v33  ;;  %v202_v33 = vpack.c.bf16 %v8758_v54, %v8758_v54  ;;  %v7429_v54 = vld [vmem:[%s11017_s1 + $0x4a4] ss:$8 sps:$4 sm:$0xff]  }
  0x98   :  { %2683 = vmatprep.subr.bf16.mxu0 %v7320_v34  ;;  %v7397_v34 = vld [vmem:[%s11017_s1 + $0x400] ss:$8 sps:$4 sm:$0xff]  }
  0x9b   :  { %2684 = vmatpush1.bf16.msra.mxu0 %v7318_v35  ;;  %v7402_v35 = vld [vmem:[%s11017_s1 + $0x414] ss:$8 sps:$4 sm:$0xff]  }
  0x9c   :  { %2685 = vmatprep.subr.bf16.mxu0 %v7323_v36  ;;  %v205_v36 = vpack.c.bf16 %v111_v32, %v111_v32  ;;  %v7478_v32 = vld [vmem:[%s11017_s1 + $0x5b0] ss:$8 sps:$4 sm:$0xff]  }
  0x9f   :  { %2686 = vmatpush1.bf16.msra.mxu0 %v7321_v37  ;;  %v7400_v37 = vld [vmem:[%s11017_s1 + $0x410] ss:$8 sps:$4 sm:$0xff]  }
  0xa0   :  { %2687 = vmatprep.subr.bf16.mxu0 %v7326_v38  ;;  %v7405_v38 = vld [vmem:[%s11017_s1 + $0x424] ss:$8 sps:$4 sm:$0xff]  }
  0xa3   :  { %2688 = vmatpush1.bf16.msra.mxu0 %v7324_v39  ;;  %v7403_v39 = vld [vmem:[%s11017_s1 + $0x420] ss:$8 sps:$4 sm:$0xff]  }
  0xa4   :  { %2689 = vmatprep.subr.bf16.mxu0 %v7329_v40  ;;  %v7408_v40 = vld [vmem:[%s11017_s1 + $0x434] ss:$8 sps:$4 sm:$0xff]  }
  0xa7   :  { %2690 = vmatpush1.bf16.msra.mxu0 %v7327_v41  ;;  %v7406_v41 = vld [vmem:[%s11017_s1 + $0x430] ss:$8 sps:$4 sm:$0xff]  }
  0xa8   :  { %2691 = vmatprep.subr.bf16.mxu0 %v7332_v42  ;;  %v7411_v42 = vld [vmem:[%s11017_s1 + $0x444] ss:$8 sps:$4 sm:$0xff]  }
  0xab   :  { %2692 = vmatpush1.bf16.msra.mxu0 %v7330_v43  ;;  %v7409_v43 = vld [vmem:[%s11017_s1 + $0x440] ss:$8 sps:$4 sm:$0xff]  }
  0xac   :  { %2693 = vmatprep.subr.bf16.mxu0 %v7335_v44  ;;  %v7414_v44 = vld [vmem:[%s11017_s1 + $0x454] ss:$8 sps:$4 sm:$0xff]  }
  0xaf   :  { %2694 = vmatpush1.bf16.msra.mxu0 %v7333_v45  ;;  %v7412_v45 = vld [vmem:[%s11017_s1 + $0x450] ss:$8 sps:$4 sm:$0xff]  }
  0xb0   :  { %2695 = vmatprep.subr.bf16.mxu0 %v7338_v46  ;;  %v7417_v46 = vld [vmem:[%s11017_s1 + $0x464] ss:$8 sps:$4 sm:$0xff]  }
  0xb3   :  { %2696 = vmatpush1.bf16.msra.mxu0 %v7336_v47  ;;  %v7415_v47 = vld [vmem:[%s11017_s1 + $0x460] ss:$8 sps:$4 sm:$0xff]  }
  0xb4   :  { %2697 = vmatprep.subr.bf16.mxu0 %v7341_v48  ;;  %v7420_v48 = vld [vmem:[%s11017_s1 + $0x474] ss:$8 sps:$4 sm:$0xff]  }
  0xb7   :  { %2698 = vmatpush1.bf16.msra.mxu0 %v7339_v49  ;;  %v7418_v49 = vld [vmem:[%s11017_s1 + $0x470] ss:$8 sps:$4 sm:$0xff]  }
  0xb8   :  { %2699 = vmatprep.subr.bf16.mxu0 %v7344_v50  ;;  %v7423_v50 = vld [vmem:[%s11017_s1 + $0x484] ss:$8 sps:$4 sm:$0xff]  }
  0xbb   :  { %2700 = vmatpush1.bf16.msra.mxu0 %v7342_v52  ;;  %v7426_v52 = vld [vmem:[%s11017_s1 + $0x494] ss:$8 sps:$4 sm:$0xff]  }
  0xbc   :  { %2701 = vmatprep.subr.bf16.mxu0 %v7347_v53  ;;  %v7424_v53 = vld [vmem:[%s11017_s1 + $0x490] ss:$8 sps:$4 sm:$0xff]  }
  0xbf   :  { %2702 = vmatpush1.bf16.msra.mxu0 %v7345_v55  ;;  %v7427_v55 = vld [vmem:[%s11017_s1 + $0x4a0] ss:$8 sps:$4 sm:$0xff]  }
  0xc0   :  { %2712 = vmatprep.subr.bf16.mxu0 %v7350_v56  ;;  %v7432_v56 = vld [vmem:[%s11017_s1 + $0x4b4] ss:$8 sps:$4 sm:$0xff]  }
  0xc2   :  { %2704 = vmatmul.mubr.bf16.vlgmr.msra.gmra.mrb[0].mxu0 %v200_v58  ;;  %v7435_v58 = vld [vmem:[%s11017_s1 + $0x4c4] ss:$8 sps:$4 sm:$0xff]  }
  0xc3   :  { %2713 = vmatpush1.bf16.msra.mxu0 %v7348_v59  ;;  %2744 = vmatprep.mubr.bf16.mxu0 %v203_v61  ;;  %v7433_v59 = vld [vmem:[%s11017_s1 + $0x4c0] ss:$8 sps:$4 sm:$0xff]   ;;  %v7436_v61 = vld [vmem:[%s11017_s1 + $0x4d0] ss:$8 sps:$4 sm:$0xff]  }
  0xc4   :  { %2714 = vmatprep.subr.bf16.mxu0 %v7353_v60  ;;  %v7438_v60 = vld [vmem:[%s11017_s1 + $0x4d4] ss:$8 sps:$4 sm:$0xff]  }
  0xc7   :  { %2715 = vmatpush1.bf16.msra.mxu0 %v7351_v62  ;;  %v7441_v62 = vld [vmem:[%s11017_s1 + $0x4e4] ss:$8 sps:$4 sm:$0xff]  }
  0xc8   :  { %2716 = vmatprep.subr.bf16.mxu0 %v7356_v63  ;;  %v96_v63 = vcombine.high %v8857_v26, %v8857_v26  ;;  %v7469_v26 = vld [vmem:[%s11017_s1 + $0x580] ss:$8 sps:$4 sm:$0xff]  }
  0xcb   :  { %2717 = vmatpush1.bf16.msra.mxu0 %v7354_v0  ;;  %v7439_v0 = vld [vmem:[%s11017_s1 + $0x4e0] ss:$8 sps:$4 sm:$0xff]  }
  0xcc   :  { %2718 = vmatprep.subr.bf16.mxu0 %v7359_v1  ;;  %v7444_v1 = vld [vmem:[%s11017_s1 + $0x4f4] ss:$8 sps:$4 sm:$0xff]  }
  0xcf   :  { %2719 = vmatpush1.bf16.msra.mxu0 %v7357_v2  ;;  %v8972_v2 = vrot.slane %v96_v63, %v8479_v16 }
  0xd0   :  { %2720 = vmatprep.subr.bf16.mxu0 %v7362_v3  ;;  %v7442_v3 = vld [vmem:[%s11017_s1 + $0x4f0] ss:$8 sps:$4 sm:$0xff]  }
  0xd3   :  { %2721 = vmatpush1.bf16.msra.mxu0 %v7360_v4  ;;  %v7447_v4 = vld [vmem:[%s11017_s1 + $0x504] ss:$8 sps:$4 sm:$0xff]  }
  0xd4   :  { %2722 = vmatprep.subr.bf16.mxu0 %v7365_v5  ;;  %v112_v5 = vcombine.high %v8972_v2, %v8972_v2 }
  0xd7   :  { %2723 = vmatpush1.bf16.msra.mxu0 %v7363_v6  ;;  %v204_v6 = vpack.c.bf16 %v8867_v29, %v8867_v29  ;;  %v7477_v29 = vld [vmem:[%s11017_s1 + $0x5a4] ss:$8 sps:$4 sm:$0xff]  }
  0xd8   :  { %2724 = vmatprep.subr.bf16.mxu0 %v7368_v7  ;;  %v7445_v7 = vld [vmem:[%s11017_s1 + $0x500] ss:$8 sps:$4 sm:$0xff]  }
  0xdb   :  { %2725 = vmatpush1.bf16.msra.mxu0 %v7366_v8  ;;  %v7450_v8 = vld [vmem:[%s11017_s1 + $0x514] ss:$8 sps:$4 sm:$0xff]  }
  0xdc   :  { %2726 = vmatprep.subr.bf16.mxu0 %v7371_v9  ;;  %v207_v9 = vpack.c.bf16 %v112_v5, %v112_v5 }
  0xdf   :  { %2727 = vmatpush1.bf16.msra.mxu0 %v7369_v10  ;;  %v7448_v10 = vld [vmem:[%s11017_s1 + $0x510] ss:$8 sps:$4 sm:$0xff]  }
  0xe0   :  { %2728 = vmatprep.subr.bf16.mxu0 %v7374_v11  ;;  %v7453_v11 = vld [vmem:[%s11017_s1 + $0x524] ss:$8 sps:$4 sm:$0xff]  }
  0xe3   :  { %2729 = vmatpush1.bf16.msra.mxu0 %v7372_v12  ;;  %v7451_v12 = vld [vmem:[%s11017_s1 + $0x520] ss:$8 sps:$4 sm:$0xff]  }
  0xe4   :  { %2730 = vmatprep.subr.bf16.mxu0 %v7377_v14  ;;  %v7456_v14 = vld [vmem:[%s11017_s1 + $0x534] ss:$8 sps:$4 sm:$0xff]  }
  0xe7   :  { %2731 = vmatpush1.bf16.msra.mxu0 %v7375_v15  ;;  %v7454_v15 = vld [vmem:[%s11017_s1 + $0x530] ss:$8 sps:$4 sm:$0xff]  }
  0xe8   :  { %2732 = vmatprep.subr.bf16.mxu0 %v7380_v17  ;;  %v7459_v17 = vld [vmem:[%s11017_s1 + $0x544] ss:$8 sps:$4 sm:$0xff]  }
  0xeb   :  { %2733 = vmatpush1.bf16.msra.mxu0 %v7378_v18  ;;  %v7457_v18 = vld [vmem:[%s11017_s1 + $0x540] ss:$8 sps:$4 sm:$0xff]  }
  0xec   :  { %2734 = vmatprep.subr.bf16.mxu0 %v7383_v19  ;;  %v7462_v19 = vld [vmem:[%s11017_s1 + $0x554] ss:$8 sps:$4 sm:$0xff]  }
  0xef   :  { %2735 = vmatpush1.bf16.msra.mxu0 %v7381_v20  ;;  %v7460_v20 = vld [vmem:[%s11017_s1 + $0x550] ss:$8 sps:$4 sm:$0xff]  }
  0xf0   :  { %2736 = vmatprep.subr.bf16.mxu0 %v7386_v21  ;;  %v7465_v21 = vld [vmem:[%s11017_s1 + $0x564] ss:$8 sps:$4 sm:$0xff]  }
  0xf3   :  { %2737 = vmatpush1.bf16.msra.mxu0 %v7384_v22  ;;  %v7463_v22 = vld [vmem:[%s11017_s1 + $0x560] ss:$8 sps:$4 sm:$0xff]  }
  0xf4   :  { %2738 = vmatprep.subr.bf16.mxu0 %v7389_v23  ;;  %v7468_v23 = vld [vmem:[%s11017_s1 + $0x574] ss:$8 sps:$4 sm:$0xff]  }
  0xf7   :  { %2739 = vmatpush1.bf16.msra.mxu0 %v7387_v24  ;;  %v7466_v24 = vld [vmem:[%s11017_s1 + $0x570] ss:$8 sps:$4 sm:$0xff]  }
  0xf8   :  { %2740 = vmatprep.subr.bf16.mxu0 %v7392_v25  ;;  %v7471_v25 = vld [vmem:[%s11017_s1 + $0x584] ss:$8 sps:$4 sm:$0xff]  }
  0xfb   :  { %2741 = vmatpush1.bf16.msra.mxu0 %v7390_v27  ;;  %v7474_v27 = vld [vmem:[%s11017_s1 + $0x594] ss:$8 sps:$4 sm:$0xff]  }
  0xfc   :  { %2742 = vmatprep.subr.bf16.mxu0 %v7395_v28  ;;  %v7472_v28 = vld [vmem:[%s11017_s1 + $0x590] ss:$8 sps:$4 sm:$0xff]  }
  0xff   :  { %2743 = vmatpush1.bf16.msra.mxu0 %v7393_v30  ;;  %v7475_v30 = vld [vmem:[%s11017_s1 + $0x5a0] ss:$8 sps:$4 sm:$0xff]  }
 0x100   :  { %2753 = vmatprep.subr.bf16.mxu0 %v7399_v31  ;;  %v7480_v31 = vld [vmem:[%s11017_s1 + $0x5b4] ss:$8 sps:$4 sm:$0xff]  }
 0x102   :  { %2745 = vmatmul.mubr.bf16.vlgmr.msra.gmra.mrb[0].mxu0 %v202_v33  ;;  %v7483_v33 = vld [vmem:[%s11017_s1 + $0x5c4] ss:$8 sps:$4 sm:$0xff]  }
 0x103   :  { %2754 = vmatpush1.bf16.msra.mxu0 %v7397_v34  ;;  %2785 = vmatprep.mubr.bf16.mxu0 %v205_v36 }
 0x104   :  { %2755 = vmatprep.subr.bf16.mxu0 %v7402_v35 }
 0x107   :  { %2756 = vmatpush1.bf16.msra.mxu0 %v7400_v37 }
 0x108   :  { %2757 = vmatprep.subr.bf16.mxu0 %v7405_v38 }
 0x10b   :  { %2758 = vmatpush1.bf16.msra.mxu0 %v7403_v39 }
 0x10c   :  { %2759 = vmatprep.subr.bf16.mxu0 %v7408_v40 }
 0x10f   :  { %2760 = vmatpush1.bf16.msra.mxu0 %v7406_v41 }
 0x110   :  { %2761 = vmatprep.subr.bf16.mxu0 %v7411_v42 }
 0x113   :  { %2762 = vmatpush1.bf16.msra.mxu0 %v7409_v43 }
 0x114   :  { %2763 = vmatprep.subr.bf16.mxu0 %v7414_v44 }
 0x117   :  { %2764 = vmatpush1.bf16.msra.mxu0 %v7412_v45 }
 0x118   :  { %2765 = vmatprep.subr.bf16.mxu0 %v7417_v46 }
 0x11b   :  { %2766 = vmatpush1.bf16.msra.mxu0 %v7415_v47 }
 0x11c   :  { %2767 = vmatprep.subr.bf16.mxu0 %v7420_v48 }
 0x11f   :  { %2768 = vmatpush1.bf16.msra.mxu0 %v7418_v49 }
 0x120   :  { %2769 = vmatprep.subr.bf16.mxu0 %v7423_v50 }
 0x123   :  { %2770 = vmatpush1.bf16.msra.mxu0 %v7421_v51 }
 0x124   :  { %2771 = vmatprep.subr.bf16.mxu0 %v7426_v52 }
 0x127   :  { %2772 = vmatpush1.bf16.msra.mxu0 %v7424_v53 }
 0x128   :  { %2773 = vmatprep.subr.bf16.mxu0 %v7429_v54 }
 0x12b   :  { %2774 = vmatpush1.bf16.msra.mxu0 %v7427_v55 }
 0x12c   :  { %2775 = vmatprep.subr.bf16.mxu0 %v7432_v56 }
 0x12f   :  { %2776 = vmatpush1.bf16.msra.mxu0 %v7430_v57 }
 0x130   :  { %2777 = vmatprep.subr.bf16.mxu0 %v7435_v58 }
 0x133   :  { %2778 = vmatpush1.bf16.msra.mxu0 %v7433_v59 }
 0x134   :  { %2779 = vmatprep.subr.bf16.mxu0 %v7438_v60 }
 0x137   :  { %2780 = vmatpush1.bf16.msra.mxu0 %v7436_v61 }
 0x138   :  { %2781 = vmatprep.subr.bf16.mxu0 %v7441_v62 }
 0x13b   :  { %2782 = vmatpush1.bf16.msra.mxu0 %v7439_v0 }
 0x13c   :  { %2783 = vmatprep.subr.bf16.mxu0 %v7444_v1 }
 0x13f   :  { %2784 = vmatpush1.bf16.msra.mxu0 %v7442_v3 }
 0x140   :  { %2794 = vmatprep.subr.bf16.mxu0 %v7447_v4 }
 0x142   :  { %2786 = vmatmul.mubr.bf16.vlgmr.msra.gmra.mrb[0].mxu0 %v204_v6 }
 0x143   :  { %2795 = vmatpush1.bf16.msra.mxu0 %v7445_v7  ;;  %2826 = vmatprep.mubr.bf16.mxu0 %v207_v9 }
 0x144   :  { %2796 = vmatprep.subr.bf16.mxu0 %v7450_v8 }
 0x147   :  { %2797 = vmatpush1.bf16.msra.mxu0 %v7448_v10 }
 0x148   :  { %2798 = vmatprep.subr.bf16.mxu0 %v7453_v11 }
 0x14b   :  { %2799 = vmatpush1.bf16.msra.mxu0 %v7451_v12 }
 0x14c   :  { %2800 = vmatprep.subr.bf16.mxu0 %v7456_v14 }
 0x14f   :  { %2801 = vmatpush1.bf16.msra.mxu0 %v7454_v15 }
 0x150   :  { %2802 = vmatprep.subr.bf16.mxu0 %v7459_v17 }
 0x153   :  { %2803 = vmatpush1.bf16.msra.mxu0 %v7457_v18 }
 0x154   :  { %2804 = vmatprep.subr.bf16.mxu0 %v7462_v19 }
 0x157   :  { %2805 = vmatpush1.bf16.msra.mxu0 %v7460_v20 }
 0x158   :  { %2806 = vmatprep.subr.bf16.mxu0 %v7465_v21 }
 0x15b   :  { %2807 = vmatpush1.bf16.msra.mxu0 %v7463_v22 }
 0x15c   :  { %2808 = vmatprep.subr.bf16.mxu0 %v7468_v23 }
 0x15f   :  { %2809 = vmatpush1.bf16.msra.mxu0 %v7466_v24 }
 0x160   :  { %2810 = vmatprep.subr.bf16.mxu0 %v7471_v25 }
 0x163   :  { %2811 = vmatpush1.bf16.msra.mxu0 %v7469_v26 }
 0x164   :  { %2812 = vmatprep.subr.bf16.mxu0 %v7474_v27 }
 0x167   :  { %2813 = vmatpush1.bf16.msra.mxu0 %v7472_v28 }
 0x168   :  { %2814 = vmatprep.subr.bf16.mxu0 %v7477_v29 }
 0x16b   :  { %2815 = vmatpush1.bf16.msra.mxu0 %v7475_v30 }
 0x16c   :  { %2816 = vmatprep.subr.bf16.mxu0 %v7480_v31 }
 0x16d   :  { %20 = vsyncpa [#allocation3], 0  ;;  %v7481_v34 = vld [vmem:[%s11017_s1 + $0x5c0] ss:$8 sps:$4 sm:$0xff]   ;;  %v7486_v35 = vld [vmem:[%s11017_s1 + $0x5d4] ss:$8 sps:$4 sm:$0xff]   ;;  %v206_v45 = vpack.c.bf16 %v8972_v2, %v8972_v2 }
 0x16e   :  { %v7484_v36 = vld [vmem:[%s11017_s1 + $0x5d0] ss:$8 sps:$4 sm:$0xff]   ;;  %v7489_v37 = vld [vmem:[%s11017_s1 + $0x5e4] ss:$8 sps:$4 sm:$0xff]   ;;  %v7487_v39 = vld [vmem:[%s11017_s1 + $0x5e0] ss:$8 sps:$4 sm:$0xff]  }
 0x16f   :  { %2817 = vmatpush1.bf16.msra.mxu0 %v7478_v32  ;;  %v9071_v38 = vld [vmem:[%s11016_s0 + $0x18] sm:$0xff]  ;;  %v7496_v44 = vld [vmem:[%s11017_s1 + $0x604] ss:$8 sps:$4 sm:$0xff]   ;;  %v7494_v46 = vld [vmem:[%s11017_s1 + $0x600] ss:$8 sps:$4 sm:$0xff]   ;;  %vm2585_vm0 = vcmask 523264  }
 0x170   :  { %2818 = vmatprep.subr.bf16.mxu0 %v7483_v33  ;;  %v9078_v40 = vrot.slane %v9071_v38, %v8479_v16  ;;  %v7492_v41 = vld [vmem:[%s11017_s1 + $0x5f4] ss:$8 sps:$4 sm:$0xff]   ;;  %v7490_v42 = vld [vmem:[%s11017_s1 + $0x5f0] ss:$8 sps:$4 sm:$0xff]   ;;  %v7502_v50 = vld [vmem:[%s11017_s1 + $0x624] ss:$8 sps:$4 sm:$0xff]   ;;  %v113_v10 = vcombine.high %v9071_v38, %v9071_v38 }
 0x171   :  { %v7499_v48 = vld [vmem:[%s11017_s1 + $0x614] ss:$8 sps:$4 sm:$0xff]   ;;  %v7497_v49 = vld [vmem:[%s11017_s1 + $0x610] ss:$8 sps:$4 sm:$0xff]   ;;  %v7500_v51 = vld [vmem:[%s11017_s1 + $0x620] ss:$8 sps:$4 sm:$0xff]  }
 0x172   :  { %v128_v43 = vcombine.high %v9078_v40, %v9078_v40  ;;  %v7505_v52 = vld [vmem:[%s11017_s1 + $0x634] ss:$8 sps:$4 sm:$0xff]   ;;  %v7503_v53 = vld [vmem:[%s11017_s1 + $0x630] ss:$8 sps:$4 sm:$0xff]   ;;  %v7508_v54 = vld [vmem:[%s11017_s1 + $0x644] ss:$8 sps:$4 sm:$0xff]   ;;  %v9183_v14 = vrot.slane %v113_v10, %v8479_v16  ;;  %v208_v20 = vpack.c.bf16 %v9078_v40, %v9078_v40 }
 0x173   :  { %2819 = vmatpush1.bf16.msra.mxu0 %v7481_v34  ;;  %v7506_v55 = vld [vmem:[%s11017_s1 + $0x640] ss:$8 sps:$4 sm:$0xff]   ;;  %v7511_v56 = vld [vmem:[%s11017_s1 + $0x654] ss:$8 sps:$4 sm:$0xff]   ;;  %v7509_v57 = vld [vmem:[%s11017_s1 + $0x650] ss:$8 sps:$4 sm:$0xff]  }
 0x174   :  { %2820 = vmatprep.subr.bf16.mxu0 %v7486_v35  ;;  %v209_v47 = vpack.c.bf16 %v128_v43, %v128_v43  ;;  %v7514_v58 = vld [vmem:[%s11017_s1 + $0x664] ss:$8 sps:$4 sm:$0xff]   ;;  %v7512_v59 = vld [vmem:[%s11017_s1 + $0x660] ss:$8 sps:$4 sm:$0xff]   ;;  %v7517_v60 = vld [vmem:[%s11017_s1 + $0x674] ss:$8 sps:$4 sm:$0xff]   ;;  %v129_v18 = vcombine.high %v9183_v14, %v9183_v14 }
 0x175   :  { %v7515_v61 = vld [vmem:[%s11017_s1 + $0x670] ss:$8 sps:$4 sm:$0xff]   ;;  %v7520_v62 = vld [vmem:[%s11017_s1 + $0x684] ss:$8 sps:$4 sm:$0xff]   ;;  %v7518_v63 = vld [vmem:[%s11017_s1 + $0x680] ss:$8 sps:$4 sm:$0xff]  }
 0x176   :  { %v7523_v0 = vld [vmem:[%s11017_s1 + $0x694] ss:$8 sps:$4 sm:$0xff]   ;;  %v7521_v1 = vld [vmem:[%s11017_s1 + $0x690] ss:$8 sps:$4 sm:$0xff]   ;;  %v7526_v2 = vld [vmem:[%s11017_s1 + $0x6a4] ss:$8 sps:$4 sm:$0xff]   ;;  %v211_v22 = vpack.c.bf16 %v129_v18, %v129_v18 }
 0x177   :  { %2821 = vmatpush1.bf16.msra.mxu0 %v7484_v36  ;;  %v7524_v3 = vld [vmem:[%s11017_s1 + $0x6a0] ss:$8 sps:$4 sm:$0xff]   ;;  %v7529_v4 = vld [vmem:[%s11017_s1 + $0x6b4] ss:$8 sps:$4 sm:$0xff]   ;;  %v7527_v5 = vld [vmem:[%s11017_s1 + $0x6b0] ss:$8 sps:$4 sm:$0xff]  }
 0x178   :  { %2822 = vmatprep.subr.bf16.mxu0 %v7489_v37  ;;  %v7532_v6 = vld [vmem:[%s11017_s1 + $0x6c4] ss:$8 sps:$4 sm:$0xff]   ;;  %v7530_v7 = vld [vmem:[%s11017_s1 + $0x6c0] ss:$8 sps:$4 sm:$0xff]   ;;  %v7535_v8 = vld [vmem:[%s11017_s1 + $0x6d4] ss:$8 sps:$4 sm:$0xff]  }
 0x179   :  { %v7533_v9 = vld [vmem:[%s11017_s1 + $0x6d0] ss:$8 sps:$4 sm:$0xff]   ;;  %v7538_v11 = vld [vmem:[%s11017_s1 + $0x6e4] ss:$8 sps:$4 sm:$0xff]   ;;  %v7536_v12 = vld [vmem:[%s11017_s1 + $0x6e0] ss:$8 sps:$4 sm:$0xff]  }
 0x17a   :  { %v7541_v15 = vld [vmem:[%s11017_s1 + $0x6f4] ss:$8 sps:$4 sm:$0xff]   ;;  %v7539_v17 = vld [vmem:[%s11017_s1 + $0x6f0] ss:$8 sps:$4 sm:$0xff]   ;;  %v7544_v19 = vld [vmem:[%s11017_s1 + $0x704] ss:$8 sps:$4 sm:$0xff]  }
 0x17b   :  { %2823 = vmatpush1.bf16.msra.mxu0 %v7487_v39  ;;  %v7542_v21 = vld [vmem:[%s11017_s1 + $0x700] ss:$8 sps:$4 sm:$0xff]   ;;  %v7547_v23 = vld [vmem:[%s11017_s1 + $0x714] ss:$8 sps:$4 sm:$0xff]   ;;  %v7545_v24 = vld [vmem:[%s11017_s1 + $0x710] ss:$8 sps:$4 sm:$0xff]  }
 0x17c   :  { %2824 = vmatprep.subr.bf16.mxu0 %v7492_v41  ;;  %v7550_v25 = vld [vmem:[%s11017_s1 + $0x724] ss:$8 sps:$4 sm:$0xff]   ;;  %v7548_v26 = vld [vmem:[%s11017_s1 + $0x720] ss:$8 sps:$4 sm:$0xff]   ;;  %v7553_v27 = vld [vmem:[%s11017_s1 + $0x734] ss:$8 sps:$4 sm:$0xff]  }
 0x17d   :  { %v7551_v28 = vld [vmem:[%s11017_s1 + $0x730] ss:$8 sps:$4 sm:$0xff]   ;;  %v7556_v29 = vld [vmem:[%s11017_s1 + $0x744] ss:$8 sps:$4 sm:$0xff]   ;;  %v7554_v30 = vld [vmem:[%s11017_s1 + $0x740] ss:$8 sps:$4 sm:$0xff]  }
 0x17e   :  { %v7559_v31 = vld [vmem:[%s11017_s1 + $0x754] ss:$8 sps:$4 sm:$0xff]   ;;  %v7557_v32 = vld [vmem:[%s11017_s1 + $0x750] ss:$8 sps:$4 sm:$0xff]   ;;  %v7562_v33 = vld [vmem:[%s11017_s1 + $0x764] ss:$8 sps:$4 sm:$0xff]  }
 0x17f   :  { %2825 = vmatpush1.bf16.msra.mxu0 %v7490_v42  ;;  %v7560_v34 = vld [vmem:[%s11017_s1 + $0x760] ss:$8 sps:$4 sm:$0xff]   ;;  %v7565_v35 = vld [vmem:[%s11017_s1 + $0x774] ss:$8 sps:$4 sm:$0xff]   ;;  %v7563_v36 = vld [vmem:[%s11017_s1 + $0x770] ss:$8 sps:$4 sm:$0xff]  }
 0x180   :  { %2835 = vmatprep.subr.bf16.mxu0 %v7496_v44  ;;  %v7568_v37 = vld [vmem:[%s11017_s1 + $0x784] ss:$8 sps:$4 sm:$0xff]   ;;  %v7566_v38 = vld [vmem:[%s11017_s1 + $0x780] ss:$8 sps:$4 sm:$0xff]   ;;  %v7571_v39 = vld [vmem:[%s11017_s1 + $0x794] ss:$8 sps:$4 sm:$0xff]  }
 0x181   :  { %v7569_v40 = vld [vmem:[%s11017_s1 + $0x790] ss:$8 sps:$4 sm:$0xff]   ;;  %v7574_v41 = vld [vmem:[%s11017_s1 + $0x7a4] ss:$8 sps:$4 sm:$0xff]   ;;  %v7572_v42 = vld [vmem:[%s11017_s1 + $0x7a0] ss:$8 sps:$4 sm:$0xff]  }
 0x182   :  { %2827 = vmatmul.mubr.bf16.vlgmr.msra.gmra.mrb[0].mxu0 %v206_v45  ;;  %v7577_v43 = vld [vmem:[%s11017_s1 + $0x7b4] ss:$8 sps:$4 sm:$0xff]   ;;  %v7575_v44 = vld [vmem:[%s11017_s1 + $0x7b0] ss:$8 sps:$4 sm:$0xff]   ;;  %v7580_v45 = vld [vmem:[%s11017_s1 + $0x7c4] ss:$8 sps:$4 sm:$0xff]  }
 0x183   :  { %2836 = vmatpush1.bf16.msra.mxu0 %v7494_v46  ;;  %2867 = vmatprep.mubr.bf16.mxu0 %v209_v47  ;;  %v7578_v46 = vld [vmem:[%s11017_s1 + $0x7c0] ss:$8 sps:$4 sm:$0xff]   ;;  %v7583_v47 = vld [vmem:[%s11017_s1 + $0x7d4] ss:$8 sps:$4 sm:$0xff]   ;;  %v7617_v10 = vld [vmem:[%s11017_s1 + $0x884] ss:$8 sps:$4 sm:$0xff]  }
 0x184   :  { %2837 = vmatprep.subr.bf16.mxu0 %v7499_v48  ;;  %v7581_v48 = vld [vmem:[%s11017_s1 + $0x7d0] ss:$8 sps:$4 sm:$0xff]   ;;  %v7626_v18 = vld [vmem:[%s11017_s1 + $0x8b4] ss:$8 sps:$4 sm:$0xff]   ;;  %vm4927_vm1 = vcmask 41984  }
 0x187   :  { %2838 = vmatpush1.bf16.msra.mxu0 %v7497_v49  ;;  %v7586_v49 = vld [vmem:[%s11017_s1 + $0x7e4] ss:$8 sps:$4 sm:$0xff]  }
 0x188   :  { %2839 = vmatprep.subr.bf16.mxu0 %v7502_v50  ;;  %v9285_v50 = vld [vmem:[%s11016_s0 + $0x20] sm:$0xff] }
 0x18b   :  { %2840 = vmatpush1.bf16.msra.mxu0 %v7500_v51  ;;  %v7584_v51 = vld [vmem:[%s11017_s1 + $0x7e0] ss:$8 sps:$4 sm:$0xff]  }
 0x18c   :  { %2841 = vmatprep.subr.bf16.mxu0 %v7505_v52  ;;  %v9292_v52 = vrot.slane %v9285_v50, %v8479_v16 }
 0x18f   :  { %2842 = vmatpush1.bf16.msra.mxu0 %v7503_v53  ;;  %v7589_v53 = vld [vmem:[%s11017_s1 + $0x7f4] ss:$8 sps:$4 sm:$0xff]  }
 0x190   :  { %2843 = vmatprep.subr.bf16.mxu0 %v7508_v54  ;;  %v7587_v54 = vld [vmem:[%s11017_s1 + $0x7f0] ss:$8 sps:$4 sm:$0xff]  }
 0x193   :  { %2844 = vmatpush1.bf16.msra.mxu0 %v7506_v55  ;;  %v145_v55 = vcombine.high %v9292_v52, %v9292_v52 }
 0x194   :  { %2845 = vmatprep.subr.bf16.mxu0 %v7511_v56  ;;  %v7593_v56 = vld [vmem:[%s11017_s1 + $0x804] ss:$8 sps:$4 sm:$0xff]  }
 0x197   :  { %2846 = vmatpush1.bf16.msra.mxu0 %v7509_v57  ;;  %v210_v57 = vpack.c.bf16 %v9183_v14, %v9183_v14  ;;  %v7618_v14 = vld [vmem:[%s11017_s1 + $0x890] ss:$8 sps:$4 sm:$0xff]  }
 0x198   :  { %2847 = vmatprep.subr.bf16.mxu0 %v7514_v58  ;;  %v7591_v58 = vld [vmem:[%s11017_s1 + $0x800] ss:$8 sps:$4 sm:$0xff]  }
 0x19b   :  { %2848 = vmatpush1.bf16.msra.mxu0 %v7512_v59  ;;  %v213_v59 = vpack.c.bf16 %v145_v55, %v145_v55  ;;  %v7674_v55 = vld [vmem:[%s11017_s1 + $0x9b4] ss:$8 sps:$4 sm:$0xff]  }
 0x19c   :  { %2849 = vmatprep.subr.bf16.mxu0 %v7517_v60  ;;  %v7596_v60 = vld [vmem:[%s11017_s1 + $0x814] ss:$8 sps:$4 sm:$0xff]  }
 0x19f   :  { %2850 = vmatpush1.bf16.msra.mxu0 %v7515_v61  ;;  %v7594_v61 = vld [vmem:[%s11017_s1 + $0x810] ss:$8 sps:$4 sm:$0xff]  }
 0x1a0   :  { %2851 = vmatprep.subr.bf16.mxu0 %v7520_v62  ;;  %v7599_v62 = vld [vmem:[%s11017_s1 + $0x824] ss:$8 sps:$4 sm:$0xff]  }
 0x1a3   :  { %2852 = vmatpush1.bf16.msra.mxu0 %v7518_v63  ;;  %v7597_v63 = vld [vmem:[%s11017_s1 + $0x820] ss:$8 sps:$4 sm:$0xff]  }
 0x1a4   :  { %2853 = vmatprep.subr.bf16.mxu0 %v7523_v0  ;;  %v7602_v0 = vld [vmem:[%s11017_s1 + $0x834] ss:$8 sps:$4 sm:$0xff]  }
 0x1a7   :  { %2854 = vmatpush1.bf16.msra.mxu0 %v7521_v1  ;;  %v7600_v1 = vld [vmem:[%s11017_s1 + $0x830] ss:$8 sps:$4 sm:$0xff]  }
 0x1a8   :  { %2855 = vmatprep.subr.bf16.mxu0 %v7526_v2  ;;  %v7605_v2 = vld [vmem:[%s11017_s1 + $0x844] ss:$8 sps:$4 sm:$0xff]  }
 0x1ab   :  { %2856 = vmatpush1.bf16.msra.mxu0 %v7524_v3  ;;  %v7603_v3 = vld [vmem:[%s11017_s1 + $0x840] ss:$8 sps:$4 sm:$0xff]  }
 0x1ac   :  { %2857 = vmatprep.subr.bf16.mxu0 %v7529_v4  ;;  %v7608_v4 = vld [vmem:[%s11017_s1 + $0x854] ss:$8 sps:$4 sm:$0xff]  }
 0x1af   :  { %2858 = vmatpush1.bf16.msra.mxu0 %v7527_v5  ;;  %v7606_v5 = vld [vmem:[%s11017_s1 + $0x850] ss:$8 sps:$4 sm:$0xff]  }
 0x1b0   :  { %2859 = vmatprep.subr.bf16.mxu0 %v7532_v6  ;;  %v7611_v6 = vld [vmem:[%s11017_s1 + $0x864] ss:$8 sps:$4 sm:$0xff]  }
 0x1b3   :  { %2860 = vmatpush1.bf16.msra.mxu0 %v7530_v7  ;;  %v7609_v7 = vld [vmem:[%s11017_s1 + $0x860] ss:$8 sps:$4 sm:$0xff]  }
 0x1b4   :  { %2861 = vmatprep.subr.bf16.mxu0 %v7535_v8  ;;  %v7614_v8 = vld [vmem:[%s11017_s1 + $0x874] ss:$8 sps:$4 sm:$0xff]  }
 0x1b7   :  { %2862 = vmatpush1.bf16.msra.mxu0 %v7533_v9  ;;  %v7612_v9 = vld [vmem:[%s11017_s1 + $0x870] ss:$8 sps:$4 sm:$0xff]  }
 0x1b8   :  { %2863 = vmatprep.subr.bf16.mxu0 %v7538_v11  ;;  %v7615_v11 = vld [vmem:[%s11017_s1 + $0x880] ss:$8 sps:$4 sm:$0xff]  }
 0x1bb   :  { %2864 = vmatpush1.bf16.msra.mxu0 %v7536_v12  ;;  %v7620_v12 = vld [vmem:[%s11017_s1 + $0x894] ss:$8 sps:$4 sm:$0xff]  }
 0x1bc   :  { %2865 = vmatprep.subr.bf16.mxu0 %v7541_v15  ;;  %v7623_v15 = vld [vmem:[%s11017_s1 + $0x8a4] ss:$8 sps:$4 sm:$0xff]  }
 0x1bf   :  { %2866 = vmatpush1.bf16.msra.mxu0 %v7539_v17  ;;  %v7621_v17 = vld [vmem:[%s11017_s1 + $0x8a0] ss:$8 sps:$4 sm:$0xff]  }
 0x1c0   :  { %2876 = vmatprep.subr.bf16.mxu0 %v7544_v19  ;;  %v7624_v19 = vld [vmem:[%s11017_s1 + $0x8b0] ss:$8 sps:$4 sm:$0xff]  }
 0x1c2   :  { %2868 = vmatmul.mubr.bf16.vlgmr.msra.gmra.mrb[0].mxu0 %v208_v20  ;;  %v7629_v20 = vld [vmem:[%s11017_s1 + $0x8c4] ss:$8 sps:$4 sm:$0xff]  }
 0x1c3   :  { %2877 = vmatpush1.bf16.msra.mxu0 %v7542_v21  ;;  %2908 = vmatprep.mubr.bf16.mxu0 %v211_v22  ;;  %v7627_v21 = vld [vmem:[%s11017_s1 + $0x8c0] ss:$8 sps:$4 sm:$0xff]   ;;  %v7632_v22 = vld [vmem:[%s11017_s1 + $0x8d4] ss:$8 sps:$4 sm:$0xff]  }
 0x1c4   :  { %2878 = vmatprep.subr.bf16.mxu0 %v7547_v23  ;;  %v7630_v23 = vld [vmem:[%s11017_s1 + $0x8d0] ss:$8 sps:$4 sm:$0xff]  }
 0x1c7   :  { %2879 = vmatpush1.bf16.msra.mxu0 %v7545_v24  ;;  %v130_v24 = vcombine.high %v9285_v50, %v9285_v50  ;;  %v7663_v50 = vld [vmem:[%s11017_s1 + $0x980] ss:$8 sps:$4 sm:$0xff]  }
 0x1c8   :  { %2880 = vmatprep.subr.bf16.mxu0 %v7550_v25  ;;  %v7635_v25 = vld [vmem:[%s11017_s1 + $0x8e4] ss:$8 sps:$4 sm:$0xff]  }
 0x1cb   :  { %2881 = vmatpush1.bf16.msra.mxu0 %v7548_v26  ;;  %v7633_v26 = vld [vmem:[%s11017_s1 + $0x8e0] ss:$8 sps:$4 sm:$0xff]  }
 0x1cc   :  { %2882 = vmatprep.subr.bf16.mxu0 %v7553_v27  ;;  %v9397_v27 = vrot.slane %v130_v24, %v8479_v16  ;;  %v7802_v24 = vld [vmem:[%s11019_s3 + $0x20] ss:$16 sps:$4 sm:$0xff]  }
 0x1cf   :  { %2883 = vmatpush1.bf16.msra.mxu0 %v7551_v28  ;;  %v7638_v28 = vld [vmem:[%s11017_s1 + $0x8f4] ss:$8 sps:$4 sm:$0xff]  }
 0x1d0   :  { %2884 = vmatprep.subr.bf16.mxu0 %v7556_v29  ;;  %v7636_v29 = vld [vmem:[%s11017_s1 + $0x8f0] ss:$8 sps:$4 sm:$0xff]  }
 0x1d3   :  { %2885 = vmatpush1.bf16.msra.mxu0 %v7554_v30  ;;  %v146_v30 = vcombine.high %v9397_v27, %v9397_v27 }
 0x1d4   :  { %2886 = vmatprep.subr.bf16.mxu0 %v7559_v31  ;;  %v7641_v31 = vld [vmem:[%s11017_s1 + $0x904] ss:$8 sps:$4 sm:$0xff]  }
 0x1d7   :  { %2887 = vmatpush1.bf16.msra.mxu0 %v7557_v32  ;;  %v212_v32 = vpack.c.bf16 %v9292_v52, %v9292_v52  ;;  %v7666_v52 = vld [vmem:[%s11017_s1 + $0x990] ss:$8 sps:$4 sm:$0xff]  }
 0x1d8   :  { %2888 = vmatprep.subr.bf16.mxu0 %v7562_v33  ;;  %v7639_v33 = vld [vmem:[%s11017_s1 + $0x900] ss:$8 sps:$4 sm:$0xff]  }
 0x1db   :  { %2889 = vmatpush1.bf16.msra.mxu0 %v7560_v34  ;;  %v215_v34 = vpack.c.bf16 %v146_v30, %v146_v30  ;;  %v7709_v30 = vld [vmem:[%s11017_s1 + $0xa70] ss:$8 sps:$4 sm:$0xff]  }
 0x1dc   :  { %2890 = vmatprep.subr.bf16.mxu0 %v7565_v35  ;;  %v7644_v35 = vld [vmem:[%s11017_s1 + $0x914] ss:$8 sps:$4 sm:$0xff]  }
 0x1df   :  { %2891 = vmatpush1.bf16.msra.mxu0 %v7563_v36  ;;  %v7642_v36 = vld [vmem:[%s11017_s1 + $0x910] ss:$8 sps:$4 sm:$0xff]  }
 0x1e0   :  { %2892 = vmatprep.subr.bf16.mxu0 %v7568_v37  ;;  %v7647_v37 = vld [vmem:[%s11017_s1 + $0x924] ss:$8 sps:$4 sm:$0xff]  }
 0x1e3   :  { %2893 = vmatpush1.bf16.msra.mxu0 %v7566_v38  ;;  %v7645_v38 = vld [vmem:[%s11017_s1 + $0x920] ss:$8 sps:$4 sm:$0xff]  }
 0x1e4   :  { %2894 = vmatprep.subr.bf16.mxu0 %v7571_v39  ;;  %v7650_v39 = vld [vmem:[%s11017_s1 + $0x934] ss:$8 sps:$4 sm:$0xff]  }
 0x1e7   :  { %2895 = vmatpush1.bf16.msra.mxu0 %v7569_v40  ;;  %v7648_v40 = vld [vmem:[%s11017_s1 + $0x930] ss:$8 sps:$4 sm:$0xff]  }
 0x1e8   :  { %2896 = vmatprep.subr.bf16.mxu0 %v7574_v41  ;;  %v7653_v41 = vld [vmem:[%s11017_s1 + $0x944] ss:$8 sps:$4 sm:$0xff]  }
 0x1eb   :  { %2897 = vmatpush1.bf16.msra.mxu0 %v7572_v42  ;;  %v7651_v42 = vld [vmem:[%s11017_s1 + $0x940] ss:$8 sps:$4 sm:$0xff]  }
 0x1ec   :  { %2898 = vmatprep.subr.bf16.mxu0 %v7577_v43  ;;  %v7656_v43 = vld [vmem:[%s11017_s1 + $0x954] ss:$8 sps:$4 sm:$0xff]  }
 0x1ef   :  { %2899 = vmatpush1.bf16.msra.mxu0 %v7575_v44  ;;  %v7654_v44 = vld [vmem:[%s11017_s1 + $0x950] ss:$8 sps:$4 sm:$0xff]  }
 0x1f0   :  { %2900 = vmatprep.subr.bf16.mxu0 %v7580_v45  ;;  %v7659_v45 = vld [vmem:[%s11017_s1 + $0x964] ss:$8 sps:$4 sm:$0xff]  }
 0x1f3   :  { %2901 = vmatpush1.bf16.msra.mxu0 %v7578_v46  ;;  %v7657_v46 = vld [vmem:[%s11017_s1 + $0x960] ss:$8 sps:$4 sm:$0xff]  }
 0x1f4   :  { %2902 = vmatprep.subr.bf16.mxu0 %v7583_v47  ;;  %v7662_v47 = vld [vmem:[%s11017_s1 + $0x974] ss:$8 sps:$4 sm:$0xff]  }
 0x1f7   :  { %2903 = vmatpush1.bf16.msra.mxu0 %v7581_v48  ;;  %v7660_v48 = vld [vmem:[%s11017_s1 + $0x970] ss:$8 sps:$4 sm:$0xff]  }
 0x1f8   :  { %2904 = vmatprep.subr.bf16.mxu0 %v7586_v49  ;;  %v7665_v49 = vld [vmem:[%s11017_s1 + $0x984] ss:$8 sps:$4 sm:$0xff]  }
 0x1fb   :  { %2905 = vmatpush1.bf16.msra.mxu0 %v7584_v51  ;;  %v7668_v51 = vld [vmem:[%s11017_s1 + $0x994] ss:$8 sps:$4 sm:$0xff]  }
 0x1fc   :  { %2906 = vmatprep.subr.bf16.mxu0 %v7589_v53  ;;  %v7671_v53 = vld [vmem:[%s11017_s1 + $0x9a4] ss:$8 sps:$4 sm:$0xff]  }
 0x1ff   :  { %2907 = vmatpush1.bf16.msra.mxu0 %v7587_v54  ;;  %v7669_v54 = vld [vmem:[%s11017_s1 + $0x9a0] ss:$8 sps:$4 sm:$0xff]  }
 0x200   :  { %2917 = vmatprep.subr.bf16.mxu0 %v7593_v56  ;;  %v7672_v56 = vld [vmem:[%s11017_s1 + $0x9b0] ss:$8 sps:$4 sm:$0xff]  }
 0x202   :  { %2909 = vmatmul.mubr.bf16.vlgmr.msra.gmra.mrb[0].mxu0 %v210_v57  ;;  %v7677_v57 = vld [vmem:[%s11017_s1 + $0x9c4] ss:$8 sps:$4 sm:$0xff]  }
 0x203   :  { %2918 = vmatpush1.bf16.msra.mxu0 %v7591_v58  ;;  %2949 = vmatprep.mubr.bf16.mxu0 %v213_v59  ;;  %v7675_v58 = vld [vmem:[%s11017_s1 + $0x9c0] ss:$8 sps:$4 sm:$0xff]   ;;  %v7680_v59 = vld [vmem:[%s11017_s1 + $0x9d4] ss:$8 sps:$4 sm:$0xff]  }
 0x204   :  { %2919 = vmatprep.subr.bf16.mxu0 %v7596_v60  ;;  %v7678_v60 = vld [vmem:[%s11017_s1 + $0x9d0] ss:$8 sps:$4 sm:$0xff]  }
 0x207   :  { %2920 = vmatpush1.bf16.msra.mxu0 %v7594_v61  ;;  %v7683_v61 = vld [vmem:[%s11017_s1 + $0x9e4] ss:$8 sps:$4 sm:$0xff]  }
 0x208   :  { %2921 = vmatprep.subr.bf16.mxu0 %v7599_v62  ;;  %v9499_v62 = vld [vmem:[%s11016_s0 + $0x28] sm:$0xff] }
 0x20b   :  { %2922 = vmatpush1.bf16.msra.mxu0 %v7597_v63  ;;  %v7681_v63 = vld [vmem:[%s11017_s1 + $0x9e0] ss:$8 sps:$4 sm:$0xff]  }
 0x20c   :  { %2923 = vmatprep.subr.bf16.mxu0 %v7602_v0  ;;  %v9506_v0 = vrot.slane %v9499_v62, %v8479_v16 }
 0x20f   :  { %2924 = vmatpush1.bf16.msra.mxu0 %v7600_v1  ;;  %v7686_v1 = vld [vmem:[%s11017_s1 + $0x9f4] ss:$8 sps:$4 sm:$0xff]  }
 0x210   :  { %2925 = vmatprep.subr.bf16.mxu0 %v7605_v2  ;;  %v7684_v2 = vld [vmem:[%s11017_s1 + $0x9f0] ss:$8 sps:$4 sm:$0xff]  }
 0x213   :  { %2926 = vmatpush1.bf16.msra.mxu0 %v7603_v3  ;;  %v162_v3 = vcombine.high %v9506_v0, %v9506_v0 }
 0x214   :  { %2927 = vmatprep.subr.bf16.mxu0 %v7608_v4  ;;  %v7690_v4 = vld [vmem:[%s11017_s1 + $0xa04] ss:$8 sps:$4 sm:$0xff]  }
 0x217   :  { %2928 = vmatpush1.bf16.msra.mxu0 %v7606_v5  ;;  %v214_v5 = vpack.c.bf16 %v9397_v27, %v9397_v27  ;;  %v7711_v27 = vld [vmem:[%s11017_s1 + $0xa74] ss:$8 sps:$4 sm:$0xff]  }
 0x218   :  { %2929 = vmatprep.subr.bf16.mxu0 %v7611_v6  ;;  %v7688_v6 = vld [vmem:[%s11017_s1 + $0xa00] ss:$8 sps:$4 sm:$0xff]  }
 0x21b   :  { %2930 = vmatpush1.bf16.msra.mxu0 %v7609_v7  ;;  %v217_v7 = vpack.c.bf16 %v162_v3, %v162_v3  ;;  %v7832_v3 = vld [vmem:[%s11019_s3 + $0x160] ss:$16 sps:$4 sm:$0xff]  }
 0x21c   :  { %2931 = vmatprep.subr.bf16.mxu0 %v7614_v8  ;;  %v7693_v8 = vld [vmem:[%s11017_s1 + $0xa14] ss:$8 sps:$4 sm:$0xff]  }
 0x21f   :  { %2932 = vmatpush1.bf16.msra.mxu0 %v7612_v9  ;;  %v7691_v9 = vld [vmem:[%s11017_s1 + $0xa10] ss:$8 sps:$4 sm:$0xff]  }
 0x220   :  { %2933 = vmatprep.subr.bf16.mxu0 %v7617_v10  ;;  %v7696_v10 = vld [vmem:[%s11017_s1 + $0xa24] ss:$8 sps:$4 sm:$0xff]  }
 0x223   :  { %2934 = vmatpush1.bf16.msra.mxu0 %v7615_v11  ;;  %v7694_v11 = vld [vmem:[%s11017_s1 + $0xa20] ss:$8 sps:$4 sm:$0xff]  }
 0x224   :  { %2935 = vmatprep.subr.bf16.mxu0 %v7620_v12  ;;  %v7699_v12 = vld [vmem:[%s11017_s1 + $0xa34] ss:$8 sps:$4 sm:$0xff]  }
 0x227   :  { %2936 = vmatpush1.bf16.msra.mxu0 %v7618_v14  ;;  %v7697_v14 = vld [vmem:[%s11017_s1 + $0xa30] ss:$8 sps:$4 sm:$0xff]  }
 0x228   :  { %2937 = vmatprep.subr.bf16.mxu0 %v7623_v15  ;;  %v7702_v15 = vld [vmem:[%s11017_s1 + $0xa44] ss:$8 sps:$4 sm:$0xff]  }
 0x22b   :  { %2938 = vmatpush1.bf16.msra.mxu0 %v7621_v17  ;;  %v7700_v17 = vld [vmem:[%s11017_s1 + $0xa40] ss:$8 sps:$4 sm:$0xff]  }
 0x22c   :  { %2939 = vmatprep.subr.bf16.mxu0 %v7626_v18  ;;  %v7705_v18 = vld [vmem:[%s11017_s1 + $0xa54] ss:$8 sps:$4 sm:$0xff]  }
 0x22f   :  { %2940 = vmatpush1.bf16.msra.mxu0 %v7624_v19  ;;  %v7797_v19 = vld [vmem:[%s11019_s3 + $0x4] ss:$16 sps:$4 sm:$0xff]  }
 0x230   :  { %2941 = vmatprep.subr.bf16.mxu0 %v7629_v20  ;;  %v7799_v20 = vld [vmem:[%s11019_s3] ss:$16 sps:$4 sm:$0xff]   ;;  %3532 = vmatprep.subr.bf16.mxu1 %v7797_v19 }
 0x231   :  { %3533 = vmatpush1.bf16.msra.mxu1 %v7799_v20  ;;  %v7748_v19 = vld [vmem:[%s11017_s1 + $0xb40] ss:$8 sps:$4 sm:$0xff]   ;;  %v7753_v20 = vld [vmem:[%s11017_s1 + $0xb54] ss:$8 sps:$4 sm:$0xff]  }
 0x233   :  { %2942 = vmatpush1.bf16.msra.mxu0 %v7627_v21  ;;  %v7800_v21 = vld [vmem:[%s11019_s3 + $0x24] ss:$16 sps:$4 sm:$0xff]  }
 0x234   :  { %2943 = vmatprep.subr.bf16.mxu0 %v7632_v22  ;;  %v7703_v22 = vld [vmem:[%s11017_s1 + $0xa50] ss:$8 sps:$4 sm:$0xff]   ;;  %3534 = vmatprep.subr.bf16.mxu1 %v7800_v21 }
 0x235   :  { %3535 = vmatpush1.bf16.msra.mxu1 %v7802_v24  ;;  %v7751_v21 = vld [vmem:[%s11017_s1 + $0xb50] ss:$8 sps:$4 sm:$0xff]   ;;  %v7759_v24 = vld [vmem:[%s11017_s1 + $0xb74] ss:$8 sps:$4 sm:$0xff]  }
 0x237   :  { %2944 = vmatpush1.bf16.msra.mxu0 %v7630_v23  ;;  %v7708_v23 = vld [vmem:[%s11017_s1 + $0xa64] ss:$8 sps:$4 sm:$0xff]  }
 0x238   :  { %2945 = vmatprep.subr.bf16.mxu0 %v7635_v25  ;;  %v7803_v25 = vld [vmem:[%s11019_s3 + $0x44] ss:$16 sps:$4 sm:$0xff]  }
 0x239   :  { %3536 = vmatprep.subr.bf16.mxu1 %v7803_v25  ;;  %v7757_v25 = vld [vmem:[%s11017_s1 + $0xb70] ss:$8 sps:$4 sm:$0xff]  }
 0x23b   :  { %2946 = vmatpush1.bf16.msra.mxu0 %v7633_v26  ;;  %v7706_v26 = vld [vmem:[%s11017_s1 + $0xa60] ss:$8 sps:$4 sm:$0xff]  }
 0x23c   :  { %2947 = vmatprep.subr.bf16.mxu0 %v7638_v28  ;;  %v7805_v28 = vld [vmem:[%s11019_s3 + $0x40] ss:$16 sps:$4 sm:$0xff]  }
 0x23d   :  { %3537 = vmatpush1.bf16.msra.mxu1 %v7805_v28  ;;  %v7765_v28 = vld [vmem:[%s11017_s1 + $0xb94] ss:$8 sps:$4 sm:$0xff]  }
 0x23f   :  { %2948 = vmatpush1.bf16.msra.mxu0 %v7636_v29  ;;  %v7806_v29 = vld [vmem:[%s11019_s3 + $0x64] ss:$16 sps:$4 sm:$0xff]  }
 0x240   :  { %2958 = vmatprep.subr.bf16.mxu0 %v7641_v31  ;;  %v7714_v31 = vld [vmem:[%s11017_s1 + $0xa84] ss:$8 sps:$4 sm:$0xff]   ;;  %3538 = vmatprep.subr.bf16.mxu1 %v7806_v29  ;;  %v7763_v29 = vld [vmem:[%s11017_s1 + $0xb90] ss:$8 sps:$4 sm:$0xff]  }
 0x242   :  { %2950 = vmatmul.mubr.bf16.vlgmr.msra.gmra.mrb[0].mxu0 %v212_v32  ;;  %v7808_v32 = vld [vmem:[%s11019_s3 + $0x60] ss:$16 sps:$4 sm:$0xff]  }
 0x243   :  { %2959 = vmatpush1.bf16.msra.mxu0 %v7639_v33  ;;  %2990 = vmatprep.mubr.bf16.mxu0 %v215_v34  ;;  %v7809_v33 = vld [vmem:[%s11019_s3 + $0x84] ss:$16 sps:$4 sm:$0xff]   ;;  %v7712_v34 = vld [vmem:[%s11017_s1 + $0xa80] ss:$8 sps:$4 sm:$0xff]  }
 0x244   :  { %2960 = vmatprep.subr.bf16.mxu0 %v7644_v35  ;;  %v7717_v35 = vld [vmem:[%s11017_s1 + $0xa94] ss:$8 sps:$4 sm:$0xff]   ;;  %3539 = vmatpush1.bf16.msra.mxu1 %v7808_v32 }
 0x245   :  { %3540 = vmatprep.subr.bf16.mxu1 %v7809_v33  ;;  %v7771_v32 = vld [vmem:[%s11017_s1 + $0xbb4] ss:$8 sps:$4 sm:$0xff]   ;;  %v7769_v33 = vld [vmem:[%s11017_s1 + $0xbb0] ss:$8 sps:$4 sm:$0xff]  }
 0x247   :  { %2961 = vmatpush1.bf16.msra.mxu0 %v7642_v36  ;;  %v7811_v36 = vld [vmem:[%s11019_s3 + $0x80] ss:$16 sps:$4 sm:$0xff]  }
 0x248   :  { %2962 = vmatprep.subr.bf16.mxu0 %v7647_v37  ;;  %v7812_v37 = vld [vmem:[%s11019_s3 + $0xa4] ss:$16 sps:$4 sm:$0xff]   ;;  %3541 = vmatpush1.bf16.msra.mxu1 %v7811_v36 }
 0x249   :  { %3542 = vmatprep.subr.bf16.mxu1 %v7812_v37  ;;  %v7777_v36 = vld [vmem:[%s11017_s1 + $0xbd4] ss:$8 sps:$4 sm:$0xff]   ;;  %v7775_v37 = vld [vmem:[%s11017_s1 + $0xbd0] ss:$8 sps:$4 sm:$0xff]  }
 0x24b   :  { %2963 = vmatpush1.bf16.msra.mxu0 %v7645_v38  ;;  %v7715_v38 = vld [vmem:[%s11017_s1 + $0xa90] ss:$8 sps:$4 sm:$0xff]  }
 0x24c   :  { %2964 = vmatprep.subr.bf16.mxu0 %v7650_v39  ;;  %v7720_v39 = vld [vmem:[%s11017_s1 + $0xaa4] ss:$8 sps:$4 sm:$0xff]  }
 0x24f   :  { %2965 = vmatpush1.bf16.msra.mxu0 %v7648_v40  ;;  %v7814_v40 = vld [vmem:[%s11019_s3 + $0xa0] ss:$16 sps:$4 sm:$0xff]  }
 0x250   :  { %2966 = vmatprep.subr.bf16.mxu0 %v7653_v41  ;;  %v7815_v41 = vld [vmem:[%s11019_s3 + $0xc4] ss:$16 sps:$4 sm:$0xff]   ;;  %3543 = vmatpush1.bf16.msra.mxu1 %v7814_v40 }
 0x251   :  { %3544 = vmatprep.subr.bf16.mxu1 %v7815_v41  ;;  %v7783_v40 = vld [vmem:[%s11017_s1 + $0xbf4] ss:$8 sps:$4 sm:$0xff]   ;;  %v7781_v41 = vld [vmem:[%s11017_s1 + $0xbf0] ss:$8 sps:$4 sm:$0xff]  }
 0x253   :  { %2967 = vmatpush1.bf16.msra.mxu0 %v7651_v42  ;;  %v7718_v42 = vld [vmem:[%s11017_s1 + $0xaa0] ss:$8 sps:$4 sm:$0xff]  }
 0x254   :  { %2968 = vmatprep.subr.bf16.mxu0 %v7656_v43  ;;  %v7723_v43 = vld [vmem:[%s11017_s1 + $0xab4] ss:$8 sps:$4 sm:$0xff]  }
 0x257   :  { %2969 = vmatpush1.bf16.msra.mxu0 %v7654_v44  ;;  %v7817_v44 = vld [vmem:[%s11019_s3 + $0xc0] ss:$16 sps:$4 sm:$0xff]  }
 0x258   :  { %2970 = vmatprep.subr.bf16.mxu0 %v7659_v45  ;;  %v7818_v45 = vld [vmem:[%s11019_s3 + $0xe4] ss:$16 sps:$4 sm:$0xff]   ;;  %3545 = vmatpush1.bf16.msra.mxu1 %v7817_v44  ;;  %v7785_v44 = vld [vmem:[%s11017_s1 + $0xc00] ss:$8 sps:$4 sm:$0xff]  }
 0x259   :  { %3546 = vmatprep.subr.bf16.mxu1 %v7818_v45  ;;  %v7790_v45 = vld [vmem:[%s11017_s1 + $0xc14] ss:$8 sps:$4 sm:$0xff]  }
 0x25b   :  { %2971 = vmatpush1.bf16.msra.mxu0 %v7657_v46  ;;  %v7721_v46 = vld [vmem:[%s11017_s1 + $0xab0] ss:$8 sps:$4 sm:$0xff]  }
 0x25c   :  { %2972 = vmatprep.subr.bf16.mxu0 %v7662_v47  ;;  %v7726_v47 = vld [vmem:[%s11017_s1 + $0xac4] ss:$8 sps:$4 sm:$0xff]  }
 0x25f   :  { %2973 = vmatpush1.bf16.msra.mxu0 %v7660_v48  ;;  %v7820_v48 = vld [vmem:[%s11019_s3 + $0xe0] ss:$16 sps:$4 sm:$0xff]  }
 0x260   :  { %2974 = vmatprep.subr.bf16.mxu0 %v7665_v49  ;;  %v7821_v49 = vld [vmem:[%s11019_s3 + $0x104] ss:$16 sps:$4 sm:$0xff]   ;;  %3547 = vmatpush1.bf16.msra.mxu1 %v7820_v48 }
 0x261   :  { %3548 = vmatprep.subr.bf16.mxu1 %v7821_v49  ;;  %v7793_v48 = vld [vmem:[%s11017_s1 + $0xc24] ss:$8 sps:$4 sm:$0xff]   ;;  %v7791_v49 = vld [vmem:[%s11017_s1 + $0xc20] ss:$8 sps:$4 sm:$0xff]  }
 0x263   :  { %2975 = vmatpush1.bf16.msra.mxu0 %v7663_v50  ;;  %v7724_v50 = vld [vmem:[%s11017_s1 + $0xac0] ss:$8 sps:$4 sm:$0xff]  }
 0x264   :  { %2976 = vmatprep.subr.bf16.mxu0 %v7668_v51  ;;  %v7729_v51 = vld [vmem:[%s11017_s1 + $0xad4] ss:$8 sps:$4 sm:$0xff]  }
 0x267   :  { %2977 = vmatpush1.bf16.msra.mxu0 %v7666_v52  ;;  %v7823_v52 = vld [vmem:[%s11019_s3 + $0x100] ss:$16 sps:$4 sm:$0xff]  }
 0x268   :  { %2978 = vmatprep.subr.bf16.mxu0 %v7671_v53  ;;  %v7824_v53 = vld [vmem:[%s11019_s3 + $0x124] ss:$16 sps:$4 sm:$0xff]   ;;  %3549 = vmatpush1.bf16.msra.mxu1 %v7823_v52  ;;  %v6258_v52 = vld.sshfl [vmem:[%s11016_s0 + $0x30] sm:$0x3 pattern:$0x76325410] }
 0x269   :  { %3550 = vmatprep.subr.bf16.mxu1 %v7824_v53  ;;  %v220_v53 = vpack.c.bf16 %v6258_v52, %v6258_v52  ;;  %v7910_v52 = vld [vmem:[%s11021_s5 + $0xa4] ss:$16 sps:$4 sm:$0xff]  }
 0x26b   :  { %2979 = vmatpush1.bf16.msra.mxu0 %v7669_v54  ;;  %v7727_v54 = vld [vmem:[%s11017_s1 + $0xad0] ss:$8 sps:$4 sm:$0xff]  }
 0x26c   :  { %2980 = vmatprep.subr.bf16.mxu0 %v7674_v55  ;;  %v147_v55 = vcombine.high %v9499_v62, %v9499_v62  ;;  %v7829_v62 = vld [vmem:[%s11019_s3 + $0x140] ss:$16 sps:$4 sm:$0xff]  }
 0x26f   :  { %2981 = vmatpush1.bf16.msra.mxu0 %v7672_v56  ;;  %v7732_v56 = vld [vmem:[%s11017_s1 + $0xae4] ss:$8 sps:$4 sm:$0xff]  }
 0x270   :  { %2982 = vmatprep.subr.bf16.mxu0 %v7677_v57  ;;  %v7826_v57 = vld [vmem:[%s11019_s3 + $0x120] ss:$16 sps:$4 sm:$0xff]  }
 0x271   :  { %3551 = vmatpush1.bf16.msra.mxu1 %v7826_v57  ;;  %v7844_v57 = vld [vmem:[%s11019_s3 + $0x1e0] ss:$16 sps:$4 sm:$0xff]  }
 0x273   :  { %2983 = vmatpush1.bf16.msra.mxu0 %v7675_v58  ;;  %v7827_v58 = vld [vmem:[%s11019_s3 + $0x144] ss:$16 sps:$4 sm:$0xff]  }
 0x274   :  { %2984 = vmatprep.subr.bf16.mxu0 %v7680_v59  ;;  %v7730_v59 = vld [vmem:[%s11017_s1 + $0xae0] ss:$8 sps:$4 sm:$0xff]   ;;  %3552 = vmatprep.subr.bf16.mxu1 %v7827_v58  ;;  %v7847_v58 = vld [vmem:[%s11019_s3 + $0xc] ss:$16 sps:$4 sm:$0xff]  }
 0x275   :  { %3553 = vmatpush1.bf16.msra.mxu1 %v7829_v62 }
 0x277   :  { %2985 = vmatpush1.bf16.msra.mxu0 %v7678_v60  ;;  %v9674_v60 = vrot.slane %v147_v55, %v8479_v16  ;;  %v7733_v16 = vld [vmem:[%s11017_s1 + $0xaf0] ss:$8 sps:$4 sm:$0xff]  }
 0x278   :  { %2986 = vmatprep.subr.bf16.mxu0 %v7683_v61  ;;  %v7735_v61 = vld [vmem:[%s11017_s1 + $0xaf4] ss:$8 sps:$4 sm:$0xff]   ;;  %v7841_v55 = vld [vmem:[%s11019_s3 + $0x1c0] ss:$16 sps:$4 sm:$0xff]  }
 0x27b   :  { %2987 = vmatpush1.bf16.msra.mxu0 %v7681_v63  ;;  %v7830_v63 = vld [vmem:[%s11019_s3 + $0x164] ss:$16 sps:$4 sm:$0xff]  }
 0x27c   :  { %2988 = vmatprep.subr.bf16.mxu0 %v7686_v1  ;;  %v163_v1 = vcombine.high %v9674_v60, %v9674_v60  ;;  %3554 = vmatprep.subr.bf16.mxu1 %v7830_v63 }
 0x27d   :  { %3555 = vmatpush1.bf16.msra.mxu1 %v7832_v3 }
 0x27f   :  { %2989 = vmatpush1.bf16.msra.mxu0 %v7684_v2  ;;  %v7738_v2 = vld [vmem:[%s11017_s1 + $0xb04] ss:$8 sps:$4 sm:$0xff]  }
 0x280   :  { %2999 = vmatprep.subr.bf16.mxu0 %v7690_v4  ;;  %v216_v4 = vpack.c.bf16 %v9506_v0, %v9506_v0  ;;  %v7835_v0 = vld [vmem:[%s11019_s3 + $0x180] ss:$16 sps:$4 sm:$0xff]  }
 0x282   :  { %2991 = vmatmul.mubr.bf16.vlgmr.msra.gmra.mrb[0].mxu0 %v214_v5  ;;  %v7833_v5 = vld [vmem:[%s11019_s3 + $0x184] ss:$16 sps:$4 sm:$0xff]  }
 0x283   :  { %3000 = vmatpush1.bf16.msra.mxu0 %v7688_v6  ;;  %3031 = vmatprep.mubr.bf16.mxu0 %v217_v7  ;;  %v7736_v6 = vld [vmem:[%s11017_s1 + $0xb00] ss:$8 sps:$4 sm:$0xff]   ;;  %v219_v7 = vpack.c.bf16 %v163_v1, %v163_v1 }
 0x284   :  { %3001 = vmatprep.subr.bf16.mxu0 %v7693_v8  ;;  %v7741_v8 = vld [vmem:[%s11017_s1 + $0xb14] ss:$8 sps:$4 sm:$0xff]   ;;  %3556 = vmatprep.subr.bf16.mxu1 %v7833_v5 }
 0x285   :  { %3557 = vmatpush1.bf16.msra.mxu1 %v7835_v0  ;;  %v7845_v0 = vld [vmem:[%s11019_s3 + $0x8] ss:$16 sps:$4 sm:$0xff]  }
 0x287   :  { %3002 = vmatpush1.bf16.msra.mxu0 %v7691_v9  ;;  %v7836_v9 = vld [vmem:[%s11019_s3 + $0x1a4] ss:$16 sps:$4 sm:$0xff]  }
 0x288   :  { %3003 = vmatprep.subr.bf16.mxu0 %v7696_v10  ;;  %v7739_v10 = vld [vmem:[%s11017_s1 + $0xb10] ss:$8 sps:$4 sm:$0xff]   ;;  %3558 = vmatprep.subr.bf16.mxu1 %v7836_v9 }
 0x28b   :  { %3004 = vmatpush1.bf16.msra.mxu0 %v7694_v11  ;;  %v7744_v11 = vld [vmem:[%s11017_s1 + $0xb24] ss:$8 sps:$4 sm:$0xff]  }
 0x28c   :  { %3005 = vmatprep.subr.bf16.mxu0 %v7699_v12  ;;  %v7838_v12 = vld [vmem:[%s11019_s3 + $0x1a0] ss:$16 sps:$4 sm:$0xff]  }
 0x28d   :  { %3559 = vmatpush1.bf16.msra.mxu1 %v7838_v12  ;;  %v7853_v12 = vld [vmem:[%s11019_s3 + $0x4c] ss:$16 sps:$4 sm:$0xff]  }
 0x28f   :  { %3006 = vmatpush1.bf16.msra.mxu0 %v7697_v14  ;;  %v7742_v14 = vld [vmem:[%s11017_s1 + $0xb20] ss:$8 sps:$4 sm:$0xff]  }
 0x290   :  { %3007 = vmatprep.subr.bf16.mxu0 %v7702_v15  ;;  %v7747_v15 = vld [vmem:[%s11017_s1 + $0xb34] ss:$8 sps:$4 sm:$0xff]  }
 0x293   :  { %3008 = vmatpush1.bf16.msra.mxu0 %v7700_v17  ;;  %v7745_v17 = vld [vmem:[%s11017_s1 + $0xb30] ss:$8 sps:$4 sm:$0xff]  }
 0x294   :  { %3009 = vmatprep.subr.bf16.mxu0 %v7705_v18  ;;  %v7750_v18 = vld [vmem:[%s11017_s1 + $0xb44] ss:$8 sps:$4 sm:$0xff]  }
 0x297   :  { %3010 = vmatpush1.bf16.msra.mxu0 %v7703_v22  ;;  %v7756_v22 = vld [vmem:[%s11017_s1 + $0xb64] ss:$8 sps:$4 sm:$0xff]  }
 0x298   :  { %3011 = vmatprep.subr.bf16.mxu0 %v7708_v23  ;;  %v7754_v23 = vld [vmem:[%s11017_s1 + $0xb60] ss:$8 sps:$4 sm:$0xff]  }
 0x29b   :  { %3012 = vmatpush1.bf16.msra.mxu0 %v7706_v26  ;;  %v7762_v26 = vld [vmem:[%s11017_s1 + $0xb84] ss:$8 sps:$4 sm:$0xff]  }
 0x29c   :  { %3013 = vmatprep.subr.bf16.mxu0 %v7711_v27  ;;  %v7760_v27 = vld [vmem:[%s11017_s1 + $0xb80] ss:$8 sps:$4 sm:$0xff]  }
 0x29f   :  { %3014 = vmatpush1.bf16.msra.mxu0 %v7709_v30  ;;  %v7768_v30 = vld [vmem:[%s11017_s1 + $0xba4] ss:$8 sps:$4 sm:$0xff]  }
 0x2a0   :  { %3015 = vmatprep.subr.bf16.mxu0 %v7714_v31  ;;  %v7766_v31 = vld [vmem:[%s11017_s1 + $0xba0] ss:$8 sps:$4 sm:$0xff]  }
 0x2a3   :  { %3016 = vmatpush1.bf16.msra.mxu0 %v7712_v34  ;;  %v7774_v34 = vld [vmem:[%s11017_s1 + $0xbc4] ss:$8 sps:$4 sm:$0xff]  }
 0x2a4   :  { %3017 = vmatprep.subr.bf16.mxu0 %v7717_v35  ;;  %v7772_v35 = vld [vmem:[%s11017_s1 + $0xbc0] ss:$8 sps:$4 sm:$0xff]  }
 0x2a7   :  { %3018 = vmatpush1.bf16.msra.mxu0 %v7715_v38  ;;  %v7780_v38 = vld [vmem:[%s11017_s1 + $0xbe4] ss:$8 sps:$4 sm:$0xff]  }
 0x2a8   :  { %3019 = vmatprep.subr.bf16.mxu0 %v7720_v39  ;;  %v7778_v39 = vld [vmem:[%s11017_s1 + $0xbe0] ss:$8 sps:$4 sm:$0xff]  }
 0x2ab   :  { %3020 = vmatpush1.bf16.msra.mxu0 %v7718_v42  ;;  %v7787_v42 = vld [vmem:[%s11017_s1 + $0xc04] ss:$8 sps:$4 sm:$0xff]  }
 0x2ac   :  { %3021 = vmatprep.subr.bf16.mxu0 %v7723_v43  ;;  %v218_v43 = vpack.c.bf16 %v9674_v60, %v9674_v60  ;;  %v613_v60 = vld [vmem:[%s11018_s2] sm:$0x3] }
 0x2af   :  { %3022 = vmatpush1.bf16.msra.mxu0 %v7721_v46  ;;  %v7788_v46 = vld [vmem:[%s11017_s1 + $0xc10] ss:$8 sps:$4 sm:$0xff]  }
 0x2b0   :  { %3023 = vmatprep.subr.bf16.mxu0 %v7726_v47  ;;  %v8366_v47 = vmov 0  }
 0x2b3   :  { %3024 = vmatpush1.bf16.msra.mxu0 %v7724_v50  ;;  %v7796_v50 = vld [vmem:[%s11017_s1 + $0xc34] ss:$8 sps:$4 sm:$0xff]  }
 0x2b4   :  { %3025 = vmatprep.subr.bf16.mxu0 %v7729_v51  ;;  %v7794_v51 = vld [vmem:[%s11017_s1 + $0xc30] ss:$8 sps:$4 sm:$0xff]  }
 0x2b7   :  { %3026 = vmatpush1.bf16.msra.mxu0 %v7727_v54  ;;  %v7839_v54 = vld [vmem:[%s11019_s3 + $0x1c4] ss:$16 sps:$4 sm:$0xff]  }
 0x2b8   :  { %3027 = vmatprep.subr.bf16.mxu0 %v7732_v56  ;;  %3560 = vmatprep.subr.bf16.mxu1 %v7839_v54  ;;  %v7842_v56 = vld [vmem:[%s11019_s3 + $0x1e4] ss:$16 sps:$4 sm:$0xff]  }
 0x2b9   :  { %3561 = vmatpush1.bf16.msra.mxu1 %v7841_v55  ;;  %v7913_v54 = vld [vmem:[%s11021_s5 + $0xc4] ss:$16 sps:$4 sm:$0xff]   ;;  %v7911_v55 = vld [vmem:[%s11021_s5 + $0xc0] ss:$16 sps:$4 sm:$0xff]  }
 0x2ba   :  { %3562 = vmatprep.subr.bf16.mxu1 %v7842_v56  ;;  %v7916_v56 = vld [vmem:[%s11021_s5 + $0xe4] ss:$16 sps:$4 sm:$0xff]  }
 0x2bb   :  { %3028 = vmatpush1.bf16.msra.mxu0 %v7730_v59  ;;  %v9848_v59 = vsub.s32 0, %v8470_v13 }
 0x2bc   :  { %3029 = vmatprep.subr.bf16.mxu0 %v7735_v61  ;;  %v9854_v61 = vsub.s32 1, %v8470_v13 }
 0x2bd   :  { %3563 = vmatpush1.bf16.msra.mxu1 %v7844_v57  ;;  %v618_v62 = vrot.slane %v613_v60, %v9848_v59  ;;  %v7914_v57 = vld [vmem:[%s11021_s5 + $0xe0] ss:$16 sps:$4 sm:$0xff]  }
 0x2be   :  { %3573 = vmatprep.subr.bf16.mxu1 %v7847_v58  ;;  %v622_v63 = vrot.slane %v613_v60, %v9854_v61  ;;  %v7919_v58 = vld [vmem:[%s11021_s5 + $0x104] ss:$16 sps:$4 sm:$0xff]   ;;  %v7917_v60 = vld [vmem:[%s11021_s5 + $0x100] ss:$16 sps:$4 sm:$0xff]  }
 0x2bf   :  { %3030 = vmatpush1.bf16.msra.mxu0 %v7733_v16 }
 0x2c0   :  { %3040 = vmatprep.subr.bf16.mxu0 %v7738_v2 }
 0x2c2   :  { %3032 = vmatmul.mubr.bf16.vlgmr.msra.gmra.mrb[0].mxu0 %v216_v4 }
 0x2c3   :  { %3041 = vmatpush1.bf16.msra.mxu0 %v7736_v6  ;;  %3072 = vmatprep.mubr.bf16.mxu0 %v219_v7 }
 0x2c4   :  { %3042 = vmatprep.subr.bf16.mxu0 %v7741_v8 }
 0x2c7   :  { %3043 = vmatpush1.bf16.msra.mxu0 %v7739_v10  ;;  %v7850_v10 = vld [vmem:[%s11019_s3 + $0x2c] ss:$16 sps:$4 sm:$0xff]  }
 0x2c8   :  { %3044 = vmatprep.subr.bf16.mxu0 %v7744_v11  ;;  %v7848_v11 = vld [vmem:[%s11019_s3 + $0x28] ss:$16 sps:$4 sm:$0xff]  }
 0x2cb   :  { %3045 = vmatpush1.bf16.msra.mxu0 %v7742_v14  ;;  %v7851_v14 = vld [vmem:[%s11019_s3 + $0x48] ss:$16 sps:$4 sm:$0xff]  }
 0x2cc   :  { %3046 = vmatprep.subr.bf16.mxu0 %v7747_v15  ;;  %v7856_v15 = vld [vmem:[%s11019_s3 + $0x6c] ss:$16 sps:$4 sm:$0xff]  }
 0x2cf   :  { %3047 = vmatpush1.bf16.msra.mxu0 %v7745_v17  ;;  %v7854_v17 = vld [vmem:[%s11019_s3 + $0x68] ss:$16 sps:$4 sm:$0xff]  }
 0x2d0   :  { %3048 = vmatprep.subr.bf16.mxu0 %v7750_v18  ;;  %v7859_v18 = vld [vmem:[%s11019_s3 + $0x8c] ss:$16 sps:$4 sm:$0xff]  }
 0x2d3   :  { %3049 = vmatpush1.bf16.msra.mxu0 %v7748_v19  ;;  %v7857_v19 = vld [vmem:[%s11019_s3 + $0x88] ss:$16 sps:$4 sm:$0xff]  }
 0x2d4   :  { %3050 = vmatprep.subr.bf16.mxu0 %v7753_v20  ;;  %v7862_v20 = vld [vmem:[%s11019_s3 + $0xac] ss:$16 sps:$4 sm:$0xff]  }
 0x2d7   :  { %3051 = vmatpush1.bf16.msra.mxu0 %v7751_v21  ;;  %v7860_v21 = vld [vmem:[%s11019_s3 + $0xa8] ss:$16 sps:$4 sm:$0xff]  }
 0x2d8   :  { %3052 = vmatprep.subr.bf16.mxu0 %v7756_v22  ;;  %v7865_v22 = vld [vmem:[%s11019_s3 + $0xcc] ss:$16 sps:$4 sm:$0xff]  }
 0x2db   :  { %3053 = vmatpush1.bf16.msra.mxu0 %v7754_v23  ;;  %v7863_v23 = vld [vmem:[%s11019_s3 + $0xc8] ss:$16 sps:$4 sm:$0xff]  }
 0x2dc   :  { %3054 = vmatprep.subr.bf16.mxu0 %v7759_v24  ;;  %v7868_v24 = vld [vmem:[%s11019_s3 + $0xec] ss:$16 sps:$4 sm:$0xff]  }
 0x2df   :  { %3055 = vmatpush1.bf16.msra.mxu0 %v7757_v25  ;;  %v7866_v25 = vld [vmem:[%s11019_s3 + $0xe8] ss:$16 sps:$4 sm:$0xff]  }
 0x2e0   :  { %3056 = vmatprep.subr.bf16.mxu0 %v7762_v26  ;;  %v7871_v26 = vld [vmem:[%s11019_s3 + $0x10c] ss:$16 sps:$4 sm:$0xff]  }
 0x2e3   :  { %3057 = vmatpush1.bf16.msra.mxu0 %v7760_v27  ;;  %v7869_v27 = vld [vmem:[%s11019_s3 + $0x108] ss:$16 sps:$4 sm:$0xff]  }
 0x2e4   :  { %3058 = vmatprep.subr.bf16.mxu0 %v7765_v28  ;;  %v7874_v28 = vld [vmem:[%s11019_s3 + $0x12c] ss:$16 sps:$4 sm:$0xff]  }
 0x2e7   :  { %3059 = vmatpush1.bf16.msra.mxu0 %v7763_v29  ;;  %v7872_v29 = vld [vmem:[%s11019_s3 + $0x128] ss:$16 sps:$4 sm:$0xff]  }
 0x2e8   :  { %3060 = vmatprep.subr.bf16.mxu0 %v7768_v30  ;;  %v7877_v30 = vld [vmem:[%s11019_s3 + $0x14c] ss:$16 sps:$4 sm:$0xff]  }
 0x2eb   :  { %3061 = vmatpush1.bf16.msra.mxu0 %v7766_v31  ;;  %v7875_v31 = vld [vmem:[%s11019_s3 + $0x148] ss:$16 sps:$4 sm:$0xff]  }
 0x2ec   :  { %3062 = vmatprep.subr.bf16.mxu0 %v7771_v32  ;;  %v7880_v32 = vld [vmem:[%s11019_s3 + $0x16c] ss:$16 sps:$4 sm:$0xff]  }
 0x2ef   :  { %3063 = vmatpush1.bf16.msra.mxu0 %v7769_v33  ;;  %v7878_v33 = vld [vmem:[%s11019_s3 + $0x168] ss:$16 sps:$4 sm:$0xff]  }
 0x2f0   :  { %3064 = vmatprep.subr.bf16.mxu0 %v7774_v34  ;;  %v7883_v34 = vld [vmem:[%s11019_s3 + $0x18c] ss:$16 sps:$4 sm:$0xff]  }
 0x2f3   :  { %3065 = vmatpush1.bf16.msra.mxu0 %v7772_v35  ;;  %v7881_v35 = vld [vmem:[%s11019_s3 + $0x188] ss:$16 sps:$4 sm:$0xff]  }
 0x2f4   :  { %3066 = vmatprep.subr.bf16.mxu0 %v7777_v36  ;;  %v7886_v36 = vld [vmem:[%s11019_s3 + $0x1ac] ss:$16 sps:$4 sm:$0xff]  }
 0x2f7   :  { %3067 = vmatpush1.bf16.msra.mxu0 %v7775_v37  ;;  %v7884_v37 = vld [vmem:[%s11019_s3 + $0x1a8] ss:$16 sps:$4 sm:$0xff]  }
 0x2f8   :  { %3068 = vmatprep.subr.bf16.mxu0 %v7780_v38  ;;  %v7889_v38 = vld [vmem:[%s11019_s3 + $0x1cc] ss:$16 sps:$4 sm:$0xff]  }
 0x2fb   :  { %3069 = vmatpush1.bf16.msra.mxu0 %v7778_v39  ;;  %v7887_v39 = vld [vmem:[%s11019_s3 + $0x1c8] ss:$16 sps:$4 sm:$0xff]  }
 0x2fc   :  { %3070 = vmatprep.subr.bf16.mxu0 %v7783_v40  ;;  %v7892_v40 = vld [vmem:[%s11019_s3 + $0x1ec] ss:$16 sps:$4 sm:$0xff]  }
 0x2ff   :  { %3071 = vmatpush1.bf16.msra.mxu0 %v7781_v41  ;;  %v7890_v41 = vld [vmem:[%s11019_s3 + $0x1e8] ss:$16 sps:$4 sm:$0xff]  }
 0x300   :  { %3081 = vmatprep.subr.bf16.mxu0 %v7787_v42  ;;  %v7895_v42 = vld [vmem:[%s11021_s5 + $0x4] ss:$16 sps:$4 sm:$0xff]  }
 0x302   :  { %3073 = vmatmul.mubr.bf16.vlgmr.msra.gmra.mrb[0].mxu0 %v218_v43  ;;  %v7893_v43 = vld [vmem:[%s11021_s5] ss:$16 sps:$4 sm:$0xff]  }
 0x303   :  { %3082 = vmatpush1.bf16.msra.mxu0 %v7785_v44  ;;  %3113 = vmatprep.mubr.bf16.mxu0 %v8366_v47  ;;  %v7898_v44 = vld [vmem:[%s11021_s5 + $0x24] ss:$16 sps:$4 sm:$0xff]   ;;  %v7899_v47 = vld [vmem:[%s11021_s5 + $0x40] ss:$16 sps:$4 sm:$0xff]  }
 0x304   :  { %3083 = vmatprep.subr.bf16.mxu0 %v7790_v45  ;;  %v7896_v45 = vld [vmem:[%s11021_s5 + $0x20] ss:$16 sps:$4 sm:$0xff]  }
 0x307   :  { %3084 = vmatpush1.bf16.msra.mxu0 %v7788_v46  ;;  %v7901_v46 = vld [vmem:[%s11021_s5 + $0x44] ss:$16 sps:$4 sm:$0xff]  }
 0x308   :  { %3085 = vmatprep.subr.bf16.mxu0 %v7793_v48  ;;  %v7904_v48 = vld [vmem:[%s11021_s5 + $0x64] ss:$16 sps:$4 sm:$0xff]  }
 0x30b   :  { %3086 = vmatpush1.bf16.msra.mxu0 %v7791_v49  ;;  %v7902_v49 = vld [vmem:[%s11021_s5 + $0x60] ss:$16 sps:$4 sm:$0xff]  }
 0x30c   :  { %3087 = vmatprep.subr.bf16.mxu0 %v7796_v50  ;;  %v7907_v50 = vld [vmem:[%s11021_s5 + $0x84] ss:$16 sps:$4 sm:$0xff]  }
 0x30f   :  { %3088 = vmatpush1.bf16.msra.mxu0 %v7794_v51  ;;  %v7905_v51 = vld [vmem:[%s11021_s5 + $0x80] ss:$16 sps:$4 sm:$0xff]  }
 0x312   :  { %6651 = vmatmul.mubr.msk.bf16.vlgmr.msra.gmra.mrb[0].mxu0 %vm2585_vm0, %v220_v53  ;;  %v7908_v53 = vld [vmem:[%s11021_s5 + $0xa0] ss:$16 sps:$4 sm:$0xff]  }
 0x3e5   :  { %v3115_v16 = vpop.f32.mrb[0].mxu0 }
 0x3e6   :  { %v7126_v1 = vadd.f32 %v3115_v16, %v618_v62  ;;  %v3117_v2 = vpop.f32.mrb[1].mxu0  ;;  %v7922_v62 = vld [vmem:[%s11021_s5 + $0x124] ss:$16 sps:$4 sm:$0xff]  }
 0x3e7   :  { %v7127_v3 = vadd.f32 %v3117_v2, %v622_v63  ;;  %v3119_v4 = vpop.f32.mrb[2].mxu0  ;;  %v7920_v63 = vld [vmem:[%s11021_s5 + $0x120] ss:$16 sps:$4 sm:$0xff]   ;;  %v7925_v16 = vld [vmem:[%s11021_s5 + $0x144] ss:$16 sps:$4 sm:$0xff]  }
 0x3e8   :  { %v3122_v5 = vmax.f32 %v7126_v1, 0.0  ;;  %v3120_v6 = vpop.f32.mrb[3].mxu0  ;;  %v7923_v1 = vld [vmem:[%s11021_s5 + $0x140] ss:$16 sps:$4 sm:$0xff]   ;;  %v7928_v2 = vld [vmem:[%s11021_s5 + $0x164] ss:$16 sps:$4 sm:$0xff]  }
 0x3e9   :  { %v3123_v7 = vmax.f32 %v7127_v3, 0.0  ;;  %v7926_v3 = vld [vmem:[%s11021_s5 + $0x160] ss:$16 sps:$4 sm:$0xff]   ;;  %v7931_v4 = vld [vmem:[%s11021_s5 + $0x184] ss:$16 sps:$4 sm:$0xff]  }
 0x3ea   :  { %v9861_v9 = vpack.c.bf16 %v3122_v5, %v3122_v5  ;;  %v7929_v5 = vld [vmem:[%s11021_s5 + $0x180] ss:$16 sps:$4 sm:$0xff]   ;;  %v7934_v6 = vld [vmem:[%s11021_s5 + $0x1a4] ss:$16 sps:$4 sm:$0xff]  }
 0x3eb   :  { %v3125_v8 = vpack.c.bf16 %v3123_v7, %v3123_v7  ;;  %v7932_v7 = vld [vmem:[%s11021_s5 + $0x1a0] ss:$16 sps:$4 sm:$0xff]  }
 0x3ed   :  { %3564 = vmatprep.mubr.bf16.mxu1 %v3125_v8 }
 0x3ee   :  { %3565 = vmatmul.mubr.bf16.vlgmr.msra.gmra.mrb[0].mxu1 %v9861_v9 }
 0x3ef   :  { %3574 = vmatpush1.bf16.msra.mxu1 %v7845_v0  ;;  %3605 = vmatprep.mubr.bf16.mxu1 %v3125_v8  ;;  %v7937_v8 = vld [vmem:[%s11021_s5 + $0x1c4] ss:$16 sps:$4 sm:$0xff]   ;;  %v7935_v0 = vld [vmem:[%s11021_s5 + $0x1c0] ss:$16 sps:$4 sm:$0xff]  }
 0x3f0   :  { %3575 = vmatprep.subr.bf16.mxu1 %v7850_v10  ;;  %v7938_v10 = vld [vmem:[%s11021_s5 + $0x1e0] ss:$16 sps:$4 sm:$0xff]  }
 0x3f3   :  { %3576 = vmatpush1.bf16.msra.mxu1 %v7848_v11  ;;  %v7943_v11 = vld [vmem:[%s11021_s5 + $0x204] ss:$16 sps:$4 sm:$0xff]  }
 0x3f4   :  { %3577 = vmatprep.subr.bf16.mxu1 %v7853_v12  ;;  %v10057_v12 = vld [vmem:[%s11020_s4] sm:$0xf] }
 0x3f7   :  { %3578 = vmatpush1.bf16.msra.mxu1 %v7851_v14  ;;  %v3195_v14 = vrot.slane %v10057_v12, %v9848_v59 }
 0x3f8   :  { %3579 = vmatprep.subr.bf16.mxu1 %v7856_v15  ;;  %v3199_v15 = vrot.slane %v10057_v12, %v9854_v61 }
 0x3fb   :  { %3580 = vmatpush1.bf16.msra.mxu1 %v7854_v17 }
 0x3fc   :  { %3581 = vmatprep.subr.bf16.mxu1 %v7859_v18 }
 0x3ff   :  { %3582 = vmatpush1.bf16.msra.mxu1 %v7857_v19 }
 0x400   :  { %3583 = vmatprep.subr.bf16.mxu1 %v7862_v20 }
 0x403   :  { %3584 = vmatpush1.bf16.msra.mxu1 %v7860_v21 }
 0x404   :  { %3585 = vmatprep.subr.bf16.mxu1 %v7865_v22 }
 0x407   :  { %3586 = vmatpush1.bf16.msra.mxu1 %v7863_v23 }
 0x408   :  { %3587 = vmatprep.subr.bf16.mxu1 %v7868_v24 }
 0x40b   :  { %3588 = vmatpush1.bf16.msra.mxu1 %v7866_v25 }
 0x40c   :  { %3589 = vmatprep.subr.bf16.mxu1 %v7871_v26  ;;  %v7941_v26 = vld [vmem:[%s11021_s5 + $0x200] ss:$16 sps:$4 sm:$0xff]  }
 0x40f   :  { %3590 = vmatpush1.bf16.msra.mxu1 %v7869_v27 }
 0x410   :  { %3591 = vmatprep.subr.bf16.mxu1 %v7874_v28  ;;  %v7946_v28 = vld [vmem:[%s11021_s5 + $0x224] ss:$16 sps:$4 sm:$0xff]  }
 0x413   :  { %3592 = vmatpush1.bf16.msra.mxu1 %v7872_v29  ;;  %v7944_v29 = vld [vmem:[%s11021_s5 + $0x220] ss:$16 sps:$4 sm:$0xff]  }
 0x414   :  { %3593 = vmatprep.subr.bf16.mxu1 %v7877_v30  ;;  %v7949_v30 = vld [vmem:[%s11021_s5 + $0x244] ss:$16 sps:$4 sm:$0xff]  }
 0x417   :  { %3594 = vmatpush1.bf16.msra.mxu1 %v7875_v31  ;;  %v7947_v31 = vld [vmem:[%s11021_s5 + $0x240] ss:$16 sps:$4 sm:$0xff]  }
 0x418   :  { %3595 = vmatprep.subr.bf16.mxu1 %v7880_v32  ;;  %v7952_v32 = vld [vmem:[%s11021_s5 + $0x264] ss:$16 sps:$4 sm:$0xff]  }
 0x41b   :  { %3596 = vmatpush1.bf16.msra.mxu1 %v7878_v33  ;;  %v7950_v33 = vld [vmem:[%s11021_s5 + $0x260] ss:$16 sps:$4 sm:$0xff]  }
 0x41c   :  { %3597 = vmatprep.subr.bf16.mxu1 %v7883_v34  ;;  %v7955_v34 = vld [vmem:[%s11021_s5 + $0x284] ss:$16 sps:$4 sm:$0xff]  }
 0x41f   :  { %3598 = vmatpush1.bf16.msra.mxu1 %v7881_v35  ;;  %v7953_v35 = vld [vmem:[%s11021_s5 + $0x280] ss:$16 sps:$4 sm:$0xff]  }
 0x420   :  { %3599 = vmatprep.subr.bf16.mxu1 %v7886_v36  ;;  %v7958_v36 = vld [vmem:[%s11021_s5 + $0x2a4] ss:$16 sps:$4 sm:$0xff]  }
 0x423   :  { %3600 = vmatpush1.bf16.msra.mxu1 %v7884_v37  ;;  %v7956_v37 = vld [vmem:[%s11021_s5 + $0x2a0] ss:$16 sps:$4 sm:$0xff]  }
 0x424   :  { %3601 = vmatprep.subr.bf16.mxu1 %v7889_v38  ;;  %v7961_v38 = vld [vmem:[%s11021_s5 + $0x2c4] ss:$16 sps:$4 sm:$0xff]  }
 0x427   :  { %3602 = vmatpush1.bf16.msra.mxu1 %v7887_v39  ;;  %v7959_v39 = vld [vmem:[%s11021_s5 + $0x2c0] ss:$16 sps:$4 sm:$0xff]  }
 0x428   :  { %3603 = vmatprep.subr.bf16.mxu1 %v7892_v40  ;;  %v7964_v40 = vld [vmem:[%s11021_s5 + $0x2e4] ss:$16 sps:$4 sm:$0xff]  }
 0x42b   :  { %3604 = vmatpush1.bf16.msra.mxu1 %v7890_v41  ;;  %v7962_v41 = vld [vmem:[%s11021_s5 + $0x2e0] ss:$16 sps:$4 sm:$0xff]  }
 0x42c   :  { %4412 = vmatprep.subr.bf16.mxu1 %v7895_v42  ;;  %v7967_v42 = vld [vmem:[%s11021_s5 + $0x304] ss:$16 sps:$4 sm:$0xff]  }
 0x42e   :  { %3606 = vmatmul.mubr.bf16.vlgmr.msra.gmra.mrb[4].mxu1 %v9861_v9  ;;  %v7940_v9 = vld [vmem:[%s11021_s5 + $0x1e4] ss:$16 sps:$4 sm:$0xff]  }
 0x42f   :  { %4413 = vmatpush1.bf16.msra.mxu1 %v7893_v43  ;;  %v7965_v43 = vld [vmem:[%s11021_s5 + $0x300] ss:$16 sps:$4 sm:$0xff]  }
 0x430   :  { %4414 = vmatprep.subr.bf16.mxu1 %v7898_v44  ;;  %v7970_v44 = vld [vmem:[%s11021_s5 + $0x324] ss:$16 sps:$4 sm:$0xff]  }
 0x433   :  { %4415 = vmatpush1.bf16.msra.mxu1 %v7896_v45  ;;  %v7968_v45 = vld [vmem:[%s11021_s5 + $0x320] ss:$16 sps:$4 sm:$0xff]  }
 0x434   :  { %4416 = vmatprep.subr.bf16.mxu1 %v7901_v46  ;;  %v7973_v46 = vld [vmem:[%s11021_s5 + $0x344] ss:$16 sps:$4 sm:$0xff]  }
 0x437   :  { %4417 = vmatpush1.bf16.msra.mxu1 %v7899_v47  ;;  %v7971_v47 = vld [vmem:[%s11021_s5 + $0x340] ss:$16 sps:$4 sm:$0xff]  }
 0x438   :  { %4418 = vmatprep.subr.bf16.mxu1 %v7904_v48  ;;  %v7976_v48 = vld [vmem:[%s11021_s5 + $0x364] ss:$16 sps:$4 sm:$0xff]  }
 0x43b   :  { %4419 = vmatpush1.bf16.msra.mxu1 %v7902_v49  ;;  %v7974_v49 = vld [vmem:[%s11021_s5 + $0x360] ss:$16 sps:$4 sm:$0xff]  }
 0x43c   :  { %4420 = vmatprep.subr.bf16.mxu1 %v7907_v50  ;;  %v7979_v50 = vld [vmem:[%s11021_s5 + $0x384] ss:$16 sps:$4 sm:$0xff]  }
 0x43f   :  { %4421 = vmatpush1.bf16.msra.mxu1 %v7905_v51  ;;  %v7977_v51 = vld [vmem:[%s11021_s5 + $0x380] ss:$16 sps:$4 sm:$0xff]  }
 0x440   :  { %4422 = vmatprep.subr.bf16.mxu1 %v7910_v52  ;;  %v7982_v52 = vld [vmem:[%s11021_s5 + $0x3a4] ss:$16 sps:$4 sm:$0xff]  }
 0x443   :  { %4423 = vmatpush1.bf16.msra.mxu1 %v7908_v53  ;;  %v10156_v53 = vsub.s32 2, %v8470_v13 }
 0x444   :  { %4424 = vmatprep.subr.bf16.mxu1 %v7913_v54  ;;  %v7980_v54 = vld [vmem:[%s11021_s5 + $0x3a0] ss:$16 sps:$4 sm:$0xff]  }
 0x447   :  { %4425 = vmatpush1.bf16.msra.mxu1 %v7911_v55  ;;  %v10162_v55 = vsub.s32 3, %v8470_v13  ;;  %v7988_v13 = vld [vmem:[%s11021_s5 + $0x3e4] ss:$16 sps:$4 sm:$0xff]  }
 0x448   :  { %4426 = vmatprep.subr.bf16.mxu1 %v7916_v56  ;;  %v7985_v56 = vld [vmem:[%s11021_s5 + $0x3c4] ss:$16 sps:$4 sm:$0xff]  }
 0x44b   :  { %4427 = vmatpush1.bf16.msra.mxu1 %v7914_v57  ;;  %v3203_v57 = vrot.slane %v10057_v12, %v10156_v53 }
 0x44c   :  { %4428 = vmatprep.subr.bf16.mxu1 %v7919_v58  ;;  %v3207_v58 = vrot.slane %v10057_v12, %v10162_v55  ;;  %v7997_v12 = vld [vmem:[%s11021_s5 + $0x4c] ss:$16 sps:$4 sm:$0xff]  }
 0x44f   :  { %4429 = vmatpush1.bf16.msra.mxu1 %v7917_v60  ;;  %v7983_v60 = vld [vmem:[%s11021_s5 + $0x3c0] ss:$16 sps:$4 sm:$0xff]  }
 0x450   :  { %4430 = vmatprep.subr.bf16.mxu1 %v7922_v62 }
 0x453   :  { %4431 = vmatpush1.bf16.msra.mxu1 %v7920_v63 }
 0x454   :  { %4432 = vmatprep.subr.bf16.mxu1 %v7925_v16 }
 0x457   :  { %4433 = vmatpush1.bf16.msra.mxu1 %v7923_v1 }
 0x458   :  { %4434 = vmatprep.subr.bf16.mxu1 %v7928_v2 }
 0x45b   :  { %4435 = vmatpush1.bf16.msra.mxu1 %v7926_v3  ;;  %v7986_v3 = vld [vmem:[%s11021_s5 + $0x3e0] ss:$16 sps:$4 sm:$0xff]  }
 0x45c   :  { %4436 = vmatprep.subr.bf16.mxu1 %v7931_v4 }
 0x45f   :  { %4437 = vmatpush1.bf16.msra.mxu1 %v7929_v5 }
 0x460   :  { %4438 = vmatprep.subr.bf16.mxu1 %v7934_v6  ;;  %v7991_v6 = vld [vmem:[%s11021_s5 + $0xc] ss:$16 sps:$4 sm:$0xff]  }
 0x463   :  { %4439 = vmatpush1.bf16.msra.mxu1 %v7932_v7 }
 0x464   :  { %4440 = vmatprep.subr.bf16.mxu1 %v7937_v8 }
 0x467   :  { %4441 = vmatpush1.bf16.msra.mxu1 %v7935_v0  ;;  %v7989_v0 = vld [vmem:[%s11021_s5 + $0x8] ss:$16 sps:$4 sm:$0xff]  }
 0x468   :  { %4442 = vmatprep.subr.bf16.mxu1 %v7940_v9 }
 0x46b   :  { %4443 = vmatpush1.bf16.msra.mxu1 %v7938_v10  ;;  %v7994_v10 = vld [vmem:[%s11021_s5 + $0x2c] ss:$16 sps:$4 sm:$0xff]  }
 0x46c   :  { %4453 = vmatprep.subr.bf16.mxu1 %v7943_v11  ;;  %v7992_v11 = vld [vmem:[%s11021_s5 + $0x28] ss:$16 sps:$4 sm:$0xff]  }
 0x4c1   :  { %v3566_v17 = vpop.f32.mrb[0].mxu1 }
 0x4c2   :  { %v3567_v18 = vadd.f32 %v3566_v17, %v3195_v14  ;;  %v3568_v19 = vpop.f32.mrb[1].mxu1  ;;  %v7995_v14 = vld [vmem:[%s11021_s5 + $0x48] ss:$16 sps:$4 sm:$0xff]  }
 0x4c3   :  { %v3569_v20 = vadd.f32 %v3568_v19, %v3199_v15  ;;  %v3570_v21 = vpop.f32.mrb[2].mxu1  ;;  %v8000_v15 = vld [vmem:[%s11021_s5 + $0x6c] ss:$16 sps:$4 sm:$0xff]   ;;  %v7998_v17 = vld [vmem:[%s11021_s5 + $0x68] ss:$16 sps:$4 sm:$0xff]  }
 0x4c4   :  { %v10063_v22 = vmax.f32 %v3567_v18, 0.0  ;;  %v3571_v23 = vpop.f32.mrb[3].mxu1  ;;  %v8003_v18 = vld [vmem:[%s11021_s5 + $0x8c] ss:$16 sps:$4 sm:$0xff]   ;;  %v8001_v19 = vld [vmem:[%s11021_s5 + $0x88] ss:$16 sps:$4 sm:$0xff]  }
 0x4c5   :  { %v10065_v24 = vmax.f32 %v3569_v20, 0.0  ;;  %v8006_v20 = vld [vmem:[%s11021_s5 + $0xac] ss:$16 sps:$4 sm:$0xff]   ;;  %v8004_v21 = vld [vmem:[%s11021_s5 + $0xa8] ss:$16 sps:$4 sm:$0xff]  }
 0x4c6   :  { %v10076_v27 = vpack.c.bf16 %v10063_v22, %v10063_v22  ;;  %v8009_v23 = vld [vmem:[%s11021_s5 + $0xcc] ss:$16 sps:$4 sm:$0xff]  }
 0x4c7   :  { %v10069_v25 = vpack.c.bf16 %v10065_v24, %v10065_v24 }
 0x4c9   :  { %4444 = vmatprep.mubr.bf16.mxu1 %v10069_v25 }
 0x4ca   :  { %4445 = vmatmul.mubr.bf16.vlgmr.msra.gmra.mrb[8].mxu1 %v10076_v27 }
 0x4cb   :  { %4454 = vmatpush1.bf16.msra.mxu1 %v7941_v26  ;;  %v8007_v26 = vld [vmem:[%s11021_s5 + $0xc8] ss:$16 sps:$4 sm:$0xff]  }
 0x4cc   :  { %4455 = vmatprep.subr.bf16.mxu1 %v7946_v28  ;;  %v8012_v28 = vld [vmem:[%s11021_s5 + $0xec] ss:$16 sps:$4 sm:$0xff]  }
 0x4cf   :  { %4456 = vmatpush1.bf16.msra.mxu1 %v7944_v29  ;;  %v8010_v29 = vld [vmem:[%s11021_s5 + $0xe8] ss:$16 sps:$4 sm:$0xff]  }
 0x4d0   :  { %4457 = vmatprep.subr.bf16.mxu1 %v7949_v30  ;;  %v8015_v30 = vld [vmem:[%s11021_s5 + $0x10c] ss:$16 sps:$4 sm:$0xff]  }
 0x4d3   :  { %4458 = vmatpush1.bf16.msra.mxu1 %v7947_v31  ;;  %v8013_v31 = vld [vmem:[%s11021_s5 + $0x108] ss:$16 sps:$4 sm:$0xff]  }
 0x4d4   :  { %4459 = vmatprep.subr.bf16.mxu1 %v7952_v32  ;;  %v8018_v32 = vld [vmem:[%s11021_s5 + $0x12c] ss:$16 sps:$4 sm:$0xff]  }
 0x4d7   :  { %4460 = vmatpush1.bf16.msra.mxu1 %v7950_v33  ;;  %v8016_v33 = vld [vmem:[%s11021_s5 + $0x128] ss:$16 sps:$4 sm:$0xff]  }
 0x4d8   :  { %4461 = vmatprep.subr.bf16.mxu1 %v7955_v34  ;;  %v8021_v34 = vld [vmem:[%s11021_s5 + $0x14c] ss:$16 sps:$4 sm:$0xff]  }
 0x4db   :  { %4462 = vmatpush1.bf16.msra.mxu1 %v7953_v35  ;;  %v8019_v35 = vld [vmem:[%s11021_s5 + $0x148] ss:$16 sps:$4 sm:$0xff]  }
 0x4dc   :  { %4463 = vmatprep.subr.bf16.mxu1 %v7958_v36  ;;  %v8024_v36 = vld [vmem:[%s11021_s5 + $0x16c] ss:$16 sps:$4 sm:$0xff]  }
 0x4df   :  { %4464 = vmatpush1.bf16.msra.mxu1 %v7956_v37  ;;  %v8022_v37 = vld [vmem:[%s11021_s5 + $0x168] ss:$16 sps:$4 sm:$0xff]  }
 0x4e0   :  { %4465 = vmatprep.subr.bf16.mxu1 %v7961_v38  ;;  %v8027_v38 = vld [vmem:[%s11021_s5 + $0x18c] ss:$16 sps:$4 sm:$0xff]  }
 0x4e3   :  { %4466 = vmatpush1.bf16.msra.mxu1 %v7959_v39  ;;  %v8025_v39 = vld [vmem:[%s11021_s5 + $0x188] ss:$16 sps:$4 sm:$0xff]  }
 0x4e4   :  { %4467 = vmatprep.subr.bf16.mxu1 %v7964_v40  ;;  %v8030_v40 = vld [vmem:[%s11021_s5 + $0x1ac] ss:$16 sps:$4 sm:$0xff]  }
 0x4e7   :  { %4468 = vmatpush1.bf16.msra.mxu1 %v7962_v41  ;;  %v8028_v41 = vld [vmem:[%s11021_s5 + $0x1a8] ss:$16 sps:$4 sm:$0xff]  }
 0x4e8   :  { %4469 = vmatprep.subr.bf16.mxu1 %v7967_v42  ;;  %v8033_v42 = vld [vmem:[%s11021_s5 + $0x1cc] ss:$16 sps:$4 sm:$0xff]  }
 0x4eb   :  { %4470 = vmatpush1.bf16.msra.mxu1 %v7965_v43  ;;  %v8031_v43 = vld [vmem:[%s11021_s5 + $0x1c8] ss:$16 sps:$4 sm:$0xff]  }
 0x4ec   :  { %4471 = vmatprep.subr.bf16.mxu1 %v7970_v44  ;;  %v8036_v44 = vld [vmem:[%s11021_s5 + $0x1ec] ss:$16 sps:$4 sm:$0xff]  }
 0x4ef   :  { %4472 = vmatpush1.bf16.msra.mxu1 %v7968_v45  ;;  %v8034_v45 = vld [vmem:[%s11021_s5 + $0x1e8] ss:$16 sps:$4 sm:$0xff]  }
 0x4f0   :  { %4473 = vmatprep.subr.bf16.mxu1 %v7973_v46  ;;  %v8039_v46 = vld [vmem:[%s11021_s5 + $0x20c] ss:$16 sps:$4 sm:$0xff]  }
 0x4f3   :  { %4474 = vmatpush1.bf16.msra.mxu1 %v7971_v47  ;;  %v8037_v47 = vld [vmem:[%s11021_s5 + $0x208] ss:$16 sps:$4 sm:$0xff]  }
 0x4f4   :  { %4475 = vmatprep.subr.bf16.mxu1 %v7976_v48  ;;  %v8042_v48 = vld [vmem:[%s11021_s5 + $0x22c] ss:$16 sps:$4 sm:$0xff]  }
 0x4f7   :  { %4476 = vmatpush1.bf16.msra.mxu1 %v7974_v49  ;;  %v8040_v49 = vld [vmem:[%s11021_s5 + $0x228] ss:$16 sps:$4 sm:$0xff]  }
 0x4f8   :  { %4477 = vmatprep.subr.bf16.mxu1 %v7979_v50  ;;  %v8045_v50 = vld [vmem:[%s11021_s5 + $0x24c] ss:$16 sps:$4 sm:$0xff]  }
 0x4fb   :  { %4478 = vmatpush1.bf16.msra.mxu1 %v7977_v51  ;;  %v8043_v51 = vld [vmem:[%s11021_s5 + $0x248] ss:$16 sps:$4 sm:$0xff]  }
 0x4fc   :  { %4479 = vmatprep.subr.bf16.mxu1 %v7982_v52  ;;  %v8048_v52 = vld [vmem:[%s11021_s5 + $0x26c] ss:$16 sps:$4 sm:$0xff]  }
 0x4ff   :  { %4480 = vmatpush1.bf16.msra.mxu1 %v7980_v54  ;;  %v8046_v54 = vld [vmem:[%s11021_s5 + $0x268] ss:$16 sps:$4 sm:$0xff]  }
 0x500   :  { %4481 = vmatprep.subr.bf16.mxu1 %v7985_v56  ;;  %v8051_v56 = vld [vmem:[%s11021_s5 + $0x28c] ss:$16 sps:$4 sm:$0xff]  }
 0x501   :  { %v3607_v62 = vpop.f32.mrb[4].mxu1 }
 0x502   :  { %v3608_v63 = vadd.f32 %v3607_v62, %v3203_v57  ;;  %v3609_v16 = vpop.f32.mrb[5].mxu1  ;;  %v8049_v57 = vld [vmem:[%s11021_s5 + $0x288] ss:$16 sps:$4 sm:$0xff]  }
 0x503   :  { %v3610_v1 = vadd.f32 %v3609_v16, %v3207_v58  ;;  %v3611_v2 = vpop.f32.mrb[6].mxu1  ;;  %4482 = vmatpush1.bf16.msra.mxu1 %v7983_v60  ;;  %v8054_v58 = vld [vmem:[%s11021_s5 + $0x2ac] ss:$16 sps:$4 sm:$0xff]   ;;  %v8052_v60 = vld [vmem:[%s11021_s5 + $0x2a8] ss:$16 sps:$4 sm:$0xff]  }
 0x504   :  { %v10180_v4 = vmax.f32 %v3608_v63, 0.0  ;;  %v3612_v5 = vpop.f32.mrb[7].mxu1  ;;  %4483 = vmatprep.subr.bf16.mxu1 %v7988_v13  ;;  %v8057_v13 = vld [vmem:[%s11021_s5 + $0x2cc] ss:$16 sps:$4 sm:$0xff]   ;;  %v8055_v62 = vld [vmem:[%s11021_s5 + $0x2c8] ss:$16 sps:$4 sm:$0xff]  }
 0x505   :  { %v10185_v7 = vmax.f32 %v3610_v1, 0.0  ;;  %v8060_v63 = vld [vmem:[%s11021_s5 + $0x2ec] ss:$16 sps:$4 sm:$0xff]   ;;  %v8058_v16 = vld [vmem:[%s11021_s5 + $0x2e8] ss:$16 sps:$4 sm:$0xff]  }
 0x506   :  { %v10196_v9 = vpack.c.bf16 %v10180_v4, %v10180_v4  ;;  %v8063_v1 = vld [vmem:[%s11021_s5 + $0x30c] ss:$16 sps:$4 sm:$0xff]   ;;  %v8061_v2 = vld [vmem:[%s11021_s5 + $0x308] ss:$16 sps:$4 sm:$0xff]  }
 0x507   :  { %v10189_v8 = vpack.c.bf16 %v10185_v7, %v10185_v7  ;;  %4484 = vmatpush1.bf16.msra.mxu1 %v7986_v3  ;;  %v8066_v3 = vld [vmem:[%s11021_s5 + $0x32c] ss:$16 sps:$4 sm:$0xff]   ;;  %v8064_v5 = vld [vmem:[%s11021_s5 + $0x328] ss:$16 sps:$4 sm:$0xff]  }
 0x508   :  { %4494 = vmatprep.subr.bf16.mxu1 %v7991_v6  ;;  %v8069_v6 = vld [vmem:[%s11021_s5 + $0x34c] ss:$16 sps:$4 sm:$0xff]  }
 0x509   :  { %4485 = vmatprep.mubr.bf16.mxu1 %v10189_v8 }
 0x50a   :  { %4486 = vmatmul.mubr.bf16.vlgmr.msra.gmra.mrb[8].mxu1 %v10196_v9 }
 0x50b   :  { %4495 = vmatpush1.bf16.msra.mxu1 %v7989_v0  ;;  %4526 = vmatprep.mubr.bf16.mxu1 %v10069_v25  ;;  %v8067_v0 = vld [vmem:[%s11021_s5 + $0x348] ss:$16 sps:$4 sm:$0xff]  }
 0x50c   :  { %4496 = vmatprep.subr.bf16.mxu1 %v7994_v10  ;;  %v8072_v10 = vld [vmem:[%s11021_s5 + $0x36c] ss:$16 sps:$4 sm:$0xff]  }
 0x50f   :  { %4497 = vmatpush1.bf16.msra.mxu1 %v7992_v11  ;;  %v8070_v11 = vld [vmem:[%s11021_s5 + $0x368] ss:$16 sps:$4 sm:$0xff]  }
 0x510   :  { %4498 = vmatprep.subr.bf16.mxu1 %v7997_v12  ;;  %v8075_v12 = vld [vmem:[%s11021_s5 + $0x38c] ss:$16 sps:$4 sm:$0xff]  }
 0x513   :  { %4499 = vmatpush1.bf16.msra.mxu1 %v7995_v14  ;;  %v8073_v14 = vld [vmem:[%s11021_s5 + $0x388] ss:$16 sps:$4 sm:$0xff]  }
 0x514   :  { %4500 = vmatprep.subr.bf16.mxu1 %v8000_v15  ;;  %v8078_v15 = vld [vmem:[%s11021_s5 + $0x3ac] ss:$16 sps:$4 sm:$0xff]  }
 0x517   :  { %4501 = vmatpush1.bf16.msra.mxu1 %v7998_v17  ;;  %v8076_v17 = vld [vmem:[%s11021_s5 + $0x3a8] ss:$16 sps:$4 sm:$0xff]  }
 0x518   :  { %4502 = vmatprep.subr.bf16.mxu1 %v8003_v18  ;;  %v8081_v18 = vld [vmem:[%s11021_s5 + $0x3cc] ss:$16 sps:$4 sm:$0xff]  }
 0x51b   :  { %4503 = vmatpush1.bf16.msra.mxu1 %v8001_v19  ;;  %v8079_v19 = vld [vmem:[%s11021_s5 + $0x3c8] ss:$16 sps:$4 sm:$0xff]  }
 0x51c   :  { %4504 = vmatprep.subr.bf16.mxu1 %v8006_v20  ;;  %v8084_v20 = vld [vmem:[%s11021_s5 + $0x3ec] ss:$16 sps:$4 sm:$0xff]  }
 0x51f   :  { %4505 = vmatpush1.bf16.msra.mxu1 %v8004_v21  ;;  %v8082_v21 = vld [vmem:[%s11021_s5 + $0x3e8] ss:$16 sps:$4 sm:$0xff]  }
 0x520   :  { %4506 = vmatprep.subr.bf16.mxu1 %v8009_v23  ;;  %v8085_v23 = vld [vmem:[%s11023_s7 + $0x40] sm:$0xff]  }
 0x523   :  { %4507 = vmatpush1.bf16.msra.mxu1 %v8007_v26  ;;  %v8086_v26 = vld [vmem:[%s11023_s7] sm:$0xff]  }
 0x524   :  { %4508 = vmatprep.subr.bf16.mxu1 %v8012_v28  ;;  %v8087_v28 = vld [vmem:[%s11023_s7 + $0x48] sm:$0xff]  }
 0x527   :  { %4509 = vmatpush1.bf16.msra.mxu1 %v8010_v29  ;;  %v8088_v29 = vld [vmem:[%s11023_s7 + $0x8] sm:$0xff]  }
 0x528   :  { %4510 = vmatprep.subr.bf16.mxu1 %v8015_v30  ;;  %v8089_v30 = vld [vmem:[%s11023_s7 + $0x50] sm:$0xff]  }
 0x52b   :  { %4511 = vmatpush1.bf16.msra.mxu1 %v8013_v31  ;;  %v8090_v31 = vld [vmem:[%s11023_s7 + $0x10] sm:$0xff]  }
 0x52c   :  { %4512 = vmatprep.subr.bf16.mxu1 %v8018_v32  ;;  %v8091_v32 = vld [vmem:[%s11023_s7 + $0x58] sm:$0xff]  }
 0x52f   :  { %4513 = vmatpush1.bf16.msra.mxu1 %v8016_v33  ;;  %v8092_v33 = vld [vmem:[%s11023_s7 + $0x18] sm:$0xff]  }
 0x530   :  { %4514 = vmatprep.subr.bf16.mxu1 %v8021_v34  ;;  %v8093_v34 = vld [vmem:[%s11023_s7 + $0x60] sm:$0xff]  }
 0x533   :  { %4515 = vmatpush1.bf16.msra.mxu1 %v8019_v35  ;;  %v8094_v35 = vld [vmem:[%s11023_s7 + $0x20] sm:$0xff]  }
 0x534   :  { %4516 = vmatprep.subr.bf16.mxu1 %v8024_v36  ;;  %v8095_v36 = vld [vmem:[%s11023_s7 + $0x68] sm:$0xff]  }
 0x537   :  { %4517 = vmatpush1.bf16.msra.mxu1 %v8022_v37  ;;  %v8096_v37 = vld [vmem:[%s11023_s7 + $0x28] sm:$0xff]  }
 0x538   :  { %4518 = vmatprep.subr.bf16.mxu1 %v8027_v38  ;;  %v8097_v38 = vld [vmem:[%s11023_s7 + $0x70] sm:$0xff]  }
 0x53b   :  { %4519 = vmatpush1.bf16.msra.mxu1 %v8025_v39  ;;  %v8098_v39 = vld [vmem:[%s11023_s7 + $0x30] sm:$0xff]  }
 0x53c   :  { %4520 = vmatprep.subr.bf16.mxu1 %v8030_v40  ;;  %v8099_v40 = vld [vmem:[%s11023_s7 + $0x78] sm:$0xff]  }
 0x53f   :  { %4521 = vmatpush1.bf16.msra.mxu1 %v8028_v41  ;;  %v8100_v41 = vld [vmem:[%s11023_s7 + $0x38] sm:$0xff]  }
 0x540   :  { %4522 = vmatprep.subr.bf16.mxu1 %v8033_v42  ;;  %v8101_v42 = vld [vmem:[%s11023_s7 + $0xc0] sm:$0xff]  }
 0x543   :  { %4523 = vmatpush1.bf16.msra.mxu1 %v8031_v43  ;;  %v3750_v43 = vld [vmem:[%s11022_s6] sm:$0xf] }
 0x544   :  { %4524 = vmatprep.subr.bf16.mxu1 %v8036_v44  ;;  %v3755_v44 = vrot.slane %v3750_v43, %v9848_v59 }
 0x547   :  { %4525 = vmatpush1.bf16.msra.mxu1 %v8034_v45  ;;  %v3759_v45 = vrot.slane %v3750_v43, %v9854_v61 }
 0x548   :  { %4535 = vmatprep.subr.bf16.mxu1 %v8039_v46 }
 0x54a   :  { %4527 = vmatmul.mubr.bf16.vlgmr.msra.gmra.mrb[12].mxu1 %v10076_v27 }
 0x54b   :  { %4536 = vmatpush1.bf16.msra.mxu1 %v8037_v47  ;;  %4567 = vmatprep.mubr.bf16.mxu1 %v10189_v8 }
 0x54c   :  { %4537 = vmatprep.subr.bf16.mxu1 %v8042_v48 }
 0x54f   :  { %4538 = vmatpush1.bf16.msra.mxu1 %v8040_v49 }
 0x550   :  { %4539 = vmatprep.subr.bf16.mxu1 %v8045_v50 }
 0x553   :  { %4540 = vmatpush1.bf16.msra.mxu1 %v8043_v51 }
 0x554   :  { %4541 = vmatprep.subr.bf16.mxu1 %v8048_v52 }
 0x557   :  { %4542 = vmatpush1.bf16.msra.mxu1 %v8046_v54 }
 0x558   :  { %4543 = vmatprep.subr.bf16.mxu1 %v8051_v56 }
 0x55b   :  { %4544 = vmatpush1.bf16.msra.mxu1 %v8049_v57  ;;  %v8102_v57 = vld [vmem:[%s11023_s7 + $0x80] sm:$0xff]  }
 0x55c   :  { %4545 = vmatprep.subr.bf16.mxu1 %v8054_v58 }
 0x55f   :  { %4546 = vmatpush1.bf16.msra.mxu1 %v8052_v60  ;;  %v8103_v60 = vld [vmem:[%s11023_s7 + $0xc8] sm:$0xff]  }
 0x560   :  { %4547 = vmatprep.subr.bf16.mxu1 %v8057_v13  ;;  %v8104_v13 = vld [vmem:[%s11023_s7 + $0x88] sm:$0xff]  }
 0x563   :  { %4548 = vmatpush1.bf16.msra.mxu1 %v8055_v62  ;;  %v8105_v62 = vld [vmem:[%s11023_s7 + $0xd0] sm:$0xff]  }
 0x564   :  { %4549 = vmatprep.subr.bf16.mxu1 %v8060_v63  ;;  %v8106_v63 = vld [vmem:[%s11023_s7 + $0x90] sm:$0xff]  }
 0x567   :  { %4550 = vmatpush1.bf16.msra.mxu1 %v8058_v16  ;;  %v8107_v16 = vld [vmem:[%s11023_s7 + $0xd8] sm:$0xff]  }
 0x568   :  { %4551 = vmatprep.subr.bf16.mxu1 %v8063_v1  ;;  %v8108_v1 = vld [vmem:[%s11023_s7 + $0x98] sm:$0xff]  }
 0x56b   :  { %4552 = vmatpush1.bf16.msra.mxu1 %v8061_v2  ;;  %v8109_v2 = vld [vmem:[%s11023_s7 + $0xe0] sm:$0xff]  }
 0x56c   :  { %4553 = vmatprep.subr.bf16.mxu1 %v8066_v3  ;;  %v8110_v3 = vld [vmem:[%s11023_s7 + $0xa0] sm:$0xff]  }
 0x56f   :  { %4554 = vmatpush1.bf16.msra.mxu1 %v8064_v5  ;;  %v8111_v5 = vld [vmem:[%s11023_s7 + $0xe8] sm:$0xff]  }
 0x570   :  { %4555 = vmatprep.subr.bf16.mxu1 %v8069_v6  ;;  %v8112_v6 = vld [vmem:[%s11023_s7 + $0xa8] sm:$0xff]  }
 0x573   :  { %4556 = vmatpush1.bf16.msra.mxu1 %v8067_v0  ;;  %v8113_v0 = vld [vmem:[%s11023_s7 + $0xf0] sm:$0xff]  }
 0x574   :  { %4557 = vmatprep.subr.bf16.mxu1 %v8072_v10  ;;  %v8114_v10 = vld [vmem:[%s11023_s7 + $0xb0] sm:$0xff]  }
 0x577   :  { %4558 = vmatpush1.bf16.msra.mxu1 %v8070_v11  ;;  %v8115_v11 = vld [vmem:[%s11023_s7 + $0xf8] sm:$0xff]  }
 0x578   :  { %4559 = vmatprep.subr.bf16.mxu1 %v8075_v12  ;;  %v8116_v12 = vld [vmem:[%s11023_s7 + $0xb8] sm:$0xff]  }
 0x57b   :  { %4560 = vmatpush1.bf16.msra.mxu1 %v8073_v14  ;;  %v8119_v14 = vld [vmem:[%s11025_s9 + $0x4] ss:$16 sps:$4 sm:$0xff]  }
 0x57c   :  { %4561 = vmatprep.subr.bf16.mxu1 %v8078_v15  ;;  %v3763_v15 = vrot.slane %v3750_v43, %v10156_v53 }
 0x57f   :  { %4562 = vmatpush1.bf16.msra.mxu1 %v8076_v17  ;;  %v3767_v17 = vrot.slane %v3750_v43, %v10162_v55  ;;  %v8137_v43 = vld [vmem:[%s11025_s9 + $0xc4] ss:$16 sps:$4 sm:$0xff]  }
 0x580   :  { %4563 = vmatprep.subr.bf16.mxu1 %v8081_v18 }
 0x583   :  { %4564 = vmatpush1.bf16.msra.mxu1 %v8079_v19 }
 0x584   :  { %4565 = vmatprep.subr.bf16.mxu1 %v8084_v20 }
 0x587   :  { %4566 = vmatpush1.bf16.msra.mxu1 %v8082_v21 }
 0x588   :  { %7038 = vmatprep.subr.bf16.mxu1 %v8085_v23 }
 0x58a   :  { %4568 = vmatmul.mubr.bf16.vlgmr.msra.gmra.mrb[12].mxu1 %v10196_v9 }
 0x58b   :  { %7039 = vmatpush3.bf16.msra.mxu1 %v8086_v26 }
 0x58c   :  { %7040 = vmatprep.subr.bf16.mxu1 %v8087_v28 }
 0x58f   :  { %7041 = vmatpush3.bf16.msra.mxu1 %v8088_v29 }
 0x590   :  { %7042 = vmatprep.subr.bf16.mxu1 %v8089_v30 }
 0x593   :  { %7043 = vmatpush3.bf16.msra.mxu1 %v8090_v31  ;;  %v8117_v31 = vld [vmem:[%s11025_s9] ss:$16 sps:$4 sm:$0xff]  }
 0x594   :  { %7044 = vmatprep.subr.bf16.mxu1 %v8091_v32 }
 0x597   :  { %7045 = vmatpush3.bf16.msra.mxu1 %v8092_v33  ;;  %v8122_v33 = vld [vmem:[%s11025_s9 + $0x24] ss:$16 sps:$4 sm:$0xff]  }
 0x598   :  { %7046 = vmatprep.subr.bf16.mxu1 %v8093_v34  ;;  %v8120_v34 = vld [vmem:[%s11025_s9 + $0x20] ss:$16 sps:$4 sm:$0xff]  }
 0x59b   :  { %7047 = vmatpush3.bf16.msra.mxu1 %v8094_v35  ;;  %v8125_v35 = vld [vmem:[%s11025_s9 + $0x44] ss:$16 sps:$4 sm:$0xff]  }
 0x59c   :  { %7048 = vmatprep.subr.bf16.mxu1 %v8095_v36  ;;  %v8123_v36 = vld [vmem:[%s11025_s9 + $0x40] ss:$16 sps:$4 sm:$0xff]  }
 0x59f   :  { %7049 = vmatpush3.bf16.msra.mxu1 %v8096_v37  ;;  %v8128_v37 = vld [vmem:[%s11025_s9 + $0x64] ss:$16 sps:$4 sm:$0xff]  }
 0x5a0   :  { %7050 = vmatprep.subr.bf16.mxu1 %v8097_v38  ;;  %v8126_v38 = vld [vmem:[%s11025_s9 + $0x60] ss:$16 sps:$4 sm:$0xff]  }
 0x5a3   :  { %7051 = vmatpush3.bf16.msra.mxu1 %v8098_v39  ;;  %v8131_v39 = vld [vmem:[%s11025_s9 + $0x84] ss:$16 sps:$4 sm:$0xff]  }
 0x5a4   :  { %7052 = vmatprep.subr.bf16.mxu1 %v8099_v40  ;;  %v8129_v40 = vld [vmem:[%s11025_s9 + $0x80] ss:$16 sps:$4 sm:$0xff]  }
 0x5a7   :  { %7053 = vmatpush3.bf16.msra.mxu1 %v8100_v41  ;;  %v8134_v41 = vld [vmem:[%s11025_s9 + $0xa4] ss:$16 sps:$4 sm:$0xff]  }
 0x5a8   :  { %7060 = vmatprep.subr.bf16.mxu1 %v8101_v42  ;;  %v8132_v42 = vld [vmem:[%s11025_s9 + $0xa0] ss:$16 sps:$4 sm:$0xff]  }
 0x5dd   :  { %v4487_v46 = vpop.f32.mrb[8].mxu1 }
 0x5de   :  { %v7128_v47 = vadd.f32 %v4487_v46, %v3755_v44  ;;  %v4489_v48 = vpop.f32.mrb[9].mxu1  ;;  %v8135_v44 = vld [vmem:[%s11025_s9 + $0xc0] ss:$16 sps:$4 sm:$0xff]  }
 0x5df   :  { %v7129_v49 = vadd.f32 %v4489_v48, %v3759_v45  ;;  %v4491_v50 = vpop.f32.mrb[10].mxu1  ;;  %v8140_v45 = vld [vmem:[%s11025_s9 + $0xe4] ss:$16 sps:$4 sm:$0xff]   ;;  %v8138_v46 = vld [vmem:[%s11025_s9 + $0xe0] ss:$16 sps:$4 sm:$0xff]  }
 0x5e0   :  { %v4576_v51 = vmax.f32 %v7128_v47, 0.0  ;;  %v4492_v52 = vpop.f32.mrb[11].mxu1  ;;  %v8143_v47 = vld [vmem:[%s11025_s9 + $0x104] ss:$16 sps:$4 sm:$0xff]   ;;  %v8141_v48 = vld [vmem:[%s11025_s9 + $0x100] ss:$16 sps:$4 sm:$0xff]  }
 0x5e1   :  { %v4577_v54 = vmax.f32 %v7129_v49, 0.0  ;;  %v8146_v49 = vld [vmem:[%s11025_s9 + $0x124] ss:$16 sps:$4 sm:$0xff]   ;;  %v8144_v50 = vld [vmem:[%s11025_s9 + $0x120] ss:$16 sps:$4 sm:$0xff]  }
 0x5e2   :  { %v4580_v58 = vpack.c.bf16 %v4576_v51, %v4576_v51  ;;  %v8149_v51 = vld [vmem:[%s11025_s9 + $0x144] ss:$16 sps:$4 sm:$0xff]   ;;  %v8147_v52 = vld [vmem:[%s11025_s9 + $0x140] ss:$16 sps:$4 sm:$0xff]  }
 0x5e3   :  { %v4581_v56 = vpack.c.bf16 %v4577_v54, %v4577_v54  ;;  %v8152_v54 = vld [vmem:[%s11025_s9 + $0x164] ss:$16 sps:$4 sm:$0xff]  }
 0x5e5   :  { %4879 = vmatprep.mubr.bf16.mxu1 %v4581_v56  ;;  %v8150_v56 = vld [vmem:[%s11025_s9 + $0x160] ss:$16 sps:$4 sm:$0xff]  }
 0x5e6   :  { %4880 = vmatmul.mubr.bf16.vlgmr.msra.gmra.mrb[16].mxu1 %v4580_v58  ;;  %v8153_v58 = vld [vmem:[%s11025_s9 + $0x180] ss:$16 sps:$4 sm:$0xff]  }
 0x5e7   :  { %7061 = vmatpush3.bf16.msra.mxu1 %v8102_v57  ;;  %v8155_v57 = vld [vmem:[%s11025_s9 + $0x184] ss:$16 sps:$4 sm:$0xff]  }
 0x5e8   :  { %7062 = vmatprep.subr.bf16.mxu1 %v8103_v60  ;;  %v8158_v60 = vld [vmem:[%s11025_s9 + $0x1a4] ss:$16 sps:$4 sm:$0xff]  }
 0x5eb   :  { %7063 = vmatpush3.bf16.msra.mxu1 %v8104_v13  ;;  %v8156_v13 = vld [vmem:[%s11025_s9 + $0x1a0] ss:$16 sps:$4 sm:$0xff]  }
 0x5ec   :  { %7064 = vmatprep.subr.bf16.mxu1 %v8105_v62  ;;  %v8161_v62 = vld [vmem:[%s11025_s9 + $0x1c4] ss:$16 sps:$4 sm:$0xff]  }
 0x5ef   :  { %7065 = vmatpush3.bf16.msra.mxu1 %v8106_v63  ;;  %v8159_v63 = vld [vmem:[%s11025_s9 + $0x1c0] ss:$16 sps:$4 sm:$0xff]  }
 0x5f0   :  { %7066 = vmatprep.subr.bf16.mxu1 %v8107_v16  ;;  %v8164_v16 = vld [vmem:[%s11025_s9 + $0x1e4] ss:$16 sps:$4 sm:$0xff]  }
 0x5f3   :  { %7067 = vmatpush3.bf16.msra.mxu1 %v8108_v1  ;;  %v8162_v1 = vld [vmem:[%s11025_s9 + $0x1e0] ss:$16 sps:$4 sm:$0xff]  }
 0x5f4   :  { %7068 = vmatprep.subr.bf16.mxu1 %v8109_v2  ;;  %v8167_v2 = vld [vmem:[%s11025_s9 + $0x204] ss:$16 sps:$4 sm:$0xff]  }
 0x5f7   :  { %7069 = vmatpush3.bf16.msra.mxu1 %v8110_v3  ;;  %v8165_v3 = vld [vmem:[%s11025_s9 + $0x200] ss:$16 sps:$4 sm:$0xff]  }
 0x5f8   :  { %7070 = vmatprep.subr.bf16.mxu1 %v8111_v5  ;;  %v8170_v5 = vld [vmem:[%s11025_s9 + $0x224] ss:$16 sps:$4 sm:$0xff]  }
 0x5fb   :  { %7071 = vmatpush3.bf16.msra.mxu1 %v8112_v6  ;;  %v8168_v6 = vld [vmem:[%s11025_s9 + $0x220] ss:$16 sps:$4 sm:$0xff]  }
 0x5fc   :  { %7072 = vmatprep.subr.bf16.mxu1 %v8113_v0  ;;  %v8173_v0 = vld [vmem:[%s11025_s9 + $0x244] ss:$16 sps:$4 sm:$0xff]  }
 0x5ff   :  { %7073 = vmatpush3.bf16.msra.mxu1 %v8114_v10  ;;  %v8171_v10 = vld [vmem:[%s11025_s9 + $0x240] ss:$16 sps:$4 sm:$0xff]  }
 0x600   :  { %7074 = vmatprep.subr.bf16.mxu1 %v8115_v11  ;;  %v8176_v11 = vld [vmem:[%s11025_s9 + $0x264] ss:$16 sps:$4 sm:$0xff]  }
 0x603   :  { %7075 = vmatpush3.bf16.msra.mxu1 %v8116_v12  ;;  %v8174_v12 = vld [vmem:[%s11025_s9 + $0x260] ss:$16 sps:$4 sm:$0xff]  }
 0x604   :  { %5719 = vmatprep.subr.bf16.mxu1 %v8119_v14  ;;  %v8179_v14 = vld [vmem:[%s11025_s9 + $0x284] ss:$16 sps:$4 sm:$0xff]  }
 0x65d   :  { %v4569_v18 = vpop.f32.mrb[12].mxu1 }
 0x65e   :  { %v7130_v19 = vadd.f32 %v4569_v18, %v3763_v15  ;;  %v4571_v20 = vpop.f32.mrb[13].mxu1  ;;  %v8177_v15 = vld [vmem:[%s11025_s9 + $0x280] ss:$16 sps:$4 sm:$0xff]  }
 0x65f   :  { %v7131_v21 = vadd.f32 %v4571_v20, %v3767_v17  ;;  %v4573_v23 = vpop.f32.mrb[14].mxu1  ;;  %v8182_v17 = vld [vmem:[%s11025_s9 + $0x2a4] ss:$16 sps:$4 sm:$0xff]   ;;  %v8180_v18 = vld [vmem:[%s11025_s9 + $0x2a0] ss:$16 sps:$4 sm:$0xff]  }
 0x660   :  { %v4578_v26 = vmax.f32 %v7130_v19, 0.0  ;;  %v4574_v28 = vpop.f32.mrb[15].mxu1  ;;  %v8185_v19 = vld [vmem:[%s11025_s9 + $0x2c4] ss:$16 sps:$4 sm:$0xff]  }
 0x661   :  { %v4579_v29 = vmax.f32 %v7131_v21, 0.0  ;;  %v8183_v28 = vld [vmem:[%s11025_s9 + $0x2c0] ss:$16 sps:$4 sm:$0xff]  }
 0x662   :  { %v4582_v32 = vpack.c.bf16 %v4578_v26, %v4578_v26 }
 0x663   :  { %v4583_v30 = vpack.c.bf16 %v4579_v29, %v4579_v29 }
 0x665   :  { %4919 = vmatprep.mubr.bf16.mxu1 %v4583_v30  ;;  %v8188_v30 = vld [vmem:[%s11025_s9 + $0x2e4] ss:$16 sps:$4 sm:$0xff]  }
 0x666   :  { %4920 = vmatmul.mubr.bf16.vlgmr.msra.gmra.mrb[20].mxu1 %v4582_v32  ;;  %v8191_v32 = vld [vmem:[%s11025_s9 + $0x304] ss:$16 sps:$4 sm:$0xff]  }
 0x667   :  { %5720 = vmatpush1.bf16.msra.mxu1 %v8117_v31  ;;  %5751 = vmatprep.mubr.bf16.mxu1 %v10069_v25  ;;  %v8186_v31 = vld [vmem:[%s11025_s9 + $0x2e0] ss:$16 sps:$4 sm:$0xff]  }
 0x668   :  { %5721 = vmatprep.subr.bf16.mxu1 %v8122_v33  ;;  %v8189_v33 = vld [vmem:[%s11025_s9 + $0x300] ss:$16 sps:$4 sm:$0xff]  }
 0x66b   :  { %5722 = vmatpush1.bf16.msra.mxu1 %v8120_v34  ;;  %v8194_v34 = vld [vmem:[%s11025_s9 + $0x324] ss:$16 sps:$4 sm:$0xff]  }
 0x66c   :  { %5723 = vmatprep.subr.bf16.mxu1 %v8125_v35  ;;  %v8192_v35 = vld [vmem:[%s11025_s9 + $0x320] ss:$16 sps:$4 sm:$0xff]  }
 0x66f   :  { %5724 = vmatpush1.bf16.msra.mxu1 %v8123_v36  ;;  %v8197_v36 = vld [vmem:[%s11025_s9 + $0x344] ss:$16 sps:$4 sm:$0xff]  }
 0x670   :  { %5725 = vmatprep.subr.bf16.mxu1 %v8128_v37  ;;  %v8195_v37 = vld [vmem:[%s11025_s9 + $0x340] ss:$16 sps:$4 sm:$0xff]  }
 0x673   :  { %5726 = vmatpush1.bf16.msra.mxu1 %v8126_v38  ;;  %v8200_v38 = vld [vmem:[%s11025_s9 + $0x364] ss:$16 sps:$4 sm:$0xff]  }
 0x674   :  { %5727 = vmatprep.subr.bf16.mxu1 %v8131_v39  ;;  %v8198_v39 = vld [vmem:[%s11025_s9 + $0x360] ss:$16 sps:$4 sm:$0xff]  }
 0x677   :  { %5728 = vmatpush1.bf16.msra.mxu1 %v8129_v40  ;;  %v8203_v40 = vld [vmem:[%s11025_s9 + $0x384] ss:$16 sps:$4 sm:$0xff]  }
 0x678   :  { %5729 = vmatprep.subr.bf16.mxu1 %v8134_v41  ;;  %v8201_v41 = vld [vmem:[%s11025_s9 + $0x380] ss:$16 sps:$4 sm:$0xff]  }
 0x67b   :  { %5730 = vmatpush1.bf16.msra.mxu1 %v8132_v42  ;;  %v8206_v42 = vld [vmem:[%s11025_s9 + $0x3a4] ss:$16 sps:$4 sm:$0xff]  }
 0x67c   :  { %5731 = vmatprep.subr.bf16.mxu1 %v8137_v43  ;;  %v8204_v43 = vld [vmem:[%s11025_s9 + $0x3a0] ss:$16 sps:$4 sm:$0xff]  }
 0x67f   :  { %5732 = vmatpush1.bf16.msra.mxu1 %v8135_v44  ;;  %v8209_v44 = vld [vmem:[%s11025_s9 + $0x3c4] ss:$16 sps:$4 sm:$0xff]  }
 0x680   :  { %5733 = vmatprep.subr.bf16.mxu1 %v8140_v45  ;;  %v8207_v45 = vld [vmem:[%s11025_s9 + $0x3c0] ss:$16 sps:$4 sm:$0xff]  }
 0x683   :  { %5734 = vmatpush1.bf16.msra.mxu1 %v8138_v46  ;;  %v8212_v46 = vld [vmem:[%s11025_s9 + $0x3e4] ss:$16 sps:$4 sm:$0xff]  }
 0x684   :  { %5735 = vmatprep.subr.bf16.mxu1 %v8143_v47  ;;  %v8210_v47 = vld [vmem:[%s11025_s9 + $0x3e0] ss:$16 sps:$4 sm:$0xff]  }
 0x687   :  { %5736 = vmatpush1.bf16.msra.mxu1 %v8141_v48  ;;  %v8215_v48 = vld [vmem:[%s11025_s9 + $0xc] ss:$16 sps:$4 sm:$0xff]  }
 0x688   :  { %5737 = vmatprep.subr.bf16.mxu1 %v8146_v49  ;;  %v8213_v49 = vld [vmem:[%s11025_s9 + $0x8] ss:$16 sps:$4 sm:$0xff]  }
 0x68b   :  { %5738 = vmatpush1.bf16.msra.mxu1 %v8144_v50  ;;  %v8218_v50 = vld [vmem:[%s11025_s9 + $0x2c] ss:$16 sps:$4 sm:$0xff]  }
 0x68c   :  { %5739 = vmatprep.subr.bf16.mxu1 %v8149_v51  ;;  %v8216_v51 = vld [vmem:[%s11025_s9 + $0x28] ss:$16 sps:$4 sm:$0xff]  }
 0x68f   :  { %5740 = vmatpush1.bf16.msra.mxu1 %v8147_v52  ;;  %v8221_v52 = vld [vmem:[%s11025_s9 + $0x4c] ss:$16 sps:$4 sm:$0xff]  }
 0x690   :  { %5741 = vmatprep.subr.bf16.mxu1 %v8152_v54  ;;  %v8219_v54 = vld [vmem:[%s11025_s9 + $0x48] ss:$16 sps:$4 sm:$0xff]  }
 0x693   :  { %5742 = vmatpush1.bf16.msra.mxu1 %v8150_v56  ;;  %v8224_v56 = vld [vmem:[%s11025_s9 + $0x6c] ss:$16 sps:$4 sm:$0xff]  }
 0x694   :  { %5743 = vmatprep.subr.bf16.mxu1 %v8155_v57  ;;  %v8227_v57 = vld [vmem:[%s11025_s9 + $0x8c] ss:$16 sps:$4 sm:$0xff]  }
 0x697   :  { %5744 = vmatpush1.bf16.msra.mxu1 %v8153_v58  ;;  %v8225_v58 = vld [vmem:[%s11025_s9 + $0x88] ss:$16 sps:$4 sm:$0xff]  }
 0x698   :  { %5745 = vmatprep.subr.bf16.mxu1 %v8158_v60  ;;  %v8230_v60 = vld [vmem:[%s11025_s9 + $0xac] ss:$16 sps:$4 sm:$0xff]  }
 0x69b   :  { %5746 = vmatpush1.bf16.msra.mxu1 %v8156_v13  ;;  %v8228_v13 = vld [vmem:[%s11025_s9 + $0xa8] ss:$16 sps:$4 sm:$0xff]  }
 0x69c   :  { %5747 = vmatprep.subr.bf16.mxu1 %v8161_v62  ;;  %v8233_v62 = vld [vmem:[%s11025_s9 + $0xcc] ss:$16 sps:$4 sm:$0xff]  }
 0x69f   :  { %5748 = vmatpush1.bf16.msra.mxu1 %v8159_v63  ;;  %v8231_v63 = vld [vmem:[%s11025_s9 + $0xc8] ss:$16 sps:$4 sm:$0xff]  }
 0x6a0   :  { %5749 = vmatprep.subr.bf16.mxu1 %v8164_v16  ;;  %v8236_v16 = vld [vmem:[%s11025_s9 + $0xec] ss:$16 sps:$4 sm:$0xff]  }
 0x6a3   :  { %5750 = vmatpush1.bf16.msra.mxu1 %v8162_v1  ;;  %v8234_v1 = vld [vmem:[%s11025_s9 + $0xe8] ss:$16 sps:$4 sm:$0xff]  }
 0x6a4   :  { %5760 = vmatprep.subr.bf16.mxu1 %v8167_v2  ;;  %v8239_v2 = vld [vmem:[%s11025_s9 + $0x10c] ss:$16 sps:$4 sm:$0xff]  }
 0x6a6   :  { %5752 = vmatmul.mubr.bf16.vlgmr.msra.gmra.mrb[24].mxu1 %v10076_v27 }
 0x6a7   :  { %5761 = vmatpush1.bf16.msra.mxu1 %v8165_v3  ;;  %5792 = vmatprep.mubr.bf16.mxu1 %v10189_v8  ;;  %v8237_v3 = vld [vmem:[%s11025_s9 + $0x108] ss:$16 sps:$4 sm:$0xff]  }
 0x6a8   :  { %5762 = vmatprep.subr.bf16.mxu1 %v8170_v5  ;;  %v8242_v5 = vld [vmem:[%s11025_s9 + $0x12c] ss:$16 sps:$4 sm:$0xff]  }
 0x6ab   :  { %5763 = vmatpush1.bf16.msra.mxu1 %v8168_v6  ;;  %v8240_v6 = vld [vmem:[%s11025_s9 + $0x128] ss:$16 sps:$4 sm:$0xff]  }
 0x6ac   :  { %5764 = vmatprep.subr.bf16.mxu1 %v8173_v0  ;;  %v8245_v0 = vld [vmem:[%s11025_s9 + $0x14c] ss:$16 sps:$4 sm:$0xff]  }
 0x6af   :  { %5765 = vmatpush1.bf16.msra.mxu1 %v8171_v10  ;;  %v8243_v10 = vld [vmem:[%s11025_s9 + $0x148] ss:$16 sps:$4 sm:$0xff]  }
 0x6b0   :  { %5766 = vmatprep.subr.bf16.mxu1 %v8176_v11  ;;  %v8248_v11 = vld [vmem:[%s11025_s9 + $0x16c] ss:$16 sps:$4 sm:$0xff]  }
 0x6b3   :  { %5767 = vmatpush1.bf16.msra.mxu1 %v8174_v12  ;;  %v8246_v12 = vld [vmem:[%s11025_s9 + $0x168] ss:$16 sps:$4 sm:$0xff]  }
 0x6b4   :  { %5768 = vmatprep.subr.bf16.mxu1 %v8179_v14  ;;  %v8251_v14 = vld [vmem:[%s11025_s9 + $0x18c] ss:$16 sps:$4 sm:$0xff]  }
 0x6b7   :  { %5769 = vmatpush1.bf16.msra.mxu1 %v8177_v15  ;;  %v8249_v15 = vld [vmem:[%s11025_s9 + $0x188] ss:$16 sps:$4 sm:$0xff]  }
 0x6b8   :  { %5770 = vmatprep.subr.bf16.mxu1 %v8182_v17  ;;  %v8254_v17 = vld [vmem:[%s11025_s9 + $0x1ac] ss:$16 sps:$4 sm:$0xff]  }
 0x6b9   :  { %v7054_v20 = vpop.f32.mrb[16].mxu1 }
 0x6ba   :  { %v7055_v21 = vpop.f32.mrb[17].mxu1 }
 0x6bb   :  { %v10631_v23 = vadd.f32 %v7055_v21, %v7054_v20  ;;  %5771 = vmatpush1.bf16.msra.mxu1 %v8180_v18  ;;  %v7057_v26 = vpop.f32.mrb[18].mxu1  ;;  %v8252_v18 = vld [vmem:[%s11025_s9 + $0x1a8] ss:$16 sps:$4 sm:$0xff]   ;;  %v8260_v21 = vld [vmem:[%s11025_s9 + $0x1ec] ss:$16 sps:$4 sm:$0xff]  }
 0x6bc   :  { %v7058_v29 = vpop.f32.mrb[19].mxu1  ;;  %5772 = vmatprep.subr.bf16.mxu1 %v8185_v19  ;;  %v8257_v19 = vld [vmem:[%s11025_s9 + $0x1cc] ss:$16 sps:$4 sm:$0xff]   ;;  %v8255_v20 = vld [vmem:[%s11025_s9 + $0x1c8] ss:$16 sps:$4 sm:$0xff]  }
 0x6bd   :  { %v8258_v26 = vld [vmem:[%s11025_s9 + $0x1e8] ss:$16 sps:$4 sm:$0xff]  }
 0x6be   :  { %v8261_v29 = vld [vmem:[%s11025_s9 + $0x208] ss:$16 sps:$4 sm:$0xff]  }
 0x6bf   :  { %5773 = vmatpush1.bf16.msra.mxu1 %v8183_v28  ;;  %v8263_v28 = vld [vmem:[%s11025_s9 + $0x20c] ss:$16 sps:$4 sm:$0xff]  }
 0x6c0   :  { %5774 = vmatprep.subr.bf16.mxu1 %v8188_v30  ;;  %v8266_v30 = vld [vmem:[%s11025_s9 + $0x22c] ss:$16 sps:$4 sm:$0xff]  }
 0x6c3   :  { %5775 = vmatpush1.bf16.msra.mxu1 %v8186_v31  ;;  %v8264_v31 = vld [vmem:[%s11025_s9 + $0x228] ss:$16 sps:$4 sm:$0xff]  }
 0x6c4   :  { %5776 = vmatprep.subr.bf16.mxu1 %v8191_v32  ;;  %v8269_v32 = vld [vmem:[%s11025_s9 + $0x24c] ss:$16 sps:$4 sm:$0xff]  }
 0x6c7   :  { %5777 = vmatpush1.bf16.msra.mxu1 %v8189_v33  ;;  %v8267_v33 = vld [vmem:[%s11025_s9 + $0x248] ss:$16 sps:$4 sm:$0xff]  }
 0x6c8   :  { %5778 = vmatprep.subr.bf16.mxu1 %v8194_v34  ;;  %v8275_v34 = vld [vmem:[%s11025_s9 + $0x28c] ss:$16 sps:$4 sm:$0xff]  }
 0x6cb   :  { %5779 = vmatpush1.bf16.msra.mxu1 %v8192_v35  ;;  %v8273_v35 = vld [vmem:[%s11025_s9 + $0x288] ss:$16 sps:$4 sm:$0xff]  }
 0x6cc   :  { %5780 = vmatprep.subr.bf16.mxu1 %v8197_v36  ;;  %v8278_v36 = vld [vmem:[%s11025_s9 + $0x2ac] ss:$16 sps:$4 sm:$0xff]  }
 0x6cf   :  { %5781 = vmatpush1.bf16.msra.mxu1 %v8195_v37  ;;  %v8276_v37 = vld [vmem:[%s11025_s9 + $0x2a8] ss:$16 sps:$4 sm:$0xff]  }
 0x6d0   :  { %5782 = vmatprep.subr.bf16.mxu1 %v8200_v38  ;;  %v6844_v38 = vld [vmem:[%s11024_s8] ss:$0 sm:$0xff] }
 0x6d3   :  { %5783 = vmatpush1.bf16.msra.mxu1 %v8198_v39  ;;  %v8281_v39 = vld [vmem:[%s11025_s9 + $0x2cc] ss:$16 sps:$4 sm:$0xff]  }
 0x6d4   :  { %5784 = vmatprep.subr.bf16.mxu1 %v8203_v40 }
 0x6d7   :  { %5785 = vmatpush1.bf16.msra.mxu1 %v8201_v41 }
 0x6d8   :  { %5786 = vmatprep.subr.bf16.mxu1 %v8206_v42  ;;  %v4882_v42 = vadd.f32 %v10631_v23, %v6844_v38  ;;  %v8282_v23 = vld [vmem:[%s11025_s9 + $0x2e8] ss:$16 sps:$4 sm:$0xff]  }
 0x6db   :  { %5787 = vmatpush1.bf16.msra.mxu1 %v8204_v43 }
 0x6dc   :  { %5788 = vmatprep.subr.bf16.mxu1 %v8209_v44 }
 0x6df   :  { %5789 = vmatpush1.bf16.msra.mxu1 %v8207_v45  ;;  %v8279_v45 = vld [vmem:[%s11025_s9 + $0x2c8] ss:$16 sps:$4 sm:$0xff]  }
 0x6e0   :  { %5790 = vmatprep.subr.bf16.mxu1 %v8212_v46 }
 0x6e3   :  { %5791 = vmatpush1.bf16.msra.mxu1 %v8210_v47  ;;  %v8284_v47 = vld [vmem:[%s11025_s9 + $0x2ec] ss:$16 sps:$4 sm:$0xff]  }
 0x6e4   :  { %5801 = vmatprep.subr.bf16.mxu1 %v8215_v48 }
 0x6e6   :  { %5793 = vmatmul.mubr.bf16.vlgmr.msra.gmra.mrb[24].mxu1 %v10196_v9 }
 0x6e7   :  { %5802 = vmatpush1.bf16.msra.mxu1 %v8213_v49  ;;  %5833 = vmatprep.mubr.bf16.mxu1 %v10069_v25  ;;  %v8222_v25 = vld [vmem:[%s11025_s9 + $0x68] ss:$16 sps:$4 sm:$0xff]   ;;  %v8287_v49 = vld [vmem:[%s11025_s9 + $0x30c] ss:$16 sps:$4 sm:$0xff]  }
 0x6e8   :  { %5803 = vmatprep.subr.bf16.mxu1 %v8218_v50  ;;  %v8285_v50 = vld [vmem:[%s11025_s9 + $0x308] ss:$16 sps:$4 sm:$0xff]  }
 0x6eb   :  { %5804 = vmatpush1.bf16.msra.mxu1 %v8216_v51  ;;  %v8290_v51 = vld [vmem:[%s11025_s9 + $0x32c] ss:$16 sps:$4 sm:$0xff]  }
 0x6ec   :  { %5805 = vmatprep.subr.bf16.mxu1 %v8221_v52  ;;  %v8288_v52 = vld [vmem:[%s11025_s9 + $0x328] ss:$16 sps:$4 sm:$0xff]  }
 0x6ef   :  { %5806 = vmatpush1.bf16.msra.mxu1 %v8219_v54  ;;  %v8293_v54 = vld [vmem:[%s11025_s9 + $0x34c] ss:$16 sps:$4 sm:$0xff]  }
 0x6f0   :  { %5807 = vmatprep.subr.bf16.mxu1 %v8224_v56  ;;  %v8291_v56 = vld [vmem:[%s11025_s9 + $0x348] ss:$16 sps:$4 sm:$0xff]  }
 0x6f3   :  { %5808 = vmatpush1.bf16.msra.mxu1 %v8222_v25  ;;  %v8296_v25 = vld [vmem:[%s11025_s9 + $0x36c] ss:$16 sps:$4 sm:$0xff]  }
 0x6f4   :  { %5809 = vmatprep.subr.bf16.mxu1 %v8227_v57  ;;  %v8294_v57 = vld [vmem:[%s11025_s9 + $0x368] ss:$16 sps:$4 sm:$0xff]  }
 0x6f7   :  { %5810 = vmatpush1.bf16.msra.mxu1 %v8225_v58  ;;  %v8299_v58 = vld [vmem:[%s11025_s9 + $0x38c] ss:$16 sps:$4 sm:$0xff]  }
 0x6f8   :  { %5811 = vmatprep.subr.bf16.mxu1 %v8230_v60  ;;  %v8297_v60 = vld [vmem:[%s11025_s9 + $0x388] ss:$16 sps:$4 sm:$0xff]  }
 0x6fb   :  { %5812 = vmatpush1.bf16.msra.mxu1 %v8228_v13  ;;  %v8302_v13 = vld [vmem:[%s11025_s9 + $0x3ac] ss:$16 sps:$4 sm:$0xff]  }
 0x6fc   :  { %5813 = vmatprep.subr.bf16.mxu1 %v8233_v62  ;;  %v8300_v62 = vld [vmem:[%s11025_s9 + $0x3a8] ss:$16 sps:$4 sm:$0xff]  }
 0x6ff   :  { %5814 = vmatpush1.bf16.msra.mxu1 %v8231_v63  ;;  %v8305_v63 = vld [vmem:[%s11025_s9 + $0x3cc] ss:$16 sps:$4 sm:$0xff]  }
 0x700   :  { %5815 = vmatprep.subr.bf16.mxu1 %v8236_v16  ;;  %v8303_v16 = vld [vmem:[%s11025_s9 + $0x3c8] ss:$16 sps:$4 sm:$0xff]  }
 0x703   :  { %5816 = vmatpush1.bf16.msra.mxu1 %v8234_v1  ;;  %v8308_v1 = vld [vmem:[%s11025_s9 + $0x3ec] ss:$16 sps:$4 sm:$0xff]  }
 0x704   :  { %5817 = vmatprep.subr.bf16.mxu1 %v8239_v2  ;;  %v8306_v2 = vld [vmem:[%s11025_s9 + $0x3e8] ss:$16 sps:$4 sm:$0xff]  }
 0x707   :  { %5818 = vmatpush1.bf16.msra.mxu1 %v8237_v3  ;;  %v8309_v3 = vld [vmem:[%s11027_s11 + $0x40] sm:$0xff]  }
 0x708   :  { %5819 = vmatprep.subr.bf16.mxu1 %v8242_v5  ;;  %v8310_v5 = vld [vmem:[%s11027_s11] sm:$0xff]  }
 0x70b   :  { %5820 = vmatpush1.bf16.msra.mxu1 %v8240_v6  ;;  %v8311_v6 = vld [vmem:[%s11027_s11 + $0x48] sm:$0xff]  }
 0x70c   :  { %5821 = vmatprep.subr.bf16.mxu1 %v8245_v0  ;;  %v8312_v0 = vld [vmem:[%s11027_s11 + $0x8] sm:$0xff]  }
 0x70f   :  { %5822 = vmatpush1.bf16.msra.mxu1 %v8243_v10  ;;  %v8313_v10 = vld [vmem:[%s11027_s11 + $0x50] sm:$0xff]  }
 0x710   :  { %5823 = vmatprep.subr.bf16.mxu1 %v8248_v11  ;;  %v8314_v11 = vld [vmem:[%s11027_s11 + $0x10] sm:$0xff]  }
 0x713   :  { %5824 = vmatpush1.bf16.msra.mxu1 %v8246_v12  ;;  %v8316_v12 = vld [vmem:[%s11027_s11 + $0x18] sm:$0xff]  }
 0x714   :  { %5825 = vmatprep.subr.bf16.mxu1 %v8251_v14  ;;  %v8317_v14 = vld [vmem:[%s11027_s11 + $0x60] sm:$0xff]  }
 0x717   :  { %5826 = vmatpush1.bf16.msra.mxu1 %v8249_v15  ;;  %v8318_v15 = vld [vmem:[%s11027_s11 + $0x20] sm:$0xff]  }
 0x718   :  { %5827 = vmatprep.subr.bf16.mxu1 %v8254_v17  ;;  %v8319_v17 = vld [vmem:[%s11027_s11 + $0x68] sm:$0xff]  }
 0x71b   :  { %5828 = vmatpush1.bf16.msra.mxu1 %v8252_v18  ;;  %v8320_v18 = vld [vmem:[%s11027_s11 + $0x28] sm:$0xff]  }
 0x71c   :  { %5829 = vmatprep.subr.bf16.mxu1 %v8257_v19  ;;  %v8321_v19 = vld [vmem:[%s11027_s11 + $0x70] sm:$0xff]  }
 0x71f   :  { %5830 = vmatpush1.bf16.msra.mxu1 %v8255_v20  ;;  %v8322_v20 = vld [vmem:[%s11027_s11 + $0x30] sm:$0xff]  }
 0x720   :  { %5831 = vmatprep.subr.bf16.mxu1 %v8260_v21  ;;  %v8323_v21 = vld [vmem:[%s11027_s11 + $0x78] sm:$0xff]  }
 0x723   :  { %5832 = vmatpush1.bf16.msra.mxu1 %v8258_v26  ;;  %v8324_v26 = vld [vmem:[%s11027_s11 + $0x38] sm:$0xff]  }
 0x724   :  { %5842 = vmatprep.subr.bf16.mxu1 %v8263_v28  ;;  %v8325_v28 = vld [vmem:[%s11027_s11 + $0xc0] sm:$0xff]  }
 0x726   :  { %5834 = vmatmul.mubr.bf16.vlgmr.msra.gmra.mrb[28].mxu1 %v10076_v27  ;;  %v8272_v27 = vld [vmem:[%s11025_s9 + $0x26c] ss:$16 sps:$4 sm:$0xff]  }
 0x727   :  { %5843 = vmatpush1.bf16.msra.mxu1 %v8261_v29  ;;  %5874 = vmatprep.mubr.bf16.mxu1 %v10189_v8  ;;  %v8270_v8 = vld [vmem:[%s11025_s9 + $0x268] ss:$16 sps:$4 sm:$0xff]   ;;  %v5057_v29 = vld [vmem:[%s11026_s10] sm:$0xf] }
 0x728   :  { %5844 = vmatprep.subr.bf16.mxu1 %v8266_v30  ;;  %v5062_v30 = vrot.slane %v5057_v29, %v9848_v59 }
 0x72b   :  { %5845 = vmatpush1.bf16.msra.mxu1 %v8264_v31  ;;  %v5066_v31 = vrot.slane %v5057_v29, %v9854_v61  ;;  %v8327_v61 = vld [vmem:[%s11027_s11 + $0xc8] sm:$0xff]  }
 0x72c   :  { %5846 = vmatprep.subr.bf16.mxu1 %v8269_v32 }
 0x72f   :  { %5847 = vmatpush1.bf16.msra.mxu1 %v8267_v33 }
 0x730   :  { %5848 = vmatprep.subr.bf16.mxu1 %v8272_v27 }
 0x733   :  { %5849 = vmatpush1.bf16.msra.mxu1 %v8270_v8 }
 0x734   :  { %5850 = vmatprep.subr.bf16.mxu1 %v8275_v34 }
 0x737   :  { %5851 = vmatpush1.bf16.msra.mxu1 %v8273_v35 }
 0x738   :  { %5852 = vmatprep.subr.bf16.mxu1 %v8278_v36 }
 0x739   :  { %v7076_v40 = vpop.f32.mrb[20].mxu1 }
 0x73a   :  { %v7077_v41 = vpop.f32.mrb[21].mxu1 }
 0x73b   :  { %v7078_v43 = vadd.f32 %v7077_v41, %v7076_v40  ;;  %5853 = vmatpush1.bf16.msra.mxu1 %v8276_v37  ;;  %v7079_v44 = vpop.f32.mrb[22].mxu1  ;;  %v8326_v41 = vld [vmem:[%s11027_s11 + $0x80] sm:$0xff]  }
 0x73c   :  { %v7080_v46 = vpop.f32.mrb[23].mxu1  ;;  %5854 = vmatprep.subr.bf16.mxu1 %v8281_v39  ;;  %v8332_v44 = vld [vmem:[%s11027_s11 + $0x98] sm:$0xff]  }
 0x73d   :  { %v4922_v48 = vadd.f32 %v7078_v43, %v4882_v42  ;;  %v8328_v42 = vld [vmem:[%s11027_s11 + $0x88] sm:$0xff]   ;;  %v8331_v43 = vld [vmem:[%s11027_s11 + $0xd8] sm:$0xff]   ;;  %v8334_v46 = vld [vmem:[%s11027_s11 + $0xa0] sm:$0xff]  }
 0x73f   :  { %5855 = vmatpush1.bf16.msra.mxu1 %v8279_v45  ;;  %4928 = vst.msk [vmem:[#allocation2] sm:$0x3] %vm4927_vm1, %v4922_v48  ;;  %v8333_v45 = vld [vmem:[%s11027_s11 + $0xe0] sm:$0xff]   ;;  %v8336_v48 = vld [vmem:[%s11027_s11 + $0xa8] sm:$0xff]  }
 0x740   :  { %5856 = vmatprep.subr.bf16.mxu1 %v8284_v47  ;;  %v8335_v47 = vld [vmem:[%s11027_s11 + $0xe8] sm:$0xff]  }
 0x743   :  { %5857 = vmatpush1.bf16.msra.mxu1 %v8282_v23  ;;  %v8337_v23 = vld [vmem:[%s11027_s11 + $0xf0] sm:$0xff]  }
 0x744   :  { %5858 = vmatprep.subr.bf16.mxu1 %v8287_v49  ;;  %v8338_v49 = vld [vmem:[%s11027_s11 + $0xb0] sm:$0xff]  }
 0x747   :  { %5859 = vmatpush1.bf16.msra.mxu1 %v8285_v50  ;;  %v8339_v50 = vld [vmem:[%s11027_s11 + $0xf8] sm:$0xff]  }
 0x748   :  { %5860 = vmatprep.subr.bf16.mxu1 %v8290_v51  ;;  %v8340_v51 = vld [vmem:[%s11027_s11 + $0xb8] sm:$0xff]  }
 0x74b   :  { %5861 = vmatpush1.bf16.msra.mxu1 %v8288_v52  ;;  %v5070_v52 = vrot.slane %v5057_v29, %v10156_v53 }
 0x74c   :  { %5862 = vmatprep.subr.bf16.mxu1 %v8293_v54  ;;  %v5074_v54 = vrot.slane %v5057_v29, %v10162_v55 }
 0x74f   :  { %5863 = vmatpush1.bf16.msra.mxu1 %v8291_v56 }
 0x750   :  { %5864 = vmatprep.subr.bf16.mxu1 %v8296_v25 }
 0x753   :  { %5865 = vmatpush1.bf16.msra.mxu1 %v8294_v57 }
 0x754   :  { %5866 = vmatprep.subr.bf16.mxu1 %v8299_v58 }
 0x757   :  { %5867 = vmatpush1.bf16.msra.mxu1 %v8297_v60 }
 0x758   :  { %5868 = vmatprep.subr.bf16.mxu1 %v8302_v13 }
 0x75b   :  { %5869 = vmatpush1.bf16.msra.mxu1 %v8300_v62 }
 0x75c   :  { %5870 = vmatprep.subr.bf16.mxu1 %v8305_v63 }
 0x75f   :  { %5871 = vmatpush1.bf16.msra.mxu1 %v8303_v16 }
 0x760   :  { %5872 = vmatprep.subr.bf16.mxu1 %v8308_v1 }
 0x763   :  { %5873 = vmatpush1.bf16.msra.mxu1 %v8306_v2 }
 0x764   :  { %7082 = vmatprep.subr.bf16.mxu1 %v8309_v3 }
 0x766   :  { %5875 = vmatmul.mubr.bf16.vlgmr.msra.gmra.mrb[28].mxu1 %v10196_v9  ;;  %v8315_v9 = vld [vmem:[%s11027_s11 + $0x58] sm:$0xff]  }
 0x767   :  { %7083 = vmatpush3.bf16.msra.mxu1 %v8310_v5 }
 0x768   :  { %7084 = vmatprep.subr.bf16.mxu1 %v8311_v6 }
 0x76b   :  { %7085 = vmatpush3.bf16.msra.mxu1 %v8312_v0 }
 0x76c   :  { %7086 = vmatprep.subr.bf16.mxu1 %v8313_v10 }
 0x76f   :  { %7087 = vmatpush3.bf16.msra.mxu1 %v8314_v11 }
 0x770   :  { %7088 = vmatprep.subr.bf16.mxu1 %v8315_v9 }
 0x773   :  { %7089 = vmatpush3.bf16.msra.mxu1 %v8316_v12 }
 0x774   :  { %7090 = vmatprep.subr.bf16.mxu1 %v8317_v14 }
 0x777   :  { %7091 = vmatpush3.bf16.msra.mxu1 %v8318_v15 }
 0x778   :  { %7092 = vmatprep.subr.bf16.mxu1 %v8319_v17 }
 0x77b   :  { %7093 = vmatpush3.bf16.msra.mxu1 %v8320_v18 }
 0x77c   :  { %7094 = vmatprep.subr.bf16.mxu1 %v8321_v19 }
 0x77f   :  { %7095 = vmatpush3.bf16.msra.mxu1 %v8322_v20 }
 0x780   :  { %7096 = vmatprep.subr.bf16.mxu1 %v8323_v21 }
 0x783   :  { %7097 = vmatpush3.bf16.msra.mxu1 %v8324_v26 }
 0x784   :  { %7104 = vmatprep.subr.bf16.mxu1 %v8325_v28 }
 0x7b9   :  { %v5794_v32 = vpop.f32.mrb[24].mxu1 }
 0x7ba   :  { %v7132_v33 = vadd.f32 %v5794_v32, %v5062_v30  ;;  %v5796_v27 = vpop.f32.mrb[25].mxu1 }
 0x7bb   :  { %v7133_v8 = vadd.f32 %v5796_v27, %v5066_v31  ;;  %v5798_v34 = vpop.f32.mrb[26].mxu1 }
 0x7bc   :  { %v5883_v35 = vmax.f32 %v7132_v33, 0.0  ;;  %v5799_v36 = vpop.f32.mrb[27].mxu1 }
 0x7bd   :  { %v5884_v37 = vmax.f32 %v7133_v8, 0.0 }
 0x7be   :  { %v5887_v38 = vadd.f32 %v5883_v35, %v10063_v22  ;;  %v8329_v22 = vld [vmem:[%s11027_s11 + $0xd0] sm:$0xff]  }
 0x7bf   :  { %v5888_v39 = vadd.f32 %v5884_v37, %v10065_v24  ;;  %v8330_v24 = vld [vmem:[%s11027_s11 + $0x90] sm:$0xff]   ;;  %s8367_s11 = smov [#allocation2]  }
 0x7c0   :  { %v5891_v59 = vpack.c.bf16 %v5887_v38, %v5887_v38  ;;  %s6246_s23 = sshll.u32 %s8367_s11, 4  ;;  %s6247_s23 = int_to_ptr.vmem [resolvable:$true] %s6246_s23 }
 0x7c1   :  { %v5892_v40 = vpack.c.bf16 %v5888_v39, %v5888_v39  ;;  %s8341_s0 = scalar_lea.vmem %s6247_s23, 32  ;;  %p8346_p1 = scmp.lt.s32.totalorder %s6247_s23, %s6247_s23 }
 0x7c2   :  { %p8342_p0 = scmp.ne.s32.totalorder %s6247_s23, %s8341_s0  ;;  %p8347_p2 = scmp.lt.s32.totalorder %s8341_s0, %s8341_s0 }
 0x7c3   :  { %6190 = vmatprep.mubr.bf16.mxu1 %v5892_v40 }
 0x7c4   :  { %6191 = vmatmul.mubr.bf16.vlgmr.msra.gmra.mrb[32].mxu1 %v5891_v59  ;;  %p8348_p3 = por %p8347_p2, %p8346_p1 }
 0x7c5   :  { %7105 = vmatpush3.bf16.msra.mxu1 %v8326_v41 }
 0x7c6   :  { %7106 = vmatprep.subr.bf16.mxu1 %v8327_v61  ;;  %p8349_p4 = pnand %p8348_p3, %p8342_p0 }
 0x7c9   :  { %7107 = vmatpush3.bf16.msra.mxu1 %v8328_v42 }
 0x7ca   :  { %7108 = vmatprep.subr.bf16.mxu1 %v8329_v22 }
 0x7cd   :  { %7109 = vmatpush3.bf16.msra.mxu1 %v8330_v24 }
 0x7ce   :  { %7110 = vmatprep.subr.bf16.mxu1 %v8331_v43 }
 0x7d1   :  { %7111 = vmatpush3.bf16.msra.mxu1 %v8332_v44 }
 0x7d2   :  { %7112 = vmatprep.subr.bf16.mxu1 %v8333_v45 }
 0x7d5   :  { %7113 = vmatpush3.bf16.msra.mxu1 %v8334_v46 }
 0x7d6   :  { %7114 = vmatprep.subr.bf16.mxu1 %v8335_v47 }
 0x7d9   :  { %7115 = vmatpush3.bf16.msra.mxu1 %v8336_v48 }
 0x7da   :  { %7116 = vmatprep.subr.bf16.mxu1 %v8337_v23 }
 0x7dd   :  { %7117 = vmatpush3.bf16.msra.mxu1 %v8338_v49 }
 0x7de   :  { %7118 = vmatprep.subr.bf16.mxu1 %v8339_v50 }
 0x7e1   :  { %7119 = vmatpush3.bf16.msra.mxu1 %v8340_v51 }
 0x839   :  { %v5876_v56 = vpop.f32.mrb[28].mxu1 }
 0x83a   :  { %v7134_v25 = vadd.f32 %v5876_v56, %v5070_v52  ;;  %v5878_v57 = vpop.f32.mrb[29].mxu1 }
 0x83b   :  { %v7135_v58 = vadd.f32 %v5878_v57, %v5074_v54  ;;  %v5880_v60 = vpop.f32.mrb[30].mxu1 }
 0x83c   :  { %v5885_v13 = vmax.f32 %v7134_v25, 0.0  ;;  %v5881_v62 = vpop.f32.mrb[31].mxu1 }
 0x83d   :  { %v5886_v63 = vmax.f32 %v7135_v58, 0.0 }
 0x83e   :  { %v5889_v16 = vadd.f32 %v5885_v13, %v10180_v4 }
 0x83f   :  { %v5890_v1 = vadd.f32 %v5886_v63, %v10185_v7 }
 0x840   :  { %v5893_v3 = vpack.c.bf16 %v5889_v16, %v5889_v16 }
 0x841   :  { %v5894_v2 = vpack.c.bf16 %v5890_v1, %v5890_v1 }
 0x843   :  { %6230 = vmatprep.mubr.bf16.mxu1 %v5894_v2 }
 0x844   :  { %6231 = vmatmul.mubr.bf16.vlgmr.msra.gmra.mrb[36].mxu1 %v5893_v3 }
 0x897   :  { %v7098_v5 = vpop.f32.mrb[32].mxu1 }
 0x898   :  { %v7099_v53 = vpop.f32.mrb[33].mxu1 }
 0x899   :  { %v7100_v6 = vadd.f32 %v7099_v53, %v7098_v5  ;;  %v7101_v55 = vpop.f32.mrb[34].mxu1 }
 0x89a   :  { %v7102_v0 = vpop.f32.mrb[35].mxu1 }
 0x89b   :  { %8352 = shalt.err (!%p8349_p4)
}
 0x89c   :  { %s8353_s8 = scalar_lea.hbm %s11029_s13, 32 }
 0x89d   :  { %p8354_p5 = scmp.ne.s32.totalorder %s11029_s13, %s8353_s8  ;;  %p8357_p6 = scmp.lt.u32.totalorder %s8353_s8, %s11029_s13 }
 0x89f   :  { %p8359_p7 = pnand %p8357_p6, %p8354_p5 }
 0x8a1   :  { %8362 = shalt.err (!%p8359_p7)
}
 0x8a2   :  { %6249 = dma.vmem_to_hbm [thread:$0]  %s6247_s23, 32, %s11029_s13, [#allocation3]   ;;  %v7005_v4 = vld [vmem:[%s11028_s12] ss:$0 sm:$0xff]  ;;  %vm6238_vm2 = vcmask 9216  }
 0x8a3   :  { %v6193_v11 = vadd.f32 %v7100_v6, %v7005_v4 }
 0x917   :  { %v7120_v7 = vpop.f32.mrb[36].mxu1 }
 0x918   :  { %v7121_v10 = vpop.f32.mrb[37].mxu1 }
 0x919   :  { %v7122_v9 = vadd.f32 %v7121_v10, %v7120_v7  ;;  %v7123_v12 = vpop.f32.mrb[38].mxu1 }
 0x91a   :  { %v7124_v14 = vpop.f32.mrb[39].mxu1 }
 0x91b   :  { %v6233_v15 = vadd.f32 %v7122_v9, %v6193_v11 }
 0x91d   :  { %6239 = vst.msk [vmem:[%s11030_s14] sm:$0x3] %vm6238_vm2, %v6233_v15 }
 0x91e   :  { %8363 = dma.done.wait [#allocation3], 32  }
 0x91f   :  { %8364 = vsyncadd [#allocation3], 4294967264 }
 0x920   :  { %6257 = vsyncpa [#allocation3], 1 }

</bundles_post_ra>
